<compile_context>
chip_gen: v5e
topology: v5e:2x2
jax: 0.10.0
libtpu: 0.0.40
codegen_flags: <defaults>
</compile_context>

<pallas_src>
import numpy as np
import jax
import jax.numpy as jnp
from jax.experimental import pallas as pl
from jax.experimental.pallas import tpu as pltpu

K = 4  # every ConvTranspose2d in this generator uses a 4x4 kernel


# ----------------------------------------------------------------------------
# One-time (hoisted, outside jit) weight preprocessing
# ----------------------------------------------------------------------------
def _row_toeplitz(w, stride, pad, w_in):
    """ConvTranspose2d weight (Cin, Cout, K, K) -> K row operators.

    Returns T of shape (K, w_in*Cin, ow*Cout) such that, with D the y-dilated
    and y-padded stack of input rows (row  stride*iy + (K-1-pad)  holds input
    row iy flattened as (x, cin); every other row zero), the transposed-conv
    output row oy (flattened as (x, cout)) is   sum_r  D[oy + r] @ T[r].
    """
    w = np.asarray(w, np.float32)
    cin, cout, k, _ = w.shape
    ow = stride * (w_in - 1) - 2 * pad + k
    t = np.zeros((k, w_in * cin, ow * cout), np.float32)
    for r in range(k):
        ky = k - 1 - r                       # flipped: D is dilated+padded in y
        for ix in range(w_in):
            for ox in range(ow):
                kx = ox - stride * ix + pad  # direct transposed-conv relation
                if 0 <= kx < k:
                    t[r, ix * cin:(ix + 1) * cin,
                         ox * cout:(ox + 1) * cout] = w[:, :, ky, kx]
    return t


def _tile_lanes(v, ow):
    """Per-channel (C,) vector -> (1, ow*C) lane vector (lane = x*C + c)."""
    return np.tile(np.asarray(v, np.float32).reshape(1, -1), (1, ow))


def prepare_generator_params(params):
    """Hoisted preprocessing: bf16 Toeplitz weights + lane-tiled BN affine."""
    return {
        "t1": jnp.asarray(_row_toeplitz(params["w1"], 1, 0, 1), jnp.bfloat16),
        "t2": jnp.asarray(_row_toeplitz(params["w2"], 2, 1, 4), jnp.bfloat16),
        "t3": jnp.asarray(_row_toeplitz(params["w3"], 2, 1, 8), jnp.bfloat16),
        "t4": jnp.asarray(_row_toeplitz(params["w4"], 2, 1, 16), jnp.bfloat16),
        "g1": jnp.asarray(_tile_lanes(params["g1"], 4)),
        "b1": jnp.asarray(_tile_lanes(params["b1"], 4)),
        "g2": jnp.asarray(_tile_lanes(params["g2"], 8)),
        "b2": jnp.asarray(_tile_lanes(params["b2"], 8)),
        "g3": jnp.asarray(_tile_lanes(params["g3"], 16)),
        "b3": jnp.asarray(_tile_lanes(params["b3"], 16)),
    }


# ----------------------------------------------------------------------------
# Fused 4-layer generator kernel
# ----------------------------------------------------------------------------
def _make_kernel(n_batch, cfgs):
    """Build the fused generator kernel (all static geometry closed over)."""

    def channel_projector(l, c):
        # P[i, j] = 1 iff lanes i and j carry the same channel (lane = x*C + c).
        li = jax.lax.broadcasted_iota(jnp.int32, (l, l), 0)
        lj = jax.lax.broadcasted_iota(jnp.int32, (l, l), 1)
        if c & (c - 1) == 0:                       # power of two -> cheap mask
            same = (li & (c - 1)) == (lj & (c - 1))
        else:
            same = (li % c) == (lj % c)
        return same.astype(jnp.float32)

    def kernel(noise_ref, t1, t2, t3, t4, g1, b1, g2, b2, g3, b3,
               out_ref, d1, a1, d2, a2, d3, a3, d4):
        t_refs = (t1, t2, t3, t4)
        d_refs = (d1, d2, d3, d4)
        a_refs = (a1, a2, a3, None)
        gb_refs = ((g1, b1), (g2, b2), (g3, b3), None)

        # Dilation / padding rows must be zero.
        for d in d_refs:
            d[...] = jnp.zeros_like(d)

        # Seed layer 1: noise sample n -> dilated row n*hdp + (K-1-pad).
        c0 = cfgs[0]
        for n in range(n_batch):
            d1[pl.ds(n * c0["hdp"] + c0["seed"], 1), :] = noise_ref[pl.ds(n, 1), :]

        def conv_rows(d_ref, t_mats, n, hdp, oh):
            # Transposed-conv output rows for sample n: sum_r D[oy+r] @ T[r].
            acc = None
            for r in range(K):
                lhs = d_ref[pl.ds(n * hdp + r, oh), :].astype(jnp.bfloat16)
                part = jnp.dot(lhs, t_mats[r],
                               preferred_element_type=jnp.float32)
                acc = part if acc is None else acc + part
            return acc                                   # (oh, ow*cout) f32

        for idx, cfg in enumerate(cfgs):
            d_ref = d_refs[idx]
            hdp, oh, cout, lw = cfg["hdp"], cfg["oh"], cfg["cout"], cfg["lw"]
            t_mats = [t_refs[idx][r] for r in range(K)]  # (win, lw) bf16 each
            last = idx == len(cfgs) - 1

            if last:
                # Final layer: transposed conv + tanh straight into the output.
                for n in range(n_batch):
                    out_ref[pl.ds(n * oh, oh), :] = jnp.tanh(
                        conv_rows(d_ref, t_mats, n, hdp, oh))
                break

            a_ref = a_refs[idx]
            g_ref, b_ref = gb_refs[idx]

            # 1) raw transposed-conv rows for every sample -> VMEM scratch.
            for n in range(n_batch):
                a_ref[pl.ds(n * oh, oh), :] = conv_rows(d_ref, t_mats, n, hdp, oh)

            # 2) fused BatchNorm (batch stats, two-pass variance) + ReLU,
            #    applied in place on the scratch (no extra temporaries).
            raw = a_ref[...]                              # (n_batch*oh, lw) f32
            proj = channel_projector(lw, cout)
            inv_m = 1.0 / (n_batch * oh * (lw // cout))   # 1 / (N*OH*OW)
            mean = jnp.dot(jnp.sum(raw, axis=0, keepdims=True), proj,
                           preferred_element_type=jnp.float32) * inv_m
            cen = raw - mean
            var = jnp.dot(jnp.sum(cen * cen, axis=0, keepdims=True), proj,
                          preferred_element_type=jnp.float32) * inv_m
            scale = g_ref[...] * jax.lax.rsqrt(var + 1e-5)
            a_ref[...] = jnp.maximum(cen * scale + b_ref[...], 0.0)

            # 3) scatter normalized rows into the next layer's dilated rows.
            nxt = cfgs[idx + 1]
            d_next = d_refs[idx + 1]
            for n in range(n_batch):
                for oy in range(oh):
                    dst = n * nxt["hdp"] + nxt["stride"] * oy + nxt["seed"]
                    d_next[pl.ds(dst, 1), :] = a_ref[pl.ds(n * oh + oy, 1), :]

    return kernel


def generator_forward(noise, prep):
    """noise: (N, latent) -> images (N, img_channels, 32, 32). One pallas_call."""
    n_batch, latent = noise.shape

    def mk_cfg(t, stride, pad, h_in):
        win, lw = int(t.shape[1]), int(t.shape[2])
        oh = stride * (h_in - 1) - 2 * pad + K
        return dict(stride=stride, h_in=h_in, oh=oh, lw=lw, win=win,
                    cout=lw // oh,                        # square outputs
                    hdp=stride * (h_in - 1) + 1 + 2 * (K - 1 - pad),
                    seed=K - 1 - pad)

    cfgs = [mk_cfg(prep["t1"], 1, 0, 1),
            mk_cfg(prep["t2"], 2, 1, 4),
            mk_cfg(prep["t3"], 2, 1, 8),
            mk_cfg(prep["t4"], 2, 1, 16)]
    oh4, lw4, img_c = cfgs[-1]["oh"], cfgs[-1]["lw"], cfgs[-1]["cout"]

    def full(shape):
        shape = tuple(int(s) for s in shape)
        zeros = (0,) * len(shape)
        return pl.BlockSpec(shape, lambda i: zeros)

    in_specs = [full(noise.shape)]
    in_specs += [full(prep[f"t{i}"].shape) for i in (1, 2, 3, 4)]
    for i in (1, 2, 3):
        in_specs += [full(prep[f"g{i}"].shape), full(prep[f"b{i}"].shape)]

    scratch = []                                 # d1, a1, d2, a2, d3, a3, d4
    for i, c in enumerate(cfgs):
        scratch.append(pltpu.VMEM((n_batch * c["hdp"], c["win"]), jnp.float32))
        if i < len(cfgs) - 1:
            scratch.append(pltpu.VMEM((n_batch * c["oh"], c["lw"]), jnp.float32))

    out = pl.pallas_call(
        _make_kernel(n_batch, cfgs),
        out_shape=jax.ShapeDtypeStruct((n_batch * oh4, lw4), jnp.float32),
        grid=(1,),
        in_specs=in_specs,
        out_specs=full((n_batch * oh4, lw4)),
        scratch_shapes=scratch,
        compiler_params=pltpu.CompilerParams(
            dimension_semantics=("arbitrary",)),
    )(noise, prep["t1"], prep["t2"], prep["t3"], prep["t4"],
      prep["g1"], prep["b1"], prep["g2"], prep["b2"], prep["g3"], prep["b3"])

    # (n, oy) rows x (ox, c) lanes == row-major NHWC -> free reshape, then one
    # small transpose to NCHW to match PyTorch's output layout.
    ow4 = lw4 // img_c
    return out.reshape(n_batch, oh4, ow4, img_c).transpose(0, 3, 1, 2)


# ----------------------------------------------------------------------------
# Pure-JAX reference (independent XLA conv path) for correctness check
# ----------------------------------------------------------------------------
def generator_ref(noise, params):
    def convt(x, w, s, p):
        k = w.shape[2]
        w_conv = jnp.flip(w, (2, 3)).transpose(1, 0, 2, 3)   # (Cout, Cin, K, K)
        return jax.lax.conv_general_dilated(
            x, w_conv, window_strides=(1, 1),
            padding=[(k - 1 - p, k - 1 - p)] * 2,
            lhs_dilation=(s, s),
            dimension_numbers=("NCHW", "OIHW", "NCHW"))

    def bn(x, g, b):
        mean = x.mean(axis=(0, 2, 3), keepdims=True)
        var = ((x - mean) ** 2).mean(axis=(0, 2, 3), keepdims=True)
        return ((x - mean) * jax.lax.rsqrt(var + 1e-5)
                * g.reshape(1, -1, 1, 1) + b.reshape(1, -1, 1, 1))

    x = noise[:, :, None, None]
    x = jax.nn.relu(bn(convt(x, params["w1"], 1, 0), params["g1"], params["b1"]))
    x = jax.nn.relu(bn(convt(x, params["w2"], 2, 1), params["g2"], params["b2"]))
    x = jax.nn.relu(bn(convt(x, params["w3"], 2, 1), params["g3"], params["b3"]))
    return jnp.tanh(convt(x, params["w4"], 2, 1))


# ----------------------------------------------------------------------------
if __name__ == "__main__":
    batch, latent_dim, img_channels, feature_maps = 2, 64, 3, 8
    fm = feature_maps

    key = jax.random.PRNGKey(0)
    ks = jax.random.split(key, 12)
    params = {
        "w1": 0.05 * jax.random.normal(ks[0], (latent_dim, fm * 8, 4, 4), jnp.float32),
        "g1": 1.0 + 0.1 * jax.random.normal(ks[1], (fm * 8,), jnp.float32),
        "b1": 0.1 * jax.random.normal(ks[2], (fm * 8,), jnp.float32),
        "w2": 0.05 * jax.random.normal(ks[3], (fm * 8, fm * 4, 4, 4), jnp.float32),
        "g2": 1.0 + 0.1 * jax.random.normal(ks[4], (fm * 4,), jnp.float32),
        "b2": 0.1 * jax.random.normal(ks[5], (fm * 4,), jnp.float32),
        "w3": 0.05 * jax.random.normal(ks[6], (fm * 4, fm * 2, 4, 4), jnp.float32),
        "g3": 1.0 + 0.1 * jax.random.normal(ks[7], (fm * 2,), jnp.float32),
        "b3": 0.1 * jax.random.normal(ks[8], (fm * 2,), jnp.float32),
        "w4": 0.05 * jax.random.normal(ks[9], (fm * 2, img_channels, 4, 4), jnp.float32),
    }
    noise = jax.random.normal(ks[10], (batch, latent_dim), jnp.float32)

    prep = prepare_generator_params(params)      # hoisted: runs exactly once
    out = jax.jit(generator_forward)(noise, prep)
    out = jax.block_until_ready(out)
    assert out.shape == (batch, img_channels, 32, 32), f"bad shape {out.shape}"

    ref = generator_ref(noise, params)
    err = float(jnp.max(jnp.abs(out - ref)))
    # bf16 MXU operands (f32 accumulation) vs an all-f32 XLA reference.
    assert err < 2e-2, f"mismatch vs reference, max abs err = {err}"

    print("KERNEL_OK")
</pallas_src>

<mosaic_0001>
module attributes {stable_mosaic.version = 11 : i64} {
  func.func @kernel(%arg0: i32, %arg1: memref<2x64xf32, #tpu.memory_space<vmem>>, %arg2: memref<4x64x256xbf16, #tpu.memory_space<vmem>>, %arg3: memref<4x256x256xbf16, #tpu.memory_space<vmem>>, %arg4: memref<4x256x256xbf16, #tpu.memory_space<vmem>>, %arg5: memref<4x256x96xbf16, #tpu.memory_space<vmem>>, %arg6: memref<1x256xf32, #tpu.memory_space<vmem>>, %arg7: memref<1x256xf32, #tpu.memory_space<vmem>>, %arg8: memref<1x256xf32, #tpu.memory_space<vmem>>, %arg9: memref<1x256xf32, #tpu.memory_space<vmem>>, %arg10: memref<1x256xf32, #tpu.memory_space<vmem>>, %arg11: memref<1x256xf32, #tpu.memory_space<vmem>>, %arg12: memref<64x96xf32, #tpu.memory_space<vmem>>, %arg13: memref<14x64xf32, #tpu.memory_space<vmem>>, %arg14: memref<8x256xf32, #tpu.memory_space<vmem>>, %arg15: memref<22x256xf32, #tpu.memory_space<vmem>>, %arg16: memref<16x256xf32, #tpu.memory_space<vmem>>, %arg17: memref<38x256xf32, #tpu.memory_space<vmem>>, %arg18: memref<32x256xf32, #tpu.memory_space<vmem>>, %arg19: memref<70x256xf32, #tpu.memory_space<vmem>>) attributes {dimension_semantics = [#tpu.dimension_semantics<arbitrary>], iteration_bounds = array<i64: 1>, scalar_prefetch = 0 : i64, scratch_operands = 7 : i64, tpu.core_type = #tpu.core_type<tc>, window_params = [{pipeline_mode = #tpu.pipeline_mode<synchronous>, transform_indices = @transform_0, window_bounds = array<i64: 2, 64>}, {pipeline_mode = #tpu.pipeline_mode<synchronous>, transform_indices = @transform_1, window_bounds = array<i64: 4, 64, 256>}, {pipeline_mode = #tpu.pipeline_mode<synchronous>, transform_indices = @transform_2, window_bounds = array<i64: 4, 256, 256>}, {pipeline_mode = #tpu.pipeline_mode<synchronous>, transform_indices = @transform_3, window_bounds = array<i64: 4, 256, 256>}, {pipeline_mode = #tpu.pipeline_mode<synchronous>, transform_indices = @transform_4, window_bounds = array<i64: 4, 256, 96>}, {pipeline_mode = #tpu.pipeline_mode<synchronous>, transform_indices = @transform_5, window_bounds = array<i64: 1, 256>}, {pipeline_mode = #tpu.pipeline_mode<synchronous>, transform_indices = @transform_6, window_bounds = array<i64: 1, 256>}, {pipeline_mode = #tpu.pipeline_mode<synchronous>, transform_indices = @transform_7, window_bounds = array<i64: 1, 256>}, {pipeline_mode = #tpu.pipeline_mode<synchronous>, transform_indices = @transform_8, window_bounds = array<i64: 1, 256>}, {pipeline_mode = #tpu.pipeline_mode<synchronous>, transform_indices = @transform_9, window_bounds = array<i64: 1, 256>}, {pipeline_mode = #tpu.pipeline_mode<synchronous>, transform_indices = @transform_10, window_bounds = array<i64: 1, 256>}, {pipeline_mode = #tpu.pipeline_mode<synchronous>, transform_indices = @transform_11, window_bounds = array<i64: 64, 96>}]} {
    %cst = arith.constant 0.000000e+00 : f32
    %0 = vector.broadcast %cst : f32 to vector<14x64xf32>
    %c0 = arith.constant 0 : index
    %c0_0 = arith.constant 0 : index
    %1 = vector.load %arg13[%c0, %c0_0] : memref<14x64xf32, #tpu.memory_space<vmem>>, vector<14x64xf32>
    tpu.vector_store %arg13[%c0, %c0_0], %0 {strides = array<i32>} : memref<14x64xf32, #tpu.memory_space<vmem>>, vector<14x64xf32>,
    %cst_1 = arith.constant 0.000000e+00 : f32
    %2 = vector.broadcast %cst_1 : f32 to vector<22x256xf32>
    %c0_2 = arith.constant 0 : index
    %c0_3 = arith.constant 0 : index
    %3 = vector.load %arg15[%c0_2, %c0_3] : memref<22x256xf32, #tpu.memory_space<vmem>>, vector<22x256xf32>
    tpu.vector_store %arg15[%c0_2, %c0_3], %2 {strides = array<i32>} : memref<22x256xf32, #tpu.memory_space<vmem>>, vector<22x256xf32>,
    %cst_4 = arith.constant 0.000000e+00 : f32
    %4 = vector.broadcast %cst_4 : f32 to vector<38x256xf32>
    %c0_5 = arith.constant 0 : index
    %c0_6 = arith.constant 0 : index
    %5 = vector.load %arg17[%c0_5, %c0_6] : memref<38x256xf32, #tpu.memory_space<vmem>>, vector<38x256xf32>
    tpu.vector_store %arg17[%c0_5, %c0_6], %4 {strides = array<i32>} : memref<38x256xf32, #tpu.memory_space<vmem>>, vector<38x256xf32>,
    %cst_7 = arith.constant 0.000000e+00 : f32
    %6 = vector.broadcast %cst_7 : f32 to vector<70x256xf32>
    %c0_8 = arith.constant 0 : index
    %c0_9 = arith.constant 0 : index
    %7 = vector.load %arg19[%c0_8, %c0_9] : memref<70x256xf32, #tpu.memory_space<vmem>>, vector<70x256xf32>
    tpu.vector_store %arg19[%c0_8, %c0_9], %6 {strides = array<i32>} : memref<70x256xf32, #tpu.memory_space<vmem>>, vector<70x256xf32>,
    %c0_10 = arith.constant 0 : index
    %c0_11 = arith.constant 0 : index
    %8 = vector.load %arg1[%c0_10, %c0_11] : memref<2x64xf32, #tpu.memory_space<vmem>>, vector<1x64xf32>
    %c3 = arith.constant 3 : index
    %c0_12 = arith.constant 0 : index
    %9 = vector.load %arg13[%c3, %c0_12] : memref<14x64xf32, #tpu.memory_space<vmem>>, vector<1x64xf32>
    tpu.vector_store %arg13[%c3, %c0_12], %8 {strides = array<i32>} : memref<14x64xf32, #tpu.memory_space<vmem>>, vector<1x64xf32>,
    %c1 = arith.constant 1 : index
    %c0_13 = arith.constant 0 : index
    %10 = vector.load %arg1[%c1, %c0_13] : memref<2x64xf32, #tpu.memory_space<vmem>>, vector<1x64xf32>
    %c10 = arith.constant 10 : index
    %c0_14 = arith.constant 0 : index
    %11 = vector.load %arg13[%c10, %c0_14] : memref<14x64xf32, #tpu.memory_space<vmem>>, vector<1x64xf32>
    tpu.vector_store %arg13[%c10, %c0_14], %10 {strides = array<i32>} : memref<14x64xf32, #tpu.memory_space<vmem>>, vector<1x64xf32>,
    %c0_15 = arith.constant 0 : index
    %c0_16 = arith.constant 0 : index
    %c0_17 = arith.constant 0 : index
    %12 = vector.load %arg2[%c0_15, %c0_16, %c0_17] : memref<4x64x256xbf16, #tpu.memory_space<vmem>>, vector<1x64x256xbf16>
    %13 = vector.shape_cast %12 : vector<1x64x256xbf16> to vector<64x256xbf16>
    %c1_18 = arith.constant 1 : index
    %c0_19 = arith.constant 0 : index
    %c0_20 = arith.constant 0 : index
    %14 = vector.load %arg2[%c1_18, %c0_19, %c0_20] : memref<4x64x256xbf16, #tpu.memory_space<vmem>>, vector<1x64x256xbf16>
    %15 = vector.shape_cast %14 : vector<1x64x256xbf16> to vector<64x256xbf16>
    %c2 = arith.constant 2 : index
    %c0_21 = arith.constant 0 : index
    %c0_22 = arith.constant 0 : index
    %16 = vector.load %arg2[%c2, %c0_21, %c0_22] : memref<4x64x256xbf16, #tpu.memory_space<vmem>>, vector<1x64x256xbf16>
    %17 = vector.shape_cast %16 : vector<1x64x256xbf16> to vector<64x256xbf16>
    %c3_23 = arith.constant 3 : index
    %c0_24 = arith.constant 0 : index
    %c0_25 = arith.constant 0 : index
    %18 = vector.load %arg2[%c3_23, %c0_24, %c0_25] : memref<4x64x256xbf16, #tpu.memory_space<vmem>>, vector<1x64x256xbf16>
    %19 = vector.shape_cast %18 : vector<1x64x256xbf16> to vector<64x256xbf16>
    %c0_26 = arith.constant 0 : index
    %c0_27 = arith.constant 0 : index
    %20 = vector.load %arg13[%c0_26, %c0_27] : memref<14x64xf32, #tpu.memory_space<vmem>>, vector<4x64xf32>
    %21 = arith.truncf %20 : vector<4x64xf32> to vector<4x64xbf16>
    %cst_28 = arith.constant dense<0.000000e+00> : vector<4x256xf32>
    %22 = tpu.matmul %21, %13, %cst_28 {dimension_numbers = #tpu.dot_dimension_numbers<[1], [0], [0], [1], [0, 0, 1, 1], [], []>} : vector<4x64xbf16>, vector<64x256xbf16>, vector<4x256xf32> -> vector<4x256xf32>
    %c1_29 = arith.constant 1 : index
    %c0_30 = arith.constant 0 : index
    %23 = vector.load %arg13[%c1_29, %c0_30] : memref<14x64xf32, #tpu.memory_space<vmem>>, vector<4x64xf32>
    %24 = arith.truncf %23 : vector<4x64xf32> to vector<4x64xbf16>
    %cst_31 = arith.constant dense<0.000000e+00> : vector<4x256xf32>
    %25 = tpu.matmul %24, %15, %cst_31 {dimension_numbers = #tpu.dot_dimension_numbers<[1], [0], [0], [1], [0, 0, 1, 1], [], []>} : vector<4x64xbf16>, vector<64x256xbf16>, vector<4x256xf32> -> vector<4x256xf32>
    %26 = arith.addf %22, %25 : vector<4x256xf32>
    %c2_32 = arith.constant 2 : index
    %c0_33 = arith.constant 0 : index
    %27 = vector.load %arg13[%c2_32, %c0_33] : memref<14x64xf32, #tpu.memory_space<vmem>>, vector<4x64xf32>
    %28 = arith.truncf %27 : vector<4x64xf32> to vector<4x64xbf16>
    %cst_34 = arith.constant dense<0.000000e+00> : vector<4x256xf32>
    %29 = tpu.matmul %28, %17, %cst_34 {dimension_numbers = #tpu.dot_dimension_numbers<[1], [0], [0], [1], [0, 0, 1, 1], [], []>} : vector<4x64xbf16>, vector<64x256xbf16>, vector<4x256xf32> -> vector<4x256xf32>
    %30 = arith.addf %26, %29 : vector<4x256xf32>
    %c3_35 = arith.constant 3 : index
    %c0_36 = arith.constant 0 : index
    %31 = vector.load %arg13[%c3_35, %c0_36] : memref<14x64xf32, #tpu.memory_space<vmem>>, vector<4x64xf32>
    %32 = arith.truncf %31 : vector<4x64xf32> to vector<4x64xbf16>
    %cst_37 = arith.constant dense<0.000000e+00> : vector<4x256xf32>
    %33 = tpu.matmul %32, %19, %cst_37 {dimension_numbers = #tpu.dot_dimension_numbers<[1], [0], [0], [1], [0, 0, 1, 1], [], []>} : vector<4x64xbf16>, vector<64x256xbf16>, vector<4x256xf32> -> vector<4x256xf32>
    %34 = arith.addf %30, %33 : vector<4x256xf32>
    %c0_38 = arith.constant 0 : index
    %c0_39 = arith.constant 0 : index
    %35 = vector.load %arg14[%c0_38, %c0_39] : memref<8x256xf32, #tpu.memory_space<vmem>>, vector<4x256xf32>
    tpu.vector_store %arg14[%c0_38, %c0_39], %34 {strides = array<i32>} : memref<8x256xf32, #tpu.memory_space<vmem>>, vector<4x256xf32>,
    %c7 = arith.constant 7 : index
    %c0_40 = arith.constant 0 : index
    %36 = vector.load %arg13[%c7, %c0_40] : memref<14x64xf32, #tpu.memory_space<vmem>>, vector<4x64xf32>
    %37 = arith.truncf %36 : vector<4x64xf32> to vector<4x64xbf16>
    %cst_41 = arith.constant dense<0.000000e+00> : vector<4x256xf32>
    %38 = tpu.matmul %37, %13, %cst_41 {dimension_numbers = #tpu.dot_dimension_numbers<[1], [0], [0], [1], [0, 0, 1, 1], [], []>} : vector<4x64xbf16>, vector<64x256xbf16>, vector<4x256xf32> -> vector<4x256xf32>
    %c8 = arith.constant 8 : index
    %c0_42 = arith.constant 0 : index
    %39 = vector.load %arg13[%c8, %c0_42] : memref<14x64xf32, #tpu.memory_space<vmem>>, vector<4x64xf32>
    %40 = arith.truncf %39 : vector<4x64xf32> to vector<4x64xbf16>
    %cst_43 = arith.constant dense<0.000000e+00> : vector<4x256xf32>
    %41 = tpu.matmul %40, %15, %cst_43 {dimension_numbers = #tpu.dot_dimension_numbers<[1], [0], [0], [1], [0, 0, 1, 1], [], []>} : vector<4x64xbf16>, vector<64x256xbf16>, vector<4x256xf32> -> vector<4x256xf32>
    %42 = arith.addf %38, %41 : vector<4x256xf32>
    %c9 = arith.constant 9 : index
    %c0_44 = arith.constant 0 : index
    %43 = vector.load %arg13[%c9, %c0_44] : memref<14x64xf32, #tpu.memory_space<vmem>>, vector<4x64xf32>
    %44 = arith.truncf %43 : vector<4x64xf32> to vector<4x64xbf16>
    %cst_45 = arith.constant dense<0.000000e+00> : vector<4x256xf32>
    %45 = tpu.matmul %44, %17, %cst_45 {dimension_numbers = #tpu.dot_dimension_numbers<[1], [0], [0], [1], [0, 0, 1, 1], [], []>} : vector<4x64xbf16>, vector<64x256xbf16>, vector<4x256xf32> -> vector<4x256xf32>
    %46 = arith.addf %42, %45 : vector<4x256xf32>
    %c10_46 = arith.constant 10 : index
    %c0_47 = arith.constant 0 : index
    %47 = vector.load %arg13[%c10_46, %c0_47] : memref<14x64xf32, #tpu.memory_space<vmem>>, vector<4x64xf32>
    %48 = arith.truncf %47 : vector<4x64xf32> to vector<4x64xbf16>
    %cst_48 = arith.constant dense<0.000000e+00> : vector<4x256xf32>
    %49 = tpu.matmul %48, %19, %cst_48 {dimension_numbers = #tpu.dot_dimension_numbers<[1], [0], [0], [1], [0, 0, 1, 1], [], []>} : vector<4x64xbf16>, vector<64x256xbf16>, vector<4x256xf32> -> vector<4x256xf32>
    %50 = arith.addf %46, %49 : vector<4x256xf32>
    %c4 = arith.constant 4 : index
    %c0_49 = arith.constant 0 : index
    %51 = vector.load %arg14[%c4, %c0_49] : memref<8x256xf32, #tpu.memory_space<vmem>>, vector<4x256xf32>
    tpu.vector_store %arg14[%c4, %c0_49], %50 {strides = array<i32>} : memref<8x256xf32, #tpu.memory_space<vmem>>, vector<4x256xf32>,
    %c0_50 = arith.constant 0 : index
    %c0_51 = arith.constant 0 : index
    %52 = vector.load %arg14[%c0_50, %c0_51] : memref<8x256xf32, #tpu.memory_space<vmem>>, vector<8x256xf32>
    %53 = tpu.iota {dimensions = array<i32: 0>} : vector<256x256xi32>
    %54 = tpu.iota {dimensions = array<i32: 1>} : vector<256x256xi32>
    %c63_i32 = arith.constant 63 : i32
    %55 = vector.broadcast %c63_i32 : i32 to vector<256x256xi32>
    %56 = arith.andi %53, %55 : vector<256x256xi32>
    %c63_i32_52 = arith.constant 63 : i32
    %57 = vector.broadcast %c63_i32_52 : i32 to vector<256x256xi32>
    %58 = arith.andi %54, %57 : vector<256x256xi32>
    %59 = arith.cmpi eq, %56, %58 : vector<256x256xi32>
    %60 = arith.extui %59 : vector<256x256xi1> to vector<256x256xi32>
    %61 = arith.sitofp %60 : vector<256x256xi32> to vector<256x256xf32>
    %cst_53 = arith.constant dense<0.000000e+00> : vector<256xf32>
    %62 = vector.multi_reduction <add>, %52, %cst_53 [0] : vector<8x256xf32> to vector<256xf32>
    %63 = vector.shape_cast %62 : vector<256xf32> to vector<1x256xf32>
    %cst_54 = arith.constant dense<0.000000e+00> : vector<1x256xf32>
    %64 = tpu.matmul %63, %61, %cst_54 {dimension_numbers = #tpu.dot_dimension_numbers<[1], [0], [0], [1], [0, 0, 1, 1], [], []>} : vector<1x256xf32>, vector<256x256xf32>, vector<1x256xf32> -> vector<1x256xf32>
    %cst_55 = arith.constant 3.125000e-02 : f32
    %65 = vector.broadcast %cst_55 : f32 to vector<1x256xf32>
    %66 = arith.mulf %64, %65 : vector<1x256xf32>
    %67 = vector.broadcast %66 : vector<1x256xf32> to vector<8x256xf32>
    %68 = arith.subf %52, %67 : vector<8x256xf32>
    %69 = arith.mulf %68, %68 : vector<8x256xf32>
    %cst_56 = arith.constant dense<0.000000e+00> : vector<256xf32>
    %70 = vector.multi_reduction <add>, %69, %cst_56 [0] : vector<8x256xf32> to vector<256xf32>
    %71 = vector.shape_cast %70 : vector<256xf32> to vector<1x256xf32>
    %cst_57 = arith.constant dense<0.000000e+00> : vector<1x256xf32>
    %72 = tpu.matmul %71, %61, %cst_57 {dimension_numbers = #tpu.dot_dimension_numbers<[1], [0], [0], [1], [0, 0, 1, 1], [], []>} : vector<1x256xf32>, vector<256x256xf32>, vector<1x256xf32> -> vector<1x256xf32>
    %cst_58 = arith.constant 3.125000e-02 : f32
    %73 = vector.broadcast %cst_58 : f32 to vector<1x256xf32>
    %74 = arith.mulf %72, %73 : vector<1x256xf32>
    %c0_59 = arith.constant 0 : index
    %c0_60 = arith.constant 0 : index
    %75 = vector.load %arg6[%c0_59, %c0_60] : memref<1x256xf32, #tpu.memory_space<vmem>>, vector<1x256xf32>
    %cst_61 = arith.constant 9.99999974E-6 : f32
    %76 = vector.broadcast %cst_61 : f32 to vector<1x256xf32>
    %77 = arith.addf %74, %76 : vector<1x256xf32>
    %78 = math.rsqrt %77 : vector<1x256xf32>
    %79 = arith.mulf %75, %78 : vector<1x256xf32>
    %80 = vector.broadcast %79 : vector<1x256xf32> to vector<8x256xf32>
    %81 = arith.mulf %68, %80 : vector<8x256xf32>
    %c0_62 = arith.constant 0 : index
    %c0_63 = arith.constant 0 : index
    %82 = vector.load %arg7[%c0_62, %c0_63] : memref<1x256xf32, #tpu.memory_space<vmem>>, vector<1x256xf32>
    %83 = vector.broadcast %82 : vector<1x256xf32> to vector<8x256xf32>
    %84 = arith.addf %81, %83 : vector<8x256xf32>
    %cst_64 = arith.constant 0.000000e+00 : f32
    %85 = vector.broadcast %cst_64 : f32 to vector<8x256xf32>
    %86 = arith.maximumf %84, %85 : vector<8x256xf32>
    %c0_65 = arith.constant 0 : index
    %c0_66 = arith.constant 0 : index
    %87 = vector.load %arg14[%c0_65, %c0_66] : memref<8x256xf32, #tpu.memory_space<vmem>>, vector<8x256xf32>
    tpu.vector_store %arg14[%c0_65, %c0_66], %86 {strides = array<i32>} : memref<8x256xf32, #tpu.memory_space<vmem>>, vector<8x256xf32>,
    %c0_67 = arith.constant 0 : index
    %c0_68 = arith.constant 0 : index
    %88 = vector.load %arg14[%c0_67, %c0_68] : memref<8x256xf32, #tpu.memory_space<vmem>>, vector<1x256xf32>
    %c2_69 = arith.constant 2 : index
    %c0_70 = arith.constant 0 : index
    %89 = vector.load %arg15[%c2_69, %c0_70] : memref<22x256xf32, #tpu.memory_space<vmem>>, vector<1x256xf32>
    tpu.vector_store %arg15[%c2_69, %c0_70], %88 {strides = array<i32>} : memref<22x256xf32, #tpu.memory_space<vmem>>, vector<1x256xf32>,
    %c1_71 = arith.constant 1 : index
    %c0_72 = arith.constant 0 : index
    %90 = vector.load %arg14[%c1_71, %c0_72] : memref<8x256xf32, #tpu.memory_space<vmem>>, vector<1x256xf32>
    %c4_73 = arith.constant 4 : index
    %c0_74 = arith.constant 0 : index
    %91 = vector.load %arg15[%c4_73, %c0_74] : memref<22x256xf32, #tpu.memory_space<vmem>>, vector<1x256xf32>
    tpu.vector_store %arg15[%c4_73, %c0_74], %90 {strides = array<i32>} : memref<22x256xf32, #tpu.memory_space<vmem>>, vector<1x256xf32>,
    %c2_75 = arith.constant 2 : index
    %c0_76 = arith.constant 0 : index
    %92 = vector.load %arg14[%c2_75, %c0_76] : memref<8x256xf32, #tpu.memory_space<vmem>>, vector<1x256xf32>
    %c6 = arith.constant 6 : index
    %c0_77 = arith.constant 0 : index
    %93 = vector.load %arg15[%c6, %c0_77] : memref<22x256xf32, #tpu.memory_space<vmem>>, vector<1x256xf32>
    tpu.vector_store %arg15[%c6, %c0_77], %92 {strides = array<i32>} : memref<22x256xf32, #tpu.memory_space<vmem>>, vector<1x256xf32>,
    %c3_78 = arith.constant 3 : index
    %c0_79 = arith.constant 0 : index
    %94 = vector.load %arg14[%c3_78, %c0_79] : memref<8x256xf32, #tpu.memory_space<vmem>>, vector<1x256xf32>
    %c8_80 = arith.constant 8 : index
    %c0_81 = arith.constant 0 : index
    %95 = vector.load %arg15[%c8_80, %c0_81] : memref<22x256xf32, #tpu.memory_space<vmem>>, vector<1x256xf32>
    tpu.vector_store %arg15[%c8_80, %c0_81], %94 {strides = array<i32>} : memref<22x256xf32, #tpu.memory_space<vmem>>, vector<1x256xf32>,
    %c4_82 = arith.constant 4 : index
    %c0_83 = arith.constant 0 : index
    %96 = vector.load %arg14[%c4_82, %c0_83] : memref<8x256xf32, #tpu.memory_space<vmem>>, vector<1x256xf32>
    %c13 = arith.constant 13 : index
    %c0_84 = arith.constant 0 : index
    %97 = vector.load %arg15[%c13, %c0_84] : memref<22x256xf32, #tpu.memory_space<vmem>>, vector<1x256xf32>
    tpu.vector_store %arg15[%c13, %c0_84], %96 {strides = array<i32>} : memref<22x256xf32, #tpu.memory_space<vmem>>, vector<1x256xf32>,
    %c5 = arith.constant 5 : index
    %c0_85 = arith.constant 0 : index
    %98 = vector.load %arg14[%c5, %c0_85] : memref<8x256xf32, #tpu.memory_space<vmem>>, vector<1x256xf32>
    %c15 = arith.constant 15 : index
    %c0_86 = arith.constant 0 : index
    %99 = vector.load %arg15[%c15, %c0_86] : memref<22x256xf32, #tpu.memory_space<vmem>>, vector<1x256xf32>
    tpu.vector_store %arg15[%c15, %c0_86], %98 {strides = array<i32>} : memref<22x256xf32, #tpu.memory_space<vmem>>, vector<1x256xf32>,
    %c6_87 = arith.constant 6 : index
    %c0_88 = arith.constant 0 : index
    %100 = vector.load %arg14[%c6_87, %c0_88] : memref<8x256xf32, #tpu.memory_space<vmem>>, vector<1x256xf32>
    %c17 = arith.constant 17 : index
    %c0_89 = arith.constant 0 : index
    %101 = vector.load %arg15[%c17, %c0_89] : memref<22x256xf32, #tpu.memory_space<vmem>>, vector<1x256xf32>
    tpu.vector_store %arg15[%c17, %c0_89], %100 {strides = array<i32>} : memref<22x256xf32, #tpu.memory_space<vmem>>, vector<1x256xf32>,
    %c7_90 = arith.constant 7 : index
    %c0_91 = arith.constant 0 : index
    %102 = vector.load %arg14[%c7_90, %c0_91] : memref<8x256xf32, #tpu.memory_space<vmem>>, vector<1x256xf32>
    %c19 = arith.constant 19 : index
    %c0_92 = arith.constant 0 : index
    %103 = vector.load %arg15[%c19, %c0_92] : memref<22x256xf32, #tpu.memory_space<vmem>>, vector<1x256xf32>
    tpu.vector_store %arg15[%c19, %c0_92], %102 {strides = array<i32>} : memref<22x256xf32, #tpu.memory_space<vmem>>, vector<1x256xf32>,
    %c0_93 = arith.constant 0 : index
    %c0_94 = arith.constant 0 : index
    %c0_95 = arith.constant 0 : index
    %104 = vector.load %arg3[%c0_93, %c0_94, %c0_95] : memref<4x256x256xbf16, #tpu.memory_space<vmem>>, vector<1x256x256xbf16>
    %105 = vector.shape_cast %104 : vector<1x256x256xbf16> to vector<256x256xbf16>
    %c1_96 = arith.constant 1 : index
    %c0_97 = arith.constant 0 : index
    %c0_98 = arith.constant 0 : index
    %106 = vector.load %arg3[%c1_96, %c0_97, %c0_98] : memref<4x256x256xbf16, #tpu.memory_space<vmem>>, vector<1x256x256xbf16>
    %107 = vector.shape_cast %106 : vector<1x256x256xbf16> to vector<256x256xbf16>
    %c2_99 = arith.constant 2 : index
    %c0_100 = arith.constant 0 : index
    %c0_101 = arith.constant 0 : index
    %108 = vector.load %arg3[%c2_99, %c0_100, %c0_101] : memref<4x256x256xbf16, #tpu.memory_space<vmem>>, vector<1x256x256xbf16>
    %109 = vector.shape_cast %108 : vector<1x256x256xbf16> to vector<256x256xbf16>
    %c3_102 = arith.constant 3 : index
    %c0_103 = arith.constant 0 : index
    %c0_104 = arith.constant 0 : index
    %110 = vector.load %arg3[%c3_102, %c0_103, %c0_104] : memref<4x256x256xbf16, #tpu.memory_space<vmem>>, vector<1x256x256xbf16>
    %111 = vector.shape_cast %110 : vector<1x256x256xbf16> to vector<256x256xbf16>
    %c0_105 = arith.constant 0 : index
    %c0_106 = arith.constant 0 : index
    %112 = vector.load %arg15[%c0_105, %c0_106] : memref<22x256xf32, #tpu.memory_space<vmem>>, vector<8x256xf32>
    %113 = arith.truncf %112 : vector<8x256xf32> to vector<8x256xbf16>
    %cst_107 = arith.constant dense<0.000000e+00> : vector<8x256xf32>
    %114 = tpu.matmul %113, %105, %cst_107 {dimension_numbers = #tpu.dot_dimension_numbers<[1], [0], [0], [1], [0, 0, 1, 1], [], []>} : vector<8x256xbf16>, vector<256x256xbf16>, vector<8x256xf32> -> vector<8x256xf32>
    %c1_108 = arith.constant 1 : index
    %c0_109 = arith.constant 0 : index
    %115 = vector.load %arg15[%c1_108, %c0_109] : memref<22x256xf32, #tpu.memory_space<vmem>>, vector<8x256xf32>
    %116 = arith.truncf %115 : vector<8x256xf32> to vector<8x256xbf16>
    %cst_110 = arith.constant dense<0.000000e+00> : vector<8x256xf32>
    %117 = tpu.matmul %116, %107, %cst_110 {dimension_numbers = #tpu.dot_dimension_numbers<[1], [0], [0], [1], [0, 0, 1, 1], [], []>} : vector<8x256xbf16>, vector<256x256xbf16>, vector<8x256xf32> -> vector<8x256xf32>
    %118 = arith.addf %114, %117 : vector<8x256xf32>
    %c2_111 = arith.constant 2 : index
    %c0_112 = arith.constant 0 : index
    %119 = vector.load %arg15[%c2_111, %c0_112] : memref<22x256xf32, #tpu.memory_space<vmem>>, vector<8x256xf32>
    %120 = arith.truncf %119 : vector<8x256xf32> to vector<8x256xbf16>
    %cst_113 = arith.constant dense<0.000000e+00> : vector<8x256xf32>
    %121 = tpu.matmul %120, %109, %cst_113 {dimension_numbers = #tpu.dot_dimension_numbers<[1], [0], [0], [1], [0, 0, 1, 1], [], []>} : vector<8x256xbf16>, vector<256x256xbf16>, vector<8x256xf32> -> vector<8x256xf32>
    %122 = arith.addf %118, %121 : vector<8x256xf32>
    %c3_114 = arith.constant 3 : index
    %c0_115 = arith.constant 0 : index
    %123 = vector.load %arg15[%c3_114, %c0_115] : memref<22x256xf32, #tpu.memory_space<vmem>>, vector<8x256xf32>
    %124 = arith.truncf %123 : vector<8x256xf32> to vector<8x256xbf16>
    %cst_116 = arith.constant dense<0.000000e+00> : vector<8x256xf32>
    %125 = tpu.matmul %124, %111, %cst_116 {dimension_numbers = #tpu.dot_dimension_numbers<[1], [0], [0], [1], [0, 0, 1, 1], [], []>} : vector<8x256xbf16>, vector<256x256xbf16>, vector<8x256xf32> -> vector<8x256xf32>
    %126 = arith.addf %122, %125 : vector<8x256xf32>
    %c0_117 = arith.constant 0 : index
    %c0_118 = arith.constant 0 : index
    %127 = vector.load %arg16[%c0_117, %c0_118] : memref<16x256xf32, #tpu.memory_space<vmem>>, vector<8x256xf32>
    tpu.vector_store %arg16[%c0_117, %c0_118], %126 {strides = array<i32>} : memref<16x256xf32, #tpu.memory_space<vmem>>, vector<8x256xf32>,
    %c11 = arith.constant 11 : index
    %c0_119 = arith.constant 0 : index
    %128 = vector.load %arg15[%c11, %c0_119] : memref<22x256xf32, #tpu.memory_space<vmem>>, vector<8x256xf32>
    %129 = arith.truncf %128 : vector<8x256xf32> to vector<8x256xbf16>
    %cst_120 = arith.constant dense<0.000000e+00> : vector<8x256xf32>
    %130 = tpu.matmul %129, %105, %cst_120 {dimension_numbers = #tpu.dot_dimension_numbers<[1], [0], [0], [1], [0, 0, 1, 1], [], []>} : vector<8x256xbf16>, vector<256x256xbf16>, vector<8x256xf32> -> vector<8x256xf32>
    %c12 = arith.constant 12 : index
    %c0_121 = arith.constant 0 : index
    %131 = vector.load %arg15[%c12, %c0_121] : memref<22x256xf32, #tpu.memory_space<vmem>>, vector<8x256xf32>
    %132 = arith.truncf %131 : vector<8x256xf32> to vector<8x256xbf16>
    %cst_122 = arith.constant dense<0.000000e+00> : vector<8x256xf32>
    %133 = tpu.matmul %132, %107, %cst_122 {dimension_numbers = #tpu.dot_dimension_numbers<[1], [0], [0], [1], [0, 0, 1, 1], [], []>} : vector<8x256xbf16>, vector<256x256xbf16>, vector<8x256xf32> -> vector<8x256xf32>
    %134 = arith.addf %130, %133 : vector<8x256xf32>
    %c13_123 = arith.constant 13 : index
    %c0_124 = arith.constant 0 : index
    %135 = vector.load %arg15[%c13_123, %c0_124] : memref<22x256xf32, #tpu.memory_space<vmem>>, vector<8x256xf32>
    %136 = arith.truncf %135 : vector<8x256xf32> to vector<8x256xbf16>
    %cst_125 = arith.constant dense<0.000000e+00> : vector<8x256xf32>
    %137 = tpu.matmul %136, %109, %cst_125 {dimension_numbers = #tpu.dot_dimension_numbers<[1], [0], [0], [1], [0, 0, 1, 1], [], []>} : vector<8x256xbf16>, vector<256x256xbf16>, vector<8x256xf32> -> vector<8x256xf32>
    %138 = arith.addf %134, %137 : vector<8x256xf32>
    %c14 = arith.constant 14 : index
    %c0_126 = arith.constant 0 : index
    %139 = vector.load %arg15[%c14, %c0_126] : memref<22x256xf32, #tpu.memory_space<vmem>>, vector<8x256xf32>
    %140 = arith.truncf %139 : vector<8x256xf32> to vector<8x256xbf16>
    %cst_127 = arith.constant dense<0.000000e+00> : vector<8x256xf32>
    %141 = tpu.matmul %140, %111, %cst_127 {dimension_numbers = #tpu.dot_dimension_numbers<[1], [0], [0], [1], [0, 0, 1, 1], [], []>} : vector<8x256xbf16>, vector<256x256xbf16>, vector<8x256xf32> -> vector<8x256xf32>
    %142 = arith.addf %138, %141 : vector<8x256xf32>
    %c8_128 = arith.constant 8 : index
    %c0_129 = arith.constant 0 : index
    %143 = vector.load %arg16[%c8_128, %c0_129] : memref<16x256xf32, #tpu.memory_space<vmem>>, vector<8x256xf32>
    tpu.vector_store %arg16[%c8_128, %c0_129], %142 {strides = array<i32>} : memref<16x256xf32, #tpu.memory_space<vmem>>, vector<8x256xf32>,
    %c0_130 = arith.constant 0 : index
    %c0_131 = arith.constant 0 : index
    %144 = vector.load %arg16[%c0_130, %c0_131] : memref<16x256xf32, #tpu.memory_space<vmem>>, vector<16x256xf32>
    %145 = tpu.iota {dimensions = array<i32: 0>} : vector<256x256xi32>
    %146 = tpu.iota {dimensions = array<i32: 1>} : vector<256x256xi32>
    %c31_i32 = arith.constant 31 : i32
    %147 = vector.broadcast %c31_i32 : i32 to vector<256x256xi32>
    %148 = arith.andi %145, %147 : vector<256x256xi32>
    %c31_i32_132 = arith.constant 31 : i32
    %149 = vector.broadcast %c31_i32_132 : i32 to vector<256x256xi32>
    %150 = arith.andi %146, %149 : vector<256x256xi32>
    %151 = arith.cmpi eq, %148, %150 : vector<256x256xi32>
    %152 = arith.extui %151 : vector<256x256xi1> to vector<256x256xi32>
    %153 = arith.sitofp %152 : vector<256x256xi32> to vector<256x256xf32>
    %cst_133 = arith.constant dense<0.000000e+00> : vector<256xf32>
    %154 = vector.multi_reduction <add>, %144, %cst_133 [0] : vector<16x256xf32> to vector<256xf32>
    %155 = vector.shape_cast %154 : vector<256xf32> to vector<1x256xf32>
    %cst_134 = arith.constant dense<0.000000e+00> : vector<1x256xf32>
    %156 = tpu.matmul %155, %153, %cst_134 {dimension_numbers = #tpu.dot_dimension_numbers<[1], [0], [0], [1], [0, 0, 1, 1], [], []>} : vector<1x256xf32>, vector<256x256xf32>, vector<1x256xf32> -> vector<1x256xf32>
    %cst_135 = arith.constant 7.812500e-03 : f32
    %157 = vector.broadcast %cst_135 : f32 to vector<1x256xf32>
    %158 = arith.mulf %156, %157 : vector<1x256xf32>
    %159 = vector.broadcast %158 : vector<1x256xf32> to vector<16x256xf32>
    %160 = arith.subf %144, %159 : vector<16x256xf32>
    %161 = arith.mulf %160, %160 : vector<16x256xf32>
    %cst_136 = arith.constant dense<0.000000e+00> : vector<256xf32>
    %162 = vector.multi_reduction <add>, %161, %cst_136 [0] : vector<16x256xf32> to vector<256xf32>
    %163 = vector.shape_cast %162 : vector<256xf32> to vector<1x256xf32>
    %cst_137 = arith.constant dense<0.000000e+00> : vector<1x256xf32>
    %164 = tpu.matmul %163, %153, %cst_137 {dimension_numbers = #tpu.dot_dimension_numbers<[1], [0], [0], [1], [0, 0, 1, 1], [], []>} : vector<1x256xf32>, vector<256x256xf32>, vector<1x256xf32> -> vector<1x256xf32>
    %cst_138 = arith.constant 7.812500e-03 : f32
    %165 = vector.broadcast %cst_138 : f32 to vector<1x256xf32>
    %166 = arith.mulf %164, %165 : vector<1x256xf32>
    %c0_139 = arith.constant 0 : index
    %c0_140 = arith.constant 0 : index
    %167 = vector.load %arg8[%c0_139, %c0_140] : memref<1x256xf32, #tpu.memory_space<vmem>>, vector<1x256xf32>
    %cst_141 = arith.constant 9.99999974E-6 : f32
    %168 = vector.broadcast %cst_141 : f32 to vector<1x256xf32>
    %169 = arith.addf %166, %168 : vector<1x256xf32>
    %170 = math.rsqrt %169 : vector<1x256xf32>
    %171 = arith.mulf %167, %170 : vector<1x256xf32>
    %172 = vector.broadcast %171 : vector<1x256xf32> to vector<16x256xf32>
    %173 = arith.mulf %160, %172 : vector<16x256xf32>
    %c0_142 = arith.constant 0 : index
    %c0_143 = arith.constant 0 : index
    %174 = vector.load %arg9[%c0_142, %c0_143] : memref<1x256xf32, #tpu.memory_space<vmem>>, vector<1x256xf32>
    %175 = vector.broadcast %174 : vector<1x256xf32> to vector<16x256xf32>
    %176 = arith.addf %173, %175 : vector<16x256xf32>
    %cst_144 = arith.constant 0.000000e+00 : f32
    %177 = vector.broadcast %cst_144 : f32 to vector<16x256xf32>
    %178 = arith.maximumf %176, %177 : vector<16x256xf32>
    %c0_145 = arith.constant 0 : index
    %c0_146 = arith.constant 0 : index
    %179 = vector.load %arg16[%c0_145, %c0_146] : memref<16x256xf32, #tpu.memory_space<vmem>>, vector<16x256xf32>
    tpu.vector_store %arg16[%c0_145, %c0_146], %178 {strides = array<i32>} : memref<16x256xf32, #tpu.memory_space<vmem>>, vector<16x256xf32>,
    %c0_147 = arith.constant 0 : index
    %c0_148 = arith.constant 0 : index
    %180 = vector.load %arg16[%c0_147, %c0_148] : memref<16x256xf32, #tpu.memory_space<vmem>>, vector<1x256xf32>
    %c2_149 = arith.constant 2 : index
    %c0_150 = arith.constant 0 : index
    %181 = vector.load %arg17[%c2_149, %c0_150] : memref<38x256xf32, #tpu.memory_space<vmem>>, vector<1x256xf32>
    tpu.vector_store %arg17[%c2_149, %c0_150], %180 {strides = array<i32>} : memref<38x256xf32, #tpu.memory_space<vmem>>, vector<1x256xf32>,
    %c1_151 = arith.constant 1 : index
    %c0_152 = arith.constant 0 : index
    %182 = vector.load %arg16[%c1_151, %c0_152] : memref<16x256xf32, #tpu.memory_space<vmem>>, vector<1x256xf32>
    %c4_153 = arith.constant 4 : index
    %c0_154 = arith.constant 0 : index
    %183 = vector.load %arg17[%c4_153, %c0_154] : memref<38x256xf32, #tpu.memory_space<vmem>>, vector<1x256xf32>
    tpu.vector_store %arg17[%c4_153, %c0_154], %182 {strides = array<i32>} : memref<38x256xf32, #tpu.memory_space<vmem>>, vector<1x256xf32>,
    %c2_155 = arith.constant 2 : index
    %c0_156 = arith.constant 0 : index
    %184 = vector.load %arg16[%c2_155, %c0_156] : memref<16x256xf32, #tpu.memory_space<vmem>>, vector<1x256xf32>
    %c6_157 = arith.constant 6 : index
    %c0_158 = arith.constant 0 : index
    %185 = vector.load %arg17[%c6_157, %c0_158] : memref<38x256xf32, #tpu.memory_space<vmem>>, vector<1x256xf32>
    tpu.vector_store %arg17[%c6_157, %c0_158], %184 {strides = array<i32>} : memref<38x256xf32, #tpu.memory_space<vmem>>, vector<1x256xf32>,
    %c3_159 = arith.constant 3 : index
    %c0_160 = arith.constant 0 : index
    %186 = vector.load %arg16[%c3_159, %c0_160] : memref<16x256xf32, #tpu.memory_space<vmem>>, vector<1x256xf32>
    %c8_161 = arith.constant 8 : index
    %c0_162 = arith.constant 0 : index
    %187 = vector.load %arg17[%c8_161, %c0_162] : memref<38x256xf32, #tpu.memory_space<vmem>>, vector<1x256xf32>
    tpu.vector_store %arg17[%c8_161, %c0_162], %186 {strides = array<i32>} : memref<38x256xf32, #tpu.memory_space<vmem>>, vector<1x256xf32>,
    %c4_163 = arith.constant 4 : index
    %c0_164 = arith.constant 0 : index
    %188 = vector.load %arg16[%c4_163, %c0_164] : memref<16x256xf32, #tpu.memory_space<vmem>>, vector<1x256xf32>
    %c10_165 = arith.constant 10 : index
    %c0_166 = arith.constant 0 : index
    %189 = vector.load %arg17[%c10_165, %c0_166] : memref<38x256xf32, #tpu.memory_space<vmem>>, vector<1x256xf32>
    tpu.vector_store %arg17[%c10_165, %c0_166], %188 {strides = array<i32>} : memref<38x256xf32, #tpu.memory_space<vmem>>, vector<1x256xf32>,
    %c5_167 = arith.constant 5 : index
    %c0_168 = arith.constant 0 : index
    %190 = vector.load %arg16[%c5_167, %c0_168] : memref<16x256xf32, #tpu.memory_space<vmem>>, vector<1x256xf32>
    %c12_169 = arith.constant 12 : index
    %c0_170 = arith.constant 0 : index
    %191 = vector.load %arg17[%c12_169, %c0_170] : memref<38x256xf32, #tpu.memory_space<vmem>>, vector<1x256xf32>
    tpu.vector_store %arg17[%c12_169, %c0_170], %190 {strides = array<i32>} : memref<38x256xf32, #tpu.memory_space<vmem>>, vector<1x256xf32>,
    %c6_171 = arith.constant 6 : index
    %c0_172 = arith.constant 0 : index
    %192 = vector.load %arg16[%c6_171, %c0_172] : memref<16x256xf32, #tpu.memory_space<vmem>>, vector<1x256xf32>
    %c14_173 = arith.constant 14 : index
    %c0_174 = arith.constant 0 : index
    %193 = vector.load %arg17[%c14_173, %c0_174] : memref<38x256xf32, #tpu.memory_space<vmem>>, vector<1x256xf32>
    tpu.vector_store %arg17[%c14_173, %c0_174], %192 {strides = array<i32>} : memref<38x256xf32, #tpu.memory_space<vmem>>, vector<1x256xf32>,
    %c7_175 = arith.constant 7 : index
    %c0_176 = arith.constant 0 : index
    %194 = vector.load %arg16[%c7_175, %c0_176] : memref<16x256xf32, #tpu.memory_space<vmem>>, vector<1x256xf32>
    %c16 = arith.constant 16 : index
    %c0_177 = arith.constant 0 : index
    %195 = vector.load %arg17[%c16, %c0_177] : memref<38x256xf32, #tpu.memory_space<vmem>>, vector<1x256xf32>
    tpu.vector_store %arg17[%c16, %c0_177], %194 {strides = array<i32>} : memref<38x256xf32, #tpu.memory_space<vmem>>, vector<1x256xf32>,
    %c8_178 = arith.constant 8 : index
    %c0_179 = arith.constant 0 : index
    %196 = vector.load %arg16[%c8_178, %c0_179] : memref<16x256xf32, #tpu.memory_space<vmem>>, vector<1x256xf32>
    %c21 = arith.constant 21 : index
    %c0_180 = arith.constant 0 : index
    %197 = vector.load %arg17[%c21, %c0_180] : memref<38x256xf32, #tpu.memory_space<vmem>>, vector<1x256xf32>
    tpu.vector_store %arg17[%c21, %c0_180], %196 {strides = array<i32>} : memref<38x256xf32, #tpu.memory_space<vmem>>, vector<1x256xf32>,
    %c9_181 = arith.constant 9 : index
    %c0_182 = arith.constant 0 : index
    %198 = vector.load %arg16[%c9_181, %c0_182] : memref<16x256xf32, #tpu.memory_space<vmem>>, vector<1x256xf32>
    %c23 = arith.constant 23 : index
    %c0_183 = arith.constant 0 : index
    %199 = vector.load %arg17[%c23, %c0_183] : memref<38x256xf32, #tpu.memory_space<vmem>>, vector<1x256xf32>
    tpu.vector_store %arg17[%c23, %c0_183], %198 {strides = array<i32>} : memref<38x256xf32, #tpu.memory_space<vmem>>, vector<1x256xf32>,
    %c10_184 = arith.constant 10 : index
    %c0_185 = arith.constant 0 : index
    %200 = vector.load %arg16[%c10_184, %c0_185] : memref<16x256xf32, #tpu.memory_space<vmem>>, vector<1x256xf32>
    %c25 = arith.constant 25 : index
    %c0_186 = arith.constant 0 : index
    %201 = vector.load %arg17[%c25, %c0_186] : memref<38x256xf32, #tpu.memory_space<vmem>>, vector<1x256xf32>
    tpu.vector_store %arg17[%c25, %c0_186], %200 {strides = array<i32>} : memref<38x256xf32, #tpu.memory_space<vmem>>, vector<1x256xf32>,
    %c11_187 = arith.constant 11 : index
    %c0_188 = arith.constant 0 : index
    %202 = vector.load %arg16[%c11_187, %c0_188] : memref<16x256xf32, #tpu.memory_space<vmem>>, vector<1x256xf32>
    %c27 = arith.constant 27 : index
    %c0_189 = arith.constant 0 : index
    %203 = vector.load %arg17[%c27, %c0_189] : memref<38x256xf32, #tpu.memory_space<vmem>>, vector<1x256xf32>
    tpu.vector_store %arg17[%c27, %c0_189], %202 {strides = array<i32>} : memref<38x256xf32, #tpu.memory_space<vmem>>, vector<1x256xf32>,
    %c12_190 = arith.constant 12 : index
    %c0_191 = arith.constant 0 : index
    %204 = vector.load %arg16[%c12_190, %c0_191] : memref<16x256xf32, #tpu.memory_space<vmem>>, vector<1x256xf32>
    %c29 = arith.constant 29 : index
    %c0_192 = arith.constant 0 : index
    %205 = vector.load %arg17[%c29, %c0_192] : memref<38x256xf32, #tpu.memory_space<vmem>>, vector<1x256xf32>
    tpu.vector_store %arg17[%c29, %c0_192], %204 {strides = array<i32>} : memref<38x256xf32, #tpu.memory_space<vmem>>, vector<1x256xf32>,
    %c13_193 = arith.constant 13 : index
    %c0_194 = arith.constant 0 : index
    %206 = vector.load %arg16[%c13_193, %c0_194] : memref<16x256xf32, #tpu.memory_space<vmem>>, vector<1x256xf32>
    %c31 = arith.constant 31 : index
    %c0_195 = arith.constant 0 : index
    %207 = vector.load %arg17[%c31, %c0_195] : memref<38x256xf32, #tpu.memory_space<vmem>>, vector<1x256xf32>
    tpu.vector_store %arg17[%c31, %c0_195], %206 {strides = array<i32>} : memref<38x256xf32, #tpu.memory_space<vmem>>, vector<1x256xf32>,
    %c14_196 = arith.constant 14 : index
    %c0_197 = arith.constant 0 : index
    %208 = vector.load %arg16[%c14_196, %c0_197] : memref<16x256xf32, #tpu.memory_space<vmem>>, vector<1x256xf32>
    %c33 = arith.constant 33 : index
    %c0_198 = arith.constant 0 : index
    %209 = vector.load %arg17[%c33, %c0_198] : memref<38x256xf32, #tpu.memory_space<vmem>>, vector<1x256xf32>
    tpu.vector_store %arg17[%c33, %c0_198], %208 {strides = array<i32>} : memref<38x256xf32, #tpu.memory_space<vmem>>, vector<1x256xf32>,
    %c15_199 = arith.constant 15 : index
    %c0_200 = arith.constant 0 : index
    %210 = vector.load %arg16[%c15_199, %c0_200] : memref<16x256xf32, #tpu.memory_space<vmem>>, vector<1x256xf32>
    %c35 = arith.constant 35 : index
    %c0_201 = arith.constant 0 : index
    %211 = vector.load %arg17[%c35, %c0_201] : memref<38x256xf32, #tpu.memory_space<vmem>>, vector<1x256xf32>
    tpu.vector_store %arg17[%c35, %c0_201], %210 {strides = array<i32>} : memref<38x256xf32, #tpu.memory_space<vmem>>, vector<1x256xf32>,
    %c0_202 = arith.constant 0 : index
    %c0_203 = arith.constant 0 : index
    %c0_204 = arith.constant 0 : index
    %212 = vector.load %arg4[%c0_202, %c0_203, %c0_204] : memref<4x256x256xbf16, #tpu.memory_space<vmem>>, vector<1x256x256xbf16>
    %213 = vector.shape_cast %212 : vector<1x256x256xbf16> to vector<256x256xbf16>
    %c1_205 = arith.constant 1 : index
    %c0_206 = arith.constant 0 : index
    %c0_207 = arith.constant 0 : index
    %214 = vector.load %arg4[%c1_205, %c0_206, %c0_207] : memref<4x256x256xbf16, #tpu.memory_space<vmem>>, vector<1x256x256xbf16>
    %215 = vector.shape_cast %214 : vector<1x256x256xbf16> to vector<256x256xbf16>
    %c2_208 = arith.constant 2 : index
    %c0_209 = arith.constant 0 : index
    %c0_210 = arith.constant 0 : index
    %216 = vector.load %arg4[%c2_208, %c0_209, %c0_210] : memref<4x256x256xbf16, #tpu.memory_space<vmem>>, vector<1x256x256xbf16>
    %217 = vector.shape_cast %216 : vector<1x256x256xbf16> to vector<256x256xbf16>
    %c3_211 = arith.constant 3 : index
    %c0_212 = arith.constant 0 : index
    %c0_213 = arith.constant 0 : index
    %218 = vector.load %arg4[%c3_211, %c0_212, %c0_213] : memref<4x256x256xbf16, #tpu.memory_space<vmem>>, vector<1x256x256xbf16>
    %219 = vector.shape_cast %218 : vector<1x256x256xbf16> to vector<256x256xbf16>
    %c0_214 = arith.constant 0 : index
    %c0_215 = arith.constant 0 : index
    %220 = vector.load %arg17[%c0_214, %c0_215] : memref<38x256xf32, #tpu.memory_space<vmem>>, vector<16x256xf32>
    %221 = arith.truncf %220 : vector<16x256xf32> to vector<16x256xbf16>
    %cst_216 = arith.constant dense<0.000000e+00> : vector<16x256xf32>
    %222 = tpu.matmul %221, %213, %cst_216 {dimension_numbers = #tpu.dot_dimension_numbers<[1], [0], [0], [1], [0, 0, 1, 1], [], []>} : vector<16x256xbf16>, vector<256x256xbf16>, vector<16x256xf32> -> vector<16x256xf32>
    %c1_217 = arith.constant 1 : index
    %c0_218 = arith.constant 0 : index
    %223 = vector.load %arg17[%c1_217, %c0_218] : memref<38x256xf32, #tpu.memory_space<vmem>>, vector<16x256xf32>
    %224 = arith.truncf %223 : vector<16x256xf32> to vector<16x256xbf16>
    %cst_219 = arith.constant dense<0.000000e+00> : vector<16x256xf32>
    %225 = tpu.matmul %224, %215, %cst_219 {dimension_numbers = #tpu.dot_dimension_numbers<[1], [0], [0], [1], [0, 0, 1, 1], [], []>} : vector<16x256xbf16>, vector<256x256xbf16>, vector<16x256xf32> -> vector<16x256xf32>
    %226 = arith.addf %222, %225 : vector<16x256xf32>
    %c2_220 = arith.constant 2 : index
    %c0_221 = arith.constant 0 : index
    %227 = vector.load %arg17[%c2_220, %c0_221] : memref<38x256xf32, #tpu.memory_space<vmem>>, vector<16x256xf32>
    %228 = arith.truncf %227 : vector<16x256xf32> to vector<16x256xbf16>
    %cst_222 = arith.constant dense<0.000000e+00> : vector<16x256xf32>
    %229 = tpu.matmul %228, %217, %cst_222 {dimension_numbers = #tpu.dot_dimension_numbers<[1], [0], [0], [1], [0, 0, 1, 1], [], []>} : vector<16x256xbf16>, vector<256x256xbf16>, vector<16x256xf32> -> vector<16x256xf32>
    %230 = arith.addf %226, %229 : vector<16x256xf32>
    %c3_223 = arith.constant 3 : index
    %c0_224 = arith.constant 0 : index
    %231 = vector.load %arg17[%c3_223, %c0_224] : memref<38x256xf32, #tpu.memory_space<vmem>>, vector<16x256xf32>
    %232 = arith.truncf %231 : vector<16x256xf32> to vector<16x256xbf16>
    %cst_225 = arith.constant dense<0.000000e+00> : vector<16x256xf32>
    %233 = tpu.matmul %232, %219, %cst_225 {dimension_numbers = #tpu.dot_dimension_numbers<[1], [0], [0], [1], [0, 0, 1, 1], [], []>} : vector<16x256xbf16>, vector<256x256xbf16>, vector<16x256xf32> -> vector<16x256xf32>
    %234 = arith.addf %230, %233 : vector<16x256xf32>
    %c0_226 = arith.constant 0 : index
    %c0_227 = arith.constant 0 : index
    %235 = vector.load %arg18[%c0_226, %c0_227] : memref<32x256xf32, #tpu.memory_space<vmem>>, vector<16x256xf32>
    tpu.vector_store %arg18[%c0_226, %c0_227], %234 {strides = array<i32>} : memref<32x256xf32, #tpu.memory_space<vmem>>, vector<16x256xf32>,
    %c19_228 = arith.constant 19 : index
    %c0_229 = arith.constant 0 : index
    %236 = vector.load %arg17[%c19_228, %c0_229] : memref<38x256xf32, #tpu.memory_space<vmem>>, vector<16x256xf32>
    %237 = arith.truncf %236 : vector<16x256xf32> to vector<16x256xbf16>
    %cst_230 = arith.constant dense<0.000000e+00> : vector<16x256xf32>
    %238 = tpu.matmul %237, %213, %cst_230 {dimension_numbers = #tpu.dot_dimension_numbers<[1], [0], [0], [1], [0, 0, 1, 1], [], []>} : vector<16x256xbf16>, vector<256x256xbf16>, vector<16x256xf32> -> vector<16x256xf32>
    %c20 = arith.constant 20 : index
    %c0_231 = arith.constant 0 : index
    %239 = vector.load %arg17[%c20, %c0_231] : memref<38x256xf32, #tpu.memory_space<vmem>>, vector<16x256xf32>
    %240 = arith.truncf %239 : vector<16x256xf32> to vector<16x256xbf16>
    %cst_232 = arith.constant dense<0.000000e+00> : vector<16x256xf32>
    %241 = tpu.matmul %240, %215, %cst_232 {dimension_numbers = #tpu.dot_dimension_numbers<[1], [0], [0], [1], [0, 0, 1, 1], [], []>} : vector<16x256xbf16>, vector<256x256xbf16>, vector<16x256xf32> -> vector<16x256xf32>
    %242 = arith.addf %238, %241 : vector<16x256xf32>
    %c21_233 = arith.constant 21 : index
    %c0_234 = arith.constant 0 : index
    %243 = vector.load %arg17[%c21_233, %c0_234] : memref<38x256xf32, #tpu.memory_space<vmem>>, vector<16x256xf32>
    %244 = arith.truncf %243 : vector<16x256xf32> to vector<16x256xbf16>
    %cst_235 = arith.constant dense<0.000000e+00> : vector<16x256xf32>
    %245 = tpu.matmul %244, %217, %cst_235 {dimension_numbers = #tpu.dot_dimension_numbers<[1], [0], [0], [1], [0, 0, 1, 1], [], []>} : vector<16x256xbf16>, vector<256x256xbf16>, vector<16x256xf32> -> vector<16x256xf32>
    %246 = arith.addf %242, %245 : vector<16x256xf32>
    %c22 = arith.constant 22 : index
    %c0_236 = arith.constant 0 : index
    %247 = vector.load %arg17[%c22, %c0_236] : memref<38x256xf32, #tpu.memory_space<vmem>>, vector<16x256xf32>
    %248 = arith.truncf %247 : vector<16x256xf32> to vector<16x256xbf16>
    %cst_237 = arith.constant dense<0.000000e+00> : vector<16x256xf32>
    %249 = tpu.matmul %248, %219, %cst_237 {dimension_numbers = #tpu.dot_dimension_numbers<[1], [0], [0], [1], [0, 0, 1, 1], [], []>} : vector<16x256xbf16>, vector<256x256xbf16>, vector<16x256xf32> -> vector<16x256xf32>
    %250 = arith.addf %246, %249 : vector<16x256xf32>
    %c16_238 = arith.constant 16 : index
    %c0_239 = arith.constant 0 : index
    %251 = vector.load %arg18[%c16_238, %c0_239] : memref<32x256xf32, #tpu.memory_space<vmem>>, vector<16x256xf32>
    tpu.vector_store %arg18[%c16_238, %c0_239], %250 {strides = array<i32>} : memref<32x256xf32, #tpu.memory_space<vmem>>, vector<16x256xf32>,
    %c0_240 = arith.constant 0 : index
    %c0_241 = arith.constant 0 : index
    %252 = vector.load %arg18[%c0_240, %c0_241] : memref<32x256xf32, #tpu.memory_space<vmem>>, vector<32x256xf32>
    %253 = tpu.iota {dimensions = array<i32: 0>} : vector<256x256xi32>
    %254 = tpu.iota {dimensions = array<i32: 1>} : vector<256x256xi32>
    %c15_i32 = arith.constant 15 : i32
    %255 = vector.broadcast %c15_i32 : i32 to vector<256x256xi32>
    %256 = arith.andi %253, %255 : vector<256x256xi32>
    %c15_i32_242 = arith.constant 15 : i32
    %257 = vector.broadcast %c15_i32_242 : i32 to vector<256x256xi32>
    %258 = arith.andi %254, %257 : vector<256x256xi32>
    %259 = arith.cmpi eq, %256, %258 : vector<256x256xi32>
    %260 = arith.extui %259 : vector<256x256xi1> to vector<256x256xi32>
    %261 = arith.sitofp %260 : vector<256x256xi32> to vector<256x256xf32>
    %cst_243 = arith.constant dense<0.000000e+00> : vector<256xf32>
    %262 = vector.multi_reduction <add>, %252, %cst_243 [0] : vector<32x256xf32> to vector<256xf32>
    %263 = vector.shape_cast %262 : vector<256xf32> to vector<1x256xf32>
    %cst_244 = arith.constant dense<0.000000e+00> : vector<1x256xf32>
    %264 = tpu.matmul %263, %261, %cst_244 {dimension_numbers = #tpu.dot_dimension_numbers<[1], [0], [0], [1], [0, 0, 1, 1], [], []>} : vector<1x256xf32>, vector<256x256xf32>, vector<1x256xf32> -> vector<1x256xf32>
    %cst_245 = arith.constant 0.001953125 : f32
    %265 = vector.broadcast %cst_245 : f32 to vector<1x256xf32>
    %266 = arith.mulf %264, %265 : vector<1x256xf32>
    %267 = vector.broadcast %266 : vector<1x256xf32> to vector<32x256xf32>
    %268 = arith.subf %252, %267 : vector<32x256xf32>
    %269 = arith.mulf %268, %268 : vector<32x256xf32>
    %cst_246 = arith.constant dense<0.000000e+00> : vector<256xf32>
    %270 = vector.multi_reduction <add>, %269, %cst_246 [0] : vector<32x256xf32> to vector<256xf32>
    %271 = vector.shape_cast %270 : vector<256xf32> to vector<1x256xf32>
    %cst_247 = arith.constant dense<0.000000e+00> : vector<1x256xf32>
    %272 = tpu.matmul %271, %261, %cst_247 {dimension_numbers = #tpu.dot_dimension_numbers<[1], [0], [0], [1], [0, 0, 1, 1], [], []>} : vector<1x256xf32>, vector<256x256xf32>, vector<1x256xf32> -> vector<1x256xf32>
    %cst_248 = arith.constant 0.001953125 : f32
    %273 = vector.broadcast %cst_248 : f32 to vector<1x256xf32>
    %274 = arith.mulf %272, %273 : vector<1x256xf32>
    %c0_249 = arith.constant 0 : index
    %c0_250 = arith.constant 0 : index
    %275 = vector.load %arg10[%c0_249, %c0_250] : memref<1x256xf32, #tpu.memory_space<vmem>>, vector<1x256xf32>
    %cst_251 = arith.constant 9.99999974E-6 : f32
    %276 = vector.broadcast %cst_251 : f32 to vector<1x256xf32>
    %277 = arith.addf %274, %276 : vector<1x256xf32>
    %278 = math.rsqrt %277 : vector<1x256xf32>
    %279 = arith.mulf %275, %278 : vector<1x256xf32>
    %280 = vector.broadcast %279 : vector<1x256xf32> to vector<32x256xf32>
    %281 = arith.mulf %268, %280 : vector<32x256xf32>
    %c0_252 = arith.constant 0 : index
    %c0_253 = arith.constant 0 : index
    %282 = vector.load %arg11[%c0_252, %c0_253] : memref<1x256xf32, #tpu.memory_space<vmem>>, vector<1x256xf32>
    %283 = vector.broadcast %282 : vector<1x256xf32> to vector<32x256xf32>
    %284 = arith.addf %281, %283 : vector<32x256xf32>
    %cst_254 = arith.constant 0.000000e+00 : f32
    %285 = vector.broadcast %cst_254 : f32 to vector<32x256xf32>
    %286 = arith.maximumf %284, %285 : vector<32x256xf32>
    %c0_255 = arith.constant 0 : index
    %c0_256 = arith.constant 0 : index
    %287 = vector.load %arg18[%c0_255, %c0_256] : memref<32x256xf32, #tpu.memory_space<vmem>>, vector<32x256xf32>
    tpu.vector_store %arg18[%c0_255, %c0_256], %286 {strides = array<i32>} : memref<32x256xf32, #tpu.memory_space<vmem>>, vector<32x256xf32>,
    %c0_257 = arith.constant 0 : index
    %c0_258 = arith.constant 0 : index
    %288 = vector.load %arg18[%c0_257, %c0_258] : memref<32x256xf32, #tpu.memory_space<vmem>>, vector<1x256xf32>
    %c2_259 = arith.constant 2 : index
    %c0_260 = arith.constant 0 : index
    %289 = vector.load %arg19[%c2_259, %c0_260] : memref<70x256xf32, #tpu.memory_space<vmem>>, vector<1x256xf32>
    tpu.vector_store %arg19[%c2_259, %c0_260], %288 {strides = array<i32>} : memref<70x256xf32, #tpu.memory_space<vmem>>, vector<1x256xf32>,
    %c1_261 = arith.constant 1 : index
    %c0_262 = arith.constant 0 : index
    %290 = vector.load %arg18[%c1_261, %c0_262] : memref<32x256xf32, #tpu.memory_space<vmem>>, vector<1x256xf32>
    %c4_263 = arith.constant 4 : index
    %c0_264 = arith.constant 0 : index
    %291 = vector.load %arg19[%c4_263, %c0_264] : memref<70x256xf32, #tpu.memory_space<vmem>>, vector<1x256xf32>
    tpu.vector_store %arg19[%c4_263, %c0_264], %290 {strides = array<i32>} : memref<70x256xf32, #tpu.memory_space<vmem>>, vector<1x256xf32>,
    %c2_265 = arith.constant 2 : index
    %c0_266 = arith.constant 0 : index
    %292 = vector.load %arg18[%c2_265, %c0_266] : memref<32x256xf32, #tpu.memory_space<vmem>>, vector<1x256xf32>
    %c6_267 = arith.constant 6 : index
    %c0_268 = arith.constant 0 : index
    %293 = vector.load %arg19[%c6_267, %c0_268] : memref<70x256xf32, #tpu.memory_space<vmem>>, vector<1x256xf32>
    tpu.vector_store %arg19[%c6_267, %c0_268], %292 {strides = array<i32>} : memref<70x256xf32, #tpu.memory_space<vmem>>, vector<1x256xf32>,
    %c3_269 = arith.constant 3 : index
    %c0_270 = arith.constant 0 : index
    %294 = vector.load %arg18[%c3_269, %c0_270] : memref<32x256xf32, #tpu.memory_space<vmem>>, vector<1x256xf32>
    %c8_271 = arith.constant 8 : index
    %c0_272 = arith.constant 0 : index
    %295 = vector.load %arg19[%c8_271, %c0_272] : memref<70x256xf32, #tpu.memory_space<vmem>>, vector<1x256xf32>
    tpu.vector_store %arg19[%c8_271, %c0_272], %294 {strides = array<i32>} : memref<70x256xf32, #tpu.memory_space<vmem>>, vector<1x256xf32>,
    %c4_273 = arith.constant 4 : index
    %c0_274 = arith.constant 0 : index
    %296 = vector.load %arg18[%c4_273, %c0_274] : memref<32x256xf32, #tpu.memory_space<vmem>>, vector<1x256xf32>
    %c10_275 = arith.constant 10 : index
    %c0_276 = arith.constant 0 : index
    %297 = vector.load %arg19[%c10_275, %c0_276] : memref<70x256xf32, #tpu.memory_space<vmem>>, vector<1x256xf32>
    tpu.vector_store %arg19[%c10_275, %c0_276], %296 {strides = array<i32>} : memref<70x256xf32, #tpu.memory_space<vmem>>, vector<1x256xf32>,
    %c5_277 = arith.constant 5 : index
    %c0_278 = arith.constant 0 : index
    %298 = vector.load %arg18[%c5_277, %c0_278] : memref<32x256xf32, #tpu.memory_space<vmem>>, vector<1x256xf32>
    %c12_279 = arith.constant 12 : index
    %c0_280 = arith.constant 0 : index
    %299 = vector.load %arg19[%c12_279, %c0_280] : memref<70x256xf32, #tpu.memory_space<vmem>>, vector<1x256xf32>
    tpu.vector_store %arg19[%c12_279, %c0_280], %298 {strides = array<i32>} : memref<70x256xf32, #tpu.memory_space<vmem>>, vector<1x256xf32>,
    %c6_281 = arith.constant 6 : index
    %c0_282 = arith.constant 0 : index
    %300 = vector.load %arg18[%c6_281, %c0_282] : memref<32x256xf32, #tpu.memory_space<vmem>>, vector<1x256xf32>
    %c14_283 = arith.constant 14 : index
    %c0_284 = arith.constant 0 : index
    %301 = vector.load %arg19[%c14_283, %c0_284] : memref<70x256xf32, #tpu.memory_space<vmem>>, vector<1x256xf32>
    tpu.vector_store %arg19[%c14_283, %c0_284], %300 {strides = array<i32>} : memref<70x256xf32, #tpu.memory_space<vmem>>, vector<1x256xf32>,
    %c7_285 = arith.constant 7 : index
    %c0_286 = arith.constant 0 : index
    %302 = vector.load %arg18[%c7_285, %c0_286] : memref<32x256xf32, #tpu.memory_space<vmem>>, vector<1x256xf32>
    %c16_287 = arith.constant 16 : index
    %c0_288 = arith.constant 0 : index
    %303 = vector.load %arg19[%c16_287, %c0_288] : memref<70x256xf32, #tpu.memory_space<vmem>>, vector<1x256xf32>
    tpu.vector_store %arg19[%c16_287, %c0_288], %302 {strides = array<i32>} : memref<70x256xf32, #tpu.memory_space<vmem>>, vector<1x256xf32>,
    %c8_289 = arith.constant 8 : index
    %c0_290 = arith.constant 0 : index
    %304 = vector.load %arg18[%c8_289, %c0_290] : memref<32x256xf32, #tpu.memory_space<vmem>>, vector<1x256xf32>
    %c18 = arith.constant 18 : index
    %c0_291 = arith.constant 0 : index
    %305 = vector.load %arg19[%c18, %c0_291] : memref<70x256xf32, #tpu.memory_space<vmem>>, vector<1x256xf32>
    tpu.vector_store %arg19[%c18, %c0_291], %304 {strides = array<i32>} : memref<70x256xf32, #tpu.memory_space<vmem>>, vector<1x256xf32>,
    %c9_292 = arith.constant 9 : index
    %c0_293 = arith.constant 0 : index
    %306 = vector.load %arg18[%c9_292, %c0_293] : memref<32x256xf32, #tpu.memory_space<vmem>>, vector<1x256xf32>
    %c20_294 = arith.constant 20 : index
    %c0_295 = arith.constant 0 : index
    %307 = vector.load %arg19[%c20_294, %c0_295] : memref<70x256xf32, #tpu.memory_space<vmem>>, vector<1x256xf32>
    tpu.vector_store %arg19[%c20_294, %c0_295], %306 {strides = array<i32>} : memref<70x256xf32, #tpu.memory_space<vmem>>, vector<1x256xf32>,
    %c10_296 = arith.constant 10 : index
    %c0_297 = arith.constant 0 : index
    %308 = vector.load %arg18[%c10_296, %c0_297] : memref<32x256xf32, #tpu.memory_space<vmem>>, vector<1x256xf32>
    %c22_298 = arith.constant 22 : index
    %c0_299 = arith.constant 0 : index
    %309 = vector.load %arg19[%c22_298, %c0_299] : memref<70x256xf32, #tpu.memory_space<vmem>>, vector<1x256xf32>
    tpu.vector_store %arg19[%c22_298, %c0_299], %308 {strides = array<i32>} : memref<70x256xf32, #tpu.memory_space<vmem>>, vector<1x256xf32>,
    %c11_300 = arith.constant 11 : index
    %c0_301 = arith.constant 0 : index
    %310 = vector.load %arg18[%c11_300, %c0_301] : memref<32x256xf32, #tpu.memory_space<vmem>>, vector<1x256xf32>
    %c24 = arith.constant 24 : index
    %c0_302 = arith.constant 0 : index
    %311 = vector.load %arg19[%c24, %c0_302] : memref<70x256xf32, #tpu.memory_space<vmem>>, vector<1x256xf32>
    tpu.vector_store %arg19[%c24, %c0_302], %310 {strides = array<i32>} : memref<70x256xf32, #tpu.memory_space<vmem>>, vector<1x256xf32>,
    %c12_303 = arith.constant 12 : index
    %c0_304 = arith.constant 0 : index
    %312 = vector.load %arg18[%c12_303, %c0_304] : memref<32x256xf32, #tpu.memory_space<vmem>>, vector<1x256xf32>
    %c26 = arith.constant 26 : index
    %c0_305 = arith.constant 0 : index
    %313 = vector.load %arg19[%c26, %c0_305] : memref<70x256xf32, #tpu.memory_space<vmem>>, vector<1x256xf32>
    tpu.vector_store %arg19[%c26, %c0_305], %312 {strides = array<i32>} : memref<70x256xf32, #tpu.memory_space<vmem>>, vector<1x256xf32>,
    %c13_306 = arith.constant 13 : index
    %c0_307 = arith.constant 0 : index
    %314 = vector.load %arg18[%c13_306, %c0_307] : memref<32x256xf32, #tpu.memory_space<vmem>>, vector<1x256xf32>
    %c28 = arith.constant 28 : index
    %c0_308 = arith.constant 0 : index
    %315 = vector.load %arg19[%c28, %c0_308] : memref<70x256xf32, #tpu.memory_space<vmem>>, vector<1x256xf32>
    tpu.vector_store %arg19[%c28, %c0_308], %314 {strides = array<i32>} : memref<70x256xf32, #tpu.memory_space<vmem>>, vector<1x256xf32>,
    %c14_309 = arith.constant 14 : index
    %c0_310 = arith.constant 0 : index
    %316 = vector.load %arg18[%c14_309, %c0_310] : memref<32x256xf32, #tpu.memory_space<vmem>>, vector<1x256xf32>
    %c30 = arith.constant 30 : index
    %c0_311 = arith.constant 0 : index
    %317 = vector.load %arg19[%c30, %c0_311] : memref<70x256xf32, #tpu.memory_space<vmem>>, vector<1x256xf32>
    tpu.vector_store %arg19[%c30, %c0_311], %316 {strides = array<i32>} : memref<70x256xf32, #tpu.memory_space<vmem>>, vector<1x256xf32>,
    %c15_312 = arith.constant 15 : index
    %c0_313 = arith.constant 0 : index
    %318 = vector.load %arg18[%c15_312, %c0_313] : memref<32x256xf32, #tpu.memory_space<vmem>>, vector<1x256xf32>
    %c32 = arith.constant 32 : index
    %c0_314 = arith.constant 0 : index
    %319 = vector.load %arg19[%c32, %c0_314] : memref<70x256xf32, #tpu.memory_space<vmem>>, vector<1x256xf32>
    tpu.vector_store %arg19[%c32, %c0_314], %318 {strides = array<i32>} : memref<70x256xf32, #tpu.memory_space<vmem>>, vector<1x256xf32>,
    %c16_315 = arith.constant 16 : index
    %c0_316 = arith.constant 0 : index
    %320 = vector.load %arg18[%c16_315, %c0_316] : memref<32x256xf32, #tpu.memory_space<vmem>>, vector<1x256xf32>
    %c37 = arith.constant 37 : index
    %c0_317 = arith.constant 0 : index
    %321 = vector.load %arg19[%c37, %c0_317] : memref<70x256xf32, #tpu.memory_space<vmem>>, vector<1x256xf32>
    tpu.vector_store %arg19[%c37, %c0_317], %320 {strides = array<i32>} : memref<70x256xf32, #tpu.memory_space<vmem>>, vector<1x256xf32>,
    %c17_318 = arith.constant 17 : index
    %c0_319 = arith.constant 0 : index
    %322 = vector.load %arg18[%c17_318, %c0_319] : memref<32x256xf32, #tpu.memory_space<vmem>>, vector<1x256xf32>
    %c39 = arith.constant 39 : index
    %c0_320 = arith.constant 0 : index
    %323 = vector.load %arg19[%c39, %c0_320] : memref<70x256xf32, #tpu.memory_space<vmem>>, vector<1x256xf32>
    tpu.vector_store %arg19[%c39, %c0_320], %322 {strides = array<i32>} : memref<70x256xf32, #tpu.memory_space<vmem>>, vector<1x256xf32>,
    %c18_321 = arith.constant 18 : index
    %c0_322 = arith.constant 0 : index
    %324 = vector.load %arg18[%c18_321, %c0_322] : memref<32x256xf32, #tpu.memory_space<vmem>>, vector<1x256xf32>
    %c41 = arith.constant 41 : index
    %c0_323 = arith.constant 0 : index
    %325 = vector.load %arg19[%c41, %c0_323] : memref<70x256xf32, #tpu.memory_space<vmem>>, vector<1x256xf32>
    tpu.vector_store %arg19[%c41, %c0_323], %324 {strides = array<i32>} : memref<70x256xf32, #tpu.memory_space<vmem>>, vector<1x256xf32>,
    %c19_324 = arith.constant 19 : index
    %c0_325 = arith.constant 0 : index
    %326 = vector.load %arg18[%c19_324, %c0_325] : memref<32x256xf32, #tpu.memory_space<vmem>>, vector<1x256xf32>
    %c43 = arith.constant 43 : index
    %c0_326 = arith.constant 0 : index
    %327 = vector.load %arg19[%c43, %c0_326] : memref<70x256xf32, #tpu.memory_space<vmem>>, vector<1x256xf32>
    tpu.vector_store %arg19[%c43, %c0_326], %326 {strides = array<i32>} : memref<70x256xf32, #tpu.memory_space<vmem>>, vector<1x256xf32>,
    %c20_327 = arith.constant 20 : index
    %c0_328 = arith.constant 0 : index
    %328 = vector.load %arg18[%c20_327, %c0_328] : memref<32x256xf32, #tpu.memory_space<vmem>>, vector<1x256xf32>
    %c45 = arith.constant 45 : index
    %c0_329 = arith.constant 0 : index
    %329 = vector.load %arg19[%c45, %c0_329] : memref<70x256xf32, #tpu.memory_space<vmem>>, vector<1x256xf32>
    tpu.vector_store %arg19[%c45, %c0_329], %328 {strides = array<i32>} : memref<70x256xf32, #tpu.memory_space<vmem>>, vector<1x256xf32>,
    %c21_330 = arith.constant 21 : index
    %c0_331 = arith.constant 0 : index
    %330 = vector.load %arg18[%c21_330, %c0_331] : memref<32x256xf32, #tpu.memory_space<vmem>>, vector<1x256xf32>
    %c47 = arith.constant 47 : index
    %c0_332 = arith.constant 0 : index
    %331 = vector.load %arg19[%c47, %c0_332] : memref<70x256xf32, #tpu.memory_space<vmem>>, vector<1x256xf32>
    tpu.vector_store %arg19[%c47, %c0_332], %330 {strides = array<i32>} : memref<70x256xf32, #tpu.memory_space<vmem>>, vector<1x256xf32>,
    %c22_333 = arith.constant 22 : index
    %c0_334 = arith.constant 0 : index
    %332 = vector.load %arg18[%c22_333, %c0_334] : memref<32x256xf32, #tpu.memory_space<vmem>>, vector<1x256xf32>
    %c49 = arith.constant 49 : index
    %c0_335 = arith.constant 0 : index
    %333 = vector.load %arg19[%c49, %c0_335] : memref<70x256xf32, #tpu.memory_space<vmem>>, vector<1x256xf32>
    tpu.vector_store %arg19[%c49, %c0_335], %332 {strides = array<i32>} : memref<70x256xf32, #tpu.memory_space<vmem>>, vector<1x256xf32>,
    %c23_336 = arith.constant 23 : index
    %c0_337 = arith.constant 0 : index
    %334 = vector.load %arg18[%c23_336, %c0_337] : memref<32x256xf32, #tpu.memory_space<vmem>>, vector<1x256xf32>
    %c51 = arith.constant 51 : index
    %c0_338 = arith.constant 0 : index
    %335 = vector.load %arg19[%c51, %c0_338] : memref<70x256xf32, #tpu.memory_space<vmem>>, vector<1x256xf32>
    tpu.vector_store %arg19[%c51, %c0_338], %334 {strides = array<i32>} : memref<70x256xf32, #tpu.memory_space<vmem>>, vector<1x256xf32>,
    %c24_339 = arith.constant 24 : index
    %c0_340 = arith.constant 0 : index
    %336 = vector.load %arg18[%c24_339, %c0_340] : memref<32x256xf32, #tpu.memory_space<vmem>>, vector<1x256xf32>
    %c53 = arith.constant 53 : index
    %c0_341 = arith.constant 0 : index
    %337 = vector.load %arg19[%c53, %c0_341] : memref<70x256xf32, #tpu.memory_space<vmem>>, vector<1x256xf32>
    tpu.vector_store %arg19[%c53, %c0_341], %336 {strides = array<i32>} : memref<70x256xf32, #tpu.memory_space<vmem>>, vector<1x256xf32>,
    %c25_342 = arith.constant 25 : index
    %c0_343 = arith.constant 0 : index
    %338 = vector.load %arg18[%c25_342, %c0_343] : memref<32x256xf32, #tpu.memory_space<vmem>>, vector<1x256xf32>
    %c55 = arith.constant 55 : index
    %c0_344 = arith.constant 0 : index
    %339 = vector.load %arg19[%c55, %c0_344] : memref<70x256xf32, #tpu.memory_space<vmem>>, vector<1x256xf32>
    tpu.vector_store %arg19[%c55, %c0_344], %338 {strides = array<i32>} : memref<70x256xf32, #tpu.memory_space<vmem>>, vector<1x256xf32>,
    %c26_345 = arith.constant 26 : index
    %c0_346 = arith.constant 0 : index
    %340 = vector.load %arg18[%c26_345, %c0_346] : memref<32x256xf32, #tpu.memory_space<vmem>>, vector<1x256xf32>
    %c57 = arith.constant 57 : index
    %c0_347 = arith.constant 0 : index
    %341 = vector.load %arg19[%c57, %c0_347] : memref<70x256xf32, #tpu.memory_space<vmem>>, vector<1x256xf32>
    tpu.vector_store %arg19[%c57, %c0_347], %340 {strides = array<i32>} : memref<70x256xf32, #tpu.memory_space<vmem>>, vector<1x256xf32>,
    %c27_348 = arith.constant 27 : index
    %c0_349 = arith.constant 0 : index
    %342 = vector.load %arg18[%c27_348, %c0_349] : memref<32x256xf32, #tpu.memory_space<vmem>>, vector<1x256xf32>
    %c59 = arith.constant 59 : index
    %c0_350 = arith.constant 0 : index
    %343 = vector.load %arg19[%c59, %c0_350] : memref<70x256xf32, #tpu.memory_space<vmem>>, vector<1x256xf32>
    tpu.vector_store %arg19[%c59, %c0_350], %342 {strides = array<i32>} : memref<70x256xf32, #tpu.memory_space<vmem>>, vector<1x256xf32>,
    %c28_351 = arith.constant 28 : index
    %c0_352 = arith.constant 0 : index
    %344 = vector.load %arg18[%c28_351, %c0_352] : memref<32x256xf32, #tpu.memory_space<vmem>>, vector<1x256xf32>
    %c61 = arith.constant 61 : index
    %c0_353 = arith.constant 0 : index
    %345 = vector.load %arg19[%c61, %c0_353] : memref<70x256xf32, #tpu.memory_space<vmem>>, vector<1x256xf32>
    tpu.vector_store %arg19[%c61, %c0_353], %344 {strides = array<i32>} : memref<70x256xf32, #tpu.memory_space<vmem>>, vector<1x256xf32>,
    %c29_354 = arith.constant 29 : index
    %c0_355 = arith.constant 0 : index
    %346 = vector.load %arg18[%c29_354, %c0_355] : memref<32x256xf32, #tpu.memory_space<vmem>>, vector<1x256xf32>
    %c63 = arith.constant 63 : index
    %c0_356 = arith.constant 0 : index
    %347 = vector.load %arg19[%c63, %c0_356] : memref<70x256xf32, #tpu.memory_space<vmem>>, vector<1x256xf32>
    tpu.vector_store %arg19[%c63, %c0_356], %346 {strides = array<i32>} : memref<70x256xf32, #tpu.memory_space<vmem>>, vector<1x256xf32>,
    %c30_357 = arith.constant 30 : index
    %c0_358 = arith.constant 0 : index
    %348 = vector.load %arg18[%c30_357, %c0_358] : memref<32x256xf32, #tpu.memory_space<vmem>>, vector<1x256xf32>
    %c65 = arith.constant 65 : index
    %c0_359 = arith.constant 0 : index
    %349 = vector.load %arg19[%c65, %c0_359] : memref<70x256xf32, #tpu.memory_space<vmem>>, vector<1x256xf32>
    tpu.vector_store %arg19[%c65, %c0_359], %348 {strides = array<i32>} : memref<70x256xf32, #tpu.memory_space<vmem>>, vector<1x256xf32>,
    %c31_360 = arith.constant 31 : index
    %c0_361 = arith.constant 0 : index
    %350 = vector.load %arg18[%c31_360, %c0_361] : memref<32x256xf32, #tpu.memory_space<vmem>>, vector<1x256xf32>
    %c67 = arith.constant 67 : index
    %c0_362 = arith.constant 0 : index
    %351 = vector.load %arg19[%c67, %c0_362] : memref<70x256xf32, #tpu.memory_space<vmem>>, vector<1x256xf32>
    tpu.vector_store %arg19[%c67, %c0_362], %350 {strides = array<i32>} : memref<70x256xf32, #tpu.memory_space<vmem>>, vector<1x256xf32>,
    %c0_363 = arith.constant 0 : index
    %c0_364 = arith.constant 0 : index
    %c0_365 = arith.constant 0 : index
    %352 = vector.load %arg5[%c0_363, %c0_364, %c0_365] : memref<4x256x96xbf16, #tpu.memory_space<vmem>>, vector<1x256x96xbf16>
    %353 = vector.shape_cast %352 : vector<1x256x96xbf16> to vector<256x96xbf16>
    %c1_366 = arith.constant 1 : index
    %c0_367 = arith.constant 0 : index
    %c0_368 = arith.constant 0 : index
    %354 = vector.load %arg5[%c1_366, %c0_367, %c0_368] : memref<4x256x96xbf16, #tpu.memory_space<vmem>>, vector<1x256x96xbf16>
    %355 = vector.shape_cast %354 : vector<1x256x96xbf16> to vector<256x96xbf16>
    %c2_369 = arith.constant 2 : index
    %c0_370 = arith.constant 0 : index
    %c0_371 = arith.constant 0 : index
    %356 = vector.load %arg5[%c2_369, %c0_370, %c0_371] : memref<4x256x96xbf16, #tpu.memory_space<vmem>>, vector<1x256x96xbf16>
    %357 = vector.shape_cast %356 : vector<1x256x96xbf16> to vector<256x96xbf16>
    %c3_372 = arith.constant 3 : index
    %c0_373 = arith.constant 0 : index
    %c0_374 = arith.constant 0 : index
    %358 = vector.load %arg5[%c3_372, %c0_373, %c0_374] : memref<4x256x96xbf16, #tpu.memory_space<vmem>>, vector<1x256x96xbf16>
    %359 = vector.shape_cast %358 : vector<1x256x96xbf16> to vector<256x96xbf16>
    %c0_375 = arith.constant 0 : index
    %c0_376 = arith.constant 0 : index
    %360 = vector.load %arg19[%c0_375, %c0_376] : memref<70x256xf32, #tpu.memory_space<vmem>>, vector<32x256xf32>
    %361 = arith.truncf %360 : vector<32x256xf32> to vector<32x256xbf16>
    %cst_377 = arith.constant dense<0.000000e+00> : vector<32x96xf32>
    %362 = tpu.matmul %361, %353, %cst_377 {dimension_numbers = #tpu.dot_dimension_numbers<[1], [0], [0], [1], [0, 0, 1, 1], [], []>} : vector<32x256xbf16>, vector<256x96xbf16>, vector<32x96xf32> -> vector<32x96xf32>
    %c1_378 = arith.constant 1 : index
    %c0_379 = arith.constant 0 : index
    %363 = vector.load %arg19[%c1_378, %c0_379] : memref<70x256xf32, #tpu.memory_space<vmem>>, vector<32x256xf32>
    %364 = arith.truncf %363 : vector<32x256xf32> to vector<32x256xbf16>
    %cst_380 = arith.constant dense<0.000000e+00> : vector<32x96xf32>
    %365 = tpu.matmul %364, %355, %cst_380 {dimension_numbers = #tpu.dot_dimension_numbers<[1], [0], [0], [1], [0, 0, 1, 1], [], []>} : vector<32x256xbf16>, vector<256x96xbf16>, vector<32x96xf32> -> vector<32x96xf32>
    %366 = arith.addf %362, %365 : vector<32x96xf32>
    %c2_381 = arith.constant 2 : index
    %c0_382 = arith.constant 0 : index
    %367 = vector.load %arg19[%c2_381, %c0_382] : memref<70x256xf32, #tpu.memory_space<vmem>>, vector<32x256xf32>
    %368 = arith.truncf %367 : vector<32x256xf32> to vector<32x256xbf16>
    %cst_383 = arith.constant dense<0.000000e+00> : vector<32x96xf32>
    %369 = tpu.matmul %368, %357, %cst_383 {dimension_numbers = #tpu.dot_dimension_numbers<[1], [0], [0], [1], [0, 0, 1, 1], [], []>} : vector<32x256xbf16>, vector<256x96xbf16>, vector<32x96xf32> -> vector<32x96xf32>
    %370 = arith.addf %366, %369 : vector<32x96xf32>
    %c3_384 = arith.constant 3 : index
    %c0_385 = arith.constant 0 : index
    %371 = vector.load %arg19[%c3_384, %c0_385] : memref<70x256xf32, #tpu.memory_space<vmem>>, vector<32x256xf32>
    %372 = arith.truncf %371 : vector<32x256xf32> to vector<32x256xbf16>
    %cst_386 = arith.constant dense<0.000000e+00> : vector<32x96xf32>
    %373 = tpu.matmul %372, %359, %cst_386 {dimension_numbers = #tpu.dot_dimension_numbers<[1], [0], [0], [1], [0, 0, 1, 1], [], []>} : vector<32x256xbf16>, vector<256x96xbf16>, vector<32x96xf32> -> vector<32x96xf32>
    %374 = arith.addf %370, %373 : vector<32x96xf32>
    %375 = math.tanh %374 : vector<32x96xf32>
    %c0_387 = arith.constant 0 : index
    %c0_388 = arith.constant 0 : index
    %376 = vector.load %arg12[%c0_387, %c0_388] : memref<64x96xf32, #tpu.memory_space<vmem>>, vector<32x96xf32>
    tpu.vector_store %arg12[%c0_387, %c0_388], %375 {strides = array<i32>} : memref<64x96xf32, #tpu.memory_space<vmem>>, vector<32x96xf32>,
    %c35_389 = arith.constant 35 : index
    %c0_390 = arith.constant 0 : index
    %377 = vector.load %arg19[%c35_389, %c0_390] : memref<70x256xf32, #tpu.memory_space<vmem>>, vector<32x256xf32>
    %378 = arith.truncf %377 : vector<32x256xf32> to vector<32x256xbf16>
    %cst_391 = arith.constant dense<0.000000e+00> : vector<32x96xf32>
    %379 = tpu.matmul %378, %353, %cst_391 {dimension_numbers = #tpu.dot_dimension_numbers<[1], [0], [0], [1], [0, 0, 1, 1], [], []>} : vector<32x256xbf16>, vector<256x96xbf16>, vector<32x96xf32> -> vector<32x96xf32>
    %c36 = arith.constant 36 : index
    %c0_392 = arith.constant 0 : index
    %380 = vector.load %arg19[%c36, %c0_392] : memref<70x256xf32, #tpu.memory_space<vmem>>, vector<32x256xf32>
    %381 = arith.truncf %380 : vector<32x256xf32> to vector<32x256xbf16>
    %cst_393 = arith.constant dense<0.000000e+00> : vector<32x96xf32>
    %382 = tpu.matmul %381, %355, %cst_393 {dimension_numbers = #tpu.dot_dimension_numbers<[1], [0], [0], [1], [0, 0, 1, 1], [], []>} : vector<32x256xbf16>, vector<256x96xbf16>, vector<32x96xf32> -> vector<32x96xf32>
    %383 = arith.addf %379, %382 : vector<32x96xf32>
    %c37_394 = arith.constant 37 : index
    %c0_395 = arith.constant 0 : index
    %384 = vector.load %arg19[%c37_394, %c0_395] : memref<70x256xf32, #tpu.memory_space<vmem>>, vector<32x256xf32>
    %385 = arith.truncf %384 : vector<32x256xf32> to vector<32x256xbf16>
    %cst_396 = arith.constant dense<0.000000e+00> : vector<32x96xf32>
    %386 = tpu.matmul %385, %357, %cst_396 {dimension_numbers = #tpu.dot_dimension_numbers<[1], [0], [0], [1], [0, 0, 1, 1], [], []>} : vector<32x256xbf16>, vector<256x96xbf16>, vector<32x96xf32> -> vector<32x96xf32>
    %387 = arith.addf %383, %386 : vector<32x96xf32>
    %c38 = arith.constant 38 : index
    %c0_397 = arith.constant 0 : index
    %388 = vector.load %arg19[%c38, %c0_397] : memref<70x256xf32, #tpu.memory_space<vmem>>, vector<32x256xf32>
    %389 = arith.truncf %388 : vector<32x256xf32> to vector<32x256xbf16>
    %cst_398 = arith.constant dense<0.000000e+00> : vector<32x96xf32>
    %390 = tpu.matmul %389, %359, %cst_398 {dimension_numbers = #tpu.dot_dimension_numbers<[1], [0], [0], [1], [0, 0, 1, 1], [], []>} : vector<32x256xbf16>, vector<256x96xbf16>, vector<32x96xf32> -> vector<32x96xf32>
    %391 = arith.addf %387, %390 : vector<32x96xf32>
    %392 = math.tanh %391 : vector<32x96xf32>
    %c32_399 = arith.constant 32 : index
    %c0_400 = arith.constant 0 : index
    %393 = vector.load %arg12[%c32_399, %c0_400] : memref<64x96xf32, #tpu.memory_space<vmem>>, vector<32x96xf32>
    tpu.vector_store %arg12[%c32_399, %c0_400], %392 {strides = array<i32>} : memref<64x96xf32, #tpu.memory_space<vmem>>, vector<32x96xf32>,
    return
  }
  func.func @transform_0(%arg0: i32) -> (i32, i32) {
    %c0_i32 = arith.constant 0 : i32
    %c0_i32_0 = arith.constant 0 : i32
    %c0_i32_1 = arith.constant 0 : i32
    return %c0_i32, %c0_i32_0 : i32, i32
  }
  func.func @transform_1(%arg0: i32) -> (i32, i32, i32) {
    %c0_i32 = arith.constant 0 : i32
    %c0_i32_0 = arith.constant 0 : i32
    %c0_i32_1 = arith.constant 0 : i32
    %c0_i32_2 = arith.constant 0 : i32
    return %c0_i32, %c0_i32_0, %c0_i32_1 : i32, i32, i32
  }
  func.func @transform_2(%arg0: i32) -> (i32, i32, i32) {
    %c0_i32 = arith.constant 0 : i32
    %c0_i32_0 = arith.constant 0 : i32
    %c0_i32_1 = arith.constant 0 : i32
    %c0_i32_2 = arith.constant 0 : i32
    return %c0_i32, %c0_i32_0, %c0_i32_1 : i32, i32, i32
  }
  func.func @transform_3(%arg0: i32) -> (i32, i32, i32) {
    %c0_i32 = arith.constant 0 : i32
    %c0_i32_0 = arith.constant 0 : i32
    %c0_i32_1 = arith.constant 0 : i32
    %c0_i32_2 = arith.constant 0 : i32
    return %c0_i32, %c0_i32_0, %c0_i32_1 : i32, i32, i32
  }
  func.func @transform_4(%arg0: i32) -> (i32, i32, i32) {
    %c0_i32 = arith.constant 0 : i32
    %c0_i32_0 = arith.constant 0 : i32
    %c0_i32_1 = arith.constant 0 : i32
    %c0_i32_2 = arith.constant 0 : i32
    return %c0_i32, %c0_i32_0, %c0_i32_1 : i32, i32, i32
  }
  func.func @transform_5(%arg0: i32) -> (i32, i32) {
    %c0_i32 = arith.constant 0 : i32
    %c0_i32_0 = arith.constant 0 : i32
    %c0_i32_1 = arith.constant 0 : i32
    return %c0_i32, %c0_i32_0 : i32, i32
  }
  func.func @transform_6(%arg0: i32) -> (i32, i32) {
    %c0_i32 = arith.constant 0 : i32
    %c0_i32_0 = arith.constant 0 : i32
    %c0_i32_1 = arith.constant 0 : i32
    return %c0_i32, %c0_i32_0 : i32, i32
  }
  func.func @transform_7(%arg0: i32) -> (i32, i32) {
    %c0_i32 = arith.constant 0 : i32
    %c0_i32_0 = arith.constant 0 : i32
    %c0_i32_1 = arith.constant 0 : i32
    return %c0_i32, %c0_i32_0 : i32, i32
  }
  func.func @transform_8(%arg0: i32) -> (i32, i32) {
    %c0_i32 = arith.constant 0 : i32
    %c0_i32_0 = arith.constant 0 : i32
    %c0_i32_1 = arith.constant 0 : i32
    return %c0_i32, %c0_i32_0 : i32, i32
  }
  func.func @transform_9(%arg0: i32) -> (i32, i32) {
    %c0_i32 = arith.constant 0 : i32
    %c0_i32_0 = arith.constant 0 : i32
    %c0_i32_1 = arith.constant 0 : i32
    return %c0_i32, %c0_i32_0 : i32, i32
  }
  func.func @transform_10(%arg0: i32) -> (i32, i32) {
    %c0_i32 = arith.constant 0 : i32
    %c0_i32_0 = arith.constant 0 : i32
    %c0_i32_1 = arith.constant 0 : i32
    return %c0_i32, %c0_i32_0 : i32, i32
  }
  func.func @transform_11(%arg0: i32) -> (i32, i32) {
    %c0_i32 = arith.constant 0 : i32
    %c0_i32_0 = arith.constant 0 : i32
    %c0_i32_1 = arith.constant 0 : i32
    return %c0_i32, %c0_i32_0 : i32, i32
  }
}

</mosaic_0001>

<bundles_post_ra>
// kernel: generator_forward.1
= control target key start
LH: loop header
LB: loop body
LE: loop exit
PB: predicated region body
PF: predicated region fallthrough
CT: control target
= control target key end

     0   :  { %16 = vsyncpa [#allocation10], 0  ;;  %s13844_s0 = inlined_call_operand.vmem [shape: f32[2,64], index: 0, kind: input, shape index: {}]   ;;  %s13845_s1 = inlined_call_operand.vmem [shape: bf16[4,64,256], index: 1, kind: input, shape index: {}]   ;;  %s13846_s2 = inlined_call_operand.hbm [shape: bf16[4,256,256], index: 2, kind: input, shape index: {}]   ;;  %s13847_s3 = inlined_call_operand.hbm [shape: bf16[4,256,256], index: 3, kind: input, shape index: {}]   ;;  %s13848_s4 = inlined_call_operand.vmem [shape: bf16[4,256,96], index: 4, kind: input, shape index: {}]   ;;  %s13849_s5 = inlined_call_operand.vmem [shape: f32[1,256], index: 5, kind: input, shape index: {}]   ;;  %s13850_s6 = inlined_call_operand.vmem [shape: f32[1,256], index: 6, kind: input, shape index: {}]   ;;  %s13851_s7 = inlined_call_operand.vmem [shape: f32[1,256], index: 7, kind: input, shape index: {}]   ;;  %s13852_s8 = inlined_call_operand.vmem [shape: f32[1,256], index: 8, kind: input, shape index: {}]   ;;  %s13853_s9 = inlined_call_operand.vmem [shape: f32[1,256], index: 9, kind: input, shape index: {}]   ;;  %s13854_s10 = inlined_call_operand.vmem [shape: f32[1,256], index: 10, kind: input, shape index: {}]   ;;  %s13855_s11 = inlined_call_operand.vmem [shape: f32[64,96], index: 11, kind: output, shape index: {}]  }
   0x1   :  { %s26_s19 = sshll.u32 %s13846_s2, 4  ;;  %s27_s19 = int_to_ptr.hbm [resolvable:$true] %s26_s19 }
   0x2   :  { %17 = vsyncpa [#allocation12], 0  ;;  %s8933_s20 = smov [#allocation9]   ;;  %s39_s24 = sshll.u32 %s13847_s3, 4  ;;  %s40_s24 = int_to_ptr.hbm [resolvable:$true] %s39_s24 }
   0x3   :  { %s28_s21 = sshll.u32 %s8933_s20, 4  ;;  %s8934_s25 = smov 128   ;;  %s29_s21 = int_to_ptr.vmem [resolvable:$true] %s28_s21 }
   0x4   :  { %s8935_s26 = smov 8   ;;  %s8936_s27 = smov [#allocation11]  }
   0x5   :  { %34 = dma.hbm_to_vmem [thread:$0]  %s27_s19, 16384, %s29_s21, [#allocation10], %s8934_s25, %s8934_s25, %s8935_s26  }
   0x6   :  { %s41_s28 = sshll.u32 %s8936_s27, 4  ;;  %s42_s28 = int_to_ptr.vmem [resolvable:$true] %s41_s28 }
   0x7   :  { %47 = dma.hbm_to_vmem [thread:$0]  %s40_s24, 16384, %s42_s28, [#allocation12], %s8934_s25, %s8934_s25, %s8935_s26  }
   0x8   :  { %8929 = dma.done.wait [#allocation10], 16384  }
   0x9   :  { %8930 = vsyncadd [#allocation10], 4294950912 }
   0xa   :  { %8931 = dma.done.wait [#allocation12], 16384  }
   0xb   :  { %8932 = vsyncadd [#allocation12], 4294950912  ;;  %vm71_vm0 = vcmask 523264   ;;  %v8937_v0 = vmov 0.0   ;;  %v6425_v1 = vld [vmem:[%s13845_s1 + $0x70] sm:$0xf] }
   0xc   :  { %72 = vst.msk [vmem:[#allocation2] sm:$0xff] %vm71_vm0, %v8937_v0  ;;  %v8510_v2 = vld [vmem:[%s13845_s1 + $0x74] sm:$0xf0]  ;;  %v8509_v3 = vld [vmem:[%s13845_s1 + $0x74] sm:$0xf]  ;;  %vm110_vm1 = vcmask 516096  }
   0xd   :  { %75 = vst [vmem:[#allocation4] sm:$0xff] %v8937_v0  ;;  %v9021_v4 = vor.u32 %v8510_v2, %v6425_v1  ;;  %v6427_v5 = vld [vmem:[%s13845_s1 + $0x78] sm:$0xf0]  ;;  %v6459_v6 = vld [vmem:[%s13845_s1 + $0x30] sm:$0xf]  ;;  %vm73_vm2 = vcmask 521216  }
   0xe   :  { %76 = vst [vmem:[#allocation4 + $0x8] sm:$0xff] %v8937_v0  ;;  %v8502_v7 = vld [vmem:[%s13845_s1 + $0x34] sm:$0xf0]  ;;  %v9032_v8 = vor.u32 %v8509_v3, %v6427_v5  ;;  %v8501_v10 = vld [vmem:[%s13845_s1 + $0x34] sm:$0xf] }
   0xf   :  { %77 = vst [vmem:[#allocation4 + $0x10] sm:$0xff] %v8937_v0  ;;  %v9034_v9 = vor.u32 %v8502_v7, %v6459_v6  ;;  %v6461_v11 = vld [vmem:[%s13845_s1 + $0x38] sm:$0xf0]  ;;  %v6417_v12 = vld [vmem:[%s13845_s1 + $0x60] sm:$0xf]  ;;  %200 = vmatpush.bf16.msra.mxu0 %v9021_v4 }
  0x10   :  { %78 = vst [vmem:[#allocation4 + $0x18] sm:$0xff] %v8937_v0  ;;  %v9046_v13 = vor.u32 %v8501_v10, %v6461_v11  ;;  %v8508_v14 = vld [vmem:[%s13845_s1 + $0x64] sm:$0xf0]  ;;  %v8507_v15 = vld [vmem:[%s13845_s1 + $0x64] sm:$0xf]  ;;  %213 = vmatpush.bf16.msra.mxu1 %v9032_v8 }
  0x11   :  { %79 = vst [vmem:[#allocation4 + $0x20] sm:$0x3f] %v8937_v0  ;;  %v6419_v16 = vld [vmem:[%s13845_s1 + $0x68] sm:$0xf0]  ;;  %269 = vmatpush.bf16.msra.mxu2 %v9034_v9  ;;  %v9059_v17 = vor.u32 %v8508_v14, %v6417_v12  ;;  %v6451_v19 = vld [vmem:[%s13845_s1 + $0x20] sm:$0xf] }
  0x12   :  { %v9061_v18 = vor.u32 %v8507_v15, %v6419_v16  ;;  %v8500_v20 = vld [vmem:[%s13845_s1 + $0x24] sm:$0xf0]  ;;  %v8499_v21 = vld [vmem:[%s13845_s1 + $0x24] sm:$0xf]  ;;  %282 = vmatpush.bf16.msra.mxu3 %v9046_v13  ;;  %v6453_v23 = vld [vmem:[%s13845_s1 + $0x28] sm:$0xf0] }
  0x13   :  { %v9073_v22 = vor.u32 %v8500_v20, %v6451_v19  ;;  %v6409_v24 = vld [vmem:[%s13845_s1 + $0x50] sm:$0xf]  ;;  %v8506_v25 = vld [vmem:[%s13845_s1 + $0x54] sm:$0xf0]  ;;  %v9084_v26 = vor.u32 %v8499_v21, %v6453_v23  ;;  %v8505_v27 = vld [vmem:[%s13845_s1 + $0x54] sm:$0xf]  ;;  %201 = vmatpush.bf16.msra.mxu0 %v9059_v17 }
  0x14   :  { %v6411_v28 = vld [vmem:[%s13845_s1 + $0x58] sm:$0xf0]  ;;  %v6443_v29 = vld [vmem:[%s13845_s1 + $0x10] sm:$0xf]  ;;  %v9096_v30 = vor.u32 %v8506_v25, %v6409_v24  ;;  %v8498_v31 = vld [vmem:[%s13845_s1 + $0x14] sm:$0xf0]  ;;  %214 = vmatpush.bf16.msra.mxu1 %v9061_v18 }
  0x15   :  { %v8497_v32 = vld [vmem:[%s13845_s1 + $0x14] sm:$0xf]  ;;  %v6445_v33 = vld [vmem:[%s13845_s1 + $0x18] sm:$0xf0]  ;;  %270 = vmatpush.bf16.msra.mxu2 %v9073_v22  ;;  %v9109_v34 = vor.u32 %v8505_v27, %v6411_v28  ;;  %v9111_v35 = vor.u32 %v8498_v31, %v6443_v29  ;;  %v6401_v36 = vld [vmem:[%s13845_s1 + $0x40] sm:$0xf] }
  0x16   :  { %v8504_v37 = vld [vmem:[%s13845_s1 + $0x44] sm:$0xf0]  ;;  %v8503_v38 = vld [vmem:[%s13845_s1 + $0x44] sm:$0xf]  ;;  %283 = vmatpush.bf16.msra.mxu3 %v9084_v26  ;;  %v9123_v39 = vor.u32 %v8497_v32, %v6445_v33  ;;  %v6403_v40 = vld [vmem:[%s13845_s1 + $0x48] sm:$0xf0] }
  0x17   :  { %v6435_v41 = vld [vmem:[%s13845_s1] sm:$0xf]  ;;  %v8496_v42 = vld [vmem:[%s13845_s1 + $0x4] sm:$0xf0]  ;;  %v8495_v43 = vld [vmem:[%s13845_s1 + $0x4] sm:$0xf]  ;;  %202 = vmatpush.bf16.msra.mxu0 %v9096_v30  ;;  %v9144_v46 = vor.u32 %v8504_v37, %v6401_v36  ;;  %v9155_v49 = vor.u32 %v8503_v38, %v6403_v40 }
  0x18   :  { %v6437_v44 = vld [vmem:[%s13845_s1 + $0x8] sm:$0xf0]  ;;  %v109_v45 = vld [vmem:[%s13844_s0] sm:$0x1]  ;;  %v6493_v47 = vld [vmem:[%s13845_s1 + $0xb0] sm:$0xf]  ;;  %215 = vmatpush.bf16.msra.mxu1 %v9109_v34  ;;  %v9157_v50 = vor.u32 %v8496_v42, %v6435_v41 }
  0x19   :  { %111 = vst.msk [vmem:[#allocation2 + $0x3] sm:$0x1] %vm110_vm1, %v109_v45  ;;  %v8518_v48 = vld [vmem:[%s13845_s1 + $0xb4] sm:$0xf0]  ;;  %271 = vmatpush.bf16.msra.mxu2 %v9111_v35  ;;  %v8517_v51 = vld [vmem:[%s13845_s1 + $0xb4] sm:$0xf]  ;;  %v9167_v53 = vor.u32 %v8495_v43, %v6437_v44 }
  0x1a   :  { %80 = vst [vmem:[#allocation4 + $0x28] sm:$0x3f] %v8937_v0  ;;  %v6495_v52 = vld [vmem:[%s13845_s1 + $0xb8] sm:$0xf0]  ;;  %284 = vmatpush.bf16.msra.mxu3 %v9123_v39  ;;  %v9170_v54 = vor.u32 %v8518_v48, %v6493_v47  ;;  %v6527_v55 = vld [vmem:[%s13845_s1 + $0xf0] sm:$0xf] }
  0x1b   :  { %81 = vst [vmem:[#allocation6] sm:$0xff] %v8937_v0  ;;  %v8526_v56 = vld [vmem:[%s13845_s1 + $0xf4] sm:$0xf0]  ;;  %v9179_v57 = vor.u32 %v8517_v51, %v6495_v52  ;;  %v8525_v59 = vld [vmem:[%s13845_s1 + $0xf4] sm:$0xf]  ;;  %203 = vmatpush.bf16.msra.mxu0 %v9144_v46 }
  0x1c   :  { %82 = vst [vmem:[#allocation6 + $0x8] sm:$0xff] %v8937_v0  ;;  %v9181_v58 = vor.u32 %v8526_v56, %v6527_v55  ;;  %v6529_v60 = vld [vmem:[%s13845_s1 + $0xf8] sm:$0xf0]  ;;  %v6485_v62 = vld [vmem:[%s13845_s1 + $0xa0] sm:$0xf]  ;;  %216 = vmatpush.bf16.msra.mxu1 %v9155_v49 }
  0x1d   :  { %83 = vst [vmem:[#allocation6 + $0x10] sm:$0xff] %v8937_v0  ;;  %v9191_v61 = vor.u32 %v8525_v59, %v6529_v60  ;;  %v8516_v63 = vld [vmem:[%s13845_s1 + $0xa4] sm:$0xf0]  ;;  %272 = vmatpush.bf16.msra.mxu2 %v9157_v50  ;;  %v8515_v1 = vld [vmem:[%s13845_s1 + $0xa4] sm:$0xf] }
  0x1e   :  { %84 = vst [vmem:[#allocation6 + $0x18] sm:$0xff] %v8937_v0  ;;  %v6487_v2 = vld [vmem:[%s13845_s1 + $0xa8] sm:$0xf0]  ;;  %285 = vmatpush.bf16.msra.mxu3 %v9167_v53  ;;  %v6519_v3 = vld [vmem:[%s13845_s1 + $0xe0] sm:$0xf]  ;;  %v9220_v10 = vor.u32 %v8516_v63, %v6485_v62 }
  0x1f   :  { %85 = vst [vmem:[#allocation6 + $0x20] sm:$0xff] %v8937_v0  ;;  %340 = vmatpush.bf16.msrb.mxu0 %v9170_v54  ;;  %v8524_v5 = vld [vmem:[%s13845_s1 + $0xe4] sm:$0xf0]  ;;  %v9224_v14 = vor.u32 %v8515_v1, %v6487_v2  ;;  %v8523_v15 = vld [vmem:[%s13845_s1 + $0xe4] sm:$0xf] }
  0x20   :  { %v151_v6 = vld [vmem:[#allocation2 + $0x1] sm:$0xf]  ;;  %86 = vst [vmem:[#allocation6 + $0x28] sm:$0xff] %v8937_v0  ;;  %353 = vmatpush.bf16.msrb.mxu1 %v9179_v57  ;;  %v6521_v16 = vld [vmem:[%s13845_s1 + $0xe8] sm:$0xf0]  ;;  %v9233_v19 = vor.u32 %v8524_v5, %v6519_v3 }
  0x21   :  { %v149_v7 = vld [vmem:[#allocation2] sm:$0xf]  ;;  %413 = vmatpush.bf16.msrb.mxu2 %v9181_v58  ;;  %v152_v11 = vpack.c.bf16 %v151_v6, %v151_v6  ;;  %87 = vst [vmem:[#allocation6 + $0x30] sm:$0xff] %v8937_v0  ;;  %v9235_v20 = vor.u32 %v8523_v15, %v6521_v16  ;;  %v6477_v21 = vld [vmem:[%s13845_s1 + $0x90] sm:$0xf] }
  0x22   :  { %v150_v12 = vpack.c.bf16 %v149_v7, %v149_v7  ;;  %426 = vmatpush.bf16.msrb.mxu3 %v9191_v61  ;;  %88 = vst [vmem:[#allocation6 + $0x38] sm:$0xff] %v8937_v0  ;;  %v8514_v23 = vld [vmem:[%s13845_s1 + $0x94] sm:$0xf0]  ;;  %v8513_v24 = vld [vmem:[%s13845_s1 + $0x94] sm:$0xf] }
  0x23   :  { %6431 = vmatmul.msk.bf16.vlgmr.msra.gmra.mxu0 %vm71_vm0, %v152_v11  ;;  %89 = vst [vmem:[#allocation6 + $0x40] sm:$0x3f] %v8937_v0  ;;  %6432 = vmatmul.msk.bf16.vlgmr.msra.gmra.mxu1 %vm71_vm0, %v152_v11  ;;  %v6479_v25 = vld [vmem:[%s13845_s1 + $0x98] sm:$0xf0]  ;;  %v6511_v27 = vld [vmem:[%s13845_s1 + $0xd0] sm:$0xf]  ;;  %v9264_v29 = vor.u32 %v8514_v23, %v6477_v21 }
  0x24   :  { %90 = vst [vmem:[#allocation6 + $0x48] sm:$0x3f] %v8937_v0  ;;  %6465 = vmatmul.msk.bf16.vlgmr.msra.gmra.mxu2 %vm71_vm0, %v150_v12  ;;  %6466 = vmatmul.msk.bf16.vlgmr.msra.gmra.mxu3 %vm71_vm0, %v150_v12  ;;  %v8522_v28 = vld [vmem:[%s13845_s1 + $0xd4] sm:$0xf0]  ;;  %v9266_v31 = vor.u32 %v8513_v24, %v6479_v25  ;;  %v8521_v32 = vld [vmem:[%s13845_s1 + $0xd4] sm:$0xf] }
  0x25   :  { %91 = vst [vmem:[#allocation8] sm:$0xff] %v8937_v0  ;;  %341 = vmatpush.bf16.msrb.mxu0 %v9220_v10  ;;  %354 = vmatpush.bf16.msrb.mxu1 %v9224_v14  ;;  %v6513_v33 = vld [vmem:[%s13845_s1 + $0xd8] sm:$0xf0]  ;;  %v9277_v36 = vor.u32 %v8522_v28, %v6511_v27  ;;  %v6469_v38 = vld [vmem:[%s13845_s1 + $0x80] sm:$0xf] }
  0x26   :  { %92 = vst [vmem:[#allocation8 + $0x8] sm:$0xff] %v8937_v0  ;;  %414 = vmatpush.bf16.msrb.mxu2 %v9233_v19  ;;  %427 = vmatpush.bf16.msrb.mxu3 %v9235_v20  ;;  %v9279_v37 = vor.u32 %v8521_v32, %v6513_v33  ;;  %v8512_v40 = vld [vmem:[%s13845_s1 + $0x84] sm:$0xf0]  ;;  %v8511_v41 = vld [vmem:[%s13845_s1 + $0x84] sm:$0xf] }
  0x27   :  { %93 = vst [vmem:[#allocation8 + $0x10] sm:$0xff] %v8937_v0  ;;  %v6471_v42 = vld [vmem:[%s13845_s1 + $0x88] sm:$0xf0]  ;;  %v6503_v43 = vld [vmem:[%s13845_s1 + $0xc0] sm:$0xf]  ;;  %v9304_v45 = vor.u32 %v8512_v40, %v6469_v38 }
  0x28   :  { %94 = vst [vmem:[#allocation8 + $0x18] sm:$0xff] %v8937_v0  ;;  %v8520_v44 = vld [vmem:[%s13845_s1 + $0xc4] sm:$0xf0]  ;;  %v9306_v47 = vor.u32 %v8511_v41, %v6471_v42  ;;  %v8519_v48 = vld [vmem:[%s13845_s1 + $0xc4] sm:$0xf] }
  0x29   :  { %95 = vst [vmem:[#allocation8 + $0x20] sm:$0xff] %v8937_v0  ;;  %342 = vmatpush.bf16.msrb.mxu0 %v9264_v29  ;;  %355 = vmatpush.bf16.msrb.mxu1 %v9266_v31  ;;  %v6505_v51 = vld [vmem:[%s13845_s1 + $0xc8] sm:$0xf0]  ;;  %v9317_v52 = vor.u32 %v8520_v44, %v6503_v43  ;;  %v291_v56 = vld [vmem:[#allocation2 + $0x2] sm:$0xf] }
  0x2a   :  { %96 = vst [vmem:[#allocation8 + $0x28] sm:$0xff] %v8937_v0  ;;  %415 = vmatpush.bf16.msrb.mxu2 %v9277_v36  ;;  %428 = vmatpush.bf16.msrb.mxu3 %v9279_v37  ;;  %v9319_v55 = vor.u32 %v8519_v48, %v6505_v51  ;;  %v364_v59 = vld [vmem:[#allocation2 + $0x3] sm:$0xf]  ;;  %v292_v60 = vpack.c.bf16 %v291_v56, %v291_v56 }
  0x2b   :  { %97 = vst [vmem:[#allocation8 + $0x30] sm:$0xff] %v8937_v0  ;;  %v365_v62 = vpack.c.bf16 %v364_v59, %v364_v59 }
  0x2c   :  { %98 = vst [vmem:[#allocation8 + $0x38] sm:$0xff] %v8937_v0 }
  0x2d   :  { %99 = vst [vmem:[#allocation8 + $0x40] sm:$0xff] %v8937_v0  ;;  %343 = vmatpush.bf16.msrb.mxu0 %v9304_v45  ;;  %356 = vmatpush.bf16.msrb.mxu1 %v9306_v47 }
  0x2e   :  { %100 = vst [vmem:[#allocation8 + $0x48] sm:$0xff] %v8937_v0  ;;  %416 = vmatpush.bf16.msrb.mxu2 %v9317_v52  ;;  %429 = vmatpush.bf16.msrb.mxu3 %v9319_v55 }
  0x2f   :  { %101 = vst [vmem:[#allocation8 + $0x50] sm:$0xff] %v8937_v0 }
  0x30   :  { %102 = vst [vmem:[#allocation8 + $0x58] sm:$0xff] %v8937_v0 }
  0x31   :  { %450 = vmatpush.bf16.msra.mxu0 %v9021_v4  ;;  %463 = vmatpush.bf16.msra.mxu1 %v9032_v8  ;;  %103 = vst [vmem:[#allocation8 + $0x60] sm:$0xff] %v8937_v0  ;;  %v112_v4 = vld [vmem:[%s13844_s0 + $0x1] sm:$0x1] }
  0x32   :  { %479 = vmatpush.bf16.msra.mxu2 %v9034_v9  ;;  %492 = vmatpush.bf16.msra.mxu3 %v9046_v13  ;;  %104 = vst [vmem:[#allocation8 + $0x68] sm:$0xff] %v8937_v0 }
  0x33   :  { %105 = vst [vmem:[#allocation8 + $0x70] sm:$0xff] %v8937_v0  ;;  %6499 = vmatmul.msk.bf16.vlgmr.msrb.gmra.mxu0 %vm71_vm0, %v292_v60  ;;  %6500 = vmatmul.msk.bf16.vlgmr.msrb.gmra.mxu1 %vm71_vm0, %v292_v60 }
  0x34   :  { %106 = vst [vmem:[#allocation8 + $0x78] sm:$0xff] %v8937_v0  ;;  %6533 = vmatmul.msk.bf16.vlgmr.msrb.gmra.mxu2 %vm71_vm0, %v365_v62  ;;  %6534 = vmatmul.msk.bf16.vlgmr.msrb.gmra.mxu3 %vm71_vm0, %v365_v62 }
  0x35   :  { %107 = vst [vmem:[#allocation8 + $0x80] sm:$0x3f] %v8937_v0  ;;  %451 = vmatpush.bf16.msra.mxu0 %v9059_v17  ;;  %464 = vmatpush.bf16.msra.mxu1 %v9061_v18 }
  0x36   :  { %108 = vst [vmem:[#allocation8 + $0x88] sm:$0x3f] %v8937_v0  ;;  %480 = vmatpush.bf16.msra.mxu2 %v9073_v22  ;;  %493 = vmatpush.bf16.msra.mxu3 %v9084_v26 }
  0x37   :  { %74 = vst.msk [vmem:[#allocation2 + $0x8] sm:$0x3f] %vm73_vm2, %v8937_v0 }
  0x38   :  { %113 = vst.msk [vmem:[#allocation2 + $0xa] sm:$0x1] %vm110_vm1, %v112_v4 }
  0x39   :  { %452 = vmatpush.bf16.msra.mxu0 %v9096_v30  ;;  %465 = vmatpush.bf16.msra.mxu1 %v9109_v34 }
  0x3a   :  { %481 = vmatpush.bf16.msra.mxu2 %v9111_v35  ;;  %494 = vmatpush.bf16.msra.mxu3 %v9123_v39 }
  0x3d   :  { %453 = vmatpush.bf16.msra.mxu0 %v9144_v46  ;;  %466 = vmatpush.bf16.msra.mxu1 %v9155_v49 }
  0x3e   :  { %482 = vmatpush.bf16.msra.mxu2 %v9157_v50  ;;  %495 = vmatpush.bf16.msra.mxu3 %v9167_v53  ;;  %v13872_v50 = vlaneseq }
  0x3f   :  { %v441_v8 = vld [vmem:[#allocation2 + $0x8] sm:$0xf] }
  0x40   :  { %v439_v0 = vld [vmem:[#allocation2 + $0x7] sm:$0xf]  ;;  %v442_v9 = vpack.c.bf16 %v441_v8, %v441_v8  ;;  %v9387_v53 = vshrl.u32 %v13872_v50, 7  ;;  %v14370_v8 = vmov 0 }
  0x41   :  { %510 = vmatpush.bf16.msrb.mxu0 %v9170_v54  ;;  %523 = vmatpush.bf16.msrb.mxu1 %v9179_v57  ;;  %v440_v13 = vpack.c.bf16 %v439_v0, %v439_v0  ;;  %v501_v17 = vld [vmem:[#allocation2 + $0x9] sm:$0xf]  ;;  %v9390_v54 = vand.u32 127, %v13872_v50  ;;  %v14372_v0 = vmov 0  ;;  %v14422_v50 = vmov 0 }
  0x42   :  { %543 = vmatpush.bf16.msrb.mxu2 %v9181_v58  ;;  %556 = vmatpush.bf16.msrb.mxu3 %v9191_v61  ;;  %v534_v18 = vld [vmem:[#allocation2 + $0xa] sm:$0xf]  ;;  %v502_v22 = vpack.c.bf16 %v501_v17, %v501_v17  ;;  %14337 = vst [vmem:[#allocation15_spill] sm:$0xff] %v9387_v53  ;;  %v9393_v57 = vadd.s32 120, %v9387_v53  ;;  %v9396_v58 = vadd.s32 248, %v9387_v53  ;;  %v9410_v11 = vadd.s32 112, %v9387_v53 }
  0x43   :  { %6535 = vmatmul.msk.bf16.vlgmr.msra.gmra.mxu0 %vm71_vm0, %v442_v9  ;;  %6536 = vmatmul.msk.bf16.vlgmr.msra.gmra.mxu1 %vm71_vm0, %v442_v9  ;;  %v535_v26 = vpack.c.bf16 %v534_v18, %v534_v18  ;;  %14338 = vst [vmem:[#allocation16_spill] sm:$0xff] %v9390_v54  ;;  %v9399_v61 = vadd.s32 128, %v9390_v54  ;;  %v9403_v3 = vand.u32 63, %v9390_v54  ;;  %v9413_v12 = vadd.s32 240, %v9387_v53 }
  0x44   :  { %6537 = vmatmul.msk.bf16.vlgmr.msra.gmra.mxu2 %vm71_vm0, %v440_v13  ;;  %6538 = vmatmul.msk.bf16.vlgmr.msra.gmra.mxu3 %vm71_vm0, %v440_v13  ;;  %14339 = vst [vmem:[#allocation17_spill] sm:$0xff] %v9393_v57  ;;  %v628_v2 = vand.u32 63, %v9393_v57  ;;  %v644_v5 = vand.u32 63, %v9396_v58  ;;  %v627_v24 = vand.u32 63, %v9410_v11  ;;  %v9447_v27 = vadd.s32 104, %v9387_v53 }
  0x45   :  { %511 = vmatpush.bf16.msrb.mxu0 %v9220_v10  ;;  %524 = vmatpush.bf16.msrb.mxu1 %v9224_v14  ;;  %14340 = vst [vmem:[#allocation18_spill] sm:$0xff] %v9396_v58  ;;  %v9407_v6 = vand.u32 63, %v9399_v61  ;;  %v643_v25 = vand.u32 63, %v9413_v12  ;;  %v9450_v28 = vadd.s32 232, %v9387_v53  ;;  %v9456_v32 = vadd.s32 96, %v9387_v53 }
  0x46   :  { %544 = vmatpush.bf16.msrb.mxu2 %v9233_v19  ;;  %557 = vmatpush.bf16.msrb.mxu3 %v9235_v20  ;;  %14341 = vst [vmem:[#allocation19_spill] sm:$0xff] %v9399_v61  ;;  %vm9416_vm3 = vcmp.eq.s32.totalorder %v628_v2, %v9403_v3  ;;  %v13985_v19 = vmov 1.0   ;;  %vm9424_vm4 = vcmp.eq.s32.totalorder %v644_v5, %v9403_v3  ;;  %v9459_v33 = vadd.s32 224, %v9387_v53 }
  0x47   :  { %14342 = vst [vmem:[#allocation20_spill] sm:$0xff] %v9410_v11  ;;  %vm9429_vm5 = vcmp.eq.s32.totalorder %v628_v2, %v9407_v6  ;;  %vm9434_vm6 = vcmp.eq.s32.totalorder %v644_v5, %v9407_v6  ;;  %vm9462_vm7 = vcmp.eq.s32.totalorder %v627_v24, %v9403_v3  ;;  %vm9467_vm8 = vcmp.eq.s32.totalorder %v643_v25, %v9403_v3 }
  0x48   :  { %14343 = vst [vmem:[#allocation21_spill] sm:$0xff] %v9413_v12  ;;  %vm9472_vm9 = vcmp.eq.s32.totalorder %v627_v24, %v9407_v6  ;;  %vm9477_vm10 = vcmp.eq.s32.totalorder %v643_v25, %v9407_v6  ;;  %v626_v41 = vand.u32 63, %v9447_v27  ;;  %v642_v42 = vand.u32 63, %v9450_v28 }
  0x49   :  { %512 = vmatpush.bf16.msrb.mxu0 %v9264_v29  ;;  %525 = vmatpush.bf16.msrb.mxu1 %v9266_v31  ;;  %14352 = vst [vmem:[#allocation22_spill] sm:$0xff] %v9447_v27  ;;  %v625_v43 = vand.u32 63, %v9456_v32  ;;  %v641_v44 = vand.u32 63, %v9459_v33  ;;  %v9498_v48 = vadd.s32 88, %v9387_v53  ;;  %v9501_v51 = vadd.s32 216, %v9387_v53 }
  0x4a   :  { %545 = vmatpush.bf16.msrb.mxu2 %v9277_v36  ;;  %558 = vmatpush.bf16.msrb.mxu3 %v9279_v37  ;;  %14353 = vst [vmem:[#allocation23_spill] sm:$0xff] %v9450_v28  ;;  %vm9510_vm11 = vcmp.eq.s32.totalorder %v626_v41, %v9403_v3  ;;  %vm9515_vm12 = vcmp.eq.s32.totalorder %v642_v42, %v9403_v3  ;;  %v14374_v9 = vmov 0  ;;  %v14376_v13 = vmov 0 }
  0x4b   :  { %14354 = vst [vmem:[#allocation24_spill] sm:$0xff] %v9456_v32  ;;  %v14371_v8 = vsel %vm9515_vm12, 4294967295, %v14370_v8  ;;  %vm9526_vm13 = vcmp.eq.s32.totalorder %v626_v41, %v9407_v6  ;;  %vm9531_vm14 = vcmp.eq.s32.totalorder %v642_v42, %v9407_v6  ;;  %vm9536_vm15 = vcmp.eq.s32.totalorder %v625_v43, %v9403_v3 }
  0x4c   :  { %14355 = vst [vmem:[#allocation25_spill] sm:$0xff] %v9459_v33  ;;  %v14373_v0 = vsel %vm9526_vm13, 4294967295, %v14372_v0  ;;  %v14375_v9 = vsel %vm9531_vm14, 4294967295, %v14374_v9  ;;  %v14377_v13 = vsel %vm9536_vm15, 4294967295, %v14376_v13  ;;  %v624_v17 = vand.u32 63, %v9498_v48 }
  0x4d   :  { %513 = vmatpush.bf16.msrb.mxu0 %v9304_v45  ;;  %526 = vmatpush.bf16.msrb.mxu1 %v9306_v47  ;;  %14364 = vst [vmem:[#allocation26_spill] sm:$0xff] %v9498_v48  ;;  %v14378_v18 = vmov 0  ;;  %vm9553_vm1 = vcmp.eq.s32.totalorder %v625_v43, %v9407_v6  ;;  %vm9558_vm2 = vcmp.eq.s32.totalorder %v641_v44, %v9407_v6  ;;  %v14391_v2 = vmov 0 }
  0x4e   :  { %546 = vmatpush.bf16.msrb.mxu2 %v9317_v52  ;;  %559 = vmatpush.bf16.msrb.mxu3 %v9319_v55  ;;  %14365 = vst [vmem:[#allocation27_spill] sm:$0xff] %v9501_v51  ;;  %v9504_v52 = vadd.s32 80, %v9387_v53  ;;  %v9507_v55 = vadd.s32 208, %v9387_v53  ;;  %v14393_v5 = vmov 0  ;;  %v9645_v42 = vadd.s32 192, %v9387_v53 }
  0x4f   :  { %v9648_v43 = vadd.s32 56, %v9387_v53  ;;  %v9822_v28 = vadd.s32 160, %v9387_v53  ;;  %v9853_v27 = vadd.s32 152, %v9387_v53  ;;  %v14467_v11 = vmov 0 }
  0x50   :  { %14366 = vst [vmem:[#allocation28_spill] sm:$0xff] %v9504_v52  ;;  %v14470_v61 = vmov 0 }
  0x51   :  { %6607 = vmatpush.msk.msra.mxu0 %vm9416_vm3, %v13985_v19  ;;  %6623 = vmatpush.msk.msra.mxu1 %vm9424_vm4, %v13985_v19  ;;  %14367 = vst [vmem:[#allocation29_spill] sm:$0xff] %v9507_v55  ;;  %v632_v54 = vand.u32 63, %v9853_v27 }
  0x52   :  { %6639 = vmatpush.msk.msra.mxu2 %vm9429_vm5, %v13985_v19  ;;  %6655 = vmatpush.msk.msra.mxu3 %vm9434_vm6, %v13985_v19  ;;  %14403 = vst [vmem:[#allocation33_spill] sm:$0xff] %v9645_v42 }
  0x53   :  { %6539 = vmatmul.msk.bf16.vlgmr.msrb.gmra.mxu0 %vm71_vm0, %v502_v22  ;;  %6540 = vmatmul.msk.bf16.vlgmr.msrb.gmra.mxu1 %vm71_vm0, %v502_v22  ;;  %v14380_v22 = vmov 0  ;;  %14404 = vst [vmem:[#allocation34_spill] sm:$0xff] %v9648_v43 }
  0x54   :  { %6541 = vmatmul.msk.bf16.vlgmr.msrb.gmra.mxu2 %vm71_vm0, %v535_v26  ;;  %6542 = vmatmul.msk.bf16.vlgmr.msrb.gmra.mxu3 %vm71_vm0, %v535_v26  ;;  %vm9548_vm0 = vcmp.eq.s32.totalorder %v641_v44, %v9403_v3  ;;  %v14381_v22 = vsel %vm9553_vm1, 4294967295, %v14380_v22  ;;  %v14382_v26 = vmov 0  ;;  %v9651_v44 = vadd.s32 184, %v9387_v53  ;;  %14447 = vst [vmem:[#allocation41_spill] sm:$0xff] %v9822_v28 }
  0x55   :  { %6608 = vmatpush.msk.msra.mxu0 %vm9462_vm7, %v13985_v19  ;;  %6624 = vmatpush.msk.msra.mxu1 %vm9467_vm8, %v13985_v19  ;;  %v14379_v18 = vsel %vm9548_vm0, 4294967295, %v14378_v18  ;;  %v14383_v26 = vsel %vm9558_vm2, 4294967295, %v14382_v26  ;;  %14455 = vst [vmem:[#allocation45_spill] sm:$0xff] %v9853_v27  ;;  %v14480_v27 = vmov 0 }
  0x56   :  { %6640 = vmatpush.msk.msra.mxu2 %vm9472_vm9, %v13985_v19  ;;  %6656 = vmatpush.msk.msra.mxu3 %vm9477_vm10, %v13985_v19  ;;  %14405 = vst [vmem:[#allocation35_spill] sm:$0xff] %v9651_v44 }
  0x57   :  { %6609 = vmatpush.msk.msra.mxu0 %vm9510_vm11, %v13985_v19  ;;  %6625 = vmatpush.msk.msra.mxu1 %vm9515_vm12, %v13985_v19  ;;  %vm9575_vm12 = vcmp.eq.s32.totalorder %v624_v17, %v9407_v6 }
  0x58   :  { %6641 = vmatpush.msk.msra.mxu2 %vm9526_vm13, %v13985_v19  ;;  %6657 = vmatpush.msk.msra.mxu3 %vm9531_vm14, %v13985_v19  ;;  %vm9569_vm14 = vcmp.eq.s32.totalorder %v624_v17, %v9403_v3  ;;  %v14413_v17 = vmov 0 }
  0x59   :  { %6610 = vmatpush.msk.msra.mxu0 %vm9536_vm15, %v13985_v19  ;;  %6626 = vmatpush.msk.msra.mxu1 %vm9548_vm0, %v13985_v19 }
  0x5a   :  { %6642 = vmatpush.msk.msra.mxu2 %vm9553_vm1, %v13985_v19  ;;  %6658 = vmatpush.msk.msra.mxu3 %vm9558_vm2, %v13985_v19 }
  0x5b   :  { %6611 = vmatpush.msk.msra.mxu0 %vm9569_vm14, %v13985_v19 }
  0x5c   :  { %6643 = vmatpush.msk.msra.mxu2 %vm9575_vm12, %v13985_v19 }
  0xa0   :  { %v205_v30 = vpop.f32.mrf.mxu0  ;;  %v218_v34 = vpop.f32.mrf.mxu1 }
  0xa7   :  { %v274_v35 = vpop.f32.mrf.mxu2  ;;  %v287_v39 = vpop.f32.mrf.mxu3 }
  0xa8   :  { %v207_v46 = vpop.f32.mrf.mxu0  ;;  %v220_v49 = vpop.f32.mrf.mxu1  ;;  %v275_v14 = vadd.f32 %v274_v35, %v205_v30  ;;  %v288_v16 = vadd.f32 %v287_v39, %v218_v34  ;;  %v14384_v30 = vmov 0  ;;  %v640_v34 = vand.u32 63, %v9501_v51 }
  0xa9   :  { %v14385_v30 = vsel %vm9569_vm14, 4294967295, %v14384_v30  ;;  %v14386_v35 = vmov 0  ;;  %v623_v39 = vand.u32 63, %v9504_v52  ;;  %v639_v46 = vand.u32 63, %v9507_v55 }
  0xaa   :  { %v14387_v35 = vsel %vm9575_vm12, 4294967295, %v14386_v35  ;;  %v9588_v49 = vadd.s32 72, %v9387_v53  ;;  %vm9600_vm0 = vcmp.eq.s32.totalorder %v640_v34, %v9403_v3  ;;  %vm9605_vm2 = vcmp.eq.s32.totalorder %v640_v34, %v9407_v6 }
  0xab   :  { %v14392_v2 = vsel %vm9600_vm0, 4294967295, %v14391_v2  ;;  %v14394_v5 = vsel %vm9605_vm2, 4294967295, %v14393_v5  ;;  %vm9610_vm1 = vcmp.eq.s32.totalorder %v623_v39, %v9403_v3  ;;  %vm9615_vm15 = vcmp.eq.s32.totalorder %v623_v39, %v9407_v6  ;;  %6627 = vmatpush.msk.msra.mxu1 %vm9600_vm0, %v13985_v19  ;;  %6659 = vmatpush.msk.msra.mxu3 %vm9605_vm2, %v13985_v19 }
  0xac   :  { %14388 = vst [vmem:[#allocation30_spill] sm:$0xff] %v9588_v49  ;;  %vm9626_vm14 = vcmp.eq.s32.totalorder %v639_v46, %v9403_v3  ;;  %vm9631_vm13 = vcmp.eq.s32.totalorder %v639_v46, %v9407_v6  ;;  %v622_v24 = vand.u32 63, %v9588_v49  ;;  %6612 = vmatpush.msk.msra.mxu0 %vm9610_vm1, %v13985_v19  ;;  %6644 = vmatpush.msk.msra.mxu2 %vm9615_vm15, %v13985_v19  ;;  %v14415_v34 = vmov 0 }
  0xad   :  { %6628 = vmatpush.msk.msra.mxu1 %vm9626_vm14, %v13985_v19  ;;  %6660 = vmatpush.msk.msra.mxu3 %vm9631_vm13, %v13985_v19  ;;  %v637_v39 = vand.u32 63, %v9645_v42  ;;  %v14417_v46 = vmov 0  ;;  %v9735_v42 = vadd.s32 168, %v9387_v53  ;;  %v9825_v52 = vadd.s32 24, %v9387_v53 }
  0xae   :  { %vm9664_vm2 = vcmp.eq.s32.totalorder %v622_v24, %v9403_v3  ;;  %vm9674_vm0 = vcmp.eq.s32.totalorder %v622_v24, %v9407_v6  ;;  %v620_v24 = vand.u32 63, %v9648_v43  ;;  %v14432_v43 = vmov 0 }
  0xaf   :  { %v276_v63 = vpop.f32.mrf.mxu2  ;;  %v289_v1 = vpop.f32.mrf.mxu3  ;;  %6613 = vmatpush.msk.msra.mxu0 %vm9664_vm2, %v13985_v19  ;;  %6645 = vmatpush.msk.msra.mxu2 %vm9674_vm0, %v13985_v19  ;;  %14425 = vst [vmem:[#allocation39_spill] sm:$0xff] %v9735_v42  ;;  %v616_v32 = vand.u32 63, %v9825_v52 }
  0xb0   :  { %v345_v7 = vpop.f32.mrf.mxu0  ;;  %v358_v10 = vpop.f32.mrf.mxu1  ;;  %v9591_v63 = vadd.s32 200, %v9387_v53  ;;  %v9594_v1 = vadd.s32 64, %v9387_v53  ;;  %14448 = vst [vmem:[#allocation42_spill] sm:$0xff] %v9825_v52  ;;  %v9872_v52 = vadd.s32 16, %v9387_v53 }
  0xb1   :  { %v362_v29 = vadd.f32 %v345_v7, %v275_v14  ;;  %v363_v31 = vadd.f32 %v358_v10, %v288_v16  ;;  %v14395_v7 = vmov 0  ;;  %v14397_v10 = vmov 0 }
  0xb2   :  { %14389 = vst [vmem:[#allocation31_spill] sm:$0xff] %v9591_v63  ;;  %v14396_v7 = vsel %vm9610_vm1, 4294967295, %v14395_v7  ;;  %v14398_v10 = vsel %vm9615_vm15, 4294967295, %v14397_v10  ;;  %v14399_v14 = vmov 0  ;;  %v14401_v16 = vmov 0 }
  0xb3   :  { %14390 = vst [vmem:[#allocation32_spill] sm:$0xff] %v9594_v1  ;;  %v14400_v14 = vsel %vm9626_vm14, 4294967295, %v14399_v14  ;;  %v14402_v16 = vsel %vm9631_vm13, 4294967295, %v14401_v16  ;;  %v638_v25 = vand.u32 63, %v9591_v63  ;;  %v621_v41 = vand.u32 63, %v9594_v1 }
  0xb4   :  { %v14428_v63 = vmov 0  ;;  %vm9754_vm13 = vcmp.eq.s32.totalorder %v620_v24, %v9407_v6  ;;  %v9799_v1 = vadd.s32 32, %v9387_v53  ;;  %14462 = vst [vmem:[#allocation48_spill] sm:$0xff] %v9872_v52  ;;  %v615_v57 = vand.u32 63, %v9872_v52 }
  0xb5   :  { %vm9669_vm1 = vcmp.eq.s32.totalorder %v638_v25, %v9403_v3  ;;  %vm9688_vm14 = vcmp.eq.s32.totalorder %v638_v25, %v9407_v6  ;;  %vm9693_vm15 = vcmp.eq.s32.totalorder %v621_v41, %v9403_v3  ;;  %vm9699_vm12 = vcmp.eq.s32.totalorder %v621_v41, %v9407_v6 }
  0xb6   :  { %v14414_v17 = vsel %vm9688_vm14, 4294967295, %v14413_v17  ;;  %v14416_v34 = vsel %vm9693_vm15, 4294967295, %v14415_v34  ;;  %v14418_v46 = vsel %vm9699_vm12, 4294967295, %v14417_v46  ;;  %6629 = vmatpush.msk.msra.mxu1 %vm9669_vm1, %v13985_v19  ;;  %v636_v25 = vand.u32 63, %v9651_v44  ;;  %6661 = vmatpush.msk.msra.mxu3 %vm9688_vm14, %v13985_v19  ;;  %14442 = vst [vmem:[#allocation40_spill] sm:$0xff] %v9799_v1 }
  0xb7   :  { %v418_v45 = vpop.f32.mrf.mxu2  ;;  %v431_v47 = vpop.f32.mrf.mxu3  ;;  %6614 = vmatpush.msk.msra.mxu0 %vm9693_vm15, %v13985_v19  ;;  %v14420_v41 = vmov 0  ;;  %v9732_v44 = vadd.s32 40, %v9387_v53  ;;  %6646 = vmatpush.msk.msra.mxu2 %vm9699_vm12, %v13985_v19  ;;  %vm9744_vm14 = vcmp.eq.s32.totalorder %v620_v24, %v9403_v3  ;;  %v617_v58 = vand.u32 63, %v9799_v1 }
  0xb8   :  { %v435_v56 = vadd.f32 %v418_v45, %v362_v29  ;;  %v436_v59 = vadd.f32 %v431_v47, %v363_v31  ;;  %v347_v60 = vpop.f32.mrf.mxu0  ;;  %v360_v62 = vpop.f32.mrf.mxu1  ;;  %vm9749_vm15 = vcmp.eq.s32.totalorder %v636_v25, %v9403_v3  ;;  %v9875_v1 = vadd.s32 144, %v9387_v53 }
  0xb9   :  { %v14410_v60 = vmov 0  ;;  %v9679_v62 = vadd.s32 48, %v9387_v53  ;;  %14424 = vst [vmem:[#allocation38_spill] sm:$0xff] %v9732_v44  ;;  %v14429_v63 = vsel %vm9749_vm15, 4294967295, %v14428_v63  ;;  %6615 = vmatpush.msk.msra.mxu0 %vm9744_vm14, %v13985_v19  ;;  %v618_v51 = vand.u32 63, %v9732_v44  ;;  %6647 = vmatpush.msk.msra.mxu2 %vm9754_vm13, %v13985_v19 }
  0xba   :  { %437 = vst [vmem:[#allocation3] sm:$0xf] %v435_v56  ;;  %v14406_v56 = vmov 0  ;;  %v14411_v60 = vsel %vm9674_vm0, 4294967295, %v14410_v60  ;;  %vm9727_vm0 = vcmp.eq.s32.totalorder %v637_v39, %v9407_v6  ;;  %v634_v44 = vand.u32 63, %v9735_v42 }
  0xbb   :  { %438 = vst [vmem:[#allocation3 + $0x8] sm:$0xf] %v436_v59  ;;  %v14407_v56 = vsel %vm9664_vm2, 4294967295, %v14406_v56  ;;  %v14408_v59 = vmov 0  ;;  %v14423_v50 = vsel %vm9727_vm0, 4294967295, %v14422_v50  ;;  %6662 = vmatpush.msk.msra.mxu3 %vm9727_vm0, %v13985_v19  ;;  %v14445_v42 = vmov 0 }
  0xbc   :  { %v14409_v59 = vsel %vm9669_vm1, 4294967295, %v14408_v59  ;;  %14412 = vst [vmem:[#allocation36_spill] sm:$0xff] %v9679_v62  ;;  %vm9722_vm1 = vcmp.eq.s32.totalorder %v637_v39, %v9403_v3  ;;  %v14426_v39 = vmov 0  ;;  %v613_v52 = vand.u32 63, %v9387_v53 }
  0xbd   :  { %v14421_v41 = vsel %vm9722_vm1, 4294967295, %v14420_v41  ;;  %6630 = vmatpush.msk.msra.mxu1 %vm9722_vm1, %v13985_v19  ;;  %v14427_v39 = vsel %vm9744_vm14, 4294967295, %v14426_v39  ;;  %vm9766_vm1 = vcmp.eq.s32.totalorder %v636_v25, %v9407_v6  ;;  %v14438_v25 = vmov 0  ;;  %14463 = vst [vmem:[#allocation49_spill] sm:$0xff] %v9875_v1 }
  0xbe   :  { %v14433_v43 = vsel %vm9766_vm1, 4294967295, %v14432_v43  ;;  %6663 = vmatpush.msk.msra.mxu3 %vm9766_vm1, %v13985_v19  ;;  %vm9834_vm1 = vcmp.eq.s32.totalorder %v634_v44, %v9403_v3 }
  0xbf   :  { %v420_v29 = vpop.f32.mrf.mxu2  ;;  %v433_v31 = vpop.f32.mrf.mxu3  ;;  %6631 = vmatpush.msk.msra.mxu1 %vm9749_vm15, %v13985_v19  ;;  %vm9812_vm15 = vcmp.eq.s32.totalorder %v618_v51, %v9403_v3 }
  0xc0   :  { %v9653_v45 = vpop.f32.mrf.mxu0  ;;  %v9655_v47 = vpop.f32.mrf.mxu1  ;;  %v619_v29 = vand.u32 63, %v9679_v62  ;;  %v9713_v31 = vadd.s32 176, %v9387_v53  ;;  %v14430_v62 = vmov 0 }
  0xc1   :  { %v14431_v62 = vsel %vm9754_vm13, 4294967295, %v14430_v62  ;;  %vm9817_vm13 = vcmp.eq.s32.totalorder %v618_v51, %v9407_v6  ;;  %v14449_v51 = vmov 0 }
  0xc2   :  { %14419 = vst [vmem:[#allocation37_spill] sm:$0xff] %v9713_v31  ;;  %v635_v55 = vand.u32 63, %v9713_v31  ;;  %vm9771_vm12 = vcmp.eq.s32.totalorder %v619_v29, %v9403_v3  ;;  %vm9776_vm2 = vcmp.eq.s32.totalorder %v619_v29, %v9407_v6  ;;  %v14436_v31 = vmov 0 }
  0xc3   :  { %v14437_v31 = vsel %vm9776_vm2, 4294967295, %v14436_v31  ;;  %v14440_v29 = vmov 0  ;;  %6616 = vmatpush.msk.msra.mxu0 %vm9771_vm12, %v13985_v19  ;;  %v14446_v42 = vsel %vm9817_vm13, 4294967295, %v14445_v42  ;;  %6648 = vmatpush.msk.msra.mxu2 %vm9776_vm2, %v13985_v19  ;;  %v14450_v51 = vsel %vm9834_vm1, 4294967295, %v14449_v51 }
  0xc4   :  { %vm9788_vm0 = vcmp.eq.s32.totalorder %v635_v55, %v9403_v3  ;;  %vm9793_vm14 = vcmp.eq.s32.totalorder %v635_v55, %v9407_v6  ;;  %v14443_v55 = vmov 0  ;;  %14451 = vst [vmem:[#allocation43_spill] sm:$0xff] %v14450_v51  ;;  %vm9894_vm2 = vcmp.eq.s32.totalorder %v616_v32, %v9403_v3 }
  0xc5   :  { %v14439_v25 = vsel %vm9788_vm0, 4294967295, %v14438_v25  ;;  %v14441_v29 = vsel %vm9793_vm14, 4294967295, %v14440_v29  ;;  %v14444_v55 = vsel %vm9812_vm15, 4294967295, %v14443_v55  ;;  %6632 = vmatpush.msk.msra.mxu1 %vm9788_vm0, %v13985_v19  ;;  %6664 = vmatpush.msk.msra.mxu3 %vm9793_vm14, %v13985_v19  ;;  %vm9846_vm0 = vcmp.eq.s32.totalorder %v634_v44, %v9407_v6 }
  0xc6   :  { %6617 = vmatpush.msk.msra.mxu0 %vm9812_vm15, %v13985_v19  ;;  %6649 = vmatpush.msk.msra.mxu2 %vm9817_vm13, %v13985_v19  ;;  %vm9862_vm14 = vcmp.eq.s32.totalorder %v617_v58, %v9403_v3  ;;  %v14456_v44 = vmov 0  ;;  %vm9867_vm15 = vcmp.eq.s32.totalorder %v617_v58, %v9407_v6  ;;  %v14464_v58 = vmov 0 }
  0xc7   :  { %v9801_v33 = vpop.f32.mrf.mxu2  ;;  %v9803_v49 = vpop.f32.mrf.mxu3  ;;  %6633 = vmatpush.msk.msra.mxu1 %vm9834_vm1, %v13985_v19  ;;  %v14457_v44 = vsel %vm9862_vm14, 4294967295, %v14456_v44  ;;  %6665 = vmatpush.msk.msra.mxu3 %vm9846_vm0, %v13985_v19  ;;  %v14471_v61 = vsel %vm9894_vm2, 4294967295, %v14470_v61  ;;  %v9970_v51 = vadd.s32 128, %v9387_v53 }
  0xc8   :  { %v457_v12 = vpop.f32.mrf.mxu0  ;;  %v470_v48 = vpop.f32.mrf.mxu1  ;;  %14458 = vst [vmem:[#allocation46_spill] sm:$0xff] %v14457_v44  ;;  %6618 = vmatpush.msk.msra.mxu0 %vm9862_vm14, %v13985_v19  ;;  %6650 = vmatpush.msk.msra.mxu2 %vm9867_vm15, %v13985_v19  ;;  %v9913_v44 = vadd.s32 8, %v9387_v53  ;;  %vm9952_vm14 = vcmp.eq.s32.totalorder %v615_v57, %v9407_v6 }
  0xc9   :  { %v14452_v12 = vmov 0  ;;  %v633_v48 = vand.u32 63, %v9822_v28  ;;  %v14459_v28 = vmov 0  ;;  %14472 = vst [vmem:[#allocation52_spill] sm:$0xff] %v14471_v61  ;;  %v14488_v61 = vmov 0 }
  0xca   :  { %v14453_v12 = vsel %vm9846_vm0, 4294967295, %v14452_v12  ;;  %v14460_v28 = vsel %vm9867_vm15, 4294967295, %v14459_v28  ;;  %vm9906_vm0 = vcmp.eq.s32.totalorder %v616_v32, %v9407_v6  ;;  %14476 = vst [vmem:[#allocation54_spill] sm:$0xff] %v9913_v44  ;;  %6619 = vmatpush.msk.msra.mxu0 %vm9894_vm2, %v13985_v19  ;;  %v14477_v32 = vmov 0 }
  0xcb   :  { %14454 = vst [vmem:[#allocation44_spill] sm:$0xff] %v14453_v12  ;;  %vm9884_vm1 = vcmp.eq.s32.totalorder %v633_v48, %v9403_v3  ;;  %vm9889_vm13 = vcmp.eq.s32.totalorder %v633_v48, %v9407_v6  ;;  %v14473_v48 = vmov 0  ;;  %v631_v12 = vand.u32 63, %v9875_v1  ;;  %6651 = vmatpush.msk.msra.mxu2 %vm9906_vm0, %v13985_v19 }
  0xcc   :  { %14461 = vst [vmem:[#allocation47_spill] sm:$0xff] %v14460_v28  ;;  %v14465_v58 = vsel %vm9884_vm1, 4294967295, %v14464_v58  ;;  %v14468_v11 = vsel %vm9889_vm13, 4294967295, %v14467_v11  ;;  %6634 = vmatpush.msk.msra.mxu1 %vm9884_vm1, %v13985_v19  ;;  %v14474_v48 = vsel %vm9906_vm0, 4294967295, %v14473_v48  ;;  %6666 = vmatpush.msk.msra.mxu3 %vm9889_vm13, %v13985_v19  ;;  %vm9922_vm1 = vcmp.eq.s32.totalorder %v632_v54, %v9403_v3 }
  0xcd   :  { %14466 = vst [vmem:[#allocation50_spill] sm:$0xff] %v14465_v58  ;;  %v14478_v32 = vsel %vm9922_vm1, 4294967295, %v14477_v32  ;;  %vm9927_vm15 = vcmp.eq.s32.totalorder %v632_v54, %v9407_v6  ;;  %v9932_v1 = vadd.s32 136, %v9387_v53  ;;  %vm9942_vm13 = vcmp.eq.s32.totalorder %v615_v57, %v9403_v3  ;;  %6652 = vmatpush.msk.msra.mxu2 %vm9952_vm14, %v13985_v19 }
  0xce   :  { %14469 = vst [vmem:[#allocation51_spill] sm:$0xff] %v14468_v11  ;;  %v14481_v27 = vsel %vm9927_vm15, 4294967295, %v14480_v27  ;;  %6635 = vmatpush.msk.msra.mxu1 %vm9922_vm1, %v13985_v19  ;;  %v14483_v11 = vmov 0  ;;  %vm9947_vm2 = vcmp.eq.s32.totalorder %v631_v12, %v9403_v3  ;;  %v14485_v54 = vmov 0  ;;  %6667 = vmatpush.msk.msra.mxu3 %vm9927_vm15, %v13985_v19 }
  0xcf   :  { %14475 = vst [vmem:[#allocation53_spill] sm:$0xff] %v14474_v48  ;;  %v14484_v11 = vsel %vm9942_vm13, 4294967295, %v14483_v11  ;;  %v14486_v54 = vsel %vm9947_vm2, 4294967295, %v14485_v54  ;;  %v14489_v61 = vsel %vm9952_vm14, 4294967295, %v14488_v61  ;;  %v486_v58 = vpop.f32.mrf.mxu2  ;;  %v499_v48 = vpop.f32.mrf.mxu3  ;;  %6620 = vmatpush.msk.msra.mxu0 %vm9942_vm13, %v13985_v19  ;;  %vm9964_vm1 = vcmp.eq.s32.totalorder %v631_v12, %v9407_v6 }
  0xd0   :  { %14479 = vst [vmem:[#allocation55_spill] sm:$0xff] %v14478_v32  ;;  %v614_v32 = vand.u32 63, %v9913_v44  ;;  %v14490_v28 = vmov 0  ;;  %v630_v57 = vand.u32 63, %v9932_v1  ;;  %v515_v58 = vpop.f32.mrf.mxu0  ;;  %v528_v48 = vpop.f32.mrf.mxu1  ;;  %6636 = vmatpush.msk.msra.mxu1 %vm9947_vm2, %v13985_v19  ;;  %v14494_v12 = vmov 0  ;;  %6668 = vmatpush.msk.msra.mxu3 %vm9964_vm1, %v13985_v19 }
  0xd1   :  { %14482 = vst [vmem:[#allocation56_spill] sm:$0xff] %v9932_v1  ;;  %v14491_v28 = vsel %vm9964_vm1, 4294967295, %v14490_v28  ;;  %vm9989_vm0 = vcmp.eq.s32.totalorder %v613_v52, %v9403_v3  ;;  %v14500_v44 = vmov 0  ;;  %vm10006_vm14 = vcmp.eq.s32.totalorder %v613_v52, %v9407_v6 }
  0xd2   :  { %14487 = vst [vmem:[#allocation57_spill] sm:$0xff] %v14486_v54  ;;  %vm9979_vm15 = vcmp.eq.s32.totalorder %v614_v32, %v9403_v3  ;;  %vm9984_vm13 = vcmp.eq.s32.totalorder %v614_v32, %v9407_v6  ;;  %vm10000_vm2 = vcmp.eq.s32.totalorder %v630_v57, %v9403_v3  ;;  %v629_v32 = vand.u32 63, %v9970_v51 }
  0xd3   :  { %14492 = vst [vmem:[#allocation58_spill] sm:$0xff] %v14491_v28  ;;  %v14495_v12 = vsel %vm9979_vm15, 4294967295, %v14494_v12  ;;  %6621 = vmatpush.msk.msra.mxu0 %vm9979_vm15, %v13985_v19  ;;  %v14501_v44 = vsel %vm10000_vm2, 4294967295, %v14500_v44  ;;  %6637 = vmatpush.msk.msra.mxu1 %vm10000_vm2, %v13985_v19  ;;  %vm10017_vm1 = vcmp.eq.s32.totalorder %v630_v57, %v9407_v6  ;;  %v14504_v28 = vmov 0 }
  0xd4   :  { %14493 = vst [vmem:[#allocation59_spill] sm:$0xff] %v9970_v51  ;;  %6653 = vmatpush.msk.msra.mxu2 %vm9984_vm13, %v13985_v19  ;;  %v14505_v28 = vsel %vm10017_vm1, 4294967295, %v14504_v28  ;;  %6669 = vmatpush.msk.msra.mxu3 %vm10017_vm1, %v13985_v19  ;;  %vm10028_vm15 = vcmp.eq.s32.totalorder %v629_v32, %v9403_v3  ;;  %vm10033_vm2 = vcmp.eq.s32.totalorder %v629_v32, %v9407_v6 }
  0xd5   :  { %14506 = vst [vmem:[#allocation60_spill] sm:$0xff] %v14505_v28  ;;  %6622 = vmatpush.msk.msra.mxu0 %vm9989_vm0, %v13985_v19  ;;  %v485_v57 = vadd.f32 %v9801_v33, %v9653_v45  ;;  %v498_v28 = vadd.f32 %v9803_v49, %v9655_v47  ;;  %6638 = vmatpush.msk.msra.mxu1 %vm10028_vm15, %v13985_v19 }
  0xd6   :  { %6654 = vmatpush.msk.msra.mxu2 %vm10006_vm14, %v13985_v19  ;;  %6670 = vmatpush.msk.msra.mxu3 %vm10033_vm2, %v13985_v19 }
  0xd7   :  { %6671 = vmatpush.msk.msrb.mxu0 %vm9416_vm3, %v13985_v19  ;;  %v532_v3 = vadd.f32 %v515_v58, %v485_v57  ;;  %v533_v6 = vadd.f32 %v528_v48, %v498_v28  ;;  %6687 = vmatpush.msk.msrb.mxu1 %vm9424_vm4, %v13985_v19  ;;  %v548_v33 = vpop.f32.mrf.mxu2  ;;  %v561_v49 = vpop.f32.mrf.mxu3  ;;  %vm14511_vm3 = vnez %v14373_v0  ;;  %vm14512_vm4 = vnez %v14371_v8 }
  0xd8   :  { %6703 = vmatpush.msk.msrb.mxu2 %vm9429_vm5, %v13985_v19  ;;  %6719 = vmatpush.msk.msrb.mxu3 %vm9434_vm6, %v13985_v19  ;;  %v517_v45 = vpop.f32.mrf.mxu0  ;;  %v530_v47 = vpop.f32.mrf.mxu1  ;;  %vm14513_vm5 = vnez %v14377_v13  ;;  %vm14514_vm6 = vnez %v14375_v9 }
  0xd9   :  { %6672 = vmatpush.msk.msrb.mxu0 %vm9462_vm7, %v13985_v19  ;;  %v565_v15 = vadd.f32 %v548_v33, %v532_v3  ;;  %v566_v28 = vadd.f32 %v561_v49, %v533_v6  ;;  %6688 = vmatpush.msk.msrb.mxu1 %vm9467_vm8, %v13985_v19  ;;  %vm14515_vm7 = vnez %v14381_v22  ;;  %vm14516_vm8 = vnez %v14379_v18  ;;  %v14543_v18 = vld [vmem:[#allocation43_spill] sm:$0xff]  ;;  %v6793_v6 = vld [vmem:[#allocation9 + $0x170] sm:$0xf]  ;;  %v8574_v33 = vld [vmem:[#allocation9 + $0x174] sm:$0xf0] }
  0xda   :  { %6704 = vmatpush.msk.msrb.mxu2 %vm9472_vm9, %v13985_v19  ;;  %6720 = vmatpush.msk.msrb.mxu3 %vm9477_vm10, %v13985_v19  ;;  %vm14517_vm9 = vnez %v14385_v30  ;;  %vm14518_vm10 = vnez %v14383_v26  ;;  %v14545_v26 = vld [vmem:[#allocation46_spill] sm:$0xff]  ;;  %v14547_v30 = vld [vmem:[#allocation44_spill] sm:$0xff]  ;;  %v6857_v49 = vld [vmem:[#allocation9 + $0x1f0] sm:$0xf] }
  0xdb   :  { %6673 = vmatpush.msk.msrb.mxu0 %vm9510_vm11, %v13985_v19  ;;  %v569_v20 = vrot.slane %v565_v15, 4  ;;  %v570_v21 = vrot.slane %v566_v28, 4  ;;  %6689 = vmatpush.msk.msrb.mxu1 %vm14512_vm4, %v13985_v19  ;;  %vm14519_vm11 = vnez %v14387_v35  ;;  %vm14521_vm4 = vnez %v14396_v7  ;;  %v14553_v7 = vld [vmem:[#allocation52_spill] sm:$0xff]  ;;  %v8590_v28 = vld [vmem:[#allocation9 + $0x1f4] sm:$0xf0] }
  0xdc   :  { %6705 = vmatpush.msk.msrb.mxu2 %vm14511_vm3, %v13985_v19  ;;  %6721 = vmatpush.msk.msrb.mxu3 %vm14514_vm6, %v13985_v19  ;;  %vm14520_vm3 = vnez %v14392_v2  ;;  %vm14523_vm6 = vnez %v14398_v10  ;;  %v14551_v2 = vld [vmem:[#allocation50_spill] sm:$0xff]  ;;  %v14555_v10 = vld [vmem:[#allocation51_spill] sm:$0xff]  ;;  %v10255_v15 = vor.u32 %v8574_v33, %v6793_v6  ;;  %v8573_v45 = vld [vmem:[#allocation9 + $0x174] sm:$0xf] }
  0xdd   :  { %6674 = vmatpush.msk.msrb.mxu0 %vm14513_vm5, %v13985_v19  ;;  %573 = vst [vmem:[#allocation3] sm:$0xf0] %v569_v20  ;;  %6690 = vmatpush.msk.msrb.mxu1 %vm14516_vm8, %v13985_v19  ;;  %vm14522_vm5 = vnez %v14394_v5  ;;  %vm14525_vm8 = vnez %v14407_v56  ;;  %v14565_v56 = vld [vmem:[#allocation57_spill] sm:$0xff]  ;;  %v6795_v47 = vld [vmem:[#allocation9 + $0x178] sm:$0xf0]  ;;  %v10257_v20 = vor.u32 %v8590_v28, %v6857_v49 }
  0xde   :  { %6706 = vmatpush.msk.msrb.mxu2 %vm14515_vm7, %v13985_v19  ;;  %574 = vst [vmem:[#allocation3 + $0x8] sm:$0xf0] %v570_v21  ;;  %6722 = vmatpush.msk.msrb.mxu3 %vm14518_vm10, %v13985_v19  ;;  %vm14524_vm7 = vnez %v14400_v14  ;;  %vm14527_vm10 = vnez %v14411_v60  ;;  %v10259_v21 = vor.u32 %v8573_v45, %v6795_v47  ;;  %v8564_v6 = vld [vmem:[#allocation9 + $0x124] sm:$0xf0]  ;;  %v6817_v33 = vld [vmem:[#allocation9 + $0x1a0] sm:$0xf] }
  0xdf   :  { %6675 = vmatpush.msk.msrb.mxu0 %vm14517_vm9, %v13985_v19  ;;  %6691 = vmatpush.msk.msrb.mxu1 %vm14520_vm3, %v13985_v19  ;;  %v550_v23 = vpop.f32.mrf.mxu2  ;;  %v563_v36 = vpop.f32.mrf.mxu3  ;;  %vm14526_vm9 = vnez %v14402_v16  ;;  %vm14529_vm3 = vnez %v14416_v34  ;;  %v14557_v16 = vld [vmem:[#allocation53_spill] sm:$0xff]  ;;  %v8580_v28 = vld [vmem:[#allocation9 + $0x1a4] sm:$0xf0]  ;;  %v8563_v45 = vld [vmem:[#allocation9 + $0x124] sm:$0xf] }
  0xe0   :  { %6707 = vmatpush.msk.msrb.mxu2 %vm14519_vm11, %v13985_v19  ;;  %6723 = vmatpush.msk.msrb.mxu3 %vm14522_vm5, %v13985_v19  ;;  %vm14528_vm11 = vnez %v14409_v59  ;;  %vm14531_vm5 = vnez %v14418_v46  ;;  %v8589_v23 = vld [vmem:[#allocation9 + $0x1f4] sm:$0xf]  ;;  %v6859_v36 = vld [vmem:[#allocation9 + $0x1f8] sm:$0xf0]  ;;  %v6755_v47 = vld [vmem:[#allocation9 + $0x128] sm:$0xf0] }
  0xe1   :  { %6676 = vmatpush.msk.msrb.mxu0 %vm14521_vm4, %v13985_v19  ;;  %6692 = vmatpush.msk.msrb.mxu1 %vm14524_vm7, %v13985_v19  ;;  %vm14530_vm4 = vnez %v14414_v17  ;;  %vm14533_vm7 = vnez %v14427_v39 }
  0xe2   :  { %6708 = vmatpush.msk.msrb.mxu2 %vm14523_vm6, %v13985_v19  ;;  %6724 = vmatpush.msk.msrb.mxu3 %vm14526_vm9, %v13985_v19  ;;  %vm14532_vm6 = vnez %v14421_v41  ;;  %vm14535_vm9 = vnez %v14431_v62 }
  0xe3   :  { %6677 = vmatpush.msk.msrb.mxu0 %vm14525_vm8, %v13985_v19  ;;  %6693 = vmatpush.msk.msrb.mxu1 %vm14528_vm11, %v13985_v19  ;;  %vm14534_vm8 = vnez %v14423_v50  ;;  %vm14537_vm11 = vnez %v14433_v43 }
  0xe4   :  { %6709 = vmatpush.msk.msrb.mxu2 %vm14527_vm10, %v13985_v19  ;;  %v575_v37 = vld [vmem:[#allocation3] sm:$0xff]  ;;  %6725 = vmatpush.msk.msrb.mxu3 %vm14530_vm4, %v13985_v19  ;;  %vm14536_vm10 = vnez %v14429_v63  ;;  %vm14539_vm4 = vnez %v14439_v25 }
  0xe5   :  { %6678 = vmatpush.msk.msrb.mxu0 %vm14529_vm3, %v13985_v19  ;;  %v839_v38 = vrot.slane %v575_v37, 4  ;;  %v10137_v40 = vld [vmem:[#allocation3 + $0x8] sm:$0xff]  ;;  %6694 = vmatpush.msk.msrb.mxu1 %vm14532_vm6, %v13985_v19  ;;  %vm14538_vm3 = vnez %v14437_v31  ;;  %vm14542_vm6 = vnez %v14446_v42  ;;  %v14549_v63 = vld [vmem:[#allocation47_spill] sm:$0xff] }
  0xe6   :  { %6710 = vmatpush.msk.msrb.mxu2 %vm14531_vm5, %v13985_v19  ;;  %v845_v4 = vrot.slane %v10137_v40, 4  ;;  %6726 = vmatpush.msk.msrb.mxu3 %vm14534_vm8, %v13985_v19  ;;  %vm14540_vm5 = vnez %v14444_v55  ;;  %vm14546_vm8 = vnez %v14545_v26  ;;  %v14559_v42 = vld [vmem:[#allocation55_spill] sm:$0xff]  ;;  %v6851_v26 = vld [vmem:[#allocation9 + $0x1e8] sm:$0xf0] }
  0xe7   :  { %6679 = vmatpush.msk.msrb.mxu0 %vm14533_vm7, %v13985_v19  ;;  %v840_v8 = vadd.f32 %v839_v38, %v575_v37  ;;  %6695 = vmatpush.msk.msrb.mxu1 %vm14536_vm10, %v13985_v19  ;;  %vm14544_vm7 = vnez %v14543_v18  ;;  %vm14550_vm10 = vnez %v14549_v63  ;;  %v6785_v38 = vld [vmem:[#allocation9 + $0x160] sm:$0xf]  ;;  %v8570_v63 = vld [vmem:[#allocation9 + $0x154] sm:$0xf0] }
  0xe8   :  { %6711 = vmatpush.msk.msrb.mxu2 %vm14535_vm9, %v13985_v19  ;;  %v846_v0 = vadd.f32 %v845_v4, %v10137_v40  ;;  %6727 = vmatpush.msk.msrb.mxu3 %vm14537_vm11, %v13985_v19  ;;  %vm14548_vm9 = vnez %v14547_v30  ;;  %vm14552_vm11 = vnez %v14551_v2  ;;  %v6849_v4 = vld [vmem:[#allocation9 + $0x1e0] sm:$0xf]  ;;  %v6841_v2 = vld [vmem:[#allocation9 + $0x1d0] sm:$0xf] }
  0xe9   :  { %6680 = vmatpush.msk.msrb.mxu0 %vm9771_vm12, %v13985_v19  ;;  %v841_v50 = vrot.slane %v840_v8, 2  ;;  %6696 = vmatpush.msk.msrb.mxu1 %vm14539_vm4, %v13985_v19  ;;  %vm14541_vm12 = vnez %v14441_v29  ;;  %vm14556_vm4 = vnez %v14555_v10  ;;  %v8569_v10 = vld [vmem:[#allocation9 + $0x154] sm:$0xf] }
  0xea   :  { %6712 = vmatpush.msk.msrb.mxu2 %vm14538_vm3, %v13985_v19  ;;  %v847_v9 = vrot.slane %v846_v0, 2  ;;  %6728 = vmatpush.msk.msrb.mxu3 %vm14541_vm12, %v13985_v19  ;;  %vm14554_vm3 = vnez %v14553_v7  ;;  %vm14560_vm12 = vnez %v14559_v42  ;;  %v8586_v7 = vld [vmem:[#allocation9 + $0x1d4] sm:$0xf0] }
  0xeb   :  { %6681 = vmatpush.msk.msrb.mxu0 %vm14540_vm5, %v13985_v19  ;;  %v842_v13 = vadd.f32 %v841_v50, %v840_v8  ;;  %6697 = vmatpush.msk.msrb.mxu1 %vm14544_vm7, %v13985_v19  ;;  %vm14558_vm5 = vnez %v14557_v16  ;;  %vm14562_vm7 = vnez %v14481_v27  ;;  %v8571_v50 = vld [vmem:[#allocation9 + $0x164] sm:$0xf]  ;;  %v10281_v16 = vor.u32 %v8586_v7, %v6841_v2  ;;  %v8578_v2 = vld [vmem:[#allocation9 + $0x194] sm:$0xf0]  ;;  %v8561_v7 = vld [vmem:[#allocation9 + $0x114] sm:$0xf] }
  0xec   :  { %6713 = vmatpush.msk.msrb.mxu2 %vm14542_vm6, %v13985_v19  ;;  %v848_v22 = vadd.f32 %v847_v9, %v846_v0  ;;  %6729 = vmatpush.msk.msrb.mxu3 %vm14548_vm9, %v13985_v19  ;;  %vm14561_vm6 = vnez %v14484_v11  ;;  %vm14564_vm9 = vnez %v14495_v12  ;;  %v14567_v11 = vld [vmem:[#allocation58_spill] sm:$0xff]  ;;  %v8588_v0 = vld [vmem:[#allocation9 + $0x1e4] sm:$0xf0]  ;;  %v6787_v9 = vld [vmem:[#allocation9 + $0x168] sm:$0xf0] }
  0xed   :  { %6682 = vmatpush.msk.msrb.mxu0 %vm14546_vm8, %v13985_v19  ;;  %v843_v35 = vrot.slane %v842_v13, 1  ;;  %6698 = vmatpush.msk.msrb.mxu1 %vm14552_vm11, %v13985_v19  ;;  %vm14563_vm8 = vnez %v14489_v61  ;;  %vm14568_vm11 = vnez %v14567_v11  ;;  %v10271_v18 = vor.u32 %v8571_v50, %v6787_v9  ;;  %v6769_v61 = vld [vmem:[#allocation9 + $0x140] sm:$0xf]  ;;  %v6745_v9 = vld [vmem:[#allocation9 + $0x110] sm:$0xf] }
  0xee   :  { %6714 = vmatpush.msk.msrb.mxu2 %vm14550_vm10, %v13985_v19  ;;  %v849_v5 = vrot.slane %v848_v22, 1  ;;  %6730 = vmatpush.msk.msrb.mxu3 %vm14556_vm4, %v13985_v19  ;;  %vm14566_vm10 = vnez %v14565_v56  ;;  %v6843_v56 = vld [vmem:[#allocation9 + $0x1d8] sm:$0xf0] }
  0xef   :  { %6683 = vmatpush.msk.msrb.mxu0 %vm14554_vm3, %v13985_v19  ;;  %v844_v14 = vadd.f32 %v843_v35, %v842_v13  ;;  %6699 = vmatpush.msk.msrb.mxu1 %vm14560_vm12, %v13985_v19  ;;  %vm14569_vm3 = vnez %v14501_v44  ;;  %v10269_v13 = vor.u32 %v8588_v0, %v6849_v4  ;;  %v6777_v35 = vld [vmem:[#allocation9 + $0x150] sm:$0xf] }
  0xf0   :  { %6715 = vmatpush.msk.msrb.mxu2 %vm14558_vm5, %v13985_v19  ;;  %v850_v43 = vadd.f32 %v849_v5, %v848_v22  ;;  %6731 = vmatpush.msk.msrb.mxu3 %vm14562_vm7, %v13985_v19  ;;  %v8587_v22 = vld [vmem:[#allocation9 + $0x1e4] sm:$0xf]  ;;  %v10279_v5 = vor.u32 %v8570_v63, %v6777_v35 }
  0xf1   :  { %6684 = vmatpush.msk.msrb.mxu0 %vm14561_vm6, %v13985_v19  ;;  %907 = vmatmul.f32.vlgmr.msra.gmra.mxu2 %v844_v14  ;;  %v10274_v30 = vor.u32 %v8587_v22, %v6851_v26  ;;  %v8562_v22 = vld [vmem:[#allocation9 + $0x114] sm:$0xf0]  ;;  %v6809_v26 = vld [vmem:[#allocation9 + $0x190] sm:$0xf] }
  0xf2   :  { %867 = vmatmul.f32.vlgmr.msra.gmra.mxu0 %v844_v14  ;;  %887 = vmatmul.f32.vlgmr.msra.gmra.mxu1 %v850_v43  ;;  %v6779_v14 = vld [vmem:[#allocation9 + $0x158] sm:$0xf0]  ;;  %v10327_v63 = vor.u32 %v8562_v22, %v6745_v9  ;;  %v8541_v9 = vld [vmem:[#allocation9 + $0x74] sm:$0xf] }
  0xf3   :  { %927 = vmatmul.f32.vlgmr.msra.gmra.mxu3 %v850_v43  ;;  %6716 = vmatpush.msk.msrb.mxu2 %vm14563_vm8, %v13985_v19  ;;  %v10283_v42 = vor.u32 %v8569_v10, %v6779_v14  ;;  %v8585_v43 = vld [vmem:[#allocation9 + $0x1d4] sm:$0xf]  ;;  %v6747_v10 = vld [vmem:[#allocation9 + $0x118] sm:$0xf0]  ;;  %v10329_v14 = vor.u32 %v8578_v2, %v6809_v26 }
  0xf4   :  { %6685 = vmatpush.msk.msrb.mxu0 %vm14564_vm9, %v13985_v19  ;;  %6700 = vmatpush.msk.msrb.mxu1 %vm14566_vm10, %v13985_v19  ;;  %v10286_v11 = vor.u32 %v8585_v43, %v6843_v56  ;;  %v10331_v43 = vor.u32 %v8561_v7, %v6747_v10  ;;  %v8577_v56 = vld [vmem:[#allocation9 + $0x194] sm:$0xf]  ;;  %v6923_v22 = vld [vmem:[#allocation9 + $0x78] sm:$0xf0]  ;;  %v6913_v7 = vld [vmem:[#allocation9 + $0x60] sm:$0xf] }
  0xf5   :  { %6732 = vmatpush.msk.msrb.mxu3 %vm14568_vm11, %v13985_v19  ;;  %6717 = vmatpush.msk.msrb.mxu2 %vm9984_vm13, %v13985_v19  ;;  %v10358_v26 = vor.u32 %v8541_v9, %v6923_v22  ;;  %v6987_v2 = vld [vmem:[#allocation9 + $0xf8] sm:$0xf0]  ;;  %v8537_v22 = vld [vmem:[#allocation9 + $0x54] sm:$0xf] }
  0xf6   :  { %6686 = vmatpush.msk.msrb.mxu0 %vm9989_vm0, %v13985_v19  ;;  %6701 = vmatpush.msk.msrb.mxu1 %vm14569_vm3, %v13985_v19 }
  0xf7   :  { %6733 = vmatpush.msk.msrb.mxu3 %vm10017_vm1, %v13985_v19  ;;  %6718 = vmatpush.msk.msrb.mxu2 %vm10006_vm14, %v13985_v19  ;;  %14574 = vst [vmem:[#allocation47_spill] sm:$0xff] %v10358_v26 }
  0xf8   :  { %6702 = vmatpush.msk.msrb.mxu1 %vm10028_vm15, %v13985_v19  ;;  %1442 = vmatpush.bf16.msra.mxu0 %v10255_v15 }
  0xf9   :  { %6734 = vmatpush.msk.msrb.mxu3 %vm10033_vm2, %v13985_v19  ;;  %1468 = vmatpush.bf16.msra.mxu2 %v10259_v21  ;;  %v6963_v19 = vld [vmem:[#allocation9 + $0xc8] sm:$0xf0]  ;;  %vm14069_vm2 = vcmask 1040384  }
  0xfa   :  { %1455 = vmatpush.bf16.msra.mxu1 %v10257_v20 }
  0xfd   :  { %1469 = vmatpush.bf16.msra.mxu2 %v10271_v18 }
  0xfe   :  { %1456 = vmatpush.bf16.msra.mxu1 %v10269_v13 }
 0x101   :  { %1470 = vmatpush.bf16.msra.mxu2 %v10283_v42 }
 0x102   :  { %1457 = vmatpush.bf16.msra.mxu1 %v10281_v16 }
 0x16f   :  { %v868_v53 = vpop.f32.mrf.mxu0  ;;  %v888_v27 = vpop.f32.mrf.mxu1 }
 0x170   :  { %v889_v1 = vadd.f32 %v888_v27, %v868_v53  ;;  %v8568_v53 = vld [vmem:[#allocation9 + $0x144] sm:$0xf0]  ;;  %v6833_v27 = vld [vmem:[#allocation9 + $0x1c0] sm:$0xf] }
 0x172   :  { %v931_v59 = vmul.f32 0.03125, %v889_v1  ;;  %v10291_v1 = vor.u32 %v8568_v53, %v6769_v61  ;;  %v6811_v61 = vld [vmem:[#allocation9 + $0x198] sm:$0xf0] }
 0x174   :  { %v933_v60 = vperm.slane %v931_v59, 0  ;;  %v908_v62 = vpop.f32.mrf.mxu2  ;;  %v8584_v59 = vld [vmem:[#allocation9 + $0x1c4] sm:$0xf0] }
 0x176   :  { %v928_v17 = vpop.f32.mrf.mxu3  ;;  %v10246_v34 = vsub.f32 %v575_v37, %v933_v60  ;;  %v10262_v37 = vor.u32 %v8589_v23, %v6859_v36  ;;  %v8567_v60 = vld [vmem:[#allocation9 + $0x144] sm:$0xf]  ;;  %v10317_v23 = vor.u32 %v8580_v28, %v6817_v33  ;;  %v10319_v36 = vor.u32 %v8563_v45, %v6755_v47  ;;  %v6921_v33 = vld [vmem:[#allocation9 + $0x70] sm:$0xf]  ;;  %v8542_v45 = vld [vmem:[#allocation9 + $0x74] sm:$0xf0] }
 0x177   :  { %v929_v46 = vadd.f32 %v928_v17, %v908_v62  ;;  %v6771_v62 = vld [vmem:[#allocation9 + $0x148] sm:$0xf0]  ;;  %v10293_v17 = vor.u32 %v8584_v59, %v6833_v27  ;;  %v10334_v27 = vor.u32 %v8577_v56, %v6811_v61  ;;  %v6737_v59 = vld [vmem:[#allocation9 + $0x100] sm:$0xf]  ;;  %v6985_v47 = vld [vmem:[#allocation9 + $0xf0] sm:$0xf] }
 0x178   :  { %v937_v31 = vmul.f32 %v10246_v34, %v10246_v34  ;;  %1481 = vmatpush.bf16.msra.mxu3 %v10262_v37  ;;  %v8540_v61 = vld [vmem:[#allocation9 + $0x64] sm:$0xf0] }
 0x179   :  { %v932_v41 = vmul.f32 0.03125, %v929_v46  ;;  %v10295_v46 = vor.u32 %v8567_v60, %v6771_v62  ;;  %1458 = vmatpush.bf16.msra.mxu1 %v10293_v17  ;;  %v8560_v60 = vld [vmem:[#allocation9 + $0x104] sm:$0xf0]  ;;  %v6801_v62 = vld [vmem:[#allocation9 + $0x180] sm:$0xf] }
 0x17a   :  { %v939_v39 = vrot.slane %v937_v31, 4 }
 0x17b   :  { %v934_v24 = vperm.slane %v932_v41, 0  ;;  %v6835_v41 = vld [vmem:[#allocation9 + $0x1c8] sm:$0xf0]  ;;  %1471 = vmatpush.bf16.msra.mxu2 %v10295_v46 }
 0x17c   :  { %v940_v25 = vadd.f32 %v939_v39, %v937_v31  ;;  %1482 = vmatpush.bf16.msra.mxu3 %v10274_v30  ;;  %v8583_v31 = vld [vmem:[#allocation9 + $0x1c4] sm:$0xf] }
 0x17d   :  { %v10251_v29 = vsub.f32 %v10137_v40, %v934_v24  ;;  %v8572_v40 = vld [vmem:[#allocation9 + $0x164] sm:$0xf0]  ;;  %v10298_v39 = vor.u32 %v8583_v31, %v6835_v41  ;;  %v6761_v24 = vld [vmem:[#allocation9 + $0x130] sm:$0xf]  ;;  %v10341_v41 = vor.u32 %v8560_v60, %v6737_v59  ;;  %v10367_v59 = vor.u32 %v8540_v61, %v6913_v7  ;;  %v8553_v61 = vld [vmem:[#allocation9 + $0xd4] sm:$0xf] }
 0x17e   :  { %v941_v55 = vrot.slane %v940_v25, 2  ;;  %v10267_v8 = vor.u32 %v8572_v40, %v6785_v38  ;;  %v8579_v38 = vld [vmem:[#allocation9 + $0x1a4] sm:$0xf]  ;;  %v6819_v40 = vld [vmem:[#allocation9 + $0x1a8] sm:$0xf0] }
 0x17f   :  { %v938_v51 = vmul.f32 %v10251_v29, %v10251_v29  ;;  %v10322_v4 = vor.u32 %v8579_v38, %v6819_v40  ;;  %v8558_v38 = vld [vmem:[#allocation9 + $0xf4] sm:$0xf0]  ;;  %14576 = vst [vmem:[#allocation52_spill] sm:$0xff] %v10367_v59  ;;  %v8556_v60 = vld [vmem:[#allocation9 + $0xe4] sm:$0xf0] }
 0x180   :  { %v942_v54 = vadd.f32 %v941_v55, %v940_v25  ;;  %1443 = vmatpush.bf16.msra.mxu0 %v10267_v8  ;;  %1483 = vmatpush.bf16.msra.mxu3 %v10286_v11  ;;  %v8566_v25 = vld [vmem:[#allocation9 + $0x134] sm:$0xf0] }
 0x181   :  { %v945_v44 = vrot.slane %v938_v51, 4  ;;  %v10303_v55 = vor.u32 %v8566_v25, %v6761_v24  ;;  %v8576_v24 = vld [vmem:[#allocation9 + $0x184] sm:$0xf0] }
 0x182   :  { %v943_v48 = vrot.slane %v942_v54, 1 }
 0x183   :  { %v946_v58 = vadd.f32 %v945_v44, %v938_v51  ;;  %v6825_v51 = vld [vmem:[#allocation9 + $0x1b0] sm:$0xf]  ;;  %v8582_v44 = vld [vmem:[#allocation9 + $0x1b4] sm:$0xf0] }
 0x184   :  { %v944_v32 = vadd.f32 %v943_v48, %v942_v54  ;;  %1444 = vmatpush.bf16.msra.mxu0 %v10279_v5  ;;  %1484 = vmatpush.bf16.msra.mxu3 %v10298_v39  ;;  %v8565_v54 = vld [vmem:[#allocation9 + $0x134] sm:$0xf]  ;;  %v6763_v48 = vld [vmem:[#allocation9 + $0x138] sm:$0xf0] }
 0x185   :  { %v947_v12 = vrot.slane %v946_v58, 2 }
 0x186   :  { %967 = vmatmul.f32.vlgmr.msrb.gmra.mxu0 %v944_v32  ;;  %1007 = vmatmul.f32.vlgmr.msrb.gmra.mxu2 %v944_v32  ;;  %v6827_v32 = vld [vmem:[#allocation9 + $0x1b8] sm:$0xf0] }
 0x187   :  { %v948_v52 = vadd.f32 %v947_v12, %v946_v58  ;;  %v10305_v58 = vor.u32 %v8582_v44, %v6825_v51  ;;  %v8581_v12 = vld [vmem:[#allocation9 + $0x1b4] sm:$0xf]  ;;  %v10343_v44 = vor.u32 %v8576_v24, %v6801_v62  ;;  %v8539_v62 = vld [vmem:[#allocation9 + $0x64] sm:$0xf]  ;;  %v6915_v24 = vld [vmem:[#allocation9 + $0x68] sm:$0xf0] }
 0x188   :  { %1445 = vmatpush.bf16.msra.mxu0 %v10291_v1 }
 0x189   :  { %v949_v57 = vrot.slane %v948_v52, 1  ;;  %1459 = vmatpush.bf16.msra.mxu1 %v10305_v58 }
 0x18b   :  { %v950_v3 = vadd.f32 %v949_v57, %v948_v52  ;;  %v10308_v52 = vor.u32 %v8565_v54, %v6763_v48  ;;  %v10310_v57 = vor.u32 %v8581_v12, %v6827_v32  ;;  %v8559_v54 = vld [vmem:[#allocation9 + $0x104] sm:$0xf]  ;;  %v6739_v48 = vld [vmem:[#allocation9 + $0x108] sm:$0xf0] }
 0x18c   :  { %1446 = vmatpush.bf16.msra.mxu0 %v10303_v55  ;;  %v10347_v32 = vor.u32 %v8559_v54, %v6739_v48  ;;  %v10375_v54 = vor.u32 %v8539_v62, %v6915_v24  ;;  %v8555_v48 = vld [vmem:[#allocation9 + $0xe4] sm:$0xf]  ;;  %v8536_v24 = vld [vmem:[#allocation9 + $0x44] sm:$0xf0] }
 0x18d   :  { %987 = vmatmul.f32.vlgmr.msrb.gmra.mxu1 %v950_v3  ;;  %1027 = vmatmul.f32.vlgmr.msrb.gmra.mxu3 %v950_v3  ;;  %v6753_v3 = vld [vmem:[#allocation9 + $0x120] sm:$0xf] }
 0x18e   :  { %1472 = vmatpush.bf16.msra.mxu2 %v10308_v52  ;;  %1485 = vmatpush.bf16.msra.mxu3 %v10310_v57  ;;  %v10315_v49 = vor.u32 %v8564_v6, %v6753_v3  ;;  %v8575_v3 = vld [vmem:[#allocation9 + $0x184] sm:$0xf]  ;;  %v6803_v6 = vld [vmem:[#allocation9 + $0x188] sm:$0xf0]  ;;  %14578 = vst [vmem:[#allocation53_spill] sm:$0xff] %v10375_v54 }
 0x18f   :  { %1460 = vmatpush.bf16.msra.mxu1 %v10317_v23  ;;  %v10350_v28 = vor.u32 %v8575_v3, %v6803_v6  ;;  %v6905_v3 = vld [vmem:[#allocation9 + $0x50] sm:$0xf] }
 0x190   :  { %1447 = vmatpush.bf16.msra.mxu0 %v10315_v49 }
 0x191   :  { %14571 = vst [vmem:[#allocation43_spill] sm:$0xff] %v10350_v28 }
 0x192   :  { %1473 = vmatpush.bf16.msra.mxu2 %v10319_v36  ;;  %1486 = vmatpush.bf16.msra.mxu3 %v10322_v4 }
 0x193   :  { %1461 = vmatpush.bf16.msra.mxu1 %v10329_v14 }
 0x194   :  { %1448 = vmatpush.bf16.msra.mxu0 %v10327_v63 }
 0x196   :  { %1474 = vmatpush.bf16.msra.mxu2 %v10331_v43  ;;  %1487 = vmatpush.bf16.msra.mxu3 %v10334_v27 }
 0x197   :  { %1462 = vmatpush.bf16.msra.mxu1 %v10343_v44 }
 0x198   :  { %1449 = vmatpush.bf16.msra.mxu0 %v10341_v41 }
 0x19a   :  { %1475 = vmatpush.bf16.msra.mxu2 %v10347_v32  ;;  %1488 = vmatpush.bf16.msra.mxu3 %v10350_v28 }
 0x19e   :  { %1680 = vmatpush.bf16.msrb.mxu2 %v10358_v26 }
 0x1a2   :  { %1681 = vmatpush.bf16.msrb.mxu2 %v10375_v54  ;;  %v8534_v54 = vld [vmem:[#allocation9 + $0x34] sm:$0xf0] }
 0x203   :  { %v968_v0 = vpop.f32.mrf.mxu0 }
 0x209   :  { %v1008_v25 = vpop.f32.mrf.mxu2 }
 0x20a   :  { %v988_v50 = vpop.f32.mrf.mxu1 }
 0x20b   :  { %v989_v35 = vadd.f32 %v988_v50, %v968_v0  ;;  %v10353_v0 = vor.u32 %v8542_v45, %v6921_v33  ;;  %v10355_v50 = vor.u32 %v8558_v38, %v6985_v47  ;;  %v8538_v45 = vld [vmem:[#allocation9 + $0x54] sm:$0xf0]  ;;  %v6969_v47 = vld [vmem:[#allocation9 + $0xd0] sm:$0xf] }
 0x20c   :  { %v8554_v38 = vld [vmem:[#allocation9 + $0xd4] sm:$0xf0] }
 0x20d   :  { %v1031_v53 = vmul.f32 0.03125, %v989_v35  ;;  %14572 = vst [vmem:[#allocation46_spill] sm:$0xff] %v10353_v0  ;;  %v8557_v35 = vld [vmem:[#allocation9 + $0xf4] sm:$0xf]  ;;  %1654 = vmatpush.bf16.msrb.mxu0 %v10353_v0  ;;  %1667 = vmatpush.bf16.msrb.mxu1 %v10355_v50  ;;  %v10385_v9 = vor.u32 %v8554_v38, %v6969_v47  ;;  %v8636_v0 = vld [vmem:[#allocation9 + $0x364] sm:$0xf0] }
 0x20e   :  { %14573 = vst [vmem:[#allocation44_spill] sm:$0xff] %v10355_v50  ;;  %v10364_v56 = vor.u32 %v8557_v35, %v6987_v2  ;;  %v6907_v35 = vld [vmem:[#allocation9 + $0x58] sm:$0xf0]  ;;  %v7169_v50 = vld [vmem:[#allocation9 + $0x360] sm:$0xf] }
 0x20f   :  { %v10337_v31 = vadd.f32 1e-05, %v1031_v53  ;;  %v6977_v53 = vld [vmem:[#allocation9 + $0xe0] sm:$0xf]  ;;  %14581 = vst [vmem:[#allocation58_spill] sm:$0xff] %v10385_v9  ;;  %v10389_v7 = vor.u32 %v8537_v22, %v6907_v35 }
 0x210   :  { %v1028_v51 = vpop.f32.mrf.mxu3  ;;  %14575 = vst [vmem:[#allocation50_spill] sm:$0xff] %v10364_v56  ;;  %1693 = vmatpush.bf16.msrb.mxu3 %v10364_v56  ;;  %v8551_v35 = vld [vmem:[#allocation9 + $0xc4] sm:$0xf]  ;;  %v8548_v56 = vld [vmem:[#allocation9 + $0xa4] sm:$0xf0] }
 0x211   :  { %8853 = vrsqrt.f32 %v10337_v31  ;;  %v1029_v12 = vadd.f32 %v1028_v51, %v1008_v25  ;;  %v10373_v51 = vor.u32 %v8556_v60, %v6977_v53  ;;  %1655 = vmatpush.bf16.msrb.mxu0 %v10367_v59  ;;  %14582 = vst [vmem:[#allocation60_spill] sm:$0xff] %v10389_v7  ;;  %v6971_v53 = vld [vmem:[#allocation9 + $0xd8] sm:$0xf0]  ;;  %v6897_v60 = vld [vmem:[#allocation9 + $0x40] sm:$0xf]  ;;  %1682 = vmatpush.bf16.msrb.mxu2 %v10389_v7  ;;  %vm1042_vm1 = vweird.f32 %v10337_v31 }
 0x212   :  { %v10392_v62 = vor.u32 %v8553_v61, %v6971_v53  ;;  %v6881_v7 = vld [vmem:[#allocation9 + $0x20] sm:$0xf]  ;;  %v8532_v59 = vld [vmem:[#allocation9 + $0x24] sm:$0xf0] }
 0x213   :  { %v1032_v40 = vmul.f32 0.03125, %v1029_v12  ;;  %14577 = vst [vmem:[#allocation51_spill] sm:$0xff] %v10373_v51  ;;  %v6979_v12 = vld [vmem:[#allocation9 + $0xe8] sm:$0xf0]  ;;  %1668 = vmatpush.bf16.msrb.mxu1 %v10373_v51  ;;  %v6955_v51 = vld [vmem:[#allocation9 + $0xb8] sm:$0xf0] }
 0x214   :  { %v10379_v33 = vor.u32 %v8555_v48, %v6979_v12  ;;  %14583 = vst [vmem:[#allocation61_spill] sm:$0xff] %v10392_v62  ;;  %v6961_v48 = vld [vmem:[#allocation9 + $0xc0] sm:$0xf]  ;;  %v8552_v12 = vld [vmem:[#allocation9 + $0xc4] sm:$0xf0] }
 0x215   :  { %v10360_v10 = vadd.f32 1e-05, %v1032_v40  ;;  %v10383_v40 = vor.u32 %v8538_v45, %v6905_v3  ;;  %v8535_v3 = vld [vmem:[#allocation9 + $0x44] sm:$0xf]  ;;  %v6899_v45 = vld [vmem:[#allocation9 + $0x48] sm:$0xf0]  ;;  %v10400_v22 = vor.u32 %v8552_v12, %v6961_v48 }
 0x216   :  { %14579 = vst [vmem:[#allocation55_spill] sm:$0xff] %v10379_v33  ;;  %1694 = vmatpush.bf16.msrb.mxu3 %v10379_v33  ;;  %v10405_v53 = vor.u32 %v8535_v3, %v6899_v45  ;;  %v6889_v33 = vld [vmem:[#allocation9 + $0x30] sm:$0xf]  ;;  %v6891_v12 = vld [vmem:[#allocation9 + $0x38] sm:$0xf0] }
 0x217   :  { %v10369_v25 = vpop.eup %8853  ;;  %8855 = vrsqrt.f32 %v10360_v10  ;;  %14580 = vst [vmem:[#allocation57_spill] sm:$0xff] %v10383_v40  ;;  %1656 = vmatpush.bf16.msrb.mxu0 %v10383_v40  ;;  %1669 = vmatpush.bf16.msrb.mxu1 %v10385_v9  ;;  %v10408_v40 = vor.u32 %v8551_v35, %v6963_v19  ;;  %v8549_v9 = vld [vmem:[#allocation9 + $0xb4] sm:$0xf]  ;;  %v10413_v3 = vor.u32 %v8534_v54, %v6889_v33  ;;  %v8547_v33 = vld [vmem:[#allocation9 + $0xa4] sm:$0xf]  ;;  %vm1052_vm14 = vweird.f32 %v10360_v10 }
 0x218   :  { %v1037_v6 = vmul.f32 %v10369_v25, %v10337_v31  ;;  %14585 = vst [vmem:[#allocation63_spill] sm:$0xff] %v10400_v22  ;;  %1683 = vmatpush.bf16.msrb.mxu2 %v10405_v53  ;;  %v10421_v26 = vor.u32 %v8549_v9, %v6955_v51  ;;  %vm1043_vm15 = vweird.f32 %v10369_v25 }
 0x219   :  { %14586 = vst [vmem:[#allocation64_spill] sm:$0xff] %v10405_v53  ;;  %vm1044_vm4 = vmor %vm1042_vm1, %vm1043_vm15 }
 0x21a   :  { %v1038_v2 = vmul.f32 %v10369_v25, %v1037_v6  ;;  %v10398_v6 = vor.u32 %v8536_v24, %v6897_v60  ;;  %1695 = vmatpush.bf16.msrb.mxu3 %v10392_v62  ;;  %14587 = vst [vmem:[#allocation65_spill] sm:$0xff] %v10408_v40  ;;  %v8550_v60 = vld [vmem:[#allocation9 + $0xb4] sm:$0xf0]  ;;  %v8533_v24 = vld [vmem:[#allocation9 + $0x34] sm:$0xf] }
 0x21b   :  { %1670 = vmatpush.bf16.msrb.mxu1 %v10400_v22  ;;  %14588 = vst [vmem:[#allocation66_spill] sm:$0xff] %v10413_v3  ;;  %v10418_v35 = vor.u32 %v8533_v24, %v6891_v12  ;;  %v6883_v22 = vld [vmem:[#allocation9 + $0x28] sm:$0xf0]  ;;  %v6873_v24 = vld [vmem:[#allocation9 + $0x10] sm:$0xf] }
 0x21c   :  { %v1039_v38 = vmul.f32 0.5, %v1038_v2  ;;  %14584 = vst [vmem:[#allocation62_spill] sm:$0xff] %v10398_v6  ;;  %v6953_v2 = vld [vmem:[#allocation9 + $0xb0] sm:$0xf]  ;;  %1657 = vmatpush.bf16.msrb.mxu0 %v10398_v6  ;;  %v8531_v6 = vld [vmem:[#allocation9 + $0x24] sm:$0xf] }
 0x21d   :  { %v10394_v47 = vpop.eup %8855  ;;  %v10415_v45 = vor.u32 %v8550_v60, %v6953_v2  ;;  %14590 = vst [vmem:[#allocation68_spill] sm:$0xff] %v10418_v35  ;;  %v6947_v2 = vld [vmem:[#allocation9 + $0xa8] sm:$0xf0]  ;;  %1684 = vmatpush.bf16.msrb.mxu2 %v10418_v35  ;;  %v8530_v12 = vld [vmem:[#allocation9 + $0x14] sm:$0xf0] }
 0x21e   :  { %v1047_v61 = vmul.f32 %v10394_v47, %v10360_v10  ;;  %v1040_v62 = vsub.f32 1.5, %v1039_v38  ;;  %1696 = vmatpush.bf16.msrb.mxu3 %v10408_v40  ;;  %14591 = vst [vmem:[#allocation69_spill] sm:$0xff] %v10421_v26  ;;  %vm1053_vm13 = vweird.f32 %v10394_v47  ;;  %v10427_v38 = vor.u32 %v8532_v59, %v6881_v7  ;;  %v1033_v59 = vld [vmem:[%s13849_s5] sm:$0x3]  ;;  %v8529_v7 = vld [vmem:[#allocation9 + $0x14] sm:$0xf] }
 0x21f   :  { %14589 = vst [vmem:[#allocation67_spill] sm:$0xff] %v10415_v45  ;;  %1671 = vmatpush.bf16.msrb.mxu1 %v10415_v45  ;;  %vm1054_vm0 = vmor %vm1052_vm14, %vm1053_vm13  ;;  %v1070_v10 = vld [vmem:[%s13850_s6] sm:$0x3]  ;;  %v8544_v35 = vld [vmem:[#allocation9 + $0x84] sm:$0xf0] }
 0x220   :  { %v1048_v48 = vmul.f32 %v10394_v47, %v1047_v61  ;;  %v6945_v61 = vld [vmem:[#allocation9 + $0xa0] sm:$0xf]  ;;  %1658 = vmatpush.bf16.msrb.mxu0 %v10413_v3  ;;  %14592 = vst [vmem:[#allocation70_spill] sm:$0xff] %v10427_v38  ;;  %v1041_v51 = vmul.f32 %v10369_v25, %v1040_v62  ;;  %v8546_v3 = vld [vmem:[#allocation9 + $0x94] sm:$0xf0]  ;;  %v1072_v40 = vperm.slane %v1070_v10, 0 }
 0x221   :  { %v10429_v60 = vor.u32 %v8548_v56, %v6945_v61  ;;  %v10445_v56 = vor.u32 %v8547_v33, %v6947_v2  ;;  %v6875_v62 = vld [vmem:[#allocation9 + $0x18] sm:$0xf0]  ;;  %v10456_v33 = vor.u32 %v8530_v12, %v6873_v24  ;;  %v8527_v24 = vld [vmem:[#allocation9 + $0x4] sm:$0xf]  ;;  %v6867_v12 = vld [vmem:[#allocation9 + $0x8] sm:$0xf0] }
 0x222   :  { %v1049_v19 = vmul.f32 0.5, %v1048_v48  ;;  %v10435_v48 = vor.u32 %v8531_v6, %v6883_v22  ;;  %1697 = vmatpush.bf16.msrb.mxu3 %v10421_v26  ;;  %v8545_v22 = vld [vmem:[#allocation9 + $0x94] sm:$0xf]  ;;  %v6939_v61 = vld [vmem:[#allocation9 + $0x98] sm:$0xf0]  ;;  %v1045_v2 = vsel %vm1044_vm4, %v10369_v25, %v1041_v51 }
 0x223   :  { %14593 = vst [vmem:[#allocation71_spill] sm:$0xff] %v10429_v60  ;;  %1672 = vmatpush.bf16.msrb.mxu1 %v10429_v60  ;;  %v6929_v26 = vld [vmem:[#allocation9 + $0x80] sm:$0xf]  ;;  %v6931_v60 = vld [vmem:[#allocation9 + $0x88] sm:$0xf0] }
 0x224   :  { %v1050_v54 = vsub.f32 1.5, %v1049_v19  ;;  %14594 = vst [vmem:[#allocation72_spill] sm:$0xff] %v10435_v48  ;;  %v6937_v19 = vld [vmem:[#allocation9 + $0x90] sm:$0xf]  ;;  %1659 = vmatpush.bf16.msrb.mxu0 %v10427_v38  ;;  %1685 = vmatpush.bf16.msrb.mxu2 %v10435_v48  ;;  %v10466_v38 = vor.u32 %v8545_v22, %v6939_v61  ;;  %v10472_v51 = vor.u32 %v8544_v35, %v6929_v26 }
 0x225   :  { %14595 = vst [vmem:[#allocation73_spill] sm:$0xff] %v10445_v56  ;;  %v10458_v31 = vor.u32 %v8546_v3, %v6937_v19  ;;  %v8543_v19 = vld [vmem:[#allocation9 + $0x84] sm:$0xf]  ;;  %v10475_v22 = vor.u32 %v8527_v24, %v6867_v12 }
 0x226   :  { %v1051_v9 = vmul.f32 %v10394_v47, %v1050_v54  ;;  %14596 = vst [vmem:[#allocation74_spill] sm:$0xff] %v10456_v33  ;;  %1698 = vmatpush.bf16.msrb.mxu3 %v10445_v56  ;;  %v8603_v56 = vld [vmem:[#allocation9 + $0x264] sm:$0xf] }
 0x227   :  { %14597 = vst [vmem:[#allocation75_spill] sm:$0xff] %v10458_v31  ;;  %1673 = vmatpush.bf16.msrb.mxu1 %v10458_v31  ;;  %v7105_v31 = vld [vmem:[#allocation9 + $0x2e0] sm:$0xf] }
 0x228   :  { %v1055_v6 = vsel %vm1054_vm0, %v10394_v47, %v1051_v9  ;;  %v6865_v47 = vld [vmem:[#allocation9] sm:$0xf]  ;;  %v10462_v9 = vor.u32 %v8529_v7, %v6875_v62  ;;  %14599 = vst [vmem:[#allocation77_spill] sm:$0xff] %v10466_v38  ;;  %1660 = vmatpush.bf16.msrb.mxu0 %v10456_v33  ;;  %v8620_v33 = vld [vmem:[#allocation9 + $0x2e4] sm:$0xf0] }
 0x229   :  { %v1058_v54 = vrot.slane %v1055_v6, 7  ;;  %v8528_v6 = vld [vmem:[#allocation9 + $0x4] sm:$0xf0]  ;;  %14601 = vst [vmem:[#allocation79_spill] sm:$0xff] %v10472_v51 }
 0x22a   :  { %14598 = vst [vmem:[#allocation76_spill] sm:$0xff] %v10462_v9  ;;  %v10470_v25 = vor.u32 %v8528_v6, %v6865_v47  ;;  %1686 = vmatpush.bf16.msrb.mxu2 %v10462_v9  ;;  %1699 = vmatpush.bf16.msrb.mxu3 %v10466_v38 }
 0x22b   :  { %v1060_v45 = vsel %vm14069_vm2, %v1045_v2, %v1058_v54  ;;  %v1073_v54 = vperm.slane %v1070_v10, 1  ;;  %14602 = vst [vmem:[#allocation80_spill] sm:$0xff] %v10475_v22  ;;  %1674 = vmatpush.bf16.msrb.mxu1 %v10472_v51  ;;  %v14605_v2 = vmov 0 }
 0x22c   :  { %v1062_v3 = vmul.f32 %v1060_v45, %v1033_v59  ;;  %14600 = vst [vmem:[#allocation78_spill] sm:$0xff] %v10470_v25  ;;  %v10478_v45 = vor.u32 %v8543_v19, %v6931_v60  ;;  %1661 = vmatpush.bf16.msrb.mxu0 %v10470_v25  ;;  %v14604_v60 = vlaneseq }
 0x22e   :  { %v1064_v7 = vperm.slane %v1062_v3, 0  ;;  %v1065_v62 = vperm.slane %v1062_v3, 1  ;;  %14603 = vst [vmem:[#allocation81_spill] sm:$0xff] %v10478_v45  ;;  %1687 = vmatpush.bf16.msrb.mxu2 %v10475_v22  ;;  %1700 = vmatpush.bf16.msrb.mxu3 %v10478_v45  ;;  %vm10487_vm5 = vcmp.lt.s32.totalorder %v14604_v60, 256  ;;  %v7051_v60 = vld [vmem:[#allocation9 + $0x278] sm:$0xf0] }
 0x22f   :  { %v14606_v2 = vsel %vm10487_vm5, 4294967295, %v14605_v2 }
 0x230   :  { %v1068_v59 = vmul.f32 %v1064_v7, %v10246_v34  ;;  %v1069_v61 = vmul.f32 %v1065_v62, %v10251_v29  ;;  %14607 = vst [vmem:[#allocation82_spill] sm:$0xff] %v14606_v2  ;;  %v8629_v2 = vld [vmem:[#allocation9 + $0x334] sm:$0xf] }
 0x232   :  { %v1076_v26 = vadd.f32 %v1072_v40, %v1068_v59  ;;  %v1077_v35 = vadd.f32 %v1073_v54, %v1069_v61  ;;  %v7049_v54 = vld [vmem:[#allocation9 + $0x270] sm:$0xf]  ;;  %v8606_v59 = vld [vmem:[#allocation9 + $0x274] sm:$0xf0] }
 0x233   :  { %v10499_v38 = vor.u32 %v8606_v59, %v7049_v54  ;;  %v7033_v54 = vld [vmem:[#allocation9 + $0x250] sm:$0xf]  ;;  %v8602_v59 = vld [vmem:[#allocation9 + $0x254] sm:$0xf0] }
 0x234   :  { %v1078_v10 = vmax.f32 %v1076_v26, 0.0  ;;  %v1079_v47 = vmax.f32 %v1077_v35, 0.0  ;;  %v7113_v35 = vld [vmem:[#allocation9 + $0x2f0] sm:$0xf] }
 0x235   :  { %14608 = vst [vmem:[#allocation83_spill] sm:$0xff] %v10499_v38 }
 0x236   :  { %1080 = vst [vmem:[#allocation3] sm:$0xff] %v1078_v10  ;;  %v8622_v10 = vld [vmem:[#allocation9 + $0x2f4] sm:$0xf0] }
 0x237   :  { %1081 = vst [vmem:[#allocation3 + $0x8] sm:$0xff] %v1079_v47  ;;  %v8605_v47 = vld [vmem:[#allocation9 + $0x274] sm:$0xf] }
 0x23e   :  { %v1082_v34 = vld [vmem:[#allocation3] ss:$8 sm:$0x3]  ;;  %v1091_v29 = vld [vmem:[#allocation3 + $0x1] ss:$8 sm:$0x3] }
 0x23f   :  { %1088 = vst.msk [vmem:[#allocation4 + $0x2] ss:$8 sm:$0x3] %vm10487_vm5, %v1082_v34  ;;  %v1096_v40 = vld [vmem:[#allocation3 + $0x2] ss:$8 sm:$0x3] }
 0x240   :  { %1093 = vst.msk [vmem:[#allocation4 + $0x4] ss:$8 sm:$0x3] %vm10487_vm5, %v1091_v29  ;;  %v1101_v6 = vld [vmem:[#allocation3 + $0x3] ss:$8 sm:$0x3] }
 0x241   :  { %1098 = vst.msk [vmem:[#allocation4 + $0x6] ss:$8 sm:$0x3] %vm10487_vm5, %v1096_v40  ;;  %v8621_v34 = vld [vmem:[#allocation9 + $0x2f4] sm:$0xf] }
 0x242   :  { %1103 = vst.msk [vmem:[#allocation4 + $0x10] ss:$8 sm:$0x3] %vm10487_vm5, %v1101_v6  ;;  %v7115_v6 = vld [vmem:[#allocation9 + $0x2f8] sm:$0xf0] }
 0x243   :  { %v10505_v9 = vor.u32 %v8621_v34, %v7115_v6  ;;  %v7099_v34 = vld [vmem:[#allocation9 + $0x2d8] sm:$0xf0]  ;;  %v1121_v28 = vld [vmem:[#allocation3 + $0x7] ss:$8 sm:$0x3] }
 0x244   :  { %1123 = vst.msk [vmem:[#allocation4 + $0x23] ss:$8 sm:$0x3] %vm10487_vm5, %v1121_v28  ;;  %v7225_v28 = vld [vmem:[#allocation9 + $0x3d0] sm:$0xf] }
 0x245   :  { %14611 = vst [vmem:[#allocation86_spill] sm:$0xff] %v10505_v9 }
 0x248   :  { %v1260_v24 = vld [vmem:[#allocation4] sm:$0xfe]  ;;  %v1261_v12 = vld [vmem:[#allocation4 + $0x8] sm:$0xfe] }
 0x249   :  { %v1262_v3 = vld [vmem:[#allocation4 + $0x10] sm:$0x1]  ;;  %v1263_v19 = vld [vmem:[#allocation4 + $0x18] sm:$0x1] }
 0x24a   :  { %v1264_v7 = vpack.c.bf16 %v1262_v3, %v1260_v24  ;;  %v1265_v62 = vpack.c.bf16 %v1263_v19, %v1261_v12  ;;  %v10501_v24 = vor.u32 %v8622_v10, %v7113_v35  ;;  %v7041_v12 = vld [vmem:[#allocation9 + $0x260] sm:$0xf]  ;;  %v8604_v3 = vld [vmem:[#allocation9 + $0x264] sm:$0xf0]  ;;  %v10503_v19 = vor.u32 %v8605_v47, %v7051_v60  ;;  %v8601_v10 = vld [vmem:[#allocation9 + $0x254] sm:$0xf] }
 0x24b   :  { %v7035_v47 = vld [vmem:[#allocation9 + $0x258] sm:$0xf0]  ;;  %v8617_v60 = vld [vmem:[#allocation9 + $0x2d4] sm:$0xf]  ;;  %v1709_v48 = vld [vmem:[#allocation4 + $0x18] sm:$0x3] }
 0x24c   :  { %v1269_v61 = vshll.u32 %v1264_v7, 16  ;;  %v1276_v26 = vshll.u32 %v1265_v62, 16  ;;  %v1267_v29 = vshrl.u32 %v1264_v7, 16  ;;  %v1274_v45 = vshrl.u32 %v1265_v62, 16  ;;  %14609 = vst [vmem:[#allocation84_spill] sm:$0xff] %v10501_v24 }
 0x24d   :  { %14610 = vst [vmem:[#allocation85_spill] sm:$0xff] %v10503_v19  ;;  %v7043_v7 = vld [vmem:[#allocation9 + $0x268] sm:$0xf0]  ;;  %v8619_v62 = vld [vmem:[#allocation9 + $0x2e4] sm:$0xf]  ;;  %v10529_v6 = vor.u32 %v8617_v60, %v7099_v34 }
 0x24e   :  { %v1271_v40 = vrot.slane %v1269_v61, 1  ;;  %v1278_v22 = vrot.slane %v1276_v26, 1  ;;  %v7107_v61 = vld [vmem:[#allocation9 + $0x2e8] sm:$0xf0]  ;;  %v10515_v26 = vor.u32 %v8603_v56, %v7043_v7  ;;  %v10527_v56 = vor.u32 %v8601_v10, %v7035_v47  ;;  %v8599_v7 = vld [vmem:[#allocation9 + $0x244] sm:$0xf] }
 0x24f   :  { %v10517_v35 = vor.u32 %v8619_v62, %v7107_v61  ;;  %14619 = vst [vmem:[#allocation94_spill] sm:$0xff] %v10529_v6  ;;  %v7027_v62 = vld [vmem:[#allocation9 + $0x248] sm:$0xf0]  ;;  %v8615_v61 = vld [vmem:[#allocation9 + $0x2c4] sm:$0xf] }
 0x250   :  { %v1272_v51 = vor.u32 %v1271_v40, %v1267_v29  ;;  %v1279_v25 = vor.u32 %v1278_v22, %v1274_v45  ;;  %v10509_v22 = vor.u32 %v8604_v3, %v7041_v12  ;;  %v10511_v45 = vor.u32 %v8620_v33, %v7105_v31  ;;  %14614 = vst [vmem:[#allocation89_spill] sm:$0xff] %v10515_v26  ;;  %v7025_v29 = vld [vmem:[#allocation9 + $0x240] sm:$0xf]  ;;  %v8600_v40 = vld [vmem:[#allocation9 + $0x244] sm:$0xf0] }
 0x251   :  { %14615 = vst [vmem:[#allocation90_spill] sm:$0xff] %v10517_v35  ;;  %v10521_v33 = vor.u32 %v8602_v59, %v7033_v54  ;;  %v7089_v12 = vld [vmem:[#allocation9 + $0x2c0] sm:$0xf]  ;;  %v8616_v3 = vld [vmem:[#allocation9 + $0x2c4] sm:$0xf0]  ;;  %v10533_v59 = vor.u32 %v8600_v40, %v7025_v29  ;;  %v10539_v60 = vor.u32 %v8599_v7, %v7027_v62 }
 0x252   :  { %1450 = vmatmul.bf16.vlgmr.msra.gmra.mxu0 %v1272_v51  ;;  %1463 = vmatmul.bf16.vlgmr.msra.gmra.mxu1 %v1279_v25  ;;  %14612 = vst [vmem:[#allocation87_spill] sm:$0xff] %v10509_v22  ;;  %v7017_v54 = vld [vmem:[#allocation9 + $0x230] sm:$0xf]  ;;  %v8614_v47 = vld [vmem:[#allocation9 + $0x2b4] sm:$0xf0] }
 0x253   :  { %1476 = vmatmul.bf16.vlgmr.msra.gmra.mxu2 %v1272_v51  ;;  %1489 = vmatmul.bf16.vlgmr.msra.gmra.mxu3 %v1279_v25  ;;  %14613 = vst [vmem:[#allocation88_spill] sm:$0xff] %v10511_v45  ;;  %v7097_v51 = vld [vmem:[#allocation9 + $0x2d0] sm:$0xf]  ;;  %v8618_v25 = vld [vmem:[#allocation9 + $0x2d4] sm:$0xf0] }
 0x254   :  { %1878 = vmatpush.bf16.msra.mxu0 %v10499_v38  ;;  %1891 = vmatpush.bf16.msra.mxu1 %v10501_v24  ;;  %14616 = vst [vmem:[#allocation91_spill] sm:$0xff] %v10521_v33  ;;  %v10523_v31 = vor.u32 %v8618_v25, %v7097_v51  ;;  %v10535_v51 = vor.u32 %v8616_v3, %v7089_v12  ;;  %v8598_v25 = vld [vmem:[#allocation9 + $0x234] sm:$0xf0]  ;;  %v7081_v10 = vld [vmem:[#allocation9 + $0x2b0] sm:$0xf] }
 0x255   :  { %1904 = vmatpush.bf16.msra.mxu2 %v10503_v19  ;;  %1917 = vmatpush.bf16.msra.mxu3 %v10505_v9  ;;  %14618 = vst [vmem:[#allocation93_spill] sm:$0xff] %v10527_v56  ;;  %v7083_v29 = vld [vmem:[#allocation9 + $0x2b8] sm:$0xf0]  ;;  %v10543_v40 = vor.u32 %v8598_v25, %v7017_v54  ;;  %v7009_v12 = vld [vmem:[#allocation9 + $0x220] sm:$0xf] }
 0x256   :  { %14617 = vst [vmem:[#allocation92_spill] sm:$0xff] %v10523_v31  ;;  %v8596_v7 = vld [vmem:[#allocation9 + $0x224] sm:$0xf0]  ;;  %v8595_v25 = vld [vmem:[#allocation9 + $0x224] sm:$0xf] }
 0x257   :  { %14620 = vst [vmem:[#allocation95_spill] sm:$0xff] %v10533_v59  ;;  %v8612_v62 = vld [vmem:[#allocation9 + $0x2a4] sm:$0xf0]  ;;  %v7011_v9 = vld [vmem:[#allocation9 + $0x228] sm:$0xf0] }
 0x258   :  { %1879 = vmatpush.bf16.msra.mxu0 %v10509_v22  ;;  %1892 = vmatpush.bf16.msra.mxu1 %v10511_v45  ;;  %v7091_v45 = vld [vmem:[#allocation9 + $0x2c8] sm:$0xf0]  ;;  %14621 = vst [vmem:[#allocation96_spill] sm:$0xff] %v10535_v51  ;;  %v7019_v22 = vld [vmem:[#allocation9 + $0x238] sm:$0xf0] }
 0x259   :  { %1905 = vmatpush.bf16.msra.mxu2 %v10515_v26  ;;  %1918 = vmatpush.bf16.msra.mxu3 %v10517_v35  ;;  %14622 = vst [vmem:[#allocation97_spill] sm:$0xff] %v10539_v60  ;;  %v10541_v34 = vor.u32 %v8615_v61, %v7091_v45  ;;  %v1256_v35 = vld [vmem:[#allocation4] sm:$0xff]  ;;  %v1257_v26 = vld [vmem:[#allocation4 + $0x8] sm:$0xff]  ;;  %v7073_v45 = vld [vmem:[#allocation9 + $0x2a0] sm:$0xf] }
 0x25a   :  { %14624 = vst [vmem:[#allocation99_spill] sm:$0xff] %v10543_v40  ;;  %v1258_v3 = vpack.c.bf16 %v1256_v35, %v1256_v35  ;;  %v7075_v35 = vld [vmem:[#allocation9 + $0x2a8] sm:$0xf0]  ;;  %v7177_v19 = vld [vmem:[#allocation9 + $0x370] sm:$0xf] }
 0x25b   :  { %14623 = vst [vmem:[#allocation98_spill] sm:$0xff] %v10541_v34  ;;  %v7241_v24 = vld [vmem:[#allocation9 + $0x3f0] sm:$0xf]  ;;  %v1707_v38 = vld [vmem:[#allocation4 + $0x8] sm:$0xfc] }
 0x25c   :  { %1880 = vmatpush.bf16.msra.mxu0 %v10521_v33  ;;  %1893 = vmatpush.bf16.msra.mxu1 %v10523_v31  ;;  %v8597_v33 = vld [vmem:[#allocation9 + $0x234] sm:$0xf] }
 0x25d   :  { %1906 = vmatpush.bf16.msra.mxu2 %v10527_v56  ;;  %1919 = vmatpush.bf16.msra.mxu3 %v10529_v6  ;;  %v8613_v31 = vld [vmem:[#allocation9 + $0x2b4] sm:$0xf]  ;;  %v1259_v56 = vpack.c.bf16 %v1257_v26, %v1257_v26  ;;  %v10547_v6 = vor.u32 %v8614_v47, %v7081_v10  ;;  %v10551_v61 = vor.u32 %v8597_v33, %v7019_v22  ;;  %v1106_v26 = vld [vmem:[#allocation3 + $0x4] ss:$8 sm:$0x3] }
 0x25e   :  { %v10553_v54 = vor.u32 %v8613_v31, %v7083_v29  ;;  %v7001_v10 = vld [vmem:[#allocation9 + $0x210] sm:$0xf]  ;;  %v10557_v47 = vor.u32 %v8596_v7, %v7009_v12  ;;  %v10559_v22 = vor.u32 %v8612_v62, %v7073_v45  ;;  %v8594_v33 = vld [vmem:[#allocation9 + $0x214] sm:$0xf0]  ;;  %v8609_v12 = vld [vmem:[#allocation9 + $0x294] sm:$0xf] }
 0x25f   :  { %14625 = vst [vmem:[#allocation100_spill] sm:$0xff] %v10547_v6  ;;  %v7065_v31 = vld [vmem:[#allocation9 + $0x290] sm:$0xf]  ;;  %v8610_v29 = vld [vmem:[#allocation9 + $0x294] sm:$0xf0] }
 0x260   :  { %1881 = vmatpush.bf16.msra.mxu0 %v10533_v59  ;;  %1894 = vmatpush.bf16.msra.mxu1 %v10535_v51  ;;  %14626 = vst [vmem:[#allocation101_spill] sm:$0xff] %v10551_v61  ;;  %v8611_v59 = vld [vmem:[#allocation9 + $0x2a4] sm:$0xf]  ;;  %v7067_v7 = vld [vmem:[#allocation9 + $0x298] sm:$0xf0] }
 0x261   :  { %1907 = vmatpush.bf16.msra.mxu2 %v10539_v60  ;;  %1920 = vmatpush.bf16.msra.mxu3 %v10541_v34  ;;  %14627 = vst [vmem:[#allocation102_spill] sm:$0xff] %v10553_v54  ;;  %v10563_v34 = vor.u32 %v8595_v25, %v7011_v9  ;;  %v6993_v45 = vld [vmem:[#allocation9 + $0x200] sm:$0xf]  ;;  %v8592_v62 = vld [vmem:[#allocation9 + $0x204] sm:$0xf0]  ;;  %v10573_v9 = vor.u32 %v8610_v29, %v7065_v31 }
 0x262   :  { %1662 = vmatmul.bf16.vlgmr.msrb.gmra.mxu0 %v1258_v3  ;;  %1675 = vmatmul.bf16.vlgmr.msrb.gmra.mxu1 %v1259_v56  ;;  %14628 = vst [vmem:[#allocation103_spill] sm:$0xff] %v10557_v47  ;;  %v8608_v60 = vld [vmem:[#allocation9 + $0x284] sm:$0xf0]  ;;  %v6995_v25 = vld [vmem:[#allocation9 + $0x208] sm:$0xf0]  ;;  %v10579_v51 = vor.u32 %v8609_v12, %v7067_v7 }
 0x263   :  { %1688 = vmatmul.bf16.vlgmr.msrb.gmra.mxu2 %v1258_v3  ;;  %1701 = vmatmul.bf16.vlgmr.msrb.gmra.mxu3 %v1259_v56  ;;  %14629 = vst [vmem:[#allocation104_spill] sm:$0xff] %v10559_v22  ;;  %v10565_v3 = vor.u32 %v8611_v59, %v7075_v35  ;;  %v8593_v56 = vld [vmem:[#allocation9 + $0x214] sm:$0xf]  ;;  %v8591_v59 = vld [vmem:[#allocation9 + $0x204] sm:$0xf] }
 0x264   :  { %1882 = vmatpush.bf16.msra.mxu0 %v10543_v40  ;;  %1895 = vmatpush.bf16.msra.mxu1 %v10547_v6  ;;  %14630 = vst [vmem:[#allocation105_spill] sm:$0xff] %v10563_v34  ;;  %v7003_v6 = vld [vmem:[#allocation9 + $0x218] sm:$0xf0]  ;;  %v7057_v40 = vld [vmem:[#allocation9 + $0x280] sm:$0xf] }
 0x265   :  { %1908 = vmatpush.bf16.msra.mxu2 %v10551_v61  ;;  %1921 = vmatpush.bf16.msra.mxu3 %v10553_v54  ;;  %14631 = vst [vmem:[#allocation106_spill] sm:$0xff] %v10565_v3  ;;  %v10571_v54 = vor.u32 %v8594_v33, %v7001_v10  ;;  %v8607_v35 = vld [vmem:[#allocation9 + $0x284] sm:$0xf]  ;;  %v7059_v61 = vld [vmem:[#allocation9 + $0x288] sm:$0xf0] }
 0x266   :  { %1108 = vst.msk [vmem:[#allocation4 + $0x15] ss:$8 sm:$0x3] %vm10487_vm5, %v1106_v26  ;;  %v10577_v26 = vor.u32 %v8593_v56, %v7003_v6  ;;  %v8637_v10 = vld [vmem:[#allocation9 + $0x374] sm:$0xf]  ;;  %v10585_v6 = vor.u32 %v8608_v60, %v7057_v40  ;;  %v10591_v53 = vor.u32 %v8607_v35, %v7059_v61 }
 0x267   :  { %14632 = vst [vmem:[#allocation107_spill] sm:$0xff] %v10571_v54  ;;  %v1706_v33 = vld [vmem:[#allocation4] sm:$0xfc]  ;;  %v1111_v31 = vld [vmem:[#allocation3 + $0x5] ss:$8 sm:$0x3] }
 0x268   :  { %1883 = vmatpush.bf16.msra.mxu0 %v10557_v47  ;;  %1896 = vmatpush.bf16.msra.mxu1 %v10559_v22  ;;  %14633 = vst [vmem:[#allocation108_spill] sm:$0xff] %v10573_v9  ;;  %v8638_v47 = vld [vmem:[#allocation9 + $0x374] sm:$0xf0]  ;;  %v1708_v29 = vld [vmem:[#allocation4 + $0x10] sm:$0x3] }
 0x269   :  { %1909 = vmatpush.bf16.msra.mxu2 %v10563_v34  ;;  %1922 = vmatpush.bf16.msra.mxu3 %v10565_v3  ;;  %14634 = vst [vmem:[#allocation109_spill] sm:$0xff] %v10577_v26  ;;  %v8654_v22 = vld [vmem:[#allocation9 + $0x3f4] sm:$0xf0]  ;;  %v10583_v34 = vor.u32 %v8592_v62, %v6993_v45  ;;  %v7179_v56 = vld [vmem:[#allocation9 + $0x378] sm:$0xf0]  ;;  %v10589_v3 = vor.u32 %v8591_v59, %v6995_v25 }
 0x26a   :  { %14635 = vst [vmem:[#allocation110_spill] sm:$0xff] %v10579_v51  ;;  %v8653_v12 = vld [vmem:[#allocation9 + $0x3f4] sm:$0xf]  ;;  %v7243_v7 = vld [vmem:[#allocation9 + $0x3f8] sm:$0xf0]  ;;  %v10595_v60 = vor.u32 %v8638_v47, %v7177_v19  ;;  %v10597_v40 = vor.u32 %v8654_v22, %v7241_v24  ;;  %v1710_v62 = vpack.c.bf16 %v1708_v29, %v1706_v33  ;;  %v10613_v24 = vor.u32 %v8636_v0, %v7169_v50 }
 0x26b   :  { %1113 = vst.msk [vmem:[#allocation4 + $0x17] ss:$8 sm:$0x3] %vm10487_vm5, %v1111_v31  ;;  %v1116_v45 = vld [vmem:[#allocation3 + $0x6] ss:$8 sm:$0x3]  ;;  %v10601_v59 = vor.u32 %v8653_v12, %v7243_v7 }
 0x26c   :  { %1884 = vmatpush.bf16.msra.mxu0 %v10571_v54  ;;  %1897 = vmatpush.bf16.msra.mxu1 %v10573_v9  ;;  %v7233_v54 = vld [vmem:[#allocation9 + $0x3e0] sm:$0xf]  ;;  %v1711_v9 = vpack.c.bf16 %v1709_v48, %v1707_v38  ;;  %v8635_v61 = vld [vmem:[#allocation9 + $0x364] sm:$0xf]  ;;  %v7171_v25 = vld [vmem:[#allocation9 + $0x368] sm:$0xf0] }
 0x26d   :  { %1910 = vmatpush.bf16.msra.mxu2 %v10577_v26  ;;  %1923 = vmatpush.bf16.msra.mxu3 %v10579_v51  ;;  %v8652_v26 = vld [vmem:[#allocation9 + $0x3e4] sm:$0xf0]  ;;  %v10599_v51 = vor.u32 %v8637_v10, %v7179_v56  ;;  %v8651_v35 = vld [vmem:[#allocation9 + $0x3e4] sm:$0xf]  ;;  %v7235_v31 = vld [vmem:[#allocation9 + $0x3e8] sm:$0xf0]  ;;  %v10619_v10 = vor.u32 %v8635_v61, %v7171_v25 }
 0x26e   :  { %1118 = vst.msk [vmem:[#allocation4 + $0x21] ss:$8 sm:$0x3] %vm10487_vm5, %v1116_v45  ;;  %v1714_v38 = vrot.slane %v1710_v62, 1  ;;  %v1715_v48 = vrot.slane %v1711_v9, 1  ;;  %v10615_v19 = vor.u32 %v8652_v26, %v7233_v54  ;;  %v10621_v33 = vor.u32 %v8651_v35, %v7235_v31 }
 0x26f   :  { %14636 = vst [vmem:[#allocation111_spill] sm:$0xff] %v10613_v24  ;;  %v7161_v47 = vld [vmem:[#allocation9 + $0x350] sm:$0xf]  ;;  %v8634_v22 = vld [vmem:[#allocation9 + $0x354] sm:$0xf0] }
 0x270   :  { %1885 = vmatpush.bf16.msra.mxu0 %v10583_v34  ;;  %1898 = vmatpush.bf16.msra.mxu1 %v10585_v6  ;;  %14637 = vst [vmem:[#allocation112_spill] sm:$0xff] %v10615_v19  ;;  %v8650_v29 = vld [vmem:[#allocation9 + $0x3d4] sm:$0xf0]  ;;  %v8633_v56 = vld [vmem:[#allocation9 + $0x354] sm:$0xf]  ;;  %v10625_v54 = vor.u32 %v8634_v22, %v7161_v47 }
 0x271   :  { %1911 = vmatpush.bf16.msra.mxu2 %v10589_v3  ;;  %1924 = vmatpush.bf16.msra.mxu3 %v10591_v53  ;;  %14638 = vst [vmem:[#allocation113_spill] sm:$0xff] %v10619_v10  ;;  %v7163_v9 = vld [vmem:[#allocation9 + $0x358] sm:$0xf0]  ;;  %v8649_v0 = vld [vmem:[#allocation9 + $0x3d4] sm:$0xf]  ;;  %v10627_v26 = vor.u32 %v8650_v29, %v7225_v28 }
 0x272   :  { %14639 = vst [vmem:[#allocation114_spill] sm:$0xff] %v10621_v33  ;;  %v7227_v50 = vld [vmem:[#allocation9 + $0x3d8] sm:$0xf0]  ;;  %v7153_v12 = vld [vmem:[#allocation9 + $0x340] sm:$0xf]  ;;  %v10631_v45 = vor.u32 %v8633_v56, %v7163_v9 }
 0x273   :  { %1886 = vmatmul.bf16.vlgmr.msra.gmra.mxu0 %v1714_v38  ;;  %1899 = vmatmul.bf16.vlgmr.msra.gmra.mxu1 %v1715_v48  ;;  %14640 = vst [vmem:[#allocation115_spill] sm:$0xff] %v10625_v54  ;;  %v8632_v7 = vld [vmem:[#allocation9 + $0x344] sm:$0xf0]  ;;  %v10633_v62 = vor.u32 %v8649_v0, %v7227_v50  ;;  %v7217_v61 = vld [vmem:[#allocation9 + $0x3c0] sm:$0xf] }
 0x274   :  { %2116 = vmatpush.bf16.msrb.mxu0 %v10595_v60  ;;  %2129 = vmatpush.bf16.msrb.mxu1 %v10597_v40  ;;  %14641 = vst [vmem:[#allocation116_spill] sm:$0xff] %v10627_v26  ;;  %v8648_v25 = vld [vmem:[#allocation9 + $0x3c4] sm:$0xf0]  ;;  %v8631_v35 = vld [vmem:[#allocation9 + $0x344] sm:$0xf]  ;;  %v10637_v47 = vor.u32 %v8632_v7, %v7153_v12 }
 0x275   :  { %2142 = vmatpush.bf16.msrb.mxu2 %v10599_v51  ;;  %2155 = vmatpush.bf16.msrb.mxu3 %v10601_v59  ;;  %14642 = vst [vmem:[#allocation117_spill] sm:$0xff] %v10631_v45  ;;  %v7155_v31 = vld [vmem:[#allocation9 + $0x348] sm:$0xf0]  ;;  %v10639_v22 = vor.u32 %v8648_v25, %v7217_v61  ;;  %v7145_v28 = vld [vmem:[#allocation9 + $0x330] sm:$0xf] }
 0x276   :  { %1912 = vmatmul.bf16.vlgmr.msra.gmra.mxu2 %v1714_v38  ;;  %1925 = vmatmul.bf16.vlgmr.msra.gmra.mxu3 %v1715_v48  ;;  %14643 = vst [vmem:[#allocation118_spill] sm:$0xff] %v10633_v62  ;;  %v8647_v38 = vld [vmem:[#allocation9 + $0x3c4] sm:$0xf]  ;;  %v7219_v48 = vld [vmem:[#allocation9 + $0x3c8] sm:$0xf0]  ;;  %v10643_v56 = vor.u32 %v8631_v35, %v7155_v31 }
 0x277   :  { %14644 = vst [vmem:[#allocation119_spill] sm:$0xff] %v10637_v47  ;;  %v8630_v29 = vld [vmem:[#allocation9 + $0x334] sm:$0xf0]  ;;  %v10645_v9 = vor.u32 %v8647_v38, %v7219_v48  ;;  %v7209_v0 = vld [vmem:[#allocation9 + $0x3b0] sm:$0xf] }
 0x278   :  { %2117 = vmatpush.bf16.msrb.mxu0 %v10613_v24  ;;  %2130 = vmatpush.bf16.msrb.mxu1 %v10615_v19  ;;  %14645 = vst [vmem:[#allocation120_spill] sm:$0xff] %v10639_v22  ;;  %v8646_v50 = vld [vmem:[#allocation9 + $0x3b4] sm:$0xf0]  ;;  %v1932_v12 = vld [vmem:[#allocation4] sm:$0xf8]  ;;  %v10649_v25 = vor.u32 %v8630_v29, %v7145_v28 }
 0x279   :  { %2143 = vmatpush.bf16.msrb.mxu2 %v10619_v10  ;;  %2156 = vmatpush.bf16.msrb.mxu3 %v10621_v33  ;;  %14646 = vst [vmem:[#allocation121_spill] sm:$0xff] %v10643_v56  ;;  %v8645_v33 = vld [vmem:[#allocation9 + $0x3b4] sm:$0xf]  ;;  %v1934_v7 = vld [vmem:[#allocation4 + $0x10] sm:$0x7] }
 0x27a   :  { %14647 = vst [vmem:[#allocation122_spill] sm:$0xff] %v10645_v9  ;;  %v1933_v61 = vld [vmem:[#allocation4 + $0x8] sm:$0xf8]  ;;  %v7137_v35 = vld [vmem:[#allocation9 + $0x320] sm:$0xf]  ;;  %v1936_v29 = vpack.c.bf16 %v1934_v7, %v1932_v12 }
 0x27b   :  { %14648 = vst [vmem:[#allocation123_spill] sm:$0xff] %v10649_v25  ;;  %v8628_v31 = vld [vmem:[#allocation9 + $0x324] sm:$0xf0]  ;;  %v7201_v10 = vld [vmem:[#allocation9 + $0x3a0] sm:$0xf] }
 0x27c   :  { %2118 = vmatpush.bf16.msrb.mxu0 %v10625_v54  ;;  %2131 = vmatpush.bf16.msrb.mxu1 %v10627_v26  ;;  %v7147_v54 = vld [vmem:[#allocation9 + $0x338] sm:$0xf0]  ;;  %v1935_v38 = vld [vmem:[#allocation4 + $0x18] sm:$0x7]  ;;  %v7139_v24 = vld [vmem:[#allocation9 + $0x328] sm:$0xf0] }
 0x27d   :  { %2144 = vmatpush.bf16.msrb.mxu2 %v10631_v45  ;;  %2157 = vmatpush.bf16.msrb.mxu3 %v10633_v62  ;;  %v7211_v26 = vld [vmem:[#allocation9 + $0x3b8] sm:$0xf0]  ;;  %v10651_v62 = vor.u32 %v8646_v50, %v7209_v0  ;;  %v10655_v48 = vor.u32 %v8629_v2, %v7147_v54  ;;  %v8644_v19 = vld [vmem:[#allocation9 + $0x3a4] sm:$0xf0]  ;;  %v7203_v28 = vld [vmem:[#allocation9 + $0x3a8] sm:$0xf0]  ;;  %v10661_v0 = vor.u32 %v8628_v31, %v7137_v35 }
 0x27e   :  { %v10657_v45 = vor.u32 %v8645_v33, %v7211_v26  ;;  %v10663_v50 = vor.u32 %v8644_v19, %v7201_v10  ;;  %v8626_v2 = vld [vmem:[#allocation9 + $0x314] sm:$0xf0]  ;;  %v1937_v54 = vpack.c.bf16 %v1935_v38, %v1933_v61  ;;  %v7193_v12 = vld [vmem:[#allocation9 + $0x390] sm:$0xf]  ;;  %v7195_v35 = vld [vmem:[#allocation9 + $0x398] sm:$0xf0] }
 0x27f   :  { %14649 = vst [vmem:[#allocation124_spill] sm:$0xff] %v10651_v62  ;;  %v8642_v7 = vld [vmem:[#allocation9 + $0x394] sm:$0xf0]  ;;  %v1939_v31 = vshrl.u32 %v1936_v29, 16  ;;  %v1942_v19 = vshll.u32 %v1936_v29, 16 }
 0x280   :  { %2119 = vmatpush.bf16.msrb.mxu0 %v10637_v47  ;;  %2132 = vmatpush.bf16.msrb.mxu1 %v10639_v22  ;;  %14650 = vst [vmem:[#allocation125_spill] sm:$0xff] %v10655_v48  ;;  %v8627_v47 = vld [vmem:[#allocation9 + $0x324] sm:$0xf]  ;;  %v10675_v61 = vor.u32 %v8642_v7, %v7193_v12  ;;  %v1950_v38 = vshll.u32 %v1937_v54, 16  ;;  %v7185_v29 = vld [vmem:[#allocation9 + $0x380] sm:$0xf] }
 0x281   :  { %2145 = vmatpush.bf16.msrb.mxu2 %v10643_v56  ;;  %2158 = vmatpush.bf16.msrb.mxu3 %v10645_v9  ;;  %14651 = vst [vmem:[#allocation126_spill] sm:$0xff] %v10657_v45  ;;  %v8643_v22 = vld [vmem:[#allocation9 + $0x3a4] sm:$0xf]  ;;  %v7129_v9 = vld [vmem:[#allocation9 + $0x310] sm:$0xf]  ;;  %v10667_v33 = vor.u32 %v8627_v47, %v7139_v24  ;;  %v1944_v7 = vrot.slane %v1942_v19, 2 }
 0x282   :  { %14652 = vst [vmem:[#allocation127_spill] sm:$0xff] %v10661_v0  ;;  %v10669_v26 = vor.u32 %v8643_v22, %v7203_v28  ;;  %v7131_v56 = vld [vmem:[#allocation9 + $0x318] sm:$0xf0]  ;;  %v10673_v10 = vor.u32 %v8626_v2, %v7129_v9  ;;  %v7121_v24 = vld [vmem:[#allocation9 + $0x300] sm:$0xf]  ;;  %v1947_v22 = vshrl.u32 %v1937_v54, 16 }
 0x283   :  { %14653 = vst [vmem:[#allocation128_spill] sm:$0xff] %v10663_v50  ;;  %v8624_v47 = vld [vmem:[#allocation9 + $0x304] sm:$0xf0]  ;;  %v8639_v9 = vld [vmem:[#allocation9 + $0x384] sm:$0xf] }
 0x284   :  { %2120 = vmatpush.bf16.msrb.mxu0 %v10649_v25  ;;  %2133 = vmatpush.bf16.msrb.mxu1 %v10651_v62  ;;  %14654 = vst [vmem:[#allocation129_spill] sm:$0xff] %v10669_v26  ;;  %v8625_v25 = vld [vmem:[#allocation9 + $0x314] sm:$0xf]  ;;  %v7187_v2 = vld [vmem:[#allocation9 + $0x388] sm:$0xf0]  ;;  %v10685_v12 = vor.u32 %v8624_v47, %v7121_v24  ;;  %v14676_v24 = vld [vmem:[#allocation70_spill] sm:$0xff] }
 0x285   :  { %2146 = vmatpush.bf16.msrb.mxu2 %v10655_v48  ;;  %2159 = vmatpush.bf16.msrb.mxu3 %v10657_v45  ;;  %v8641_v62 = vld [vmem:[#allocation9 + $0x394] sm:$0xf]  ;;  %v10679_v28 = vor.u32 %v8625_v25, %v7131_v56  ;;  %v8623_v48 = vld [vmem:[#allocation9 + $0x304] sm:$0xf]  ;;  %v10693_v56 = vor.u32 %v8639_v9, %v7187_v2  ;;  %v1941_v25 = vrot.slane %v1939_v31, 1 }
 0x286   :  { %v10681_v45 = vor.u32 %v8641_v62, %v7195_v35  ;;  %v1949_v35 = vrot.slane %v1947_v22, 1  ;;  %v14677_v47 = vld [vmem:[#allocation71_spill] sm:$0xff]  ;;  %v14678_v22 = vld [vmem:[#allocation72_spill] sm:$0xff] }
 0x288   :  { %2121 = vmatpush.bf16.msrb.mxu0 %v10661_v0  ;;  %2134 = vmatpush.bf16.msrb.mxu1 %v10663_v50  ;;  %v8640_v0 = vld [vmem:[#allocation9 + $0x384] sm:$0xf0]  ;;  %v7123_v50 = vld [vmem:[#allocation9 + $0x308] sm:$0xf0] }
 0x289   :  { %2147 = vmatpush.bf16.msrb.mxu2 %v10667_v33  ;;  %2160 = vmatpush.bf16.msrb.mxu3 %v10669_v26  ;;  %v10687_v54 = vor.u32 %v8640_v0, %v7185_v29  ;;  %v10691_v62 = vor.u32 %v8623_v48, %v7123_v50  ;;  %v1952_v26 = vrot.slane %v1950_v38, 2  ;;  %v1945_v48 = vor.u32 %v1944_v7, %v1941_v25  ;;  %v14674_v50 = vld [vmem:[#allocation68_spill] sm:$0xff]  ;;  %v14679_v38 = vld [vmem:[#allocation73_spill] sm:$0xff]  ;;  %v14680_v7 = vld [vmem:[#allocation74_spill] sm:$0xff] }
 0x28b   :  { %v1953_v0 = vor.u32 %v1952_v26, %v1949_v35  ;;  %v14675_v26 = vld [vmem:[#allocation69_spill] sm:$0xff]  ;;  %v14681_v35 = vld [vmem:[#allocation75_spill] sm:$0xff] }
 0x28c   :  { %2122 = vmatpush.bf16.msrb.mxu0 %v10673_v10  ;;  %2135 = vmatpush.bf16.msrb.mxu1 %v10675_v61 }
 0x28d   :  { %2148 = vmatpush.bf16.msrb.mxu2 %v10679_v28  ;;  %2161 = vmatpush.bf16.msrb.mxu3 %v10681_v45 }
 0x290   :  { %2123 = vmatpush.bf16.msrb.mxu0 %v10685_v12  ;;  %2136 = vmatpush.bf16.msrb.mxu1 %v10687_v54 }
 0x291   :  { %2149 = vmatpush.bf16.msrb.mxu2 %v10691_v62  ;;  %2162 = vmatpush.bf16.msrb.mxu3 %v10693_v56 }
 0x293   :  { %2124 = vmatmul.bf16.vlgmr.msrb.gmra.mxu0 %v1945_v48  ;;  %2137 = vmatmul.bf16.vlgmr.msrb.gmra.mxu1 %v1953_v0 }
 0x294   :  { %2190 = vmatpush.bf16.msra.mxu0 %v10255_v15  ;;  %2203 = vmatpush.bf16.msra.mxu1 %v10257_v20  ;;  %v2178_v15 = vld [vmem:[#allocation4 + $0x10] sm:$0xf0]  ;;  %v2180_v20 = vld [vmem:[#allocation4 + $0x20] sm:$0xf] }
 0x295   :  { %2216 = vmatpush.bf16.msra.mxu2 %v10259_v21  ;;  %2229 = vmatpush.bf16.msra.mxu3 %v10262_v37  ;;  %v2179_v21 = vld [vmem:[#allocation4 + $0x18] sm:$0xf0]  ;;  %v2181_v37 = vld [vmem:[#allocation4 + $0x28] sm:$0xf] }
 0x296   :  { %2150 = vmatmul.bf16.vlgmr.msrb.gmra.mxu2 %v1945_v48  ;;  %2163 = vmatmul.bf16.vlgmr.msrb.gmra.mxu3 %v1953_v0  ;;  %v14682_v48 = vld [vmem:[#allocation76_spill] sm:$0xff]  ;;  %v14683_v0 = vld [vmem:[#allocation77_spill] sm:$0xff] }
 0x298   :  { %2191 = vmatpush.bf16.msra.mxu0 %v10267_v8  ;;  %2204 = vmatpush.bf16.msra.mxu1 %v10269_v13  ;;  %v2182_v8 = vpack.c.bf16 %v2180_v20, %v2178_v15  ;;  %v2183_v13 = vpack.c.bf16 %v2181_v37, %v2179_v21 }
 0x299   :  { %2217 = vmatpush.bf16.msra.mxu2 %v10271_v18  ;;  %2230 = vmatpush.bf16.msra.mxu3 %v10274_v30  ;;  %v14655_v18 = vld [vmem:[#allocation43_spill] sm:$0xff]  ;;  %v14656_v30 = vld [vmem:[#allocation46_spill] sm:$0xff] }
 0x29c   :  { %2192 = vmatpush.bf16.msra.mxu0 %v10279_v5  ;;  %2205 = vmatpush.bf16.msra.mxu1 %v10281_v16  ;;  %v14657_v5 = vld [vmem:[#allocation44_spill] sm:$0xff]  ;;  %v2186_v16 = vrot.slane %v2182_v8, 2  ;;  %v14684_v8 = vld [vmem:[#allocation78_spill] sm:$0xff] }
 0x29d   :  { %2218 = vmatpush.bf16.msra.mxu2 %v10283_v42  ;;  %2231 = vmatpush.bf16.msra.mxu3 %v10286_v11  ;;  %v2187_v42 = vrot.slane %v2183_v13, 2  ;;  %v14658_v11 = vld [vmem:[#allocation47_spill] sm:$0xff] }
 0x29e   :  { %v14685_v13 = vld [vmem:[#allocation79_spill] sm:$0xff] }
 0x2a0   :  { %2193 = vmatpush.bf16.msra.mxu0 %v10291_v1  ;;  %2206 = vmatpush.bf16.msra.mxu1 %v10293_v17  ;;  %v14659_v1 = vld [vmem:[#allocation50_spill] sm:$0xff]  ;;  %v14660_v17 = vld [vmem:[#allocation52_spill] sm:$0xff] }
 0x2a1   :  { %2219 = vmatpush.bf16.msra.mxu2 %v10295_v46  ;;  %2232 = vmatpush.bf16.msra.mxu3 %v10298_v39  ;;  %v14661_v46 = vld [vmem:[#allocation51_spill] sm:$0xff]  ;;  %v14662_v39 = vld [vmem:[#allocation53_spill] sm:$0xff] }
 0x2a4   :  { %2194 = vmatpush.bf16.msra.mxu0 %v10303_v55  ;;  %2207 = vmatpush.bf16.msra.mxu1 %v10305_v58  ;;  %v14663_v55 = vld [vmem:[#allocation55_spill] sm:$0xff]  ;;  %v14664_v58 = vld [vmem:[#allocation57_spill] sm:$0xff] }
 0x2a5   :  { %2220 = vmatpush.bf16.msra.mxu2 %v10308_v52  ;;  %2233 = vmatpush.bf16.msra.mxu3 %v10310_v57  ;;  %v14665_v52 = vld [vmem:[#allocation58_spill] sm:$0xff]  ;;  %v14666_v57 = vld [vmem:[#allocation60_spill] sm:$0xff] }
 0x2a8   :  { %2195 = vmatpush.bf16.msra.mxu0 %v10315_v49  ;;  %2208 = vmatpush.bf16.msra.mxu1 %v10317_v23  ;;  %v14667_v49 = vld [vmem:[#allocation61_spill] sm:$0xff]  ;;  %v14668_v23 = vld [vmem:[#allocation62_spill] sm:$0xff] }
 0x2a9   :  { %2221 = vmatpush.bf16.msra.mxu2 %v10319_v36  ;;  %2234 = vmatpush.bf16.msra.mxu3 %v10322_v4  ;;  %v14669_v36 = vld [vmem:[#allocation63_spill] sm:$0xff]  ;;  %v14670_v4 = vld [vmem:[#allocation64_spill] sm:$0xff] }
 0x2ac   :  { %2196 = vmatpush.bf16.msra.mxu0 %v10327_v63  ;;  %2209 = vmatpush.bf16.msra.mxu1 %v10329_v14  ;;  %v14671_v63 = vld [vmem:[#allocation65_spill] sm:$0xff]  ;;  %v2172_v14 = vld [vmem:[#allocation4 + $0x10] sm:$0xf8] }
 0x2ad   :  { %2222 = vmatpush.bf16.msra.mxu2 %v10331_v43  ;;  %2235 = vmatpush.bf16.msra.mxu3 %v10334_v27  ;;  %v2174_v43 = vld [vmem:[#allocation4 + $0x20] sm:$0x7]  ;;  %v2173_v27 = vld [vmem:[#allocation4 + $0x18] sm:$0xf8] }
 0x2ae   :  { %v2176_v31 = vpack.c.bf16 %v2174_v43, %v2172_v14 }
 0x2b0   :  { %2197 = vmatpush.bf16.msra.mxu0 %v10341_v41  ;;  %2210 = vmatpush.bf16.msra.mxu1 %v10343_v44  ;;  %v2175_v41 = vld [vmem:[#allocation4 + $0x28] sm:$0x7]  ;;  %v2243_v29 = vshrl.u32 %v2176_v31, 16  ;;  %v2246_v9 = vshll.u32 %v2176_v31, 16 }
 0x2b1   :  { %2223 = vmatpush.bf16.msra.mxu2 %v10347_v32  ;;  %2236 = vmatpush.bf16.msra.mxu3 %v14655_v18  ;;  %v14672_v44 = vld [vmem:[#allocation66_spill] sm:$0xff]  ;;  %v14673_v32 = vld [vmem:[#allocation67_spill] sm:$0xff]  ;;  %v2177_v19 = vpack.c.bf16 %v2175_v41, %v2173_v27  ;;  %v14686_v18 = vld [vmem:[#allocation80_spill] sm:$0xff] }
 0x2b2   :  { %v2245_v15 = vrot.slane %v2243_v29, 1  ;;  %v2248_v20 = vrot.slane %v2246_v9, 2  ;;  %v14703_v31 = vld [vmem:[#allocation98_spill] sm:$0xff]  ;;  %v14705_v29 = vld [vmem:[#allocation100_spill] sm:$0xff]  ;;  %v14706_v9 = vld [vmem:[#allocation101_spill] sm:$0xff] }
 0x2b3   :  { %2198 = vmatmul.bf16.vlgmr.msra.gmra.mxu0 %v2186_v16  ;;  %2211 = vmatmul.bf16.vlgmr.msra.gmra.mxu1 %v2187_v42  ;;  %v2251_v2 = vshrl.u32 %v2177_v19, 16  ;;  %v2254_v25 = vshll.u32 %v2177_v19, 16  ;;  %v2312_v19 = vld [vmem:[#allocation4 + $0x10] sm:$0xe0] }
 0x2b4   :  { %2260 = vmatpush.bf16.msrb.mxu0 %v14656_v30  ;;  %2273 = vmatpush.bf16.msrb.mxu1 %v14657_v5  ;;  %v14687_v30 = vld [vmem:[#allocation81_spill] sm:$0xff]  ;;  %v14688_v5 = vld [vmem:[#allocation83_spill] sm:$0xff] }
 0x2b5   :  { %2286 = vmatpush.bf16.msrb.mxu2 %v14658_v11  ;;  %2299 = vmatpush.bf16.msrb.mxu3 %v14659_v1  ;;  %v2253_v21 = vrot.slane %v2251_v2, 1  ;;  %v2256_v37 = vrot.slane %v2254_v25, 2  ;;  %v14690_v1 = vld [vmem:[#allocation85_spill] sm:$0xff]  ;;  %v14707_v2 = vld [vmem:[#allocation102_spill] sm:$0xff] }
 0x2b6   :  { %2224 = vmatmul.bf16.vlgmr.msra.gmra.mxu2 %v2186_v16  ;;  %2237 = vmatmul.bf16.vlgmr.msra.gmra.mxu3 %v2187_v42  ;;  %v14689_v16 = vld [vmem:[#allocation84_spill] sm:$0xff]  ;;  %v2249_v42 = vor.u32 %v2248_v20, %v2245_v15  ;;  %v14708_v20 = vld [vmem:[#allocation103_spill] sm:$0xff] }
 0x2b7   :  { %v2257_v11 = vor.u32 %v2256_v37, %v2253_v21  ;;  %v14709_v21 = vld [vmem:[#allocation104_spill] sm:$0xff] }
 0x2b8   :  { %2261 = vmatpush.bf16.msrb.mxu0 %v14660_v17  ;;  %2274 = vmatpush.bf16.msrb.mxu1 %v14661_v46  ;;  %v14691_v17 = vld [vmem:[#allocation86_spill] sm:$0xff] }
 0x2b9   :  { %2287 = vmatpush.bf16.msrb.mxu2 %v14662_v39  ;;  %2300 = vmatpush.bf16.msrb.mxu3 %v14663_v55  ;;  %v14692_v55 = vld [vmem:[#allocation87_spill] sm:$0xff] }
 0x2bc   :  { %2262 = vmatpush.bf16.msrb.mxu0 %v14664_v58  ;;  %2275 = vmatpush.bf16.msrb.mxu1 %v14665_v52  ;;  %v14693_v58 = vld [vmem:[#allocation88_spill] sm:$0xff] }
 0x2bd   :  { %2288 = vmatpush.bf16.msrb.mxu2 %v14666_v57  ;;  %2301 = vmatpush.bf16.msrb.mxu3 %v14667_v49  ;;  %v14694_v57 = vld [vmem:[#allocation89_spill] sm:$0xff]  ;;  %v14695_v49 = vld [vmem:[#allocation90_spill] sm:$0xff] }
 0x2c0   :  { %2263 = vmatpush.bf16.msrb.mxu0 %v14668_v23  ;;  %2276 = vmatpush.bf16.msrb.mxu1 %v14669_v36  ;;  %v14696_v23 = vld [vmem:[#allocation91_spill] sm:$0xff]  ;;  %v14697_v36 = vld [vmem:[#allocation92_spill] sm:$0xff] }
 0x2c1   :  { %2289 = vmatpush.bf16.msrb.mxu2 %v14670_v4  ;;  %2302 = vmatpush.bf16.msrb.mxu3 %v14671_v63  ;;  %v14698_v4 = vld [vmem:[#allocation93_spill] sm:$0xff]  ;;  %v14699_v63 = vld [vmem:[#allocation94_spill] sm:$0xff] }
 0x2c4   :  { %2264 = vmatpush.bf16.msrb.mxu0 %v14672_v44  ;;  %2277 = vmatpush.bf16.msrb.mxu1 %v14673_v32  ;;  %v14700_v32 = vld [vmem:[#allocation95_spill] sm:$0xff] }
 0x2c5   :  { %2290 = vmatpush.bf16.msrb.mxu2 %v14674_v50  ;;  %2303 = vmatpush.bf16.msrb.mxu3 %v14675_v26  ;;  %v14701_v50 = vld [vmem:[#allocation96_spill] sm:$0xff]  ;;  %v14702_v26 = vld [vmem:[#allocation97_spill] sm:$0xff] }
 0x2c8   :  { %2265 = vmatpush.bf16.msrb.mxu0 %v14676_v24  ;;  %2278 = vmatpush.bf16.msrb.mxu1 %v14677_v47  ;;  %v2314_v24 = vld [vmem:[#allocation4 + $0x20] sm:$0x1f]  ;;  %v2313_v47 = vld [vmem:[#allocation4 + $0x18] sm:$0xe0] }
 0x2c9   :  { %2291 = vmatpush.bf16.msrb.mxu2 %v14678_v22  ;;  %2304 = vmatpush.bf16.msrb.mxu3 %v14679_v38  ;;  %v2315_v22 = vld [vmem:[#allocation4 + $0x28] sm:$0x1f]  ;;  %v14704_v38 = vld [vmem:[#allocation99_spill] sm:$0xff]  ;;  %v2316_v25 = vpack.c.bf16 %v2314_v24, %v2312_v19  ;;  %v14725_v19 = vld [vmem:[#allocation120_spill] sm:$0xff] }
 0x2ca   :  { %v14726_v24 = vld [vmem:[#allocation121_spill] sm:$0xff] }
 0x2cc   :  { %2266 = vmatpush.bf16.msrb.mxu0 %v14680_v7  ;;  %2279 = vmatpush.bf16.msrb.mxu1 %v14681_v35 }
 0x2cd   :  { %2292 = vmatpush.bf16.msrb.mxu2 %v14682_v48  ;;  %2305 = vmatpush.bf16.msrb.mxu3 %v14683_v0  ;;  %v2317_v48 = vpack.c.bf16 %v2315_v22, %v2313_v47  ;;  %v14727_v47 = vld [vmem:[#allocation122_spill] sm:$0xff] }
 0x2cf   :  { %v1451_v46 = vpop.f32.mrf.mxu0  ;;  %v1464_v39 = vpop.f32.mrf.mxu1 }
 0x2d0   :  { %2267 = vmatpush.bf16.msrb.mxu0 %v14684_v8  ;;  %2280 = vmatpush.bf16.msrb.mxu1 %v14685_v13  ;;  %v1465_v52 = vadd.f32 %v1464_v39, %v1451_v46  ;;  %v14710_v8 = vld [vmem:[#allocation105_spill] sm:$0xff]  ;;  %v14711_v13 = vld [vmem:[#allocation106_spill] sm:$0xff] }
 0x2d1   :  { %2293 = vmatpush.bf16.msrb.mxu2 %v14686_v18  ;;  %2306 = vmatpush.bf16.msrb.mxu3 %v14687_v30  ;;  %v2319_v18 = vshrl.u32 %v2316_v25, 16  ;;  %v14715_v46 = vld [vmem:[#allocation110_spill] sm:$0xff] }
 0x2d3   :  { %2268 = vmatmul.bf16.vlgmr.msrb.gmra.mxu0 %v2249_v42  ;;  %2281 = vmatmul.bf16.vlgmr.msrb.gmra.mxu1 %v2257_v11 }
 0x2d4   :  { %2336 = vmatpush.bf16.msra.mxu0 %v14688_v5  ;;  %2349 = vmatpush.bf16.msra.mxu1 %v14689_v16  ;;  %v2322_v5 = vshll.u32 %v2316_v25, 16  ;;  %v2327_v16 = vshrl.u32 %v2317_v48, 16  ;;  %v14728_v25 = vld [vmem:[#allocation123_spill] sm:$0xff] }
 0x2d5   :  { %2362 = vmatpush.bf16.msra.mxu2 %v14690_v1  ;;  %2375 = vmatpush.bf16.msra.mxu3 %v14691_v17  ;;  %v14713_v1 = vld [vmem:[#allocation108_spill] sm:$0xff]  ;;  %v14714_v17 = vld [vmem:[#allocation109_spill] sm:$0xff] }
 0x2d6   :  { %2294 = vmatmul.bf16.vlgmr.msrb.gmra.mxu2 %v2249_v42  ;;  %2307 = vmatmul.bf16.vlgmr.msrb.gmra.mxu3 %v2257_v11  ;;  %v1477_v14 = vpop.f32.mrf.mxu2  ;;  %v1490_v43 = vpop.f32.mrf.mxu3  ;;  %v2330_v42 = vshll.u32 %v2317_v48, 16  ;;  %v14712_v11 = vld [vmem:[#allocation107_spill] sm:$0xff]  ;;  %v14731_v48 = vld [vmem:[#allocation126_spill] sm:$0xff] }
 0x2d7   :  { %v1491_v27 = vadd.f32 %v1490_v43, %v1477_v14  ;;  %v1453_v41 = vpop.f32.mrf.mxu0  ;;  %v1466_v44 = vpop.f32.mrf.mxu1 }
 0x2d8   :  { %2337 = vmatpush.bf16.msra.mxu0 %v14692_v55  ;;  %2350 = vmatpush.bf16.msra.mxu1 %v14693_v58  ;;  %v2321_v58 = vrot.slane %v2319_v18, 2  ;;  %v14720_v44 = vld [vmem:[#allocation115_spill] sm:$0xff]  ;;  %v2392_v18 = vld [vmem:[#allocation4 + $0x20] sm:$0x3f] }
 0x2d9   :  { %2363 = vmatpush.bf16.msra.mxu2 %v14694_v57  ;;  %2376 = vmatpush.bf16.msra.mxu3 %v14695_v49  ;;  %v2329_v57 = vrot.slane %v2327_v16, 2  ;;  %v2332_v49 = vrot.slane %v2330_v42, 3 }
 0x2db   :  { %v2333_v43 = vor.u32 %v2332_v49, %v2329_v57 }
 0x2dc   :  { %2338 = vmatpush.bf16.msra.mxu0 %v14696_v23  ;;  %2351 = vmatpush.bf16.msra.mxu1 %v14697_v36 }
 0x2dd   :  { %2364 = vmatpush.bf16.msra.mxu2 %v14698_v4  ;;  %2377 = vmatpush.bf16.msra.mxu3 %v14699_v63 }
 0x2de   :  { %v1479_v7 = vpop.f32.mrf.mxu2  ;;  %v1492_v35 = vpop.f32.mrf.mxu3 }
 0x2df   :  { %v1663_v0 = vpop.f32.mrf.mxu0  ;;  %v1676_v15 = vpop.f32.mrf.mxu1  ;;  %v14729_v7 = vld [vmem:[#allocation124_spill] sm:$0xff]  ;;  %v14730_v35 = vld [vmem:[#allocation125_spill] sm:$0xff] }
 0x2e0   :  { %2339 = vmatpush.bf16.msra.mxu0 %v14700_v32  ;;  %2352 = vmatpush.bf16.msra.mxu1 %v14701_v50  ;;  %v1664_v37 = vadd.f32 %v1663_v0, %v1465_v52  ;;  %v2324_v52 = vrot.slane %v2322_v5, 3  ;;  %v14722_v32 = vld [vmem:[#allocation117_spill] sm:$0xff]  ;;  %v14723_v50 = vld [vmem:[#allocation118_spill] sm:$0xff] }
 0x2e1   :  { %2365 = vmatpush.bf16.msra.mxu2 %v14702_v26  ;;  %2378 = vmatpush.bf16.msra.mxu3 %v14703_v31  ;;  %v14724_v31 = vld [vmem:[#allocation119_spill] sm:$0xff]  ;;  %v2393_v5 = vld [vmem:[#allocation4 + $0x28] sm:$0x3f] }
 0x2e2   :  { %v1677_v30 = vadd.f32 %v1676_v15, %v1664_v37  ;;  %v2325_v14 = vor.u32 %v2324_v52, %v2321_v58  ;;  %v14732_v15 = vld [vmem:[#allocation127_spill] sm:$0xff] }
 0x2e3   :  { %v2390_v37 = vld [vmem:[#allocation4 + $0x10] sm:$0xc0] }
 0x2e4   :  { %2340 = vmatpush.bf16.msra.mxu0 %v14704_v38  ;;  %2353 = vmatpush.bf16.msra.mxu1 %v14705_v29  ;;  %v2394_v16 = vpack.c.bf16 %v2392_v18, %v2390_v37 }
 0x2e5   :  { %2366 = vmatpush.bf16.msra.mxu2 %v14706_v9  ;;  %2379 = vmatpush.bf16.msra.mxu3 %v14707_v2 }
 0x2e6   :  { %v1689_v39 = vpop.f32.mrf.mxu2  ;;  %v1702_v55 = vpop.f32.mrf.mxu3 }
 0x2e7   :  { %v1690_v23 = vadd.f32 %v1689_v39, %v1491_v27  ;;  %v1665_v36 = vpop.f32.mrf.mxu0  ;;  %v1678_v4 = vpop.f32.mrf.mxu1  ;;  %v14718_v27 = vld [vmem:[#allocation113_spill] sm:$0xff] }
 0x2e8   :  { %2341 = vmatpush.bf16.msra.mxu0 %v14708_v20  ;;  %2354 = vmatpush.bf16.msra.mxu1 %v14709_v21  ;;  %v14733_v20 = vld [vmem:[#allocation128_spill] sm:$0xff]  ;;  %v14734_v21 = vld [vmem:[#allocation129_spill] sm:$0xff] }
 0x2e9   :  { %2367 = vmatpush.bf16.msra.mxu2 %v14710_v8  ;;  %2380 = vmatpush.bf16.msra.mxu3 %v14711_v13  ;;  %v1703_v63 = vadd.f32 %v1702_v55, %v1690_v23 }
 0x2ec   :  { %2342 = vmatpush.bf16.msra.mxu0 %v14712_v11  ;;  %2355 = vmatpush.bf16.msra.mxu1 %v14713_v1 }
 0x2ed   :  { %2368 = vmatpush.bf16.msra.mxu2 %v14714_v17  ;;  %2381 = vmatpush.bf16.msra.mxu3 %v14715_v46 }
 0x2f0   :  { %2343 = vmatpush.bf16.msra.mxu0 %v10583_v34  ;;  %2356 = vmatpush.bf16.msra.mxu1 %v10585_v6  ;;  %v14716_v34 = vld [vmem:[#allocation111_spill] sm:$0xff]  ;;  %v1704_v6 = vpop.f32.mrf.mxu3  ;;  %v1900_v41 = vpop.f32.mrf.mxu1 }
 0x2f1   :  { %2369 = vmatpush.bf16.msra.mxu2 %v10589_v3  ;;  %2382 = vmatpush.bf16.msra.mxu3 %v10591_v53  ;;  %v14717_v3 = vld [vmem:[#allocation112_spill] sm:$0xff]  ;;  %v1691_v53 = vpop.f32.mrf.mxu2 }
 0x2f3   :  { %2344 = vmatmul.bf16.vlgmr.msra.gmra.mxu0 %v2325_v14  ;;  %2357 = vmatmul.bf16.vlgmr.msra.gmra.mxu1 %v2333_v43 }
 0x2f4   :  { %2402 = vmatpush.bf16.msrb.mxu0 %v10595_v60  ;;  %2415 = vmatpush.bf16.msrb.mxu1 %v10597_v40  ;;  %v14719_v60 = vld [vmem:[#allocation114_spill] sm:$0xff]  ;;  %v1887_v40 = vpop.f32.mrf.mxu0 }
 0x2f5   :  { %2428 = vmatpush.bf16.msrb.mxu2 %v10599_v51  ;;  %2441 = vmatpush.bf16.msrb.mxu3 %v10601_v59  ;;  %v14721_v51 = vld [vmem:[#allocation116_spill] sm:$0xff]  ;;  %v1901_v59 = vadd.f32 %v1900_v41, %v1887_v40 }
 0x2f6   :  { %2370 = vmatmul.bf16.vlgmr.msra.gmra.mxu2 %v2325_v14  ;;  %2383 = vmatmul.bf16.vlgmr.msra.gmra.mxu3 %v2333_v43  ;;  %v14736_v41 = vld [vmem:[#allocation16_spill] sm:$0xff] }
 0x2f7   :  { %v1930_v26 = vadd.f32 %v1901_v59, %v1677_v30  ;;  %v2391_v30 = vld [vmem:[#allocation4 + $0x18] sm:$0xc0] }
 0x2f8   :  { %2403 = vmatpush.bf16.msrb.mxu0 %v14716_v34  ;;  %2416 = vmatpush.bf16.msrb.mxu1 %v14717_v3  ;;  %v1902_v2 = vpop.f32.mrf.mxu1  ;;  %v2395_v42 = vpack.c.bf16 %v2393_v5, %v2391_v30  ;;  %v14761_v5 = vmov 0 }
 0x2f9   :  { %2429 = vmatpush.bf16.msrb.mxu2 %v14718_v27  ;;  %2442 = vmatpush.bf16.msrb.mxu3 %v14719_v60  ;;  %v1913_v22 = vpop.f32.mrf.mxu2  ;;  %v1926_v38 = vpop.f32.mrf.mxu3  ;;  %v14735_v60 = vld [vmem:[#allocation17_spill] sm:$0xff]  ;;  %v14748_v2 = vld [vmem:[#allocation22_spill] sm:$0xff] }
 0x2fa   :  { %v1927_v29 = vadd.f32 %v1926_v38, %v1913_v22  ;;  %v2399_v11 = vrot.slane %v2395_v42, 3  ;;  %v2477_v40 = vand.u32 31, %v14735_v60  ;;  %v14747_v38 = vmov 1.0  }
 0x2fb   :  { %v14765_v42 = vmov 0  ;;  %v14850_v60 = vmov 0 }
 0x2fc   :  { %2404 = vmatpush.bf16.msrb.mxu0 %v14720_v44  ;;  %2417 = vmatpush.bf16.msrb.mxu1 %v14721_v51  ;;  %v1889_v9 = vpop.f32.mrf.mxu0  ;;  %v1931_v0 = vadd.f32 %v1927_v29, %v1703_v63  ;;  %v10845_v44 = vand.u32 31, %v14736_v41  ;;  %v14737_v51 = vld [vmem:[#allocation19_spill] sm:$0xff] }
 0x2fd   :  { %2430 = vmatpush.bf16.msrb.mxu2 %v14722_v32  ;;  %2443 = vmatpush.bf16.msrb.mxu3 %v14723_v50  ;;  %v10848_v59 = vand.u32 31, %v14737_v51  ;;  %v14738_v32 = vld [vmem:[#allocation20_spill] sm:$0xff]  ;;  %v14849_v51 = vld [vmem:[#allocation39_spill] sm:$0xff] }
 0x2fe   :  { %v2476_v50 = vand.u32 31, %v14738_v32  ;;  %vm10852_vm12 = vcmp.eq.s32.totalorder %v2477_v40, %v10845_v44  ;;  %v14839_v32 = vmov 0  ;;  %v2483_v41 = vand.u32 31, %v14849_v51 }
 0x2ff   :  { %vm10857_vm6 = vcmp.eq.s32.totalorder %v2477_v40, %v10848_v59  ;;  %v14782_v40 = vmov 0  ;;  %v14856_v51 = vmov 0 }
 0x300   :  { %2405 = vmatpush.bf16.msrb.mxu0 %v14724_v31  ;;  %2418 = vmatpush.bf16.msrb.mxu1 %v14725_v19  ;;  %vm10862_vm7 = vcmp.eq.s32.totalorder %v2476_v50, %v10845_v44  ;;  %vm10867_vm8 = vcmp.eq.s32.totalorder %v2476_v50, %v10848_v59  ;;  %v14784_v50 = vmov 0 }
 0x301   :  { %2431 = vmatpush.bf16.msrb.mxu2 %v14726_v24  ;;  %2444 = vmatpush.bf16.msrb.mxu3 %v14727_v47  ;;  %v1915_v8 = vpop.f32.mrf.mxu2  ;;  %v1928_v13 = vpop.f32.mrf.mxu3 }
 0x304   :  { %2406 = vmatpush.bf16.msrb.mxu0 %v14728_v25  ;;  %2419 = vmatpush.bf16.msrb.mxu1 %v14729_v7  ;;  %v2475_v25 = vand.u32 31, %v14748_v2  ;;  %v14749_v7 = vld [vmem:[#allocation24_spill] sm:$0xff]  ;;  %v14836_v2 = vmov 0 }
 0x305   :  { %2432 = vmatpush.bf16.msrb.mxu2 %v14730_v35  ;;  %2445 = vmatpush.bf16.msrb.mxu3 %v14731_v48  ;;  %v2474_v35 = vand.u32 31, %v14749_v7  ;;  %v14750_v48 = vld [vmem:[#allocation18_spill] sm:$0xff] }
 0x306   :  { %vm10893_vm9 = vcmp.eq.s32.totalorder %v2475_v25, %v10845_v44  ;;  %vm10898_vm10 = vcmp.eq.s32.totalorder %v2475_v25, %v10848_v59  ;;  %v14790_v25 = vmov 0 }
 0x307   :  { %vm10903_vm11 = vcmp.eq.s32.totalorder %v2474_v35, %v10845_v44  ;;  %vm10919_vm13 = vcmp.eq.s32.totalorder %v2474_v35, %v10848_v59  ;;  %v14792_v35 = vld [vmem:[#allocation29_spill] sm:$0xff] }
 0x308   :  { %2407 = vmatpush.bf16.msrb.mxu0 %v14732_v15  ;;  %2420 = vmatpush.bf16.msrb.mxu1 %v14733_v20  ;;  %v14751_v15 = vld [vmem:[#allocation26_spill] sm:$0xff]  ;;  %v14762_v5 = vsel %vm10919_vm13, 4294967295, %v14761_v5 }
 0x309   :  { %2433 = vmatpush.bf16.msrb.mxu2 %v10667_v33  ;;  %2446 = vmatpush.bf16.msrb.mxu3 %v14734_v21  ;;  %v2398_v33 = vrot.slane %v2394_v16, 3  ;;  %v2473_v20 = vand.u32 31, %v14751_v15  ;;  %v14752_v21 = vld [vmem:[#allocation21_spill] sm:$0xff]  ;;  %v14763_v16 = vmov 0  ;;  %v14834_v15 = vld [vmem:[#allocation42_spill] sm:$0xff] }
 0x30a   :  { %v2492_v37 = vand.u32 31, %v14752_v21  ;;  %v14824_v21 = vmov 0 }
 0x30b   :  { %vm10935_vm15 = vcmp.eq.s32.totalorder %v2473_v20, %v10845_v44  ;;  %vm10945_vm1 = vcmp.eq.s32.totalorder %v2473_v20, %v10848_v59  ;;  %v14793_v20 = vmov 0 }
 0x30c   :  { %2408 = vmatpush.bf16.msrb.mxu0 %v10673_v10  ;;  %2421 = vmatpush.bf16.msrb.mxu1 %v10675_v61  ;;  %v14766_v42 = vsel %vm10935_vm15, 4294967295, %v14765_v42  ;;  %vm10940_vm0 = vcmp.eq.s32.totalorder %v2492_v37, %v10845_v44  ;;  %vm10956_vm4 = vcmp.eq.s32.totalorder %v2492_v37, %v10848_v59  ;;  %v14795_v37 = vmov 0 }
 0x30d   :  { %2434 = vmatpush.bf16.msrb.mxu2 %v10679_v28  ;;  %2447 = vmatpush.bf16.msrb.mxu3 %v10681_v45 }
 0x310   :  { %2409 = vmatpush.bf16.msrb.mxu0 %v10685_v12  ;;  %2422 = vmatpush.bf16.msrb.mxu1 %v10687_v54  ;;  %v2125_v10 = vpop.f32.mrf.mxu0  ;;  %v2138_v61 = vpop.f32.mrf.mxu1 }
 0x311   :  { %2435 = vmatpush.bf16.msrb.mxu2 %v10691_v62  ;;  %2448 = vmatpush.bf16.msrb.mxu3 %v10693_v56  ;;  %v2139_v28 = vadd.f32 %v2138_v61, %v2125_v10  ;;  %v14771_v10 = vmov 0 }
 0x312   :  { %v14772_v10 = vsel %vm10956_vm4, 4294967295, %v14771_v10 }
 0x313   :  { %2410 = vmatmul.bf16.vlgmr.msrb.gmra.mxu0 %v2398_v33  ;;  %2423 = vmatmul.bf16.vlgmr.msrb.gmra.mxu1 %v2399_v11  ;;  %v10827_v45 = vadd.f32 %v2139_v28, %v1930_v26 }
 0x314   :  { %2436 = vmatmul.bf16.vlgmr.msrb.gmra.mxu2 %v2398_v33  ;;  %2449 = vmatmul.bf16.vlgmr.msrb.gmra.mxu3 %v2399_v11  ;;  %v14767_v33 = vmov 0  ;;  %v14769_v11 = vmov 0 }
 0x315   :  { %7311 = vmatpush.msk.msra.mxu0 %vm10852_vm12, %v14747_v38  ;;  %7343 = vmatpush.msk.msra.mxu2 %vm10857_vm6, %v14747_v38  ;;  %v14768_v33 = vsel %vm10940_vm0, 4294967295, %v14767_v33  ;;  %v14770_v11 = vsel %vm10945_vm1, 4294967295, %v14769_v11 }
 0x317   :  { %7312 = vmatpush.msk.msra.mxu0 %vm10862_vm7, %v14747_v38  ;;  %7344 = vmatpush.msk.msra.mxu2 %vm10867_vm8, %v14747_v38 }
 0x318   :  { %v2127_v46 = vpop.f32.mrf.mxu0  ;;  %v2140_v54 = vpop.f32.mrf.mxu1 }
 0x319   :  { %v2151_v1 = vpop.f32.mrf.mxu2  ;;  %v2164_v17 = vpop.f32.mrf.mxu3  ;;  %7313 = vmatpush.msk.msra.mxu0 %vm10893_vm9, %v14747_v38  ;;  %7345 = vmatpush.msk.msra.mxu2 %vm10898_vm10, %v14747_v38  ;;  %v14775_v54 = vld [vmem:[#allocation30_spill] sm:$0xff] }
 0x31a   :  { %v2165_v12 = vadd.f32 %v2164_v17, %v2151_v1  ;;  %v14773_v1 = vld [vmem:[#allocation28_spill] sm:$0xff] }
 0x31b   :  { %7314 = vmatpush.msk.msra.mxu0 %vm10903_vm11, %v14747_v38  ;;  %7346 = vmatpush.msk.msra.mxu2 %vm10919_vm13, %v14747_v38  ;;  %v2472_v17 = vand.u32 31, %v14773_v1  ;;  %v14822_v1 = vmov 0 }
 0x31c   :  { %v10829_v39 = vadd.f32 %v2165_v12, %v1931_v0  ;;  %v2493_v0 = vand.u32 31, %v14750_v48  ;;  %v14774_v12 = vld [vmem:[#allocation23_spill] sm:$0xff]  ;;  %v14835_v48 = vld [vmem:[#allocation37_spill] sm:$0xff] }
 0x31d   :  { %7315 = vmatpush.msk.msra.mxu0 %vm10935_vm15, %v14747_v38  ;;  %7347 = vmatpush.msk.msra.mxu2 %vm10945_vm1, %v14747_v38  ;;  %v2491_v46 = vand.u32 31, %v14774_v12  ;;  %vm10984_vm2 = vcmp.eq.s32.totalorder %v2472_v17, %v10845_v44  ;;  %v2484_v7 = vand.u32 31, %v14835_v48  ;;  %v14842_v48 = vmov 0 }
 0x31e   :  { %vm10908_vm3 = vcmp.eq.s32.totalorder %v2493_v0, %v10845_v44  ;;  %vm10924_vm14 = vcmp.eq.s32.totalorder %v2493_v0, %v10848_v59  ;;  %v2488_v0 = vand.u32 31, %v14792_v35  ;;  %v14810_v35 = vld [vmem:[#allocation31_spill] sm:$0xff] }
 0x31f   :  { %v14764_v16 = vsel %vm10924_vm14, 4294967295, %v14763_v16  ;;  %7327 = vmatpush.msk.msra.mxu1 %vm10908_vm3, %v14747_v38  ;;  %7359 = vmatpush.msk.msra.mxu3 %vm10924_vm14, %v14747_v38  ;;  %vm10989_vm5 = vcmp.eq.s32.totalorder %v2491_v46, %v10845_v44  ;;  %vm10999_vm1 = vcmp.eq.s32.totalorder %v2491_v46, %v10848_v59  ;;  %v14799_v46 = vmov 0 }
 0x320   :  { %v14783_v40 = vsel %vm10989_vm5, 4294967295, %v14782_v40  ;;  %7316 = vmatpush.msk.msra.mxu0 %vm10984_vm2, %v14747_v38 }
 0x321   :  { %v2153_v62 = vpop.f32.mrf.mxu2  ;;  %v2166_v56 = vpop.f32.mrf.mxu3  ;;  %7328 = vmatpush.msk.msra.mxu1 %vm10940_vm0, %v14747_v38  ;;  %7360 = vmatpush.msk.msra.mxu3 %vm10956_vm4, %v14747_v38  ;;  %vm10994_vm4 = vcmp.eq.s32.totalorder %v2472_v17, %v10848_v59  ;;  %v14797_v17 = vmov 0 }
 0x322   :  { %v2471_v62 = vand.u32 31, %v14775_v54  ;;  %v14776_v56 = vld [vmem:[#allocation25_spill] sm:$0xff]  ;;  %v14785_v50 = vsel %vm10994_vm4, 4294967295, %v14784_v50  ;;  %7348 = vmatpush.msk.msra.mxu2 %vm10994_vm4, %v14747_v38 }
 0x323   :  { %7329 = vmatpush.msk.msra.mxu1 %vm10989_vm5, %v14747_v38  ;;  %7361 = vmatpush.msk.msra.mxu3 %vm10999_vm1, %v14747_v38 }
 0x324   :  { %vm11010_vm0 = vcmp.eq.s32.totalorder %v2471_v62, %v10845_v44  ;;  %vm11027_vm5 = vcmp.eq.s32.totalorder %v2471_v62, %v10848_v59  ;;  %v14801_v62 = vmov 0 }
 0x325   :  { %v14794_v20 = vsel %vm11027_vm5, 4294967295, %v14793_v20  ;;  %7317 = vmatpush.msk.msra.mxu0 %vm11010_vm0, %v14747_v38  ;;  %7349 = vmatpush.msk.msra.mxu2 %vm11027_vm5, %v14747_v38  ;;  %vm11092_vm5 = vcmp.eq.s32.totalorder %v2488_v0, %v10848_v59 }
 0x330   :  { %v2199_v55 = vpop.f32.mrf.mxu0  ;;  %v2212_v58 = vpop.f32.mrf.mxu1 }
 0x331   :  { %v10831_v52 = vadd.f32 %v2212_v58, %v2199_v55  ;;  %v2490_v55 = vand.u32 31, %v14776_v56 }
 0x333   :  { %vm11015_vm15 = vcmp.eq.s32.totalorder %v2490_v55, %v10845_v44 }
 0x334   :  { %v14791_v25 = vsel %vm11015_vm15, 4294967295, %v14790_v25  ;;  %7330 = vmatpush.msk.msra.mxu1 %vm11015_vm15, %v14747_v38 }
 0x338   :  { %v2201_v36 = vpop.f32.mrf.mxu0  ;;  %v2214_v4 = vpop.f32.mrf.mxu1 }
 0x339   :  { %v2225_v57 = vpop.f32.mrf.mxu2  ;;  %v2238_v49 = vpop.f32.mrf.mxu3  ;;  %v14778_v4 = vld [vmem:[#allocation27_spill] sm:$0xff] }
 0x33a   :  { %v10833_v23 = vadd.f32 %v2238_v49, %v2225_v57  ;;  %v14777_v49 = vld [vmem:[#allocation32_spill] sm:$0xff] }
 0x33b   :  { %v2470_v36 = vand.u32 31, %v14777_v49  ;;  %v14815_v49 = vld [vmem:[#allocation38_spill] sm:$0xff] }
 0x33d   :  { %vm11037_vm14 = vcmp.eq.s32.totalorder %v2470_v36, %v10845_v44  ;;  %vm11053_vm4 = vcmp.eq.s32.totalorder %v2470_v36, %v10848_v59  ;;  %v14806_v36 = vmov 0 }
 0x33e   :  { %v14798_v17 = vsel %vm11037_vm14, 4294967295, %v14797_v17  ;;  %v14802_v62 = vsel %vm11053_vm4, 4294967295, %v14801_v62  ;;  %7318 = vmatpush.msk.msra.mxu0 %vm11037_vm14, %v14747_v38  ;;  %7350 = vmatpush.msk.msra.mxu2 %vm11053_vm4, %v14747_v38 }
 0x341   :  { %v2227_v63 = vpop.f32.mrf.mxu2  ;;  %v2240_v14 = vpop.f32.mrf.mxu3 }
 0x342   :  { %v2489_v63 = vand.u32 31, %v14778_v4  ;;  %v14779_v14 = vld [vmem:[#allocation34_spill] sm:$0xff]  ;;  %v14813_v4 = vmov 0 }
 0x343   :  { %v14814_v4 = vsel %vm11092_vm5, 4294967295, %v14813_v4 }
 0x344   :  { %vm11058_vm13 = vcmp.eq.s32.totalorder %v2489_v63, %v10848_v59 }
 0x350   :  { %v10835_v43 = vpop.f32.mrf.mxu0  ;;  %v10837_v34 = vpop.f32.mrf.mxu1 }
 0x358   :  { %v2271_v6 = vpop.f32.mrf.mxu0  ;;  %v2284_v27 = vpop.f32.mrf.mxu1 }
 0x359   :  { %v10839_v3 = vpop.f32.mrf.mxu2  ;;  %v10841_v53 = vpop.f32.mrf.mxu3  ;;  %v2469_v6 = vand.u32 31, %v14779_v14  ;;  %v14780_v27 = vmov 0  ;;  %v14811_v14 = vmov 0 }
 0x35a   :  { %v14781_v27 = vsel %vm10984_vm2, 4294967295, %v14780_v27  ;;  %vm11032_vm2 = vcmp.eq.s32.totalorder %v2490_v55, %v10848_v59  ;;  %v14803_v55 = vmov 0 }
 0x35b   :  { %v14796_v37 = vsel %vm11032_vm2, 4294967295, %v14795_v37  ;;  %v14804_v55 = vsel %vm11058_vm13, 4294967295, %v14803_v55  ;;  %7362 = vmatpush.msk.msra.mxu3 %vm11032_vm2, %v14747_v38  ;;  %vm11070_vm15 = vcmp.eq.s32.totalorder %v2469_v6, %v10845_v44  ;;  %vm11087_vm2 = vcmp.eq.s32.totalorder %v2469_v6, %v10848_v59 }
 0x35c   :  { %v14807_v36 = vsel %vm11070_vm15, 4294967295, %v14806_v36  ;;  %v14812_v14 = vsel %vm11087_vm2, 4294967295, %v14811_v14  ;;  %v14816_v6 = vmov 0  ;;  %7319 = vmatpush.msk.msra.mxu0 %vm11070_vm15, %v14747_v38  ;;  %7351 = vmatpush.msk.msra.mxu2 %vm11087_vm2, %v14747_v38 }
 0x35d   :  { %7363 = vmatpush.msk.msra.mxu3 %vm11058_vm13, %v14747_v38 }
 0x35f   :  { %7364 = vmatpush.msk.msra.mxu3 %vm11092_vm5, %v14747_v38 }
 0x361   :  { %v2297_v26 = vpop.f32.mrf.mxu2  ;;  %v2310_v31 = vpop.f32.mrf.mxu3 }
 0x362   :  { %v14786_v26 = vmov 0  ;;  %v14788_v31 = vmov 0 }
 0x363   :  { %v14787_v26 = vsel %vm10999_vm1, 4294967295, %v14786_v26  ;;  %v14789_v31 = vsel %vm11010_vm0, 4294967295, %v14788_v31  ;;  %vm11048_vm1 = vcmp.eq.s32.totalorder %v2489_v63, %v10845_v44  ;;  %vm11075_vm0 = vcmp.eq.s32.totalorder %v2488_v0, %v10845_v44 }
 0x364   :  { %v14800_v46 = vsel %vm11048_vm1, 4294967295, %v14799_v46  ;;  %v14808_v63 = vmov 0  ;;  %7331 = vmatpush.msk.msra.mxu1 %vm11048_vm1, %v14747_v38  ;;  %v14818_v0 = vmov 0 }
 0x365   :  { %v14809_v63 = vsel %vm11075_vm0, 4294967295, %v14808_v63 }
 0x366   :  { %7332 = vmatpush.msk.msra.mxu1 %vm11075_vm0, %v14747_v38 }
 0x370   :  { %v10883_v29 = vpop.f32.mrf.mxu0  ;;  %v10885_v9 = vpop.f32.mrf.mxu1 }
 0x378   :  { %v2347_v58 = vpop.f32.mrf.mxu0  ;;  %v2360_v57 = vpop.f32.mrf.mxu1 }
 0x379   :  { %v10966_v61 = vpop.f32.mrf.mxu2  ;;  %v10968_v28 = vpop.f32.mrf.mxu3  ;;  %v14805_v58 = vld [vmem:[#allocation36_spill] sm:$0xff] }
 0x37a   :  { %v2468_v57 = vand.u32 31, %v14805_v58  ;;  %v2487_v58 = vand.u32 31, %v14810_v35  ;;  %v2467_v35 = vand.u32 31, %v14815_v49  ;;  %v14821_v49 = vld [vmem:[#allocation40_spill] sm:$0xff] }
 0x37b   :  { %v2466_v12 = vand.u32 31, %v14821_v49 }
 0x37c   :  { %vm11104_vm1 = vcmp.eq.s32.totalorder %v2468_v57, %v10845_v44  ;;  %vm11109_vm14 = vcmp.eq.s32.totalorder %v2487_v58, %v10845_v44  ;;  %vm11122_vm13 = vcmp.eq.s32.totalorder %v2468_v57, %v10848_v59  ;;  %vm11127_vm4 = vcmp.eq.s32.totalorder %v2487_v58, %v10848_v59 }
 0x37d   :  { %v14817_v6 = vsel %vm11104_vm1, 4294967295, %v14816_v6  ;;  %v14819_v0 = vsel %vm11109_vm14, 4294967295, %v14818_v0  ;;  %v14823_v1 = vsel %vm11122_vm13, 4294967295, %v14822_v1  ;;  %v14825_v21 = vsel %vm11127_vm4, 4294967295, %v14824_v21  ;;  %7320 = vmatpush.msk.msra.mxu0 %vm11104_vm1, %v14747_v38  ;;  %7333 = vmatpush.msk.msra.mxu1 %vm11109_vm14, %v14747_v38 }
 0x37e   :  { %14826 = vst [vmem:[#allocation43_spill] sm:$0xff] %v14825_v21  ;;  %vm11139_vm0 = vcmp.eq.s32.totalorder %v2467_v35, %v10845_v44  ;;  %v14828_v57 = vmov 0  ;;  %v14831_v58 = vmov 0  ;;  %vm11157_vm5 = vcmp.eq.s32.totalorder %v2467_v35, %v10848_v59  ;;  %7352 = vmatpush.msk.msra.mxu2 %vm11122_vm13, %v14747_v38  ;;  %7365 = vmatpush.msk.msra.mxu3 %vm11127_vm4, %v14747_v38 }
 0x37f   :  { %v14829_v57 = vsel %vm11139_vm0, 4294967295, %v14828_v57  ;;  %v14837_v2 = vsel %vm11157_vm5, 4294967295, %v14836_v2  ;;  %vm11173_vm14 = vcmp.eq.s32.totalorder %v2466_v12, %v10845_v44  ;;  %v14845_v35 = vmov 0  ;;  %7321 = vmatpush.msk.msra.mxu0 %vm11139_vm0, %v14747_v38 }
 0x380   :  { %14830 = vst [vmem:[#allocation46_spill] sm:$0xff] %v14829_v57  ;;  %v14843_v48 = vsel %vm11173_vm14, 4294967295, %v14842_v48  ;;  %vm11191_vm4 = vcmp.eq.s32.totalorder %v2466_v12, %v10848_v59  ;;  %v14853_v21 = vmov 0  ;;  %7353 = vmatpush.msk.msra.mxu2 %vm11157_vm5, %v14747_v38  ;;  %vm11212_vm0 = vcmp.eq.s32.totalorder %v2484_v7, %v10845_v44 }
 0x381   :  { %v2373_v56 = vpop.f32.mrf.mxu2  ;;  %v2386_v54 = vpop.f32.mrf.mxu3  ;;  %14838 = vst [vmem:[#allocation47_spill] sm:$0xff] %v14837_v2  ;;  %v14851_v60 = vsel %vm11191_vm4, 4294967295, %v14850_v60  ;;  %v14858_v12 = vmov 0  ;;  %7322 = vmatpush.msk.msra.mxu0 %vm11173_vm14, %v14747_v38  ;;  %vm11230_vm5 = vcmp.eq.s32.totalorder %v2484_v7, %v10848_v59  ;;  %v14865_v2 = vmov 0  ;;  %v14872_v7 = vld [vmem:[#allocation15_spill] sm:$0xff] }
 0x382   :  { %v14820_v56 = vld [vmem:[#allocation33_spill] sm:$0xff]  ;;  %14844 = vst [vmem:[#allocation52_spill] sm:$0xff] %v14843_v48  ;;  %v14859_v12 = vsel %vm11212_vm0, 4294967295, %v14858_v12  ;;  %v14866_v2 = vsel %vm11230_vm5, 4294967295, %v14865_v2  ;;  %7354 = vmatpush.msk.msra.mxu2 %vm11191_vm4, %v14747_v38  ;;  %vm11246_vm14 = vcmp.eq.s32.totalorder %v2483_v41, %v10845_v44  ;;  %vm11266_vm4 = vcmp.eq.s32.totalorder %v2483_v41, %v10848_v59 }
 0x383   :  { %v2486_v54 = vand.u32 31, %v14820_v56  ;;  %v14827_v56 = vld [vmem:[#allocation35_spill] sm:$0xff]  ;;  %14852 = vst [vmem:[#allocation53_spill] sm:$0xff] %v14851_v60  ;;  %v2270_v60 = vadd.f32 %v10835_v43, %v10831_v52  ;;  %v14880_v52 = vmov 0  ;;  %v14883_v43 = vmov 0  ;;  %v14886_v41 = vld [vmem:[#allocation49_spill] sm:$0xff] }
 0x384   :  { %v2485_v49 = vand.u32 31, %v14827_v56  ;;  %v2465_v56 = vand.u32 31, %v14834_v15  ;;  %14867 = vst [vmem:[#allocation58_spill] sm:$0xff] %v14866_v2  ;;  %v14887_v2 = vmov 0 }
 0x385   :  { %vm11144_vm15 = vcmp.eq.s32.totalorder %v2486_v54, %v10845_v44  ;;  %vm11162_vm2 = vcmp.eq.s32.totalorder %v2486_v54, %v10848_v59  ;;  %v14848_v54 = vld [vmem:[#allocation48_spill] sm:$0xff] }
 0x386   :  { %v14832_v58 = vsel %vm11144_vm15, 4294967295, %v14831_v58  ;;  %v14840_v32 = vsel %vm11162_vm2, 4294967295, %v14839_v32  ;;  %vm11178_vm1 = vcmp.eq.s32.totalorder %v2485_v49, %v10845_v44  ;;  %v2464_v15 = vand.u32 31, %v14848_v54  ;;  %7334 = vmatpush.msk.msra.mxu1 %vm11144_vm15, %v14747_v38  ;;  %7366 = vmatpush.msk.msra.mxu3 %vm11162_vm2, %v14747_v38 }
 0x387   :  { %14833 = vst [vmem:[#allocation44_spill] sm:$0xff] %v14832_v58  ;;  %v14846_v35 = vsel %vm11178_vm1, 4294967295, %v14845_v35  ;;  %vm11196_vm13 = vcmp.eq.s32.totalorder %v2485_v49, %v10848_v59  ;;  %vm11207_vm15 = vcmp.eq.s32.totalorder %v2465_v56, %v10845_v44  ;;  %v14860_v49 = vld [vmem:[#allocation54_spill] sm:$0xff]  ;;  %v14861_v58 = vld [vmem:[#allocation41_spill] sm:$0xff]  ;;  %vm11225_vm2 = vcmp.eq.s32.totalorder %v2465_v56, %v10848_v59 }
 0x388   :  { %14841 = vst [vmem:[#allocation50_spill] sm:$0xff] %v14840_v32  ;;  %v14854_v21 = vsel %vm11196_vm13, 4294967295, %v14853_v21  ;;  %v14857_v51 = vsel %vm11207_vm15, 4294967295, %v14856_v51  ;;  %v2463_v54 = vand.u32 31, %v14860_v49  ;;  %v2482_v57 = vand.u32 31, %v14861_v58  ;;  %7335 = vmatpush.msk.msra.mxu1 %vm11178_vm1, %v14747_v38  ;;  %7367 = vmatpush.msk.msra.mxu3 %vm11196_vm13, %v14747_v38 }
 0x389   :  { %14847 = vst [vmem:[#allocation51_spill] sm:$0xff] %v14846_v35  ;;  %v14862_v32 = vmov 0  ;;  %vm11241_vm1 = vcmp.eq.s32.totalorder %v2464_v15, %v10845_v44  ;;  %v14868_v58 = vmov 0  ;;  %v14870_v56 = vmov 0  ;;  %v14873_v35 = vld [vmem:[#allocation45_spill] sm:$0xff]  ;;  %7323 = vmatpush.msk.msra.mxu0 %vm11207_vm15, %v14747_v38  ;;  %7355 = vmatpush.msk.msra.mxu2 %vm11225_vm2, %v14747_v38 }
 0x38a   :  { %14855 = vst [vmem:[#allocation55_spill] sm:$0xff] %v14854_v21  ;;  %v14863_v32 = vsel %vm11225_vm2, 4294967295, %v14862_v32  ;;  %v14869_v58 = vsel %vm11241_vm1, 4294967295, %v14868_v58  ;;  %v14871_v56 = vsel %vm11246_vm14, 4294967295, %v14870_v56  ;;  %v2462_v49 = vand.u32 31, %v14872_v7  ;;  %7336 = vmatpush.msk.msra.mxu1 %vm11212_vm0, %v14747_v38  ;;  %7368 = vmatpush.msk.msra.mxu3 %vm11230_vm5, %v14747_v38 }
 0x38b   :  { %14864 = vst [vmem:[#allocation57_spill] sm:$0xff] %v14863_v32  ;;  %v2481_v48 = vand.u32 31, %v14873_v35  ;;  %vm11261_vm13 = vcmp.eq.s32.totalorder %v2464_v15, %v10848_v59  ;;  %v14874_v21 = vmov 0  ;;  %v14877_v7 = vmov 0  ;;  %7324 = vmatpush.msk.msra.mxu0 %vm11241_vm1, %v14747_v38 }
 0x38c   :  { %v14875_v21 = vsel %vm11261_vm13, 4294967295, %v14874_v21  ;;  %v14878_v7 = vsel %vm11266_vm4, 4294967295, %v14877_v7  ;;  %vm11277_vm0 = vcmp.eq.s32.totalorder %v2463_v54, %v10845_v44  ;;  %vm11282_vm15 = vcmp.eq.s32.totalorder %v2482_v57, %v10845_v44  ;;  %7337 = vmatpush.msk.msra.mxu1 %vm11246_vm14, %v14747_v38  ;;  %7356 = vmatpush.msk.msra.mxu2 %vm11261_vm13, %v14747_v38 }
 0x38d   :  { %14876 = vst [vmem:[#allocation60_spill] sm:$0xff] %v14875_v21  ;;  %v14881_v52 = vsel %vm11277_vm0, 4294967295, %v14880_v52  ;;  %v14884_v43 = vsel %vm11282_vm15, 4294967295, %v14883_v43  ;;  %v2480_v15 = vand.u32 31, %v14886_v41  ;;  %v2359_v35 = vadd.f32 %v10885_v9, %v10883_v29  ;;  %7369 = vmatpush.msk.msra.mxu3 %vm11266_vm4, %v14747_v38  ;;  %7325 = vmatpush.msk.msra.mxu0 %vm11277_vm0, %v14747_v38 }
 0x38e   :  { %14879 = vst [vmem:[#allocation61_spill] sm:$0xff] %v14878_v7  ;;  %vm11296_vm5 = vcmp.eq.s32.totalorder %v2463_v54, %v10848_v59  ;;  %vm11301_vm2 = vcmp.eq.s32.totalorder %v2482_v57, %v10848_v59  ;;  %v14890_v32 = vmov 0  ;;  %vm11312_vm14 = vcmp.eq.s32.totalorder %v2462_v49, %v10845_v44  ;;  %v14897_v57 = vld [vmem:[#allocation56_spill] sm:$0xff]  ;;  %7338 = vmatpush.msk.msra.mxu1 %vm11282_vm15, %v14747_v38 }
 0x38f   :  { %14882 = vst [vmem:[#allocation62_spill] sm:$0xff] %v14881_v52  ;;  %v14888_v2 = vsel %vm11296_vm5, 4294967295, %v14887_v2  ;;  %v14891_v32 = vsel %vm11301_vm2, 4294967295, %v14890_v32  ;;  %v14893_v29 = vmov 0  ;;  %vm11317_vm1 = vcmp.eq.s32.totalorder %v2481_v48, %v10845_v44  ;;  %7357 = vmatpush.msk.msra.mxu2 %vm11296_vm5, %v14747_v38  ;;  %7370 = vmatpush.msk.msra.mxu3 %vm11301_vm2, %v14747_v38 }
 0x390   :  { %14885 = vst [vmem:[#allocation63_spill] sm:$0xff] %v14884_v43  ;;  %v14894_v29 = vsel %vm11312_vm14, 4294967295, %v14893_v29  ;;  %v14895_v9 = vmov 0  ;;  %v2479_v54 = vand.u32 31, %v14897_v57  ;;  %v2283_v41 = vadd.f32 %v10837_v34, %v2270_v60  ;;  %v2411_v57 = vpop.f32.mrf.mxu0  ;;  %v2424_v34 = vpop.f32.mrf.mxu1  ;;  %7326 = vmatpush.msk.msra.mxu0 %vm11312_vm14, %v14747_v38  ;;  %7339 = vmatpush.msk.msra.mxu1 %vm11317_vm1, %v14747_v38 }
 0x391   :  { %14889 = vst [vmem:[#allocation64_spill] sm:$0xff] %v14888_v2  ;;  %v14896_v9 = vsel %vm11317_vm1, 4294967295, %v14895_v9  ;;  %vm11330_vm4 = vcmp.eq.s32.totalorder %v2462_v49, %v10848_v59  ;;  %vm11335_vm13 = vcmp.eq.s32.totalorder %v2481_v48, %v10848_v59  ;;  %v14900_v21 = vmov 0  ;;  %v14904_v49 = vld [vmem:[#allocation59_spill] sm:$0xff] }
 0x392   :  { %14892 = vst [vmem:[#allocation65_spill] sm:$0xff] %v14891_v32  ;;  %v14901_v21 = vsel %vm11335_vm13, 4294967295, %v14900_v21  ;;  %vm11346_vm15 = vcmp.eq.s32.totalorder %v2480_v15, %v10845_v44  ;;  %v2478_v48 = vand.u32 31, %v14904_v49  ;;  %v2388_v43 = vadd.f32 %v2359_v35, %v2283_v41  ;;  %7358 = vmatpush.msk.msra.mxu2 %vm11330_vm4, %v14747_v38  ;;  %7371 = vmatpush.msk.msra.mxu3 %vm11335_vm13, %v14747_v38  ;;  %v8660_v49 = vld [vmem:[#allocation11 + $0x24] sm:$0xf0] }
 0x393   :  { %v2425_v52 = vadd.f32 %v2424_v34, %v2411_v57  ;;  %vm11358_vm5 = vcmp.eq.s32.totalorder %v2480_v15, %v10848_v59  ;;  %v2296_v2 = vadd.f32 %v10839_v3, %v10833_v23  ;;  %vm11371_vm14 = vcmp.eq.s32.totalorder %v2479_v54, %v10845_v44  ;;  %7340 = vmatpush.msk.msra.mxu1 %vm11346_vm15, %v14747_v38 }
 0x394   :  { %vm11381_vm1 = vcmp.eq.s32.totalorder %v2479_v54, %v10848_v59  ;;  %7375 = vmatpush.msk.msrb.mxu0 %vm10852_vm12, %v14747_v38  ;;  %v2385_v3 = vadd.f32 %v10968_v28, %v10966_v61  ;;  %7372 = vmatpush.msk.msra.mxu3 %vm11358_vm5, %v14747_v38  ;;  %vm11394_vm13 = vcmp.eq.s32.totalorder %v2478_v48, %v10845_v44 }
 0x395   :  { %v11375_v41 = vadd.f32 %v2425_v52, %v2388_v43  ;;  %7407 = vmatpush.msk.msrb.mxu2 %vm10857_vm6, %v14747_v38  ;;  %7341 = vmatpush.msk.msra.mxu1 %vm11371_vm14, %v14747_v38  ;;  %vm11407_vm12 = vcmp.eq.s32.totalorder %v2478_v48, %v10848_v59  ;;  %v2309_v44 = vadd.f32 %v10841_v53, %v2296_v2 }
 0x396   :  { %7376 = vmatpush.msk.msrb.mxu0 %vm10862_vm7, %v14747_v38  ;;  %7373 = vmatpush.msk.msra.mxu3 %vm11381_vm1, %v14747_v38  ;;  %vm14915_vm6 = vnez %v14762_v5  ;;  %vm14916_vm7 = vnez %v14764_v16 }
 0x397   :  { %v2688_v19 = vadd.f32 %v11375_v41, %v10827_v45  ;;  %7408 = vmatpush.msk.msrb.mxu2 %vm10867_vm8, %v14747_v38  ;;  %v2437_v24 = vpop.f32.mrf.mxu2  ;;  %v2450_v28 = vpop.f32.mrf.mxu3  ;;  %7342 = vmatpush.msk.msra.mxu1 %vm11394_vm13, %v14747_v38  ;;  %v2389_v53 = vadd.f32 %v2385_v3, %v2309_v44  ;;  %vm14917_vm8 = vnez %v14766_v42 }
 0x398   :  { %7377 = vmatpush.msk.msrb.mxu0 %vm10893_vm9, %v14747_v38  ;;  %v2451_v47 = vadd.f32 %v2450_v28, %v2437_v24  ;;  %v2413_v2 = vpop.f32.mrf.mxu0  ;;  %v2426_v43 = vpop.f32.mrf.mxu1  ;;  %7374 = vmatpush.msk.msra.mxu3 %vm11407_vm12, %v14747_v38  ;;  %vm14918_vm9 = vnez %v14768_v33 }
 0x399   :  { %v2689_v59 = vrot.slane %v2688_v19, 4  ;;  %7409 = vmatpush.msk.msrb.mxu2 %vm10898_vm10, %v14747_v38  ;;  %7391 = vmatpush.msk.msrb.mxu1 %vm10908_vm3, %v14747_v38  ;;  %vm14919_vm10 = vnez %v14770_v11  ;;  %vm14921_vm3 = vnez %v14781_v27 }
 0x39a   :  { %7378 = vmatpush.msk.msrb.mxu0 %vm10903_vm11, %v14747_v38  ;;  %v11439_v8 = vadd.f32 %v2451_v47, %v2389_v53  ;;  %7423 = vmatpush.msk.msrb.mxu3 %vm14916_vm7, %v14747_v38  ;;  %vm14920_vm11 = vnez %v14772_v10  ;;  %vm14923_vm7 = vnez %v14785_v50 }
 0x39b   :  { %v2690_v22 = vadd.f32 %v2689_v59, %v2688_v19  ;;  %7410 = vmatpush.msk.msrb.mxu2 %vm14915_vm6, %v14747_v38  ;;  %7392 = vmatpush.msk.msrb.mxu1 %vm14918_vm9, %v14747_v38  ;;  %vm14922_vm6 = vnez %v14783_v40  ;;  %vm14925_vm9 = vnez %v14789_v31  ;;  %v14944_v31 = vld [vmem:[#allocation44_spill] sm:$0xff] }
 0x39c   :  { %7379 = vmatpush.msk.msrb.mxu0 %vm14917_vm8, %v14747_v38  ;;  %v2695_v18 = vadd.f32 %v11439_v8, %v10829_v39  ;;  %7424 = vmatpush.msk.msrb.mxu3 %vm14920_vm11, %v14747_v38  ;;  %vm14924_vm8 = vnez %v14787_v26  ;;  %vm14927_vm11 = vnez %v14794_v20  ;;  %v14950_v20 = vld [vmem:[#allocation52_spill] sm:$0xff] }
 0x39d   :  { %v2691_v13 = vrot.slane %v2690_v22, 2  ;;  %7411 = vmatpush.msk.msrb.mxu2 %vm14919_vm10, %v14747_v38  ;;  %7393 = vmatpush.msk.msrb.mxu1 %vm14922_vm6, %v14747_v38  ;;  %vm14926_vm10 = vnez %v14791_v25  ;;  %vm14929_vm6 = vnez %v14798_v17  ;;  %v14946_v25 = vld [vmem:[#allocation47_spill] sm:$0xff]  ;;  %v14954_v17 = vld [vmem:[#allocation53_spill] sm:$0xff] }
 0x39e   :  { %7380 = vmatpush.msk.msrb.mxu0 %vm14921_vm3, %v14747_v38  ;;  %v2696_v5 = vrot.slane %v2695_v18, 4  ;;  %7425 = vmatpush.msk.msrb.mxu3 %vm14924_vm8, %v14747_v38  ;;  %vm14928_vm3 = vnez %v14796_v37  ;;  %vm14931_vm8 = vnez %v14802_v62  ;;  %v14952_v37 = vld [vmem:[#allocation51_spill] sm:$0xff]  ;;  %v14960_v62 = vld [vmem:[#allocation57_spill] sm:$0xff] }
 0x39f   :  { %v2692_v30 = vadd.f32 %v2691_v13, %v2690_v22  ;;  %7412 = vmatpush.msk.msrb.mxu2 %vm14923_vm7, %v14747_v38  ;;  %v2439_v16 = vpop.f32.mrf.mxu2  ;;  %v2452_v42 = vpop.f32.mrf.mxu3  ;;  %7394 = vmatpush.msk.msrb.mxu1 %vm14926_vm10, %v14747_v38  ;;  %vm14930_vm7 = vnez %v14800_v46  ;;  %vm14933_vm10 = vnez %v14807_v36  ;;  %v14956_v46 = vld [vmem:[#allocation55_spill] sm:$0xff]  ;;  %v14968_v36 = vld [vmem:[#allocation61_spill] sm:$0xff] }
 0x3a0   :  { %7381 = vmatpush.msk.msrb.mxu0 %vm14925_vm9, %v14747_v38  ;;  %v2697_v11 = vadd.f32 %v2696_v5, %v2695_v18  ;;  %7426 = vmatpush.msk.msrb.mxu3 %vm14928_vm3, %v14747_v38  ;;  %vm14932_vm9 = vnez %v14804_v55  ;;  %vm14935_vm3 = vnez %v14812_v14  ;;  %v14940_v14 = vld [vmem:[#allocation43_spill] sm:$0xff]  ;;  %v14962_v55 = vld [vmem:[#allocation58_spill] sm:$0xff] }
 0x3a1   :  { %v2693_v33 = vrot.slane %v2692_v30, 1  ;;  %7413 = vmatpush.msk.msrb.mxu2 %vm14927_vm11, %v14747_v38  ;;  %7395 = vmatpush.msk.msrb.mxu1 %vm14930_vm7, %v14747_v38  ;;  %vm14934_vm11 = vnez %v14809_v63  ;;  %vm14937_vm7 = vnez %v14817_v6  ;;  %v14971_v6 = vld [vmem:[#allocation63_spill] sm:$0xff] }
 0x3a2   :  { %7382 = vmatpush.msk.msrb.mxu0 %vm14929_vm6, %v14747_v38  ;;  %v2698_v27 = vrot.slane %v2697_v11, 2  ;;  %7427 = vmatpush.msk.msrb.mxu3 %vm14932_vm9, %v14747_v38  ;;  %vm14936_vm6 = vnez %v14814_v4  ;;  %vm14939_vm9 = vnez %v14823_v1  ;;  %v14942_v4 = vld [vmem:[#allocation46_spill] sm:$0xff]  ;;  %v7489_v63 = vld [vmem:[#allocation11 + $0x160] sm:$0xf] }
 0x3a3   :  { %v2694_v10 = vadd.f32 %v2693_v33, %v2692_v30  ;;  %7414 = vmatpush.msk.msrb.mxu2 %vm14931_vm8, %v14747_v38  ;;  %7396 = vmatpush.msk.msrb.mxu1 %vm14934_vm11, %v14747_v38  ;;  %vm14938_vm8 = vnez %v14819_v0  ;;  %vm14943_vm11 = vnez %v14942_v4  ;;  %v14948_v1 = vld [vmem:[#allocation50_spill] sm:$0xff]  ;;  %v14973_v0 = vld [vmem:[#allocation64_spill] sm:$0xff] }
 0x3a4   :  { %v2699_v40 = vadd.f32 %v2698_v27, %v2697_v11  ;;  %7383 = vmatpush.msk.msrb.mxu0 %vm14933_vm10, %v14747_v38  ;;  %7428 = vmatpush.msk.msrb.mxu3 %vm14936_vm6, %v14747_v38  ;;  %vm14941_vm10 = vnez %v14940_v14  ;;  %vm14947_vm6 = vnez %v14946_v25  ;;  %v7497_v14 = vld [vmem:[#allocation11 + $0x170] sm:$0xf] }
 0x3a5   :  { %2718 = vmatmul.f32.vlgmr.msra.gmra.mxu0 %v2694_v10  ;;  %2758 = vmatmul.f32.vlgmr.msra.gmra.mxu2 %v2694_v10  ;;  %v7561_v25 = vld [vmem:[#allocation11 + $0x1f0] sm:$0xf] }
 0x3a6   :  { %7415 = vmatpush.msk.msrb.mxu2 %vm14935_vm3, %v14747_v38  ;;  %v2700_v50 = vrot.slane %v2699_v40, 1  ;;  %7384 = vmatpush.msk.msrb.mxu0 %vm14937_vm7, %v14747_v38  ;;  %vm14945_vm3 = vnez %v14944_v31  ;;  %vm14949_vm7 = vnez %v14948_v1  ;;  %v8718_v1 = vld [vmem:[#allocation11 + $0x1f4] sm:$0xf0] }
 0x3a7   :  { %7397 = vmatpush.msk.msrb.mxu1 %vm14938_vm8, %v14747_v38  ;;  %7429 = vmatpush.msk.msrb.mxu3 %vm14941_vm10, %v14747_v38  ;;  %vm14951_vm8 = vnez %v14950_v20  ;;  %vm14955_vm10 = vnez %v14954_v17  ;;  %v8701_v20 = vld [vmem:[#allocation11 + $0x174] sm:$0xf]  ;;  %v7499_v17 = vld [vmem:[#allocation11 + $0x178] sm:$0xf0] }
 0x3a8   :  { %7416 = vmatpush.msk.msrb.mxu2 %vm14939_vm9, %v14747_v38  ;;  %v2701_v26 = vadd.f32 %v2700_v50, %v2699_v40  ;;  %7385 = vmatpush.msk.msrb.mxu0 %vm14943_vm11, %v14747_v38  ;;  %vm14953_vm9 = vnez %v14952_v37  ;;  %vm14957_vm11 = vnez %v14956_v46  ;;  %v11641_v37 = vor.u32 %v8718_v1, %v7561_v25  ;;  %v8717_v46 = vld [vmem:[#allocation11 + $0x1f4] sm:$0xf]  ;;  %v8694_v1 = vld [vmem:[#allocation11 + $0x134] sm:$0xf0] }
 0x3a9   :  { %7398 = vmatpush.msk.msrb.mxu1 %vm14945_vm3, %v14747_v38  ;;  %7430 = vmatpush.msk.msrb.mxu3 %vm14949_vm7, %v14747_v38  ;;  %vm14958_vm3 = vnez %v14857_v51  ;;  %vm14961_vm7 = vnez %v14960_v62  ;;  %v14966_v51 = vld [vmem:[#allocation60_spill] sm:$0xff]  ;;  %v7563_v62 = vld [vmem:[#allocation11 + $0x1f8] sm:$0xf0] }
 0x3aa   :  { %7417 = vmatpush.msk.msrb.mxu2 %vm14947_vm6, %v14747_v38  ;;  %2738 = vmatmul.f32.vlgmr.msra.gmra.mxu1 %v2701_v26  ;;  %vm14959_vm6 = vnez %v14859_v12 }
 0x3ab   :  { %2778 = vmatmul.f32.vlgmr.msra.gmra.mxu3 %v2701_v26  ;;  %7386 = vmatpush.msk.msrb.mxu0 %vm14951_vm8, %v14747_v38  ;;  %vm14963_vm8 = vnez %v14962_v55  ;;  %v8702_v26 = vld [vmem:[#allocation11 + $0x174] sm:$0xf0] }
 0x3ac   :  { %7399 = vmatpush.msk.msrb.mxu1 %vm14953_vm9, %v14747_v38  ;;  %7418 = vmatpush.msk.msrb.mxu2 %vm14955_vm10, %v14747_v38  ;;  %vm14964_vm9 = vnez %v14869_v58  ;;  %vm14965_vm10 = vnez %v14871_v56  ;;  %v11639_v31 = vor.u32 %v8702_v26, %v7497_v14  ;;  %v7465_v14 = vld [vmem:[#allocation11 + $0x130] sm:$0xf] }
 0x3ad   :  { %7431 = vmatpush.msk.msrb.mxu3 %vm14957_vm11, %v14747_v38  ;;  %7387 = vmatpush.msk.msrb.mxu0 %vm14958_vm3, %v14747_v38  ;;  %vm14967_vm11 = vnez %v14966_v51  ;;  %vm14969_vm3 = vnez %v14968_v36  ;;  %v11644_v51 = vor.u32 %v8701_v20, %v7499_v17  ;;  %v11646_v36 = vor.u32 %v8717_v46, %v7563_v62  ;;  %v7529_v20 = vld [vmem:[#allocation11 + $0x1b0] sm:$0xf]  ;;  %v8710_v17 = vld [vmem:[#allocation11 + $0x1b4] sm:$0xf0]  ;;  %v8693_v46 = vld [vmem:[#allocation11 + $0x134] sm:$0xf] }
 0x3ae   :  { %7400 = vmatpush.msk.msrb.mxu1 %vm14959_vm6, %v14747_v38  ;;  %7419 = vmatpush.msk.msrb.mxu2 %vm14961_vm7, %v14747_v38  ;;  %vm14972_vm6 = vnez %v14971_v6  ;;  %vm14974_vm7 = vnez %v14973_v0  ;;  %v8700_v6 = vld [vmem:[#allocation11 + $0x164] sm:$0xf0]  ;;  %v7467_v62 = vld [vmem:[#allocation11 + $0x138] sm:$0xf0] }
 0x3af   :  { %7432 = vmatpush.msk.msrb.mxu3 %vm14963_vm8, %v14747_v38  ;;  %7388 = vmatpush.msk.msrb.mxu0 %vm14964_vm9, %v14747_v38  ;;  %vm14976_vm8 = vnez %v14894_v29  ;;  %vm14977_vm9 = vnez %v14896_v9  ;;  %v11651_v58 = vor.u32 %v8700_v6, %v7489_v63  ;;  %v2890_v63 = vld [vmem:[%s13851_s7] sm:$0x3] }
 0x3b0   :  { %7401 = vmatpush.msk.msrb.mxu1 %vm14965_vm10, %v14747_v38  ;;  %7420 = vmatpush.msk.msrb.mxu2 %vm14967_vm11, %v14747_v38  ;;  %vm14231_vm10 = vsmask.f32 7424  ;;  %vm14229_vm11 = vcmask 1046528  }
 0x3b1   :  { %7433 = vmatpush.msk.msrb.mxu3 %vm14969_vm3, %v14747_v38  ;;  %7389 = vmatpush.msk.msrb.mxu0 %vm11277_vm0, %v14747_v38  ;;  %vm14978_vm0 = vnez %v14901_v21  ;;  %vm14230_vm3 = vsmask.f32 6400 }
 0x3b2   :  { %7402 = vmatpush.msk.msrb.mxu1 %vm14972_vm6, %v14747_v38  ;;  %7421 = vmatpush.msk.msrb.mxu2 %vm14974_vm7, %v14747_v38  ;;  %vm14228_vm6 = vcmask 1045504   ;;  %vm14226_vm7 = vsmask.f32 5376 }
 0x3b3   :  { %7434 = vmatpush.msk.msrb.mxu3 %vm11301_vm2, %v14747_v38  ;;  %7390 = vmatpush.msk.msrb.mxu0 %vm14976_vm8, %v14747_v38  ;;  %vm14227_vm8 = vcmask 1044480  }
 0x3b4   :  { %7403 = vmatpush.msk.msrb.mxu1 %vm14977_vm9, %v14747_v38  ;;  %7422 = vmatpush.msk.msrb.mxu2 %vm11330_vm4, %v14747_v38  ;;  %vm14981_vm4 = vcmask 1040384  }
 0x3b5   :  { %7435 = vmatpush.msk.msrb.mxu3 %vm14978_vm0, %v14747_v38  ;;  %3357 = vmatpush.bf16.msra.mxu0 %v11639_v31 }
 0x3b6   :  { %7404 = vmatpush.msk.msrb.mxu1 %vm11346_vm15, %v14747_v38  ;;  %3385 = vmatpush.bf16.msra.mxu2 %v11644_v51 }
 0x3b7   :  { %7436 = vmatpush.msk.msrb.mxu3 %vm11358_vm5, %v14747_v38 }
 0x3b8   :  { %7405 = vmatpush.msk.msrb.mxu1 %vm11371_vm14, %v14747_v38 }
 0x3b9   :  { %7437 = vmatpush.msk.msrb.mxu3 %vm11381_vm1, %v14747_v38  ;;  %3358 = vmatpush.bf16.msra.mxu0 %v11651_v58 }
 0x3ba   :  { %7406 = vmatpush.msk.msrb.mxu1 %vm11394_vm13, %v14747_v38 }
 0x3bb   :  { %7438 = vmatpush.msk.msrb.mxu3 %vm11407_vm12, %v14747_v38  ;;  %v8676_v38 = vld [vmem:[#allocation11 + $0xa4] sm:$0xf0] }
 0x3bc   :  { %3371 = vmatpush.bf16.msra.mxu1 %v11641_v37 }
 0x3bd   :  { %3399 = vmatpush.bf16.msra.mxu3 %v11646_v36 }
 0x422   :  { %v2719_v21 = vpop.f32.mrf.mxu0 }
 0x427   :  { %v2739_v12 = vpop.f32.mrf.mxu1 }
 0x428   :  { %v2740_v32 = vadd.f32 %v2739_v12, %v2719_v21  ;;  %v2759_v15 = vpop.f32.mrf.mxu2  ;;  %v7553_v21 = vld [vmem:[#allocation11 + $0x1e0] sm:$0xf]  ;;  %v8716_v12 = vld [vmem:[#allocation11 + $0x1e4] sm:$0xf0] }
 0x42a   :  { %v2782_v56 = vmul.f32 0.0078125, %v2740_v32  ;;  %v8699_v32 = vld [vmem:[#allocation11 + $0x164] sm:$0xf] }
 0x42c   :  { %v2784_v7 = vperm.slane %v2782_v56, 0 }
 0x42e   :  { %v2779_v29 = vpop.f32.mrf.mxu3  ;;  %v11612_v9 = vsub.f32 %v10827_v45, %v2784_v7  ;;  %v11615_v57 = vsub.f32 %v11375_v41, %v2784_v7  ;;  %v11656_v7 = vor.u32 %v8716_v12, %v7553_v21  ;;  %v11705_v21 = vor.u32 %v8694_v1, %v7465_v14  ;;  %v7531_v12 = vld [vmem:[#allocation11 + $0x1b8] sm:$0xf0] }
 0x42f   :  { %v2780_v54 = vadd.f32 %v2779_v29, %v2759_v15  ;;  %v7491_v15 = vld [vmem:[#allocation11 + $0x168] sm:$0xf0]  ;;  %v8715_v29 = vld [vmem:[#allocation11 + $0x1e4] sm:$0xf]  ;;  %v7515_v1 = vld [vmem:[#allocation11 + $0x198] sm:$0xf0] }
 0x430   :  { %v2790_v34 = vmul.f32 %v11612_v9, %v11612_v9  ;;  %v2792_v60 = vmul.f32 %v11615_v57, %v11615_v57  ;;  %3372 = vmatpush.bf16.msra.mxu1 %v11656_v7 }
 0x431   :  { %v2783_v48 = vmul.f32 0.0078125, %v2780_v54 }
 0x432   :  { %v2794_v35 = vadd.f32 %v2792_v60, %v2790_v34  ;;  %v11658_v34 = vor.u32 %v8699_v32, %v7491_v15  ;;  %v7555_v60 = vld [vmem:[#allocation11 + $0x1e8] sm:$0xf0]  ;;  %v8692_v15 = vld [vmem:[#allocation11 + $0x124] sm:$0xf0] }
 0x433   :  { %v2785_v23 = vperm.slane %v2783_v48, 0  ;;  %v7481_v48 = vld [vmem:[#allocation11 + $0x150] sm:$0xf] }
 0x434   :  { %v2795_v3 = vrot.slane %v2794_v35, 4  ;;  %3386 = vmatpush.bf16.msra.mxu2 %v11658_v34 }
 0x435   :  { %v11622_v52 = vsub.f32 %v10829_v39, %v2785_v23  ;;  %v11625_v45 = vsub.f32 %v11439_v8, %v2785_v23  ;;  %v11662_v23 = vor.u32 %v8715_v29, %v7555_v60 }
 0x436   :  { %v2796_v19 = vadd.f32 %v2795_v3, %v2794_v35  ;;  %v8698_v3 = vld [vmem:[#allocation11 + $0x154] sm:$0xf0] }
 0x437   :  { %v2791_v41 = vmul.f32 %v11622_v52, %v11622_v52  ;;  %v2793_v61 = vmul.f32 %v11625_v45, %v11625_v45  ;;  %3400 = vmatpush.bf16.msra.mxu3 %v11662_v23 }
 0x438   :  { %v2797_v44 = vrot.slane %v2796_v19, 2 }
 0x439   :  { %v2801_v24 = vadd.f32 %v2793_v61, %v2791_v41  ;;  %v8714_v41 = vld [vmem:[#allocation11 + $0x1d4] sm:$0xf0]  ;;  %v11666_v61 = vor.u32 %v8698_v3, %v7481_v48  ;;  %v7521_v48 = vld [vmem:[#allocation11 + $0x1a0] sm:$0xf] }
 0x43a   :  { %v2798_v28 = vadd.f32 %v2797_v44, %v2796_v19  ;;  %v7545_v19 = vld [vmem:[#allocation11 + $0x1d0] sm:$0xf] }
 0x43b   :  { %v2802_v59 = vrot.slane %v2801_v24, 4  ;;  %v11668_v44 = vor.u32 %v8714_v41, %v7545_v19  ;;  %3359 = vmatpush.bf16.msra.mxu0 %v11666_v61  ;;  %v8691_v19 = vld [vmem:[#allocation11 + $0x124] sm:$0xf]  ;;  %v7459_v41 = vld [vmem:[#allocation11 + $0x128] sm:$0xf0] }
 0x43c   :  { %v2799_v53 = vrot.slane %v2798_v28, 1 }
 0x43d   :  { %v2803_v47 = vadd.f32 %v2802_v59, %v2801_v24  ;;  %v8697_v24 = vld [vmem:[#allocation11 + $0x154] sm:$0xf]  ;;  %3373 = vmatpush.bf16.msra.mxu1 %v11668_v44 }
 0x43e   :  { %v2800_v43 = vadd.f32 %v2799_v53, %v2798_v28  ;;  %v7483_v28 = vld [vmem:[#allocation11 + $0x158] sm:$0xf0]  ;;  %v8713_v59 = vld [vmem:[#allocation11 + $0x1d4] sm:$0xf] }
 0x43f   :  { %v2804_v2 = vrot.slane %v2803_v47, 2 }
 0x440   :  { %2824 = vmatmul.f32.vlgmr.msrb.gmra.mxu0 %v2800_v43  ;;  %2864 = vmatmul.f32.vlgmr.msrb.gmra.mxu2 %v2800_v43  ;;  %v7473_v43 = vld [vmem:[#allocation11 + $0x140] sm:$0xf] }
 0x441   :  { %v2805_v39 = vadd.f32 %v2804_v2, %v2803_v47  ;;  %v11672_v47 = vor.u32 %v8697_v24, %v7483_v28  ;;  %v7547_v2 = vld [vmem:[#allocation11 + $0x1d8] sm:$0xf0]  ;;  %v8707_v24 = vld [vmem:[#allocation11 + $0x1a4] sm:$0xf] }
 0x443   :  { %v2806_v22 = vrot.slane %v2805_v39, 1  ;;  %3387 = vmatpush.bf16.msra.mxu2 %v11672_v47 }
 0x445   :  { %v2807_v8 = vadd.f32 %v2806_v22, %v2805_v39  ;;  %v11674_v39 = vor.u32 %v8713_v59, %v7547_v2  ;;  %v8696_v22 = vld [vmem:[#allocation11 + $0x144] sm:$0xf0]  ;;  %v7523_v59 = vld [vmem:[#allocation11 + $0x1a8] sm:$0xf0]  ;;  %v8690_v2 = vld [vmem:[#allocation11 + $0x114] sm:$0xf0] }
 0x447   :  { %2844 = vmatmul.f32.vlgmr.msrb.gmra.mxu1 %v2807_v8  ;;  %2884 = vmatmul.f32.vlgmr.msrb.gmra.mxu3 %v2807_v8  ;;  %v7537_v8 = vld [vmem:[#allocation11 + $0x1c0] sm:$0xf] }
 0x448   :  { %3401 = vmatpush.bf16.msra.mxu3 %v11674_v39 }
 0x4bd   :  { %v2825_v13 = vpop.f32.mrf.mxu0 }
 0x4c3   :  { %v2865_v42 = vpop.f32.mrf.mxu2 }
 0x4c4   :  { %v2845_v18 = vpop.f32.mrf.mxu1 }
 0x4c5   :  { %v2846_v30 = vadd.f32 %v2845_v18, %v2825_v13  ;;  %v8712_v13 = vld [vmem:[#allocation11 + $0x1c4] sm:$0xf0] }
 0x4c7   :  { %v2888_v5 = vmul.f32 0.0078125, %v2846_v30 }
 0x4c9   :  { %v11631_v16 = vadd.f32 1e-05, %v2888_v5  ;;  %v11683_v5 = vor.u32 %v8696_v22, %v7473_v43 }
 0x4ca   :  { %v2885_v33 = vpop.f32.mrf.mxu3 }
 0x4cb   :  { %8857 = vrsqrt.f32 %v11631_v16  ;;  %v2886_v11 = vadd.f32 %v2885_v33, %v2865_v42  ;;  %v8695_v42 = vld [vmem:[#allocation11 + $0x144] sm:$0xf]  ;;  %v7475_v33 = vld [vmem:[#allocation11 + $0x148] sm:$0xf0]  ;;  %vm2899_vm15 = vweird.f32 %v11631_v16  ;;  %3360 = vmatpush.bf16.msra.mxu0 %v11683_v5 }
 0x4cd   :  { %v2889_v10 = vmul.f32 0.0078125, %v2886_v11 }
 0x4cf   :  { %v2892_v27 = vadd.f32 1e-05, %v2889_v10  ;;  %v11687_v10 = vor.u32 %v8712_v13, %v7537_v8  ;;  %3361 = vmatpush.bf16.msra.mxu0 %v11705_v21  ;;  %v7513_v13 = vld [vmem:[#allocation11 + $0x190] sm:$0xf] }
 0x4d1   :  { %v11634_v40 = vpop.eup %8857  ;;  %8859 = vrsqrt.f32 %v2892_v27  ;;  %vm2909_vm5 = vweird.f32 %v2892_v27  ;;  %3374 = vmatpush.bf16.msra.mxu1 %v11687_v10 }
 0x4d2   :  { %v2894_v50 = vmul.f32 %v11634_v40, %v11631_v16  ;;  %vm2900_vm14 = vweird.f32 %v11634_v40  ;;  %v11710_v16 = vor.u32 %v8710_v17, %v7529_v20 }
 0x4d3   :  { %vm2901_vm1 = vmor %vm2899_vm15, %vm2900_vm14 }
 0x4d4   :  { %v2895_v4 = vmul.f32 %v11634_v40, %v2894_v50  ;;  %v7539_v50 = vld [vmem:[#allocation11 + $0x1c8] sm:$0xf0] }
 0x4d5   :  { %3375 = vmatpush.bf16.msra.mxu1 %v11710_v16 }
 0x4d6   :  { %v2896_v55 = vmul.f32 0.5, %v2895_v4  ;;  %v11693_v4 = vor.u32 %v8695_v42, %v7475_v33  ;;  %v11731_v33 = vor.u32 %v8691_v19, %v7459_v41  ;;  %v7689_v41 = vld [vmem:[#allocation11 + $0xf0] sm:$0xf] }
 0x4d7   :  { %v11648_v0 = vpop.eup %8859 }
 0x4d8   :  { %v2904_v56 = vmul.f32 %v11648_v0, %v2892_v27  ;;  %v2897_v54 = vsub.f32 1.5, %v2896_v55  ;;  %vm2910_vm2 = vweird.f32 %v11648_v0  ;;  %v8711_v27 = vld [vmem:[#allocation11 + $0x1c4] sm:$0xf]  ;;  %v8709_v55 = vld [vmem:[#allocation11 + $0x1b4] sm:$0xf]  ;;  %3388 = vmatpush.bf16.msra.mxu2 %v11693_v4 }
 0x4d9   :  { %vm11678_vm13 = vmor %vm2909_vm5, %vm2910_vm2  ;;  %v11695_v25 = vor.u32 %v8711_v27, %v7539_v50  ;;  %v11720_v60 = vor.u32 %v8709_v55, %v7531_v12  ;;  %v7451_v27 = vld [vmem:[#allocation11 + $0x118] sm:$0xf0]  ;;  %v11733_v50 = vor.u32 %v8707_v24, %v7523_v59  ;;  %v7441_v55 = vld [vmem:[#allocation11 + $0x100] sm:$0xf] }
 0x4da   :  { %v2905_v35 = vmul.f32 %v11648_v0, %v2904_v56  ;;  %v2898_v11 = vmul.f32 %v11634_v40, %v2897_v54  ;;  %v7457_v56 = vld [vmem:[#allocation11 + $0x120] sm:$0xf]  ;;  %v11718_v54 = vor.u32 %v8693_v46, %v7467_v62  ;;  %v8686_v24 = vld [vmem:[#allocation11 + $0xf4] sm:$0xf0] }
 0x4db   :  { %3402 = vmatpush.bf16.msra.mxu3 %v11695_v25  ;;  %v11724_v28 = vor.u32 %v8692_v15, %v7457_v56  ;;  %v8704_v56 = vld [vmem:[#allocation11 + $0x184] sm:$0xf0]  ;;  %v8687_v15 = vld [vmem:[#allocation11 + $0x104] sm:$0xf] }
 0x4dc   :  { %v2906_v53 = vmul.f32 0.5, %v2905_v35  ;;  %v2902_v29 = vsel %vm2901_vm1, %v11634_v40, %v2898_v11  ;;  %v8708_v35 = vld [vmem:[#allocation11 + $0x1a4] sm:$0xf0]  ;;  %3389 = vmatpush.bf16.msra.mxu2 %v11718_v54  ;;  %v8689_v11 = vld [vmem:[#allocation11 + $0x114] sm:$0xf] }
 0x4dd   :  { %v11727_v8 = vor.u32 %v8708_v35, %v7521_v48  ;;  %3362 = vmatpush.bf16.msra.mxu0 %v11724_v28  ;;  %v7507_v48 = vld [vmem:[#allocation11 + $0x188] sm:$0xf0]  ;;  %v7625_v35 = vld [vmem:[#allocation11 + $0x70] sm:$0xf] }
 0x4de   :  { %v2907_v18 = vsub.f32 1.5, %v2906_v53  ;;  %v7449_v53 = vld [vmem:[#allocation11 + $0x110] sm:$0xf] }
 0x4df   :  { %3403 = vmatpush.bf16.msra.mxu3 %v11720_v60  ;;  %v11735_v14 = vor.u32 %v8690_v2, %v7449_v53  ;;  %3376 = vmatpush.bf16.msra.mxu1 %v11727_v8 }
 0x4e0   :  { %v2908_v26 = vmul.f32 %v11648_v0, %v2907_v18  ;;  %v8706_v18 = vld [vmem:[#allocation11 + $0x194] sm:$0xf0]  ;;  %3390 = vmatpush.bf16.msra.mxu2 %v11731_v33 }
 0x4e1   :  { %v11743_v12 = vor.u32 %v8706_v18, %v7513_v13  ;;  %3363 = vmatpush.bf16.msra.mxu0 %v11735_v14 }
 0x4e2   :  { %v2912_v6 = vsel %vm11678_vm13, %v11648_v0, %v2908_v26  ;;  %v2928_v0 = vld [vmem:[%s13852_s8] sm:$0x3]  ;;  %v8705_v26 = vld [vmem:[#allocation11 + $0x194] sm:$0xf] }
 0x4e3   :  { %v2915_v32 = vrot.slane %v2912_v6, 7  ;;  %v2930_v43 = vperm.slane %v2928_v0, 0  ;;  %v2931_v22 = vperm.slane %v2928_v0, 1  ;;  %v7505_v6 = vld [vmem:[#allocation11 + $0x180] sm:$0xf]  ;;  %3404 = vmatpush.bf16.msra.mxu3 %v11733_v50  ;;  %v11749_v19 = vor.u32 %v8705_v26, %v7515_v1  ;;  %3377 = vmatpush.bf16.msra.mxu1 %v11743_v12 }
 0x4e4   :  { %v11755_v18 = vor.u32 %v8704_v56, %v7505_v6  ;;  %v11762_v26 = vor.u32 %v8686_v24, %v7689_v41  ;;  %v7617_v1 = vld [vmem:[#allocation11 + $0x60] sm:$0xf]  ;;  %v8667_v6 = vld [vmem:[#allocation11 + $0x64] sm:$0xf]  ;;  %v7619_v56 = vld [vmem:[#allocation11 + $0x68] sm:$0xf0] }
 0x4e5   :  { %v2916_v3 = vsel %vm14981_vm4, %v2902_v29, %v2915_v32  ;;  %v11745_v32 = vor.u32 %v8689_v11, %v7451_v27  ;;  %v7691_v11 = vld [vmem:[#allocation11 + $0xf8] sm:$0xf0]  ;;  %v8665_v41 = vld [vmem:[#allocation11 + $0x54] sm:$0xf] }
 0x4e6   :  { %v2918_v40 = vmul.f32 %v2916_v3, %v2890_v63  ;;  %v8688_v63 = vld [vmem:[#allocation11 + $0x104] sm:$0xf0]  ;;  %v8670_v3 = vld [vmem:[#allocation11 + $0x74] sm:$0xf0]  ;;  %14982 = vst [vmem:[#allocation66_spill] sm:$0xff] %v11755_v18 }
 0x4e7   :  { %3391 = vmatpush.bf16.msra.mxu2 %v11745_v32  ;;  %14985 = vst [vmem:[#allocation69_spill] sm:$0xff] %v11762_v26  ;;  %3405 = vmatpush.bf16.msra.mxu3 %v11749_v19  ;;  %v7611_v24 = vld [vmem:[#allocation11 + $0x58] sm:$0xf0] }
 0x4e8   :  { %v2920_v30 = vperm.slane %v2918_v40, 0  ;;  %v2921_v42 = vperm.slane %v2918_v40, 1  ;;  %v8669_v40 = vld [vmem:[#allocation11 + $0x74] sm:$0xf]  ;;  %3378 = vmatpush.bf16.msra.mxu1 %v11755_v18 }
 0x4ea   :  { %v2924_v20 = vmul.f32 %v2920_v30, %v11612_v9  ;;  %v2925_v17 = vmul.f32 %v2921_v42, %v11622_v52  ;;  %v2926_v46 = vmul.f32 %v2920_v30, %v11615_v57  ;;  %v2927_v62 = vmul.f32 %v2921_v42, %v11625_v45  ;;  %v7443_v9 = vld [vmem:[#allocation11 + $0x108] sm:$0xf0]  ;;  %v8703_v45 = vld [vmem:[#allocation11 + $0x184] sm:$0xf]  ;;  %v8685_v42 = vld [vmem:[#allocation11 + $0xf4] sm:$0xf] }
 0x4eb   :  { %v11757_v30 = vor.u32 %v8670_v3, %v7625_v35  ;;  %v11760_v27 = vor.u32 %v8687_v15, %v7443_v9  ;;  %v8683_v9 = vld [vmem:[#allocation11 + $0xe4] sm:$0xf]  ;;  %v8682_v35 = vld [vmem:[#allocation11 + $0xd4] sm:$0xf0] }
 0x4ec   :  { %v2934_v29 = vadd.f32 %v2930_v43, %v2924_v20  ;;  %v2935_v52 = vadd.f32 %v2931_v22, %v2925_v17  ;;  %v2936_v0 = vadd.f32 %v2930_v43, %v2926_v46  ;;  %v2937_v57 = vadd.f32 %v2931_v22, %v2927_v62  ;;  %v7627_v22 = vld [vmem:[#allocation11 + $0x78] sm:$0xf0]  ;;  %v8668_v20 = vld [vmem:[#allocation11 + $0x64] sm:$0xf0]  ;;  %v7681_v62 = vld [vmem:[#allocation11 + $0xe0] sm:$0xf]  ;;  %3587 = vmatpush.bf16.msrb.mxu1 %v11762_v26 }
 0x4ed   :  { %v11752_v43 = vor.u32 %v8688_v63, %v7441_v55  ;;  %14983 = vst [vmem:[#allocation67_spill] sm:$0xff] %v11757_v30  ;;  %v11765_v17 = vor.u32 %v8703_v45, %v7507_v48  ;;  %v11767_v46 = vor.u32 %v8669_v40, %v7627_v22  ;;  %v8684_v55 = vld [vmem:[#allocation11 + $0xe4] sm:$0xf0]  ;;  %v11770_v63 = vor.u32 %v8685_v42, %v7691_v11  ;;  %v7673_v48 = vld [vmem:[#allocation11 + $0xd0] sm:$0xf] }
 0x4ee   :  { %v2938_v59 = vmax.f32 %v2934_v29, 0.0  ;;  %v2939_v53 = vmax.f32 %v2935_v52, 0.0  ;;  %v2940_v2 = vmax.f32 %v2936_v0, 0.0  ;;  %v2941_v13 = vmax.f32 %v2937_v57, 0.0  ;;  %14984 = vst [vmem:[#allocation68_spill] sm:$0xff] %v11760_v27  ;;  %3392 = vmatpush.bf16.msra.mxu2 %v11760_v27 }
 0x4ef   :  { %14986 = vst [vmem:[#allocation70_spill] sm:$0xff] %v11765_v17  ;;  %3364 = vmatpush.bf16.msra.mxu0 %v11752_v43  ;;  %v11774_v15 = vor.u32 %v8668_v20, %v7617_v1  ;;  %v7683_v29 = vld [vmem:[#allocation11 + $0xe8] sm:$0xf0]  ;;  %v11778_v52 = vor.u32 %v8684_v55, %v7681_v62  ;;  %v7609_v0 = vld [vmem:[#allocation11 + $0x50] sm:$0xf]  ;;  %3406 = vmatpush.bf16.msra.mxu3 %v11765_v17 }
 0x4f0   :  { %2942 = vst [vmem:[#allocation5] sm:$0xff] %v2938_v59  ;;  %v8666_v57 = vld [vmem:[#allocation11 + $0x54] sm:$0xf0]  ;;  %v11782_v45 = vor.u32 %v8667_v6, %v7619_v56  ;;  %v11785_v3 = vor.u32 %v8683_v9, %v7683_v29  ;;  %v8681_v59 = vld [vmem:[#allocation11 + $0xd4] sm:$0xf]  ;;  %v11794_v42 = vor.u32 %v8665_v41, %v7611_v24 }
 0x4f1   :  { %2943 = vst [vmem:[#allocation5 + $0x8] sm:$0xff] %v2939_v53  ;;  %v11788_v40 = vor.u32 %v8666_v57, %v7609_v0  ;;  %v7675_v53 = vld [vmem:[#allocation11 + $0xd8] sm:$0xf0]  ;;  %3588 = vmatpush.bf16.msrb.mxu1 %v11778_v52  ;;  %v7601_v22 = vld [vmem:[#allocation11 + $0x40] sm:$0xf] }
 0x4f2   :  { %14987 = vst [vmem:[#allocation71_spill] sm:$0xff] %v11767_v46  ;;  %3601 = vmatpush.bf16.msrb.mxu2 %v11767_v46  ;;  %v7665_v11 = vld [vmem:[#allocation11 + $0xc0] sm:$0xf]  ;;  %v8680_v1 = vld [vmem:[#allocation11 + $0xc4] sm:$0xf0]  ;;  %v11797_v20 = vor.u32 %v8681_v59, %v7675_v53 }
 0x4f3   :  { %2944 = vst [vmem:[#allocation5 + $0x10] sm:$0xff] %v2940_v2  ;;  %3573 = vmatpush.bf16.msrb.mxu0 %v11757_v30  ;;  %3615 = vmatpush.bf16.msrb.mxu3 %v11770_v63  ;;  %v11791_v2 = vor.u32 %v8682_v35, %v7673_v48  ;;  %v8663_v62 = vld [vmem:[#allocation11 + $0x44] sm:$0xf]  ;;  %v7603_v55 = vld [vmem:[#allocation11 + $0x48] sm:$0xf0]  ;;  %v11803_v29 = vor.u32 %v8680_v1, %v7665_v11 }
 0x4f4   :  { %14988 = vst [vmem:[#allocation72_spill] sm:$0xff] %v11770_v63  ;;  %v8679_v56 = vld [vmem:[#allocation11 + $0xc4] sm:$0xf]  ;;  %v7667_v9 = vld [vmem:[#allocation11 + $0xc8] sm:$0xf0]  ;;  %v11806_v48 = vor.u32 %v8663_v62, %v7603_v55 }
 0x4f5   :  { %2945 = vst [vmem:[#allocation5 + $0x18] sm:$0xff] %v2941_v13  ;;  %v8664_v13 = vld [vmem:[#allocation11 + $0x44] sm:$0xf0]  ;;  %3589 = vmatpush.bf16.msrb.mxu1 %v11791_v2  ;;  %v7593_v0 = vld [vmem:[#allocation11 + $0x30] sm:$0xf]  ;;  %v11809_v24 = vor.u32 %v8679_v56, %v7667_v9 }
 0x4f6   :  { %14989 = vst [vmem:[#allocation73_spill] sm:$0xff] %v11774_v15  ;;  %3602 = vmatpush.bf16.msrb.mxu2 %v11782_v45  ;;  %v11800_v6 = vor.u32 %v8664_v13, %v7601_v22  ;;  %v8662_v57 = vld [vmem:[#allocation11 + $0x34] sm:$0xf0]  ;;  %v7657_v35 = vld [vmem:[#allocation11 + $0xb0] sm:$0xf] }
 0x4f7   :  { %14990 = vst [vmem:[#allocation74_spill] sm:$0xff] %v11778_v52  ;;  %3574 = vmatpush.bf16.msrb.mxu0 %v11774_v15  ;;  %3616 = vmatpush.bf16.msrb.mxu3 %v11785_v3  ;;  %v8678_v41 = vld [vmem:[#allocation11 + $0xb4] sm:$0xf0]  ;;  %v8661_v59 = vld [vmem:[#allocation11 + $0x34] sm:$0xf]  ;;  %v11812_v13 = vor.u32 %v8662_v57, %v7593_v0 }
 0x4f8   :  { %14991 = vst [vmem:[#allocation75_spill] sm:$0xff] %v11782_v45  ;;  %v7595_v53 = vld [vmem:[#allocation11 + $0x38] sm:$0xf0]  ;;  %v8677_v22 = vld [vmem:[#allocation11 + $0xb4] sm:$0xf]  ;;  %v11815_v62 = vor.u32 %v8678_v41, %v7657_v35 }
 0x4f9   :  { %14992 = vst [vmem:[#allocation76_spill] sm:$0xff] %v11785_v3  ;;  %v7659_v11 = vld [vmem:[#allocation11 + $0xb8] sm:$0xf0]  ;;  %v7585_v1 = vld [vmem:[#allocation11 + $0x20] sm:$0xf]  ;;  %3590 = vmatpush.bf16.msrb.mxu1 %v11803_v29  ;;  %v11818_v56 = vor.u32 %v8661_v59, %v7595_v53 }
 0x4fa   :  { %14993 = vst [vmem:[#allocation77_spill] sm:$0xff] %v11788_v40  ;;  %3603 = vmatpush.bf16.msrb.mxu2 %v11794_v42  ;;  %v7649_v55 = vld [vmem:[#allocation11 + $0xa0] sm:$0xf]  ;;  %v7587_v9 = vld [vmem:[#allocation11 + $0x28] sm:$0xf0]  ;;  %v11821_v0 = vor.u32 %v8677_v22, %v7659_v11  ;;  %v11824_v35 = vor.u32 %v8660_v49, %v7585_v1  ;;  %v15006_v3 = vld [vmem:[#allocation82_spill] sm:$0xff] }
 0x4fb   :  { %14994 = vst [vmem:[#allocation78_spill] sm:$0xff] %v11791_v2  ;;  %3575 = vmatpush.bf16.msrb.mxu0 %v11788_v40  ;;  %3617 = vmatpush.bf16.msrb.mxu3 %v11797_v20  ;;  %v7651_v2 = vld [vmem:[#allocation11 + $0xa8] sm:$0xf0]  ;;  %v7577_v57 = vld [vmem:[#allocation11 + $0x10] sm:$0xf]  ;;  %vm15007_vm12 = vnez %v15006_v3  ;;  %v11829_v53 = vor.u32 %v8676_v38, %v7649_v55 }
 0x4fc   :  { %14995 = vst [vmem:[#allocation79_spill] sm:$0xff] %v11794_v42  ;;  %v8659_v42 = vld [vmem:[#allocation11 + $0x24] sm:$0xf]  ;;  %v2946_v40 = vld [vmem:[#allocation5] ss:$8 sm:$0x3] }
 0x4fd   :  { %14996 = vst [vmem:[#allocation80_spill] sm:$0xff] %v11797_v20  ;;  %v8675_v20 = vld [vmem:[#allocation11 + $0xa4] sm:$0xf]  ;;  %v7641_v41 = vld [vmem:[#allocation11 + $0x90] sm:$0xf]  ;;  %3591 = vmatpush.bf16.msrb.mxu1 %v11815_v62  ;;  %v11834_v49 = vor.u32 %v8659_v42, %v7587_v9 }
 0x4fe   :  { %14997 = vst [vmem:[#allocation81_spill] sm:$0xff] %v11800_v6  ;;  %3604 = vmatpush.bf16.msrb.mxu2 %v11806_v48  ;;  %v2951_v59 = vld [vmem:[#allocation5 + $0x1] ss:$8 sm:$0x3]  ;;  %v7579_v22 = vld [vmem:[#allocation11 + $0x18] sm:$0xf0]  ;;  %v11839_v38 = vor.u32 %v8675_v20, %v7651_v2 }
 0x4ff   :  { %14998 = vst [vmem:[#allocation83_spill] sm:$0xff] %v11803_v29  ;;  %3576 = vmatpush.bf16.msrb.mxu0 %v11800_v6  ;;  %3618 = vmatpush.bf16.msrb.mxu3 %v11809_v24  ;;  %v8658_v6 = vld [vmem:[#allocation11 + $0x14] sm:$0xf0]  ;;  %v2956_v11 = vld [vmem:[#allocation5 + $0x2] ss:$8 sm:$0x3] }
 0x500   :  { %14999 = vst [vmem:[#allocation84_spill] sm:$0xff] %v11806_v48  ;;  %v8674_v29 = vld [vmem:[#allocation11 + $0x94] sm:$0xf0]  ;;  %v8673_v1 = vld [vmem:[#allocation11 + $0x94] sm:$0xf]  ;;  %v11844_v42 = vor.u32 %v8658_v6, %v7577_v57 }
 0x501   :  { %15000 = vst [vmem:[#allocation85_spill] sm:$0xff] %v11809_v24  ;;  %v8657_v24 = vld [vmem:[#allocation11 + $0x14] sm:$0xf]  ;;  %v7569_v55 = vld [vmem:[#allocation11] sm:$0xf]  ;;  %3592 = vmatpush.bf16.msrb.mxu1 %v11829_v53  ;;  %v11849_v2 = vor.u32 %v8674_v29, %v7641_v41 }
 0x502   :  { %15001 = vst [vmem:[#allocation86_spill] sm:$0xff] %v11812_v13  ;;  %3605 = vmatpush.bf16.msrb.mxu2 %v11818_v56  ;;  %v7633_v9 = vld [vmem:[#allocation11 + $0x80] sm:$0xf]  ;;  %v8655_v20 = vld [vmem:[#allocation11 + $0x4] sm:$0xf] }
 0x503   :  { %15002 = vst [vmem:[#allocation87_spill] sm:$0xff] %v11815_v62  ;;  %3577 = vmatpush.bf16.msrb.mxu0 %v11812_v13  ;;  %v7643_v13 = vld [vmem:[#allocation11 + $0x98] sm:$0xf0]  ;;  %3619 = vmatpush.bf16.msrb.mxu3 %v11821_v0  ;;  %v8656_v62 = vld [vmem:[#allocation11 + $0x4] sm:$0xf0] }
 0x504   :  { %15003 = vst [vmem:[#allocation88_spill] sm:$0xff] %v11818_v56  ;;  %v8672_v56 = vld [vmem:[#allocation11 + $0x84] sm:$0xf0]  ;;  %v2981_v6 = vld [vmem:[#allocation5 + $0x7] ss:$8 sm:$0x3]  ;;  %v11859_v57 = vor.u32 %v8673_v1, %v7643_v13  ;;  %v11864_v29 = vor.u32 %v8656_v62, %v7569_v55 }
 0x505   :  { %15004 = vst [vmem:[#allocation89_spill] sm:$0xff] %v11821_v0  ;;  %v8671_v41 = vld [vmem:[#allocation11 + $0x84] sm:$0xf]  ;;  %3593 = vmatpush.bf16.msrb.mxu1 %v11849_v2  ;;  %v8733_v0 = vld [vmem:[#allocation11 + $0x274] sm:$0xf] }
 0x506   :  { %15005 = vst [vmem:[#allocation90_spill] sm:$0xff] %v11824_v35  ;;  %3606 = vmatpush.bf16.msrb.mxu2 %v11834_v49  ;;  %v7755_v48 = vld [vmem:[#allocation11 + $0x278] sm:$0xf0]  ;;  %v8748_v26 = vld [vmem:[#allocation11 + $0x2e4] sm:$0xf0] }
 0x507   :  { %2948 = vst.msk [vmem:[#allocation6 + $0x2] ss:$8 sm:$0x3] %vm15007_vm12, %v2946_v40  ;;  %v2961_v40 = vld [vmem:[#allocation5 + $0x3] ss:$8 sm:$0x3]  ;;  %3578 = vmatpush.bf16.msrb.mxu0 %v11824_v35  ;;  %v11854_v35 = vor.u32 %v8657_v24, %v7579_v22  ;;  %3620 = vmatpush.bf16.msrb.mxu3 %v11839_v38  ;;  %v11867_v24 = vor.u32 %v8672_v56, %v7633_v9 }
 0x508   :  { %15008 = vst [vmem:[#allocation91_spill] sm:$0xff] %v11829_v53  ;;  %v7819_v45 = vld [vmem:[#allocation11 + $0x2f8] sm:$0xf0]  ;;  %v8765_v30 = vld [vmem:[#allocation11 + $0x374] sm:$0xf] }
 0x509   :  { %2953 = vst.msk [vmem:[#allocation6 + $0x4] ss:$8 sm:$0x3] %vm15007_vm12, %v2951_v59  ;;  %v2966_v59 = vld [vmem:[#allocation5 + $0x4] ss:$8 sm:$0x3]  ;;  %3594 = vmatpush.bf16.msrb.mxu1 %v11867_v24 }
 0x50a   :  { %15009 = vst [vmem:[#allocation92_spill] sm:$0xff] %v11834_v49  ;;  %3607 = vmatpush.bf16.msrb.mxu2 %v11854_v35 }
 0x50b   :  { %2958 = vst.msk [vmem:[#allocation6 + $0x6] ss:$8 sm:$0x3] %vm15007_vm12, %v2956_v11  ;;  %v2971_v11 = vld [vmem:[#allocation5 + $0x5] ss:$8 sm:$0x3]  ;;  %3579 = vmatpush.bf16.msrb.mxu0 %v11844_v42  ;;  %3621 = vmatpush.bf16.msrb.mxu3 %v11859_v57 }
 0x50c   :  { %15010 = vst [vmem:[#allocation93_spill] sm:$0xff] %v11839_v38  ;;  %v8750_v38 = vld [vmem:[#allocation11 + $0x2f4] sm:$0xf0] }
 0x50d   :  { %2963 = vst.msk [vmem:[#allocation6 + $0x10] ss:$8 sm:$0x3] %vm15007_vm12, %v2961_v40  ;;  %v2976_v40 = vld [vmem:[#allocation5 + $0x6] ss:$8 sm:$0x3] }
 0x50e   :  { %15011 = vst [vmem:[#allocation94_spill] sm:$0xff] %v11844_v42  ;;  %v7817_v42 = vld [vmem:[#allocation11 + $0x2f0] sm:$0xf] }
 0x50f   :  { %2968 = vst.msk [vmem:[#allocation6 + $0x12] ss:$8 sm:$0x3] %vm15007_vm12, %v2966_v59  ;;  %v7571_v59 = vld [vmem:[#allocation11 + $0x8] sm:$0xf0]  ;;  %3580 = vmatpush.bf16.msrb.mxu0 %v11864_v29  ;;  %v11887_v63 = vor.u32 %v8750_v38, %v7817_v42 }
 0x510   :  { %15012 = vst [vmem:[#allocation95_spill] sm:$0xff] %v11849_v2  ;;  %v11870_v22 = vor.u32 %v8655_v20, %v7571_v59 }
 0x511   :  { %2973 = vst.msk [vmem:[#allocation6 + $0x14] ss:$8 sm:$0x3] %vm15007_vm12, %v2971_v11  ;;  %v7635_v11 = vld [vmem:[#allocation11 + $0x88] sm:$0xf0] }
 0x512   :  { %15013 = vst [vmem:[#allocation96_spill] sm:$0xff] %v11854_v35  ;;  %v11873_v13 = vor.u32 %v8671_v41, %v7635_v11  ;;  %v3162_v1 = vld [vmem:[#allocation6] sm:$0xfe]  ;;  %3608 = vmatpush.bf16.msrb.mxu2 %v11870_v22 }
 0x513   :  { %2978 = vst.msk [vmem:[#allocation6 + $0x16] ss:$8 sm:$0x3] %vm15007_vm12, %v2976_v40  ;;  %v3163_v40 = vld [vmem:[#allocation6 + $0x8] sm:$0xfe] }
 0x514   :  { %15014 = vst [vmem:[#allocation97_spill] sm:$0xff] %v11859_v57  ;;  %3622 = vmatpush.bf16.msrb.mxu3 %v11873_v13  ;;  %v8734_v57 = vld [vmem:[#allocation11 + $0x274] sm:$0xf0] }
 0x515   :  { %2983 = vst.msk [vmem:[#allocation6 + $0x20] ss:$8 sm:$0x3] %vm15007_vm12, %v2981_v6 }
 0x516   :  { %15015 = vst [vmem:[#allocation98_spill] sm:$0xff] %v11864_v29 }
 0x517   :  { %15016 = vst [vmem:[#allocation99_spill] sm:$0xff] %v11867_v24  ;;  %v7753_v24 = vld [vmem:[#allocation11 + $0x270] sm:$0xf] }
 0x518   :  { %15017 = vst [vmem:[#allocation100_spill] sm:$0xff] %v11870_v22  ;;  %v11885_v15 = vor.u32 %v8734_v57, %v7753_v24  ;;  %v8746_v57 = vld [vmem:[#allocation11 + $0x2d4] sm:$0xf0]  ;;  %v8729_v24 = vld [vmem:[#allocation11 + $0x254] sm:$0xf] }
 0x519   :  { %15018 = vst [vmem:[#allocation101_spill] sm:$0xff] %v11873_v13 }
 0x51a   :  { %v11877_v62 = vld [vmem:[#allocation6 + $0x10] sm:$0xff]  ;;  %v11879_v55 = vld [vmem:[#allocation6 + $0x18] sm:$0xff]  ;;  %15019 = vst [vmem:[#allocation102_spill] sm:$0xff] %v11885_v15 }
 0x51b   :  { %v3166_v9 = vpack.c.bf16 %v11877_v62, %v3162_v1  ;;  %v3167_v6 = vpack.c.bf16 %v11879_v55, %v3163_v40  ;;  %v8749_v40 = vld [vmem:[#allocation11 + $0x2f4] sm:$0xf]  ;;  %15020 = vst [vmem:[#allocation103_spill] sm:$0xff] %v11887_v63 }
 0x51c   :  { %v3164_v56 = vld [vmem:[#allocation6 + $0x20] sm:$0x1]  ;;  %v3165_v20 = vld [vmem:[#allocation6 + $0x28] sm:$0x1] }
 0x51d   :  { %v3168_v59 = vpack.c.bf16 %v3164_v56, %v3164_v56  ;;  %v3169_v41 = vpack.c.bf16 %v3165_v20, %v3165_v20  ;;  %v3174_v11 = vshll.u32 %v3166_v9, 16  ;;  %v3186_v29 = vshll.u32 %v3167_v6, 16 }
 0x51e   :  { %v3172_v22 = vshrl.u32 %v3166_v9, 16  ;;  %v3184_v53 = vshrl.u32 %v3167_v6, 16  ;;  %v11891_v6 = vor.u32 %v8733_v0, %v7755_v48  ;;  %v8730_v48 = vld [vmem:[#allocation11 + $0x254] sm:$0xf0] }
 0x51f   :  { %v3179_v35 = vshll.u32 %v3168_v59, 16  ;;  %v3191_v2 = vshll.u32 %v3169_v41, 16  ;;  %v3176_v49 = vrot.slane %v3174_v11, 1  ;;  %v3188_v1 = vrot.slane %v3186_v29, 1  ;;  %v7745_v59 = vld [vmem:[#allocation11 + $0x260] sm:$0xf] }
 0x520   :  { %v8732_v41 = vld [vmem:[#allocation11 + $0x264] sm:$0xf0]  ;;  %15021 = vst [vmem:[#allocation104_spill] sm:$0xff] %v11891_v6  ;;  %v11893_v29 = vor.u32 %v8749_v40, %v7819_v45  ;;  %v7809_v11 = vld [vmem:[#allocation11 + $0x2e0] sm:$0xf] }
 0x521   :  { %v3177_v13 = vor.u32 %v3176_v49, %v3172_v22  ;;  %v3181_v56 = vrot.slane %v3179_v35, 1  ;;  %v3189_v52 = vor.u32 %v3188_v1, %v3184_v53  ;;  %v3193_v20 = vrot.slane %v3191_v2, 1  ;;  %v8731_v49 = vld [vmem:[#allocation11 + $0x264] sm:$0xf]  ;;  %v7747_v35 = vld [vmem:[#allocation11 + $0x268] sm:$0xf0] }
 0x522   :  { %15022 = vst [vmem:[#allocation105_spill] sm:$0xff] %v11893_v29  ;;  %v8747_v53 = vld [vmem:[#allocation11 + $0x2e4] sm:$0xf]  ;;  %v7811_v2 = vld [vmem:[#allocation11 + $0x2e8] sm:$0xf0]  ;;  %v11897_v38 = vor.u32 %v8732_v41, %v7745_v59  ;;  %v11903_v0 = vor.u32 %v8731_v49, %v7747_v35 }
 0x523   :  { %v3182_v46 = vsel %vm14231_vm10, %v3177_v13, %v3181_v56  ;;  %v3194_v9 = vsel %vm14231_vm10, %v3189_v52, %v3193_v20  ;;  %v11899_v52 = vor.u32 %v8748_v26, %v7809_v11  ;;  %v7737_v45 = vld [vmem:[#allocation11 + $0x250] sm:$0xf]  ;;  %v11905_v42 = vor.u32 %v8747_v53, %v7811_v2  ;;  %v7739_v22 = vld [vmem:[#allocation11 + $0x258] sm:$0xf0]  ;;  %v8745_v13 = vld [vmem:[#allocation11 + $0x2d4] sm:$0xf] }
 0x524   :  { %3365 = vmatmul.bf16.vlgmr.msra.gmra.mxu0 %v3182_v46  ;;  %3379 = vmatmul.bf16.vlgmr.msra.gmra.mxu1 %v3194_v9  ;;  %15023 = vst [vmem:[#allocation106_spill] sm:$0xff] %v11897_v38  ;;  %v7803_v1 = vld [vmem:[#allocation11 + $0x2d8] sm:$0xf0]  ;;  %v11909_v26 = vor.u32 %v8730_v48, %v7737_v45  ;;  %v7729_v56 = vld [vmem:[#allocation11 + $0x240] sm:$0xf]  ;;  %v11915_v59 = vor.u32 %v8729_v24, %v7739_v22 }
 0x525   :  { %3393 = vmatmul.bf16.vlgmr.msra.gmra.mxu2 %v3182_v46  ;;  %3407 = vmatmul.bf16.vlgmr.msra.gmra.mxu3 %v3194_v9  ;;  %15024 = vst [vmem:[#allocation107_spill] sm:$0xff] %v11899_v52  ;;  %v7801_v46 = vld [vmem:[#allocation11 + $0x2d0] sm:$0xf]  ;;  %v8728_v20 = vld [vmem:[#allocation11 + $0x244] sm:$0xf0]  ;;  %v11917_v41 = vor.u32 %v8745_v13, %v7803_v1  ;;  %v3156_v45 = vld [vmem:[#allocation6] sm:$0xff] }
 0x526   :  { %3810 = vmatpush.bf16.msra.mxu0 %v11885_v15  ;;  %3824 = vmatpush.bf16.msra.mxu1 %v11887_v63  ;;  %15025 = vst [vmem:[#allocation108_spill] sm:$0xff] %v11903_v0  ;;  %v11911_v40 = vor.u32 %v8746_v57, %v7801_v46  ;;  %v7793_v9 = vld [vmem:[#allocation11 + $0x2c0] sm:$0xf]  ;;  %v8744_v11 = vld [vmem:[#allocation11 + $0x2c4] sm:$0xf0]  ;;  %v11921_v48 = vor.u32 %v8728_v20, %v7729_v56 }
 0x527   :  { %3838 = vmatpush.bf16.msra.mxu2 %v11891_v6  ;;  %3852 = vmatpush.bf16.msra.mxu3 %v11893_v29  ;;  %15026 = vst [vmem:[#allocation109_spill] sm:$0xff] %v11905_v42  ;;  %v8727_v49 = vld [vmem:[#allocation11 + $0x244] sm:$0xf]  ;;  %v7731_v35 = vld [vmem:[#allocation11 + $0x248] sm:$0xf0]  ;;  %v11923_v46 = vor.u32 %v8744_v11, %v7793_v9  ;;  %v3160_v20 = vpack.c.bf16 %v11877_v62, %v3156_v45 }
 0x528   :  { %15027 = vst [vmem:[#allocation110_spill] sm:$0xff] %v11909_v26  ;;  %v8743_v53 = vld [vmem:[#allocation11 + $0x2c4] sm:$0xf]  ;;  %v7795_v2 = vld [vmem:[#allocation11 + $0x2c8] sm:$0xf0]  ;;  %v11927_v13 = vor.u32 %v8727_v49, %v7731_v35 }
 0x529   :  { %15028 = vst [vmem:[#allocation111_spill] sm:$0xff] %v11911_v40  ;;  %v3157_v57 = vld [vmem:[#allocation6 + $0x8] sm:$0xff]  ;;  %v7721_v24 = vld [vmem:[#allocation11 + $0x230] sm:$0xf]  ;;  %v8726_v22 = vld [vmem:[#allocation11 + $0x234] sm:$0xf0]  ;;  %v11929_v1 = vor.u32 %v8743_v53, %v7795_v2 }
 0x52a   :  { %3811 = vmatpush.bf16.msra.mxu0 %v11897_v38  ;;  %3825 = vmatpush.bf16.msra.mxu1 %v11899_v52  ;;  %15029 = vst [vmem:[#allocation112_spill] sm:$0xff] %v11915_v59  ;;  %v7723_v52 = vld [vmem:[#allocation11 + $0x238] sm:$0xf0]  ;;  %v3161_v9 = vpack.c.bf16 %v11879_v55, %v3157_v57  ;;  %v11935_v11 = vor.u32 %v8726_v22, %v7721_v24  ;;  %v7713_v35 = vld [vmem:[#allocation11 + $0x220] sm:$0xf] }
 0x52b   :  { %3839 = vmatpush.bf16.msra.mxu2 %v11903_v0  ;;  %3853 = vmatpush.bf16.msra.mxu3 %v11905_v42  ;;  %15030 = vst [vmem:[#allocation113_spill] sm:$0xff] %v11917_v41  ;;  %v7785_v42 = vld [vmem:[#allocation11 + $0x2b0] sm:$0xf]  ;;  %v8742_v0 = vld [vmem:[#allocation11 + $0x2b4] sm:$0xf0] }
 0x52c   :  { %15031 = vst [vmem:[#allocation114_spill] sm:$0xff] %v11921_v48  ;;  %v7787_v56 = vld [vmem:[#allocation11 + $0x2b8] sm:$0xf0]  ;;  %v11937_v49 = vor.u32 %v8742_v0, %v7785_v42  ;;  %v8724_v53 = vld [vmem:[#allocation11 + $0x224] sm:$0xf0] }
 0x52d   :  { %15032 = vst [vmem:[#allocation115_spill] sm:$0xff] %v11923_v46  ;;  %v7777_v45 = vld [vmem:[#allocation11 + $0x2a0] sm:$0xf]  ;;  %v7715_v57 = vld [vmem:[#allocation11 + $0x228] sm:$0xf0]  ;;  %v11947_v0 = vor.u32 %v8724_v53, %v7713_v35 }
 0x52e   :  { %3812 = vmatpush.bf16.msra.mxu0 %v11909_v26  ;;  %3826 = vmatpush.bf16.msra.mxu1 %v11911_v40  ;;  %15033 = vst [vmem:[#allocation116_spill] sm:$0xff] %v11927_v13  ;;  %v8725_v26 = vld [vmem:[#allocation11 + $0x234] sm:$0xf]  ;;  %v8739_v24 = vld [vmem:[#allocation11 + $0x2a4] sm:$0xf] }
 0x52f   :  { %3840 = vmatpush.bf16.msra.mxu2 %v11915_v59  ;;  %3854 = vmatpush.bf16.msra.mxu3 %v11917_v41  ;;  %15034 = vst [vmem:[#allocation117_spill] sm:$0xff] %v11929_v1  ;;  %v8741_v40 = vld [vmem:[#allocation11 + $0x2b4] sm:$0xf]  ;;  %v11941_v2 = vor.u32 %v8725_v26, %v7723_v52  ;;  %v8723_v59 = vld [vmem:[#allocation11 + $0x224] sm:$0xf] }
 0x530   :  { %15035 = vst [vmem:[#allocation118_spill] sm:$0xff] %v11935_v11  ;;  %v11943_v41 = vor.u32 %v8741_v40, %v7787_v56  ;;  %v7779_v22 = vld [vmem:[#allocation11 + $0x2a8] sm:$0xf0]  ;;  %v7705_v42 = vld [vmem:[#allocation11 + $0x210] sm:$0xf]  ;;  %v11953_v40 = vor.u32 %v8723_v59, %v7715_v57 }
 0x531   :  { %15036 = vst [vmem:[#allocation119_spill] sm:$0xff] %v11937_v49  ;;  %v8722_v26 = vld [vmem:[#allocation11 + $0x214] sm:$0xf0]  ;;  %v11955_v56 = vor.u32 %v8739_v24, %v7779_v22  ;;  %v7697_v35 = vld [vmem:[#allocation11 + $0x200] sm:$0xf] }
 0x532   :  { %3813 = vmatpush.bf16.msra.mxu0 %v11921_v48  ;;  %3827 = vmatpush.bf16.msra.mxu1 %v11923_v46  ;;  %15037 = vst [vmem:[#allocation120_spill] sm:$0xff] %v11941_v2  ;;  %v8740_v48 = vld [vmem:[#allocation11 + $0x2a4] sm:$0xf0]  ;;  %v3631_v46 = vld [vmem:[#allocation6 + $0x20] sm:$0x3] }
 0x533   :  { %3841 = vmatpush.bf16.msra.mxu2 %v11927_v13  ;;  %3855 = vmatpush.bf16.msra.mxu3 %v11929_v1  ;;  %15038 = vst [vmem:[#allocation121_spill] sm:$0xff] %v11943_v41  ;;  %v11949_v52 = vor.u32 %v8740_v48, %v7777_v45  ;;  %v8721_v1 = vld [vmem:[#allocation11 + $0x214] sm:$0xf]  ;;  %v8720_v53 = vld [vmem:[#allocation11 + $0x204] sm:$0xf0] }
 0x534   :  { %3581 = vmatmul.bf16.vlgmr.msrb.gmra.mxu0 %v3160_v20  ;;  %3595 = vmatmul.bf16.vlgmr.msrb.gmra.mxu1 %v3161_v9  ;;  %15039 = vst [vmem:[#allocation122_spill] sm:$0xff] %v11947_v0  ;;  %v8737_v13 = vld [vmem:[#allocation11 + $0x294] sm:$0xf]  ;;  %v7761_v48 = vld [vmem:[#allocation11 + $0x280] sm:$0xf] }
 0x535   :  { %3609 = vmatmul.bf16.vlgmr.msrb.gmra.mxu2 %v3160_v20  ;;  %3623 = vmatmul.bf16.vlgmr.msrb.gmra.mxu3 %v3161_v9  ;;  %15040 = vst [vmem:[#allocation123_spill] sm:$0xff] %v11949_v52  ;;  %v7769_v20 = vld [vmem:[#allocation11 + $0x290] sm:$0xf]  ;;  %v8738_v9 = vld [vmem:[#allocation11 + $0x294] sm:$0xf0] }
 0x536   :  { %3814 = vmatpush.bf16.msra.mxu0 %v11935_v11  ;;  %3828 = vmatpush.bf16.msra.mxu1 %v11937_v49  ;;  %15041 = vst [vmem:[#allocation124_spill] sm:$0xff] %v11953_v40  ;;  %v7707_v11 = vld [vmem:[#allocation11 + $0x218] sm:$0xf0]  ;;  %v3629_v45 = vld [vmem:[#allocation6] sm:$0xfc]  ;;  %v11961_v59 = vor.u32 %v8738_v9, %v7769_v20  ;;  %v3635_v20 = vpack.c.bf16 %v3631_v46, %v3631_v46 }
 0x537   :  { %3842 = vmatpush.bf16.msra.mxu2 %v11941_v2  ;;  %3856 = vmatpush.bf16.msra.mxu3 %v11943_v41  ;;  %15042 = vst [vmem:[#allocation125_spill] sm:$0xff] %v11955_v56  ;;  %v7771_v49 = vld [vmem:[#allocation11 + $0x298] sm:$0xf0]  ;;  %v11959_v41 = vor.u32 %v8722_v26, %v7705_v42  ;;  %v8736_v57 = vld [vmem:[#allocation11 + $0x284] sm:$0xf0]  ;;  %v11965_v2 = vor.u32 %v8721_v1, %v7707_v11 }
 0x538   :  { %15044 = vst [vmem:[#allocation127_spill] sm:$0xff] %v11961_v59  ;;  %v3630_v24 = vld [vmem:[#allocation6 + $0x8] sm:$0xfc]  ;;  %v3632_v22 = vld [vmem:[#allocation6 + $0x28] sm:$0x3]  ;;  %v11967_v38 = vor.u32 %v8737_v13, %v7771_v49  ;;  %v3633_v26 = vpack.c.bf16 %v11877_v62, %v3629_v45  ;;  %v11973_v13 = vor.u32 %v8720_v53, %v7697_v35  ;;  %v11975_v1 = vor.u32 %v8736_v57, %v7761_v48 }
 0x539   :  { %15043 = vst [vmem:[#allocation126_spill] sm:$0xff] %v11959_v41  ;;  %v8719_v29 = vld [vmem:[#allocation11 + $0x204] sm:$0xf]  ;;  %v7699_v6 = vld [vmem:[#allocation11 + $0x208] sm:$0xf0]  ;;  %v3636_v17 = vpack.c.bf16 %v3632_v22, %v3632_v22  ;;  %v3643_v53 = vrot.slane %v3635_v20, 1 }
 0x53a   :  { %3815 = vmatpush.bf16.msra.mxu0 %v11947_v0  ;;  %3829 = vmatpush.bf16.msra.mxu1 %v11949_v52  ;;  %15045 = vst [vmem:[#allocation128_spill] sm:$0xff] %v11965_v2  ;;  %v8735_v0 = vld [vmem:[#allocation11 + $0x284] sm:$0xf]  ;;  %v7763_v63 = vld [vmem:[#allocation11 + $0x288] sm:$0xf0]  ;;  %v11979_v46 = vor.u32 %v8719_v29, %v7699_v6  ;;  %v3642_v35 = vrot.slane %v3633_v26, 1 }
 0x53b   :  { %3843 = vmatpush.bf16.msra.mxu2 %v11953_v40  ;;  %3857 = vmatpush.bf16.msra.mxu3 %v11955_v56  ;;  %15046 = vst [vmem:[#allocation129_spill] sm:$0xff] %v11967_v38  ;;  %v7881_v52 = vld [vmem:[#allocation11 + $0x370] sm:$0xf]  ;;  %v8766_v42 = vld [vmem:[#allocation11 + $0x374] sm:$0xf0]  ;;  %v3634_v40 = vpack.c.bf16 %v11879_v55, %v3630_v24  ;;  %v11981_v45 = vor.u32 %v8735_v0, %v7763_v63 }
 0x53c   :  { %v7945_v9 = vld [vmem:[#allocation11 + $0x3f0] sm:$0xf]  ;;  %v8782_v15 = vld [vmem:[#allocation11 + $0x3f4] sm:$0xf0]  ;;  %15047 = vst [vmem:[#allocation43_spill] sm:$0xff] %v11975_v1 }
 0x53d   :  { %v7883_v11 = vld [vmem:[#allocation11 + $0x378] sm:$0xf0]  ;;  %v8781_v49 = vld [vmem:[#allocation11 + $0x3f4] sm:$0xf]  ;;  %15048 = vst [vmem:[#allocation46_spill] sm:$0xff] %v11979_v46 }
 0x53e   :  { %3816 = vmatpush.bf16.msra.mxu0 %v11959_v41  ;;  %3830 = vmatpush.bf16.msra.mxu1 %v11961_v59  ;;  %v7947_v56 = vld [vmem:[#allocation11 + $0x3f8] sm:$0xf0]  ;;  %15049 = vst [vmem:[#allocation44_spill] sm:$0xff] %v11981_v45  ;;  %v7873_v24 = vld [vmem:[#allocation11 + $0x360] sm:$0xf]  ;;  %v11983_v41 = vor.u32 %v8766_v42, %v7881_v52  ;;  %v11985_v59 = vor.u32 %v8782_v15, %v7945_v9 }
 0x53f   :  { %3844 = vmatpush.bf16.msra.mxu2 %v11965_v2  ;;  %3858 = vmatpush.bf16.msra.mxu3 %v11967_v38  ;;  %v8764_v22 = vld [vmem:[#allocation11 + $0x364] sm:$0xf0]  ;;  %v7937_v48 = vld [vmem:[#allocation11 + $0x3e0] sm:$0xf]  ;;  %v11987_v27 = vor.u32 %v8765_v30, %v7883_v11  ;;  %v11989_v18 = vor.u32 %v8781_v49, %v7947_v56  ;;  %v3645_v2 = vrot.slane %v3634_v40, 1  ;;  %v3646_v38 = vrot.slane %v3636_v17, 1 }
 0x540   :  { %15050 = vst [vmem:[#allocation47_spill] sm:$0xff] %v11983_v41  ;;  %v8780_v57 = vld [vmem:[#allocation11 + $0x3e4] sm:$0xf0]  ;;  %v8763_v6 = vld [vmem:[#allocation11 + $0x364] sm:$0xf]  ;;  %v11997_v30 = vor.u32 %v8764_v22, %v7873_v24  ;;  %v3644_v56 = vsel %vm14229_vm11, %v3642_v35, %v3643_v53 }
 0x541   :  { %15051 = vst [vmem:[#allocation50_spill] sm:$0xff] %v11985_v59  ;;  %v7875_v29 = vld [vmem:[#allocation11 + $0x368] sm:$0xf0]  ;;  %v8779_v63 = vld [vmem:[#allocation11 + $0x3e4] sm:$0xf]  ;;  %v11999_v17 = vor.u32 %v8780_v57, %v7937_v48  ;;  %v3647_v42 = vsel %vm14229_vm11, %v3645_v2, %v3646_v38 }
 0x542   :  { %15052 = vst [vmem:[#allocation52_spill] sm:$0xff] %v11987_v27  ;;  %3817 = vmatpush.bf16.msra.mxu0 %v11973_v13  ;;  %3831 = vmatpush.bf16.msra.mxu1 %v11975_v1  ;;  %v7939_v15 = vld [vmem:[#allocation11 + $0x3e8] sm:$0xf0]  ;;  %v12001_v0 = vor.u32 %v8763_v6, %v7875_v29  ;;  %v7865_v52 = vld [vmem:[#allocation11 + $0x350] sm:$0xf] }
 0x543   :  { %15053 = vst [vmem:[#allocation51_spill] sm:$0xff] %v11989_v18  ;;  %3845 = vmatpush.bf16.msra.mxu2 %v11979_v46  ;;  %3859 = vmatpush.bf16.msra.mxu3 %v11981_v45  ;;  %v8762_v40 = vld [vmem:[#allocation11 + $0x354] sm:$0xf0]  ;;  %v12007_v26 = vor.u32 %v8779_v63, %v7939_v15  ;;  %v7929_v20 = vld [vmem:[#allocation11 + $0x3d0] sm:$0xf] }
 0x544   :  { %15054 = vst [vmem:[#allocation53_spill] sm:$0xff] %v11997_v30  ;;  %v8778_v9 = vld [vmem:[#allocation11 + $0x3d4] sm:$0xf0]  ;;  %v8761_v11 = vld [vmem:[#allocation11 + $0x354] sm:$0xf]  ;;  %v12011_v35 = vor.u32 %v8762_v40, %v7865_v52 }
 0x545   :  { %15055 = vst [vmem:[#allocation55_spill] sm:$0xff] %v11999_v17  ;;  %3818 = vmatmul.bf16.vlgmr.msra.gmra.mxu0 %v3644_v56  ;;  %3832 = vmatmul.bf16.vlgmr.msra.gmra.mxu1 %v3647_v42  ;;  %v7867_v49 = vld [vmem:[#allocation11 + $0x358] sm:$0xf0]  ;;  %v8777_v24 = vld [vmem:[#allocation11 + $0x3d4] sm:$0xf]  ;;  %v12013_v38 = vor.u32 %v8778_v9, %v7929_v20 }
 0x546   :  { %4075 = vmatpush.bf16.msrb.mxu0 %v11983_v41  ;;  %4089 = vmatpush.bf16.msrb.mxu1 %v11985_v59  ;;  %15056 = vst [vmem:[#allocation57_spill] sm:$0xff] %v12001_v0  ;;  %v7931_v22 = vld [vmem:[#allocation11 + $0x3d8] sm:$0xf0]  ;;  %v7857_v48 = vld [vmem:[#allocation11 + $0x340] sm:$0xf]  ;;  %v12017_v6 = vor.u32 %v8761_v11, %v7867_v49 }
 0x547   :  { %4103 = vmatpush.bf16.msrb.mxu2 %v11987_v27  ;;  %4117 = vmatpush.bf16.msrb.mxu3 %v11989_v18  ;;  %15057 = vst [vmem:[#allocation58_spill] sm:$0xff] %v12007_v26  ;;  %v8760_v2 = vld [vmem:[#allocation11 + $0x344] sm:$0xf0]  ;;  %v7921_v53 = vld [vmem:[#allocation11 + $0x3c0] sm:$0xf]  ;;  %v12019_v29 = vor.u32 %v8777_v24, %v7931_v22 }
 0x548   :  { %3846 = vmatmul.bf16.vlgmr.msra.gmra.mxu2 %v3644_v56  ;;  %3860 = vmatmul.bf16.vlgmr.msra.gmra.mxu3 %v3647_v42  ;;  %15058 = vst [vmem:[#allocation60_spill] sm:$0xff] %v12011_v35  ;;  %v8776_v57 = vld [vmem:[#allocation11 + $0x3c4] sm:$0xf0]  ;;  %v8759_v63 = vld [vmem:[#allocation11 + $0x344] sm:$0xf] }
 0x549   :  { %15059 = vst [vmem:[#allocation61_spill] sm:$0xff] %v12013_v38  ;;  %v7859_v15 = vld [vmem:[#allocation11 + $0x348] sm:$0xf0]  ;;  %v8775_v56 = vld [vmem:[#allocation11 + $0x3c4] sm:$0xf]  ;;  %v12025_v11 = vor.u32 %v8776_v57, %v7921_v53 }
 0x54a   :  { %4076 = vmatpush.bf16.msrb.mxu0 %v11997_v30  ;;  %4090 = vmatpush.bf16.msrb.mxu1 %v11999_v17  ;;  %15060 = vst [vmem:[#allocation62_spill] sm:$0xff] %v12017_v6  ;;  %v7923_v42 = vld [vmem:[#allocation11 + $0x3c8] sm:$0xf0]  ;;  %v2986_v17 = vld [vmem:[#allocation5 + $0x10] ss:$8 sm:$0x3]  ;;  %v12029_v18 = vor.u32 %v8759_v63, %v7859_v15 }
 0x54b   :  { %4104 = vmatpush.bf16.msrb.mxu2 %v12001_v0  ;;  %4118 = vmatpush.bf16.msrb.mxu3 %v12007_v26  ;;  %15061 = vst [vmem:[#allocation63_spill] sm:$0xff] %v12019_v29  ;;  %v7849_v52 = vld [vmem:[#allocation11 + $0x330] sm:$0xf]  ;;  %v8758_v40 = vld [vmem:[#allocation11 + $0x334] sm:$0xf0]  ;;  %v12023_v0 = vor.u32 %v8760_v2, %v7857_v48  ;;  %v12031_v27 = vor.u32 %v8775_v56, %v7923_v42 }
 0x54c   :  { %v7913_v20 = vld [vmem:[#allocation11 + $0x3b0] sm:$0xf]  ;;  %v8774_v9 = vld [vmem:[#allocation11 + $0x3b4] sm:$0xf0]  ;;  %15063 = vst [vmem:[#allocation65_spill] sm:$0xff] %v12025_v11 }
 0x54d   :  { %v2991_v30 = vld [vmem:[#allocation5 + $0x11] ss:$8 sm:$0x3]  ;;  %15062 = vst [vmem:[#allocation64_spill] sm:$0xff] %v12023_v0  ;;  %v8757_v49 = vld [vmem:[#allocation11 + $0x334] sm:$0xf]  ;;  %v12043_v15 = vor.u32 %v8774_v9, %v7913_v20 }
 0x54e   :  { %4077 = vmatpush.bf16.msrb.mxu0 %v12011_v35  ;;  %4091 = vmatpush.bf16.msrb.mxu1 %v12013_v38  ;;  %v7851_v24 = vld [vmem:[#allocation11 + $0x338] sm:$0xf0]  ;;  %v8773_v22 = vld [vmem:[#allocation11 + $0x3b4] sm:$0xf]  ;;  %15064 = vst [vmem:[#allocation130_spill] sm:$0xff] %v12029_v18 }
 0x54f   :  { %v7915_v26 = vld [vmem:[#allocation11 + $0x3b8] sm:$0xf0]  ;;  %4105 = vmatpush.bf16.msrb.mxu2 %v12017_v6  ;;  %4119 = vmatpush.bf16.msrb.mxu3 %v12019_v29  ;;  %15065 = vst [vmem:[#allocation131_spill] sm:$0xff] %v12031_v27  ;;  %v3870_v59 = vld [vmem:[#allocation6] sm:$0xf8] }
 0x550   :  { %v3872_v35 = vld [vmem:[#allocation6 + $0x20] sm:$0x7]  ;;  %2988 = vst.msk [vmem:[#allocation6 + $0x25] ss:$8 sm:$0x3] %vm15007_vm12, %v2986_v17  ;;  %v12041_v17 = vor.u32 %v8758_v40, %v7849_v52  ;;  %v3874_v40 = vpack.c.bf16 %v11877_v62, %v3870_v59 }
 0x551   :  { %v2996_v48 = vld [vmem:[#allocation5 + $0x12] ss:$8 sm:$0x3]  ;;  %v3871_v2 = vld [vmem:[#allocation6 + $0x8] sm:$0xf8]  ;;  %15067 = vst [vmem:[#allocation133_spill] sm:$0xff] %v12043_v15  ;;  %v3876_v20 = vpack.c.bf16 %v3872_v35, %v3872_v35 }
 0x552   :  { %v3873_v53 = vld [vmem:[#allocation6 + $0x28] sm:$0x7]  ;;  %2993 = vst.msk [vmem:[#allocation6 + $0x27] ss:$8 sm:$0x3] %vm15007_vm12, %v2991_v30  ;;  %4078 = vmatpush.bf16.msrb.mxu0 %v12023_v0  ;;  %4092 = vmatpush.bf16.msrb.mxu1 %v12025_v11  ;;  %v12051_v0 = vor.u32 %v8773_v22, %v7915_v26 }
 0x553   :  { %v3001_v57 = vld [vmem:[#allocation5 + $0x13] ss:$8 sm:$0x3]  ;;  %v7841_v38 = vld [vmem:[#allocation11 + $0x320] sm:$0xf]  ;;  %15066 = vst [vmem:[#allocation132_spill] sm:$0xff] %v12041_v17  ;;  %4106 = vmatpush.bf16.msrb.mxu2 %v12029_v18  ;;  %4120 = vmatpush.bf16.msrb.mxu3 %v12031_v27  ;;  %v3875_v27 = vpack.c.bf16 %v11879_v55, %v3871_v2 }
 0x554   :  { %v8756_v6 = vld [vmem:[#allocation11 + $0x324] sm:$0xf0]  ;;  %v7905_v41 = vld [vmem:[#allocation11 + $0x3a0] sm:$0xf]  ;;  %v8755_v56 = vld [vmem:[#allocation11 + $0x324] sm:$0xf] }
 0x555   :  { %v8772_v29 = vld [vmem:[#allocation11 + $0x3a4] sm:$0xf0]  ;;  %2998 = vst.msk [vmem:[#allocation6 + $0x31] ss:$8 sm:$0x3] %vm15007_vm12, %v2996_v48  ;;  %v12049_v48 = vor.u32 %v8757_v49, %v7851_v24  ;;  %v3877_v49 = vpack.c.bf16 %v3873_v53, %v3873_v53  ;;  %v12063_v26 = vor.u32 %v8756_v6, %v7841_v38  ;;  %v3880_v38 = vshrl.u32 %v3874_v40, 16 }
 0x556   :  { %v3006_v63 = vld [vmem:[#allocation5 + $0x14] ss:$8 sm:$0x3]  ;;  %v7843_v42 = vld [vmem:[#allocation11 + $0x328] sm:$0xf0]  ;;  %15069 = vst [vmem:[#allocation135_spill] sm:$0xff] %v12051_v0  ;;  %4079 = vmatpush.bf16.msrb.mxu0 %v12041_v17  ;;  %4093 = vmatpush.bf16.msrb.mxu1 %v12043_v15  ;;  %v12065_v62 = vor.u32 %v8772_v29, %v7905_v41 }
 0x557   :  { %v8771_v30 = vld [vmem:[#allocation11 + $0x3a4] sm:$0xf]  ;;  %v7907_v45 = vld [vmem:[#allocation11 + $0x3a8] sm:$0xf0]  ;;  %15068 = vst [vmem:[#allocation134_spill] sm:$0xff] %v12049_v48  ;;  %4107 = vmatpush.bf16.msrb.mxu2 %v12049_v48  ;;  %4121 = vmatpush.bf16.msrb.mxu3 %v12051_v0  ;;  %v12071_v55 = vor.u32 %v8755_v56, %v7843_v42  ;;  %v3883_v6 = vshll.u32 %v3874_v40, 16 }
 0x558   :  { %3003 = vst.msk [vmem:[#allocation6 + $0x33] ss:$8 sm:$0x3] %vm15007_vm12, %v3001_v57  ;;  %v3011_v46 = vld [vmem:[#allocation5 + $0x15] ss:$8 sm:$0x3] }
 0x559   :  { %3008 = vst.msk [vmem:[#allocation6 + $0x35] ss:$8 sm:$0x3] %vm15007_vm12, %v3006_v63  ;;  %v3016_v52 = vld [vmem:[#allocation5 + $0x16] ss:$8 sm:$0x3] }
 0x55a   :  { %3013 = vst.msk [vmem:[#allocation6 + $0x37] ss:$8 sm:$0x3] %vm15007_vm12, %v3011_v46  ;;  %v3021_v9 = vld [vmem:[#allocation5 + $0x17] ss:$8 sm:$0x3]  ;;  %v12073_v46 = vor.u32 %v8771_v30, %v7907_v45  ;;  %4080 = vmatpush.bf16.msrb.mxu0 %v12063_v26  ;;  %4094 = vmatpush.bf16.msrb.mxu1 %v12065_v62 }
 0x55b   :  { %v7833_v57 = vld [vmem:[#allocation11 + $0x310] sm:$0xf]  ;;  %v8754_v11 = vld [vmem:[#allocation11 + $0x314] sm:$0xf0]  ;;  %15070 = vst [vmem:[#allocation136_spill] sm:$0xff] %v12063_v26  ;;  %v3888_v41 = vshrl.u32 %v3876_v20, 16  ;;  %4108 = vmatpush.bf16.msrb.mxu2 %v12071_v55 }
 0x55c   :  { %v7897_v18 = vld [vmem:[#allocation11 + $0x390] sm:$0xf]  ;;  %3018 = vst.msk [vmem:[#allocation6 + $0x41] ss:$8 sm:$0x3] %vm15007_vm12, %v3016_v52  ;;  %v3891_v29 = vshll.u32 %v3876_v20, 16  ;;  %v12077_v56 = vor.u32 %v8754_v11, %v7833_v57  ;;  %4122 = vmatpush.bf16.msrb.mxu3 %v12073_v46 }
 0x55d   :  { %15071 = vst [vmem:[#allocation137_spill] sm:$0xff] %v12065_v62  ;;  %v8770_v59 = vld [vmem:[#allocation11 + $0x394] sm:$0xf0]  ;;  %v8753_v35 = vld [vmem:[#allocation11 + $0x314] sm:$0xf]  ;;  %v3897_v63 = vshrl.u32 %v3875_v27, 16 }
 0x55e   :  { %3023 = vst.msk [vmem:[#allocation6 + $0x43] ss:$8 sm:$0x3] %vm15007_vm12, %v3021_v9  ;;  %v7835_v24 = vld [vmem:[#allocation11 + $0x318] sm:$0xf0]  ;;  %v3900_v52 = vshll.u32 %v3875_v27, 16  ;;  %v12079_v45 = vor.u32 %v8770_v59, %v7897_v18  ;;  %4081 = vmatpush.bf16.msrb.mxu0 %v12077_v56 }
 0x55f   :  { %v8769_v22 = vld [vmem:[#allocation11 + $0x394] sm:$0xf]  ;;  %v7899_v2 = vld [vmem:[#allocation11 + $0x398] sm:$0xf0]  ;;  %v7825_v53 = vld [vmem:[#allocation11 + $0x300] sm:$0xf]  ;;  %v12083_v40 = vor.u32 %v8753_v35, %v7835_v24 }
 0x560   :  { %v3905_v9 = vshrl.u32 %v3877_v49, 16  ;;  %v3908_v3 = vshll.u32 %v3877_v49, 16  ;;  %v8752_v42 = vld [vmem:[#allocation11 + $0x304] sm:$0xf0]  ;;  %v7889_v30 = vld [vmem:[#allocation11 + $0x380] sm:$0xf]  ;;  %v12085_v27 = vor.u32 %v8769_v22, %v7899_v2  ;;  %4095 = vmatpush.bf16.msrb.mxu1 %v12079_v45 }
 0x561   :  { %v8768_v0 = vld [vmem:[#allocation11 + $0x384] sm:$0xf0]  ;;  %v8751_v20 = vld [vmem:[#allocation11 + $0x304] sm:$0xf]  ;;  %v7827_v49 = vld [vmem:[#allocation11 + $0x308] sm:$0xf0]  ;;  %v12089_v35 = vor.u32 %v8752_v42, %v7825_v53  ;;  %4109 = vmatpush.bf16.msrb.mxu2 %v12083_v40 }
 0x562   :  { %v8767_v26 = vld [vmem:[#allocation11 + $0x384] sm:$0xf]  ;;  %v7891_v48 = vld [vmem:[#allocation11 + $0x388] sm:$0xf0]  ;;  %v3882_v62 = vrot.slane %v3880_v38, 1  ;;  %v3885_v11 = vrot.slane %v3883_v6, 2  ;;  %v12091_v24 = vor.u32 %v8768_v0, %v7889_v30  ;;  %4123 = vmatpush.bf16.msrb.mxu3 %v12085_v27  ;;  %v12095_v22 = vor.u32 %v8751_v20, %v7827_v49 }
 0x563   :  { %v3890_v57 = vrot.slane %v3888_v41, 1  ;;  %v3893_v18 = vrot.slane %v3891_v29, 2  ;;  %v3899_v59 = vrot.slane %v3897_v63, 1  ;;  %v3902_v15 = vrot.slane %v3900_v52, 2  ;;  %4082 = vmatpush.bf16.msrb.mxu0 %v12089_v35  ;;  %v15088_v29 = vld [vmem:[#allocation83_spill] sm:$0xff]  ;;  %v15089_v52 = vld [vmem:[#allocation84_spill] sm:$0xff] }
 0x564   :  { %v3907_v17 = vrot.slane %v3905_v9, 1  ;;  %v3910_v1 = vrot.slane %v3908_v3, 2  ;;  %v12097_v2 = vor.u32 %v8767_v26, %v7891_v48  ;;  %v3886_v38 = vor.u32 %v3885_v11, %v3882_v62  ;;  %4096 = vmatpush.bf16.msrb.mxu1 %v12091_v24  ;;  %v4139_v48 = vld [vmem:[#allocation6 + $0x20] sm:$0xf8]  ;;  %v4143_v26 = vld [vmem:[#allocation6 + $0x40] sm:$0x7] }
 0x565   :  { %v3894_v6 = vor.u32 %v3893_v18, %v3890_v57  ;;  %v3903_v41 = vor.u32 %v3902_v15, %v3899_v59  ;;  %4110 = vmatpush.bf16.msrb.mxu2 %v12095_v22  ;;  %v15086_v15 = vld [vmem:[#allocation80_spill] sm:$0xff]  ;;  %v15087_v62 = vld [vmem:[#allocation81_spill] sm:$0xff]  ;;  %v4147_v30 = vpack.c.bf16 %v4143_v26, %v4143_v26  ;;  %v15091_v11 = vld [vmem:[#allocation86_spill] sm:$0xff] }
 0x566   :  { %v3911_v3 = vor.u32 %v3910_v1, %v3907_v17  ;;  %4124 = vmatpush.bf16.msrb.mxu3 %v12097_v2  ;;  %v15085_v17 = vld [vmem:[#allocation79_spill] sm:$0xff]  ;;  %v4140_v53 = vld [vmem:[#allocation6 + $0x28] sm:$0xf8]  ;;  %v4144_v63 = vld [vmem:[#allocation6 + $0x48] sm:$0x7] }
 0x567   :  { %4170 = vmatpush.bf16.msra.mxu0 %v11639_v31  ;;  %v3895_v0 = vsel %vm14230_vm3, %v3886_v38, %v3894_v6  ;;  %v12125_v31 = vld [vmem:[#allocation6 + $0x30] sm:$0xff]  ;;  %v4148_v49 = vpack.c.bf16 %v4144_v63, %v4144_v63  ;;  %v15092_v57 = vld [vmem:[#allocation87_spill] sm:$0xff]  ;;  %v15093_v18 = vld [vmem:[#allocation88_spill] sm:$0xff] }
 0x568   :  { %4184 = vmatpush.bf16.msra.mxu1 %v11641_v37  ;;  %v3912_v1 = vsel %vm14230_vm3, %v3903_v41, %v3911_v3  ;;  %4083 = vmatmul.bf16.vlgmr.msrb.gmra.mxu0 %v3895_v0  ;;  %v4149_v37 = vld [vmem:[#allocation6 + $0x20] sm:$0xf0]  ;;  %v15090_v9 = vld [vmem:[#allocation85_spill] sm:$0xff]  ;;  %v4145_v42 = vpack.c.bf16 %v12125_v31, %v4139_v48  ;;  %v4235_v41 = vshrl.u32 %v4147_v30, 16  ;;  %v4238_v3 = vshll.u32 %v4147_v30, 16  ;;  %v15111_v63 = vld [vmem:[#allocation106_spill] sm:$0xff] }
 0x569   :  { %4198 = vmatpush.bf16.msra.mxu2 %v11644_v51  ;;  %4097 = vmatmul.bf16.vlgmr.msrb.gmra.mxu1 %v3912_v1  ;;  %v4150_v51 = vld [vmem:[#allocation6 + $0x28] sm:$0xf0]  ;;  %v15094_v59 = vld [vmem:[#allocation89_spill] sm:$0xff] }
 0x56a   :  { %4212 = vmatpush.bf16.msra.mxu3 %v11646_v36  ;;  %4111 = vmatmul.bf16.vlgmr.msrb.gmra.mxu2 %v3895_v0  ;;  %v4151_v36 = vld [vmem:[#allocation6 + $0x40] sm:$0xf]  ;;  %v4227_v38 = vshrl.u32 %v4145_v42, 16  ;;  %v4230_v6 = vshll.u32 %v4145_v42, 16  ;;  %v15110_v48 = vld [vmem:[#allocation105_spill] sm:$0xff]  ;;  %v15113_v42 = vld [vmem:[#allocation108_spill] sm:$0xff] }
 0x56b   :  { %4125 = vmatmul.bf16.vlgmr.msrb.gmra.mxu3 %v3912_v1  ;;  %4171 = vmatpush.bf16.msra.mxu0 %v11651_v58  ;;  %v12129_v58 = vld [vmem:[#allocation6 + $0x38] sm:$0xff]  ;;  %v15114_v30 = vld [vmem:[#allocation109_spill] sm:$0xff] }
 0x56c   :  { %4185 = vmatpush.bf16.msra.mxu1 %v11656_v7  ;;  %v4152_v7 = vld [vmem:[#allocation6 + $0x48] sm:$0xf]  ;;  %v4146_v20 = vpack.c.bf16 %v12129_v58, %v4140_v53 }
 0x56d   :  { %4199 = vmatpush.bf16.msra.mxu2 %v11658_v34  ;;  %v4153_v34 = vpack.c.bf16 %v12125_v31, %v4149_v37  ;;  %v4252_v37 = vshrl.u32 %v4148_v49, 16 }
 0x56e   :  { %4213 = vmatpush.bf16.msra.mxu3 %v11662_v23  ;;  %v4155_v23 = vpack.c.bf16 %v4151_v36, %v4151_v36  ;;  %v4244_v0 = vshrl.u32 %v4146_v20, 16  ;;  %v4247_v1 = vshll.u32 %v4146_v20, 16  ;;  %v15095_v36 = vld [vmem:[#allocation90_spill] sm:$0xff] }
 0x56f   :  { %4172 = vmatpush.bf16.msra.mxu0 %v11666_v61  ;;  %v4154_v61 = vpack.c.bf16 %v12129_v58, %v4150_v51  ;;  %v4255_v51 = vshll.u32 %v4148_v49, 16  ;;  %v15115_v20 = vld [vmem:[#allocation110_spill] sm:$0xff]  ;;  %v15116_v49 = vld [vmem:[#allocation111_spill] sm:$0xff] }
 0x570   :  { %4186 = vmatpush.bf16.msra.mxu1 %v11668_v44  ;;  %v4156_v44 = vpack.c.bf16 %v4152_v7, %v4152_v7  ;;  %v15096_v7 = vld [vmem:[#allocation91_spill] sm:$0xff] }
 0x571   :  { %4200 = vmatpush.bf16.msra.mxu2 %v11672_v47  ;;  %v4162_v47 = vrot.slane %v4153_v34, 2  ;;  %v15097_v34 = vld [vmem:[#allocation92_spill] sm:$0xff] }
 0x572   :  { %4214 = vmatpush.bf16.msra.mxu3 %v11674_v39  ;;  %v4163_v39 = vrot.slane %v4155_v23, 2  ;;  %v15098_v23 = vld [vmem:[#allocation93_spill] sm:$0xff] }
 0x573   :  { %4173 = vmatpush.bf16.msra.mxu0 %v11683_v5  ;;  %v4165_v5 = vrot.slane %v4154_v61, 2  ;;  %v4229_v61 = vrot.slane %v4227_v38, 1  ;;  %v4318_v38 = vld [vmem:[#allocation6 + $0x20] sm:$0xe0] }
 0x574   :  { %4187 = vmatpush.bf16.msra.mxu1 %v11687_v10  ;;  %v4166_v10 = vrot.slane %v4156_v44, 2  ;;  %v4232_v44 = vrot.slane %v4230_v6, 2 }
 0x575   :  { %4201 = vmatpush.bf16.msra.mxu2 %v11693_v4  ;;  %v15072_v4 = vld [vmem:[#allocation66_spill] sm:$0xff] }
 0x576   :  { %4215 = vmatpush.bf16.msra.mxu3 %v11695_v25  ;;  %v15073_v25 = vld [vmem:[#allocation68_spill] sm:$0xff] }
 0x577   :  { %4174 = vmatpush.bf16.msra.mxu0 %v11705_v21  ;;  %v15074_v21 = vld [vmem:[#allocation70_spill] sm:$0xff] }
 0x578   :  { %4188 = vmatpush.bf16.msra.mxu1 %v11710_v16  ;;  %v15075_v16 = vld [vmem:[#allocation67_spill] sm:$0xff] }
 0x579   :  { %4202 = vmatpush.bf16.msra.mxu2 %v11718_v54  ;;  %v15076_v54 = vld [vmem:[#allocation69_spill] sm:$0xff] }
 0x57a   :  { %4216 = vmatpush.bf16.msra.mxu3 %v11720_v60  ;;  %v15077_v60 = vld [vmem:[#allocation71_spill] sm:$0xff] }
 0x57b   :  { %4175 = vmatpush.bf16.msra.mxu0 %v11724_v28  ;;  %v15078_v28 = vld [vmem:[#allocation72_spill] sm:$0xff] }
 0x57c   :  { %4189 = vmatpush.bf16.msra.mxu1 %v11727_v8  ;;  %v4164_v8 = vsel %vm14228_vm6, %v4162_v47, %v4163_v39  ;;  %v4237_v47 = vrot.slane %v4235_v41, 1  ;;  %v4240_v39 = vrot.slane %v4238_v3, 2 }
 0x57d   :  { %4203 = vmatpush.bf16.msra.mxu2 %v11731_v33  ;;  %v4167_v33 = vsel %vm14228_vm6, %v4165_v5, %v4166_v10  ;;  %v4246_v5 = vrot.slane %v4244_v0, 1  ;;  %v4249_v10 = vrot.slane %v4247_v1, 2  ;;  %v4320_v0 = vld [vmem:[#allocation6 + $0x40] sm:$0x1f]  ;;  %v15119_v1 = vld [vmem:[#allocation114_spill] sm:$0xff] }
 0x57e   :  { %4217 = vmatpush.bf16.msra.mxu3 %v11733_v50  ;;  %v15079_v50 = vld [vmem:[#allocation73_spill] sm:$0xff] }
 0x57f   :  { %4176 = vmatpush.bf16.msra.mxu0 %v11735_v14  ;;  %v15080_v14 = vld [vmem:[#allocation74_spill] sm:$0xff] }
 0x580   :  { %4190 = vmatpush.bf16.msra.mxu1 %v11743_v12  ;;  %v15081_v12 = vld [vmem:[#allocation75_spill] sm:$0xff] }
 0x581   :  { %4204 = vmatpush.bf16.msra.mxu2 %v11745_v32  ;;  %v15082_v32 = vld [vmem:[#allocation76_spill] sm:$0xff] }
 0x582   :  { %4218 = vmatpush.bf16.msra.mxu3 %v11749_v19  ;;  %v15083_v19 = vld [vmem:[#allocation77_spill] sm:$0xff] }
 0x583   :  { %4177 = vmatpush.bf16.msra.mxu0 %v11752_v43  ;;  %v15084_v43 = vld [vmem:[#allocation78_spill] sm:$0xff] }
 0x584   :  { %4191 = vmatpush.bf16.msra.mxu1 %v15072_v4  ;;  %v4254_v4 = vrot.slane %v4252_v37, 1  ;;  %v15120_v37 = vld [vmem:[#allocation115_spill] sm:$0xff] }
 0x585   :  { %4205 = vmatpush.bf16.msra.mxu2 %v15073_v25  ;;  %v4257_v25 = vrot.slane %v4255_v51, 2  ;;  %v4319_v51 = vld [vmem:[#allocation6 + $0x28] sm:$0xe0] }
 0x586   :  { %4219 = vmatpush.bf16.msra.mxu3 %v15074_v21  ;;  %4178 = vmatmul.bf16.vlgmr.msra.gmra.mxu0 %v4164_v8  ;;  %v15099_v21 = vld [vmem:[#allocation94_spill] sm:$0xff] }
 0x587   :  { %4262 = vmatpush.bf16.msrb.mxu0 %v15075_v16  ;;  %4192 = vmatmul.bf16.vlgmr.msra.gmra.mxu1 %v4167_v33  ;;  %v15100_v16 = vld [vmem:[#allocation95_spill] sm:$0xff] }
 0x588   :  { %4276 = vmatpush.bf16.msrb.mxu1 %v15076_v54  ;;  %4206 = vmatmul.bf16.vlgmr.msra.gmra.mxu2 %v4164_v8  ;;  %v15101_v54 = vld [vmem:[#allocation96_spill] sm:$0xff]  ;;  %v4241_v8 = vor.u32 %v4240_v39, %v4237_v47  ;;  %v15123_v39 = vld [vmem:[#allocation118_spill] sm:$0xff] }
 0x589   :  { %4290 = vmatpush.bf16.msrb.mxu2 %v15077_v60  ;;  %4220 = vmatmul.bf16.vlgmr.msra.gmra.mxu3 %v4167_v33  ;;  %v15102_v60 = vld [vmem:[#allocation97_spill] sm:$0xff]  ;;  %v4250_v33 = vor.u32 %v4249_v10, %v4246_v5  ;;  %v15124_v5 = vld [vmem:[#allocation119_spill] sm:$0xff]  ;;  %v15125_v10 = vld [vmem:[#allocation120_spill] sm:$0xff] }
 0x58a   :  { %4304 = vmatpush.bf16.msrb.mxu3 %v15078_v28  ;;  %v4233_v28 = vor.u32 %v4232_v44, %v4229_v61  ;;  %v4324_v61 = vpack.c.bf16 %v4320_v0, %v4320_v0  ;;  %v4323_v44 = vpack.c.bf16 %v12129_v58, %v4319_v51 }
 0x58b   :  { %4263 = vmatpush.bf16.msrb.mxu0 %v15079_v50  ;;  %v4258_v50 = vor.u32 %v4257_v25, %v4254_v4  ;;  %v15126_v4 = vld [vmem:[#allocation121_spill] sm:$0xff] }
 0x58c   :  { %4277 = vmatpush.bf16.msrb.mxu1 %v15080_v14  ;;  %v15103_v14 = vld [vmem:[#allocation98_spill] sm:$0xff]  ;;  %v4242_v26 = vsel %vm14230_vm3, %v4233_v28, %v4241_v8  ;;  %v4339_v28 = vshll.u32 %v4324_v61, 16 }
 0x58d   :  { %4291 = vmatpush.bf16.msrb.mxu2 %v15081_v12  ;;  %v15104_v12 = vld [vmem:[#allocation99_spill] sm:$0xff] }
 0x58e   :  { %4305 = vmatpush.bf16.msrb.mxu3 %v15082_v32  ;;  %v15105_v32 = vld [vmem:[#allocation100_spill] sm:$0xff] }
 0x58f   :  { %4264 = vmatpush.bf16.msrb.mxu0 %v15083_v19  ;;  %v15106_v19 = vld [vmem:[#allocation101_spill] sm:$0xff] }
 0x590   :  { %4278 = vmatpush.bf16.msrb.mxu1 %v15084_v43  ;;  %v15107_v43 = vld [vmem:[#allocation102_spill] sm:$0xff] }
 0x591   :  { %4292 = vmatpush.bf16.msrb.mxu2 %v15085_v17  ;;  %v15108_v17 = vld [vmem:[#allocation103_spill] sm:$0xff] }
 0x592   :  { %4306 = vmatpush.bf16.msrb.mxu3 %v15086_v15  ;;  %v15109_v15 = vld [vmem:[#allocation104_spill] sm:$0xff] }
 0x593   :  { %4265 = vmatpush.bf16.msrb.mxu0 %v15087_v62  ;;  %v4259_v62 = vsel %vm14230_vm3, %v4250_v33, %v4258_v50  ;;  %v4345_v50 = vshrl.u32 %v4323_v44, 16 }
 0x594   :  { %4279 = vmatpush.bf16.msrb.mxu1 %v15088_v29 }
 0x595   :  { %4293 = vmatpush.bf16.msrb.mxu2 %v15089_v52  ;;  %v15112_v52 = vld [vmem:[#allocation107_spill] sm:$0xff] }
 0x596   :  { %4307 = vmatpush.bf16.msrb.mxu3 %v15090_v9 }
 0x597   :  { %4266 = vmatpush.bf16.msrb.mxu0 %v15091_v11  ;;  %v15117_v11 = vld [vmem:[#allocation112_spill] sm:$0xff] }
 0x598   :  { %4280 = vmatpush.bf16.msrb.mxu1 %v15092_v57  ;;  %v15118_v57 = vld [vmem:[#allocation113_spill] sm:$0xff] }
 0x599   :  { %4294 = vmatpush.bf16.msrb.mxu2 %v15093_v18 }
 0x59a   :  { %4308 = vmatpush.bf16.msrb.mxu3 %v15094_v59 }
 0x59b   :  { %4267 = vmatpush.bf16.msrb.mxu0 %v15095_v36  ;;  %v4321_v36 = vld [vmem:[#allocation6 + $0x48] sm:$0x1f] }
 0x59c   :  { %4281 = vmatpush.bf16.msrb.mxu1 %v15096_v7  ;;  %v15121_v7 = vld [vmem:[#allocation116_spill] sm:$0xff]  ;;  %v4325_v47 = vpack.c.bf16 %v4321_v36, %v4321_v36 }
 0x59d   :  { %4295 = vmatpush.bf16.msrb.mxu2 %v15097_v34  ;;  %v15122_v34 = vld [vmem:[#allocation117_spill] sm:$0xff] }
 0x59e   :  { %4309 = vmatpush.bf16.msrb.mxu3 %v15098_v23  ;;  %v4322_v23 = vpack.c.bf16 %v12125_v31, %v4318_v38 }
 0x59f   :  { %4268 = vmatpush.bf16.msrb.mxu0 %v15099_v21 }
 0x5a0   :  { %4282 = vmatpush.bf16.msrb.mxu1 %v15100_v16  ;;  %v4328_v25 = vshrl.u32 %v4322_v23, 16 }
 0x5a1   :  { %4296 = vmatpush.bf16.msrb.mxu2 %v15101_v54  ;;  %v3366_v29 = vpop.f32.mrf.mxu0  ;;  %v3380_v53 = vpop.f32.mrf.mxu1  ;;  %v4331_v54 = vshll.u32 %v4322_v23, 16  ;;  %v15136_v23 = vld [vmem:[#allocation46_spill] sm:$0xff] }
 0x5a2   :  { %4310 = vmatpush.bf16.msrb.mxu3 %v15102_v60  ;;  %v3381_v9 = vadd.f32 %v3380_v53, %v3366_v29  ;;  %v4336_v60 = vshrl.u32 %v4324_v61, 16  ;;  %v15137_v61 = vld [vmem:[#allocation44_spill] sm:$0xff] }
 0x5a3   :  { %4269 = vmatpush.bf16.msrb.mxu0 %v15103_v14  ;;  %v4348_v14 = vshll.u32 %v4323_v44, 16  ;;  %v4333_v29 = vrot.slane %v4331_v54, 3 }
 0x5a4   :  { %4283 = vmatpush.bf16.msrb.mxu1 %v15104_v12  ;;  %v4353_v12 = vshrl.u32 %v4325_v47, 16  ;;  %v4338_v53 = vrot.slane %v4336_v60, 2 }
 0x5a5   :  { %4297 = vmatpush.bf16.msrb.mxu2 %v15105_v32  ;;  %v4356_v32 = vshll.u32 %v4325_v47, 16  ;;  %v15138_v47 = vld [vmem:[#allocation47_spill] sm:$0xff] }
 0x5a6   :  { %4311 = vmatpush.bf16.msrb.mxu3 %v15106_v19  ;;  %4270 = vmatmul.bf16.vlgmr.msrb.gmra.mxu0 %v4242_v26  ;;  %v15127_v19 = vld [vmem:[#allocation122_spill] sm:$0xff] }
 0x5a7   :  { %4363 = vmatpush.bf16.msra.mxu0 %v15107_v43  ;;  %4284 = vmatmul.bf16.vlgmr.msrb.gmra.mxu1 %v4259_v62  ;;  %v15128_v43 = vld [vmem:[#allocation123_spill] sm:$0xff] }
 0x5a8   :  { %4377 = vmatpush.bf16.msra.mxu1 %v15108_v17  ;;  %4298 = vmatmul.bf16.vlgmr.msrb.gmra.mxu2 %v4242_v26  ;;  %v3394_v18 = vpop.f32.mrf.mxu2  ;;  %v3408_v59 = vpop.f32.mrf.mxu3  ;;  %v4330_v26 = vrot.slane %v4328_v25, 2  ;;  %v15143_v25 = vld [vmem:[#allocation55_spill] sm:$0xff] }
 0x5a9   :  { %4391 = vmatpush.bf16.msra.mxu2 %v15109_v15  ;;  %4312 = vmatmul.bf16.vlgmr.msrb.gmra.mxu3 %v4259_v62  ;;  %v3409_v6 = vadd.f32 %v3408_v59, %v3394_v18  ;;  %v12193_v41 = vpop.f32.mrf.mxu0  ;;  %v12195_v3 = vpop.f32.mrf.mxu1  ;;  %v15129_v15 = vld [vmem:[#allocation124_spill] sm:$0xff] }
 0x5aa   :  { %4405 = vmatpush.bf16.msra.mxu3 %v15110_v48  ;;  %v15130_v48 = vld [vmem:[#allocation125_spill] sm:$0xff]  ;;  %v4334_v38 = vor.u32 %v4333_v29, %v4330_v26  ;;  %v15152_v26 = vld [vmem:[#allocation130_spill] sm:$0xff]  ;;  %v15153_v29 = vld [vmem:[#allocation131_spill] sm:$0xff] }
 0x5ab   :  { %4364 = vmatpush.bf16.msra.mxu0 %v15111_v63  ;;  %v4341_v63 = vrot.slane %v4339_v28, 3  ;;  %v15144_v28 = vld [vmem:[#allocation57_spill] sm:$0xff] }
 0x5ac   :  { %4378 = vmatpush.bf16.msra.mxu1 %v15112_v52  ;;  %v4347_v52 = vrot.slane %v4345_v50, 2 }
 0x5ad   :  { %4392 = vmatpush.bf16.msra.mxu2 %v15113_v42  ;;  %v4350_v42 = vrot.slane %v4348_v14, 3  ;;  %v15146_v14 = vld [vmem:[#allocation60_spill] sm:$0xff] }
 0x5ae   :  { %4406 = vmatpush.bf16.msra.mxu3 %v15114_v30  ;;  %v4355_v30 = vrot.slane %v4353_v12, 2  ;;  %v15147_v12 = vld [vmem:[#allocation61_spill] sm:$0xff] }
 0x5af   :  { %4365 = vmatpush.bf16.msra.mxu0 %v15115_v20  ;;  %v4358_v20 = vrot.slane %v4356_v32, 3 }
 0x5b0   :  { %4379 = vmatpush.bf16.msra.mxu1 %v15116_v49  ;;  %v12207_v21 = vpop.f32.mrf.mxu2  ;;  %v12209_v16 = vpop.f32.mrf.mxu3  ;;  %v15131_v49 = vld [vmem:[#allocation126_spill] sm:$0xff] }
 0x5b1   :  { %4393 = vmatpush.bf16.msra.mxu2 %v15117_v11  ;;  %v3582_v8 = vpop.f32.mrf.mxu0  ;;  %v3596_v33 = vpop.f32.mrf.mxu1  ;;  %v15132_v11 = vld [vmem:[#allocation127_spill] sm:$0xff]  ;;  %v4359_v51 = vor.u32 %v4358_v20, %v4355_v30  ;;  %v15155_v30 = vld [vmem:[#allocation133_spill] sm:$0xff]  ;;  %v15156_v20 = vld [vmem:[#allocation134_spill] sm:$0xff] }
 0x5b2   :  { %4407 = vmatpush.bf16.msra.mxu3 %v15118_v57  ;;  %v3583_v17 = vadd.f32 %v3582_v8, %v3381_v9  ;;  %v15133_v57 = vld [vmem:[#allocation128_spill] sm:$0xff]  ;;  %v15134_v9 = vld [vmem:[#allocation129_spill] sm:$0xff]  ;;  %v15145_v8 = vld [vmem:[#allocation58_spill] sm:$0xff] }
 0x5b3   :  { %4366 = vmatpush.bf16.msra.mxu0 %v15119_v1  ;;  %v4342_v1 = vor.u32 %v4341_v63, %v4338_v53 }
 0x5b4   :  { %4380 = vmatpush.bf16.msra.mxu1 %v15120_v37  ;;  %v3597_v62 = vadd.f32 %v3596_v33, %v3583_v17  ;;  %v4351_v37 = vor.u32 %v4350_v42, %v4347_v52  ;;  %v15154_v42 = vld [vmem:[#allocation132_spill] sm:$0xff] }
 0x5b5   :  { %4394 = vmatpush.bf16.msra.mxu2 %v15121_v7 }
 0x5b6   :  { %4408 = vmatpush.bf16.msra.mxu3 %v15122_v34  ;;  %v15135_v34 = vld [vmem:[#allocation43_spill] sm:$0xff] }
 0x5b7   :  { %4367 = vmatpush.bf16.msra.mxu0 %v15123_v39  ;;  %v15140_v39 = vld [vmem:[#allocation52_spill] sm:$0xff] }
 0x5b8   :  { %4381 = vmatpush.bf16.msra.mxu1 %v15124_v5  ;;  %v3610_v18 = vpop.f32.mrf.mxu2  ;;  %v3624_v59 = vpop.f32.mrf.mxu3  ;;  %v15141_v5 = vld [vmem:[#allocation51_spill] sm:$0xff] }
 0x5b9   :  { %4395 = vmatpush.bf16.msra.mxu2 %v15125_v10  ;;  %v3611_v0 = vadd.f32 %v3610_v18, %v3409_v6  ;;  %v12219_v36 = vpop.f32.mrf.mxu0  ;;  %v12221_v7 = vpop.f32.mrf.mxu1  ;;  %v15139_v6 = vld [vmem:[#allocation50_spill] sm:$0xff]  ;;  %v4343_v10 = vsel %vm14226_vm7, %v4334_v38, %v4342_v1  ;;  %v4426_v18 = vld [vmem:[#allocation6 + $0x48] sm:$0x3f]  ;;  %v15159_v38 = vld [vmem:[#allocation137_spill] sm:$0xff] }
 0x5ba   :  { %4409 = vmatpush.bf16.msra.mxu3 %v15126_v4  ;;  %v15142_v4 = vld [vmem:[#allocation53_spill] sm:$0xff] }
 0x5bb   :  { %4368 = vmatpush.bf16.msra.mxu0 %v15127_v19  ;;  %v3625_v44 = vadd.f32 %v3624_v59, %v3611_v0  ;;  %v15148_v19 = vld [vmem:[#allocation62_spill] sm:$0xff]  ;;  %v15158_v59 = vld [vmem:[#allocation136_spill] sm:$0xff] }
 0x5bc   :  { %4382 = vmatpush.bf16.msra.mxu1 %v15128_v43  ;;  %v15149_v43 = vld [vmem:[#allocation63_spill] sm:$0xff] }
 0x5bd   :  { %4396 = vmatpush.bf16.msra.mxu2 %v15129_v15  ;;  %v15150_v15 = vld [vmem:[#allocation64_spill] sm:$0xff] }
 0x5be   :  { %4410 = vmatpush.bf16.msra.mxu3 %v15130_v48  ;;  %v15151_v48 = vld [vmem:[#allocation65_spill] sm:$0xff] }
 0x5bf   :  { %4369 = vmatpush.bf16.msra.mxu0 %v15131_v49  ;;  %v15157_v49 = vld [vmem:[#allocation135_spill] sm:$0xff] }
 0x5c0   :  { %4383 = vmatpush.bf16.msra.mxu1 %v15132_v11  ;;  %v12235_v54 = vpop.f32.mrf.mxu2  ;;  %v12237_v60 = vpop.f32.mrf.mxu3  ;;  %v4423_v11 = vld [vmem:[#allocation6 + $0x20] sm:$0xc0] }
 0x5c1   :  { %4397 = vmatpush.bf16.msra.mxu2 %v15133_v57  ;;  %v4425_v57 = vld [vmem:[#allocation6 + $0x40] sm:$0x3f]  ;;  %v4427_v0 = vpack.c.bf16 %v12125_v31, %v4423_v11 }
 0x5c2   :  { %4411 = vmatpush.bf16.msra.mxu3 %v15134_v9  ;;  %v3819_v33 = vpop.f32.mrf.mxu0  ;;  %v3833_v50 = vpop.f32.mrf.mxu1  ;;  %v4424_v9 = vld [vmem:[#allocation6 + $0x28] sm:$0xc0]  ;;  %v4429_v1 = vpack.c.bf16 %v4425_v57, %v4425_v57 }
 0x5c3   :  { %4370 = vmatpush.bf16.msra.mxu0 %v11973_v13  ;;  %v4360_v13 = vsel %vm14226_vm7, %v4351_v37, %v4359_v51  ;;  %v3834_v32 = vadd.f32 %v3833_v50, %v3819_v33  ;;  %v4428_v37 = vpack.c.bf16 %v12129_v58, %v4424_v9  ;;  %v4430_v51 = vpack.c.bf16 %v4426_v18, %v4426_v18  ;;  %v15170_v18 = vld [vmem:[#allocation22_spill] sm:$0xff] }
 0x5c4   :  { %4384 = vmatpush.bf16.msra.mxu1 %v15135_v34  ;;  %v4436_v34 = vrot.slane %v4427_v0, 3 }
 0x5c5   :  { %4398 = vmatpush.bf16.msra.mxu2 %v15136_v23  ;;  %v3866_v17 = vadd.f32 %v3834_v32, %v3597_v62  ;;  %v4437_v23 = vrot.slane %v4429_v1, 3  ;;  %v15172_v1 = vld [vmem:[#allocation18_spill] sm:$0xff] }
 0x5c6   :  { %4412 = vmatpush.bf16.msra.mxu3 %v15137_v61  ;;  %4371 = vmatmul.bf16.vlgmr.msra.gmra.mxu0 %v4343_v10  ;;  %v4439_v61 = vrot.slane %v4428_v37, 3  ;;  %v4547_v37 = vand.u32 15, %v15172_v1  ;;  %v15213_v1 = vmov 0 }
 0x5c7   :  { %4444 = vmatpush.bf16.msrb.mxu0 %v15138_v47  ;;  %4385 = vmatmul.bf16.vlgmr.msra.gmra.mxu1 %v4360_v13 }
 0x5c8   :  { %4458 = vmatpush.bf16.msrb.mxu1 %v15139_v6  ;;  %4399 = vmatmul.bf16.vlgmr.msra.gmra.mxu2 %v4343_v10 }
 0x5c9   :  { %4472 = vmatpush.bf16.msrb.mxu2 %v15140_v39  ;;  %4413 = vmatmul.bf16.vlgmr.msra.gmra.mxu3 %v4360_v13 }
 0x5ca   :  { %4486 = vmatpush.bf16.msrb.mxu3 %v15141_v5  ;;  %v3835_v31 = vpop.f32.mrf.mxu1 }
 0x5cb   :  { %4445 = vmatpush.bf16.msrb.mxu0 %v15142_v4  ;;  %v3847_v53 = vpop.f32.mrf.mxu2  ;;  %v3861_v63 = vpop.f32.mrf.mxu3 }
 0x5cc   :  { %4459 = vmatpush.bf16.msrb.mxu1 %v15143_v25  ;;  %v3862_v52 = vadd.f32 %v3861_v63, %v3847_v53  ;;  %v15163_v53 = vld [vmem:[#allocation19_spill] sm:$0xff] }
 0x5cd   :  { %4473 = vmatpush.bf16.msrb.mxu2 %v15144_v28  ;;  %v12300_v63 = vand.u32 15, %v15163_v53 }
 0x5ce   :  { %4487 = vmatpush.bf16.msrb.mxu3 %v15145_v8  ;;  %v3867_v62 = vadd.f32 %v3862_v52, %v3625_v44  ;;  %v3383_v52 = vadd.f32 %v12195_v3, %v12193_v41  ;;  %v15168_v3 = vmov 1.0  }
 0x5cf   :  { %4446 = vmatpush.bf16.msrb.mxu0 %v15146_v14  ;;  %vm12392_vm7 = vcmp.eq.s32.totalorder %v4547_v37, %v12300_v63 }
 0x5d0   :  { %4460 = vmatpush.bf16.msrb.mxu1 %v15147_v12 }
 0x5d1   :  { %4474 = vmatpush.bf16.msrb.mxu2 %v15148_v19 }
 0x5d2   :  { %4488 = vmatpush.bf16.msrb.mxu3 %v15149_v43 }
 0x5d3   :  { %4447 = vmatpush.bf16.msrb.mxu0 %v15150_v15  ;;  %v15161_v15 = vld [vmem:[#allocation17_spill] sm:$0xff] }
 0x5d4   :  { %4461 = vmatpush.bf16.msrb.mxu1 %v15151_v48  ;;  %v4531_v48 = vand.u32 15, %v15161_v15  ;;  %v15197_v15 = vmov 0 }
 0x5d5   :  { %4475 = vmatpush.bf16.msrb.mxu2 %v15152_v26  ;;  %v15162_v26 = vld [vmem:[#allocation16_spill] sm:$0xff] }
 0x5d6   :  { %4489 = vmatpush.bf16.msrb.mxu3 %v15153_v29  ;;  %v12297_v29 = vand.u32 15, %v15162_v26  ;;  %vm12312_vm0 = vcmp.eq.s32.totalorder %v4531_v48, %v12300_v63 }
 0x5d7   :  { %4448 = vmatpush.bf16.msrb.mxu0 %v15154_v42  ;;  %v3411_v42 = vadd.f32 %v12209_v16, %v12207_v21 }
 0x5d8   :  { %4462 = vmatpush.bf16.msrb.mxu1 %v15155_v30  ;;  %vm12307_vm9 = vcmp.eq.s32.totalorder %v4531_v48, %v12297_v29  ;;  %vm12376_vm1 = vcmp.eq.s32.totalorder %v4547_v37, %v12297_v29 }
 0x5d9   :  { %4476 = vmatpush.bf16.msrb.mxu2 %v15156_v20 }
 0x5da   :  { %4490 = vmatpush.bf16.msrb.mxu3 %v15157_v49  ;;  %v3585_v49 = vadd.f32 %v12219_v36, %v3383_v52  ;;  %v15169_v36 = vld [vmem:[#allocation20_spill] sm:$0xff] }
 0x5db   :  { %4449 = vmatpush.bf16.msrb.mxu0 %v15158_v59  ;;  %v4530_v9 = vand.u32 15, %v15169_v36  ;;  %v4529_v59 = vand.u32 15, %v15170_v18  ;;  %v15200_v52 = vld [vmem:[#allocation28_spill] sm:$0xff] }
 0x5dc   :  { %4463 = vmatpush.bf16.msrb.mxu1 %v15159_v38  ;;  %v3599_v21 = vadd.f32 %v12221_v7, %v3585_v49  ;;  %v15171_v38 = vld [vmem:[#allocation24_spill] sm:$0xff]  ;;  %v15201_v49 = vld [vmem:[#allocation23_spill] sm:$0xff] }
 0x5dd   :  { %4477 = vmatpush.bf16.msrb.mxu2 %v12071_v55  ;;  %v4440_v55 = vrot.slane %v4430_v51, 3  ;;  %v4528_v0 = vand.u32 15, %v15171_v38  ;;  %vm12335_vm2 = vcmp.eq.s32.totalorder %v4530_v9, %v12297_v29  ;;  %vm12340_vm5 = vcmp.eq.s32.totalorder %v4530_v9, %v12300_v63  ;;  %v15204_v36 = vld [vmem:[#allocation32_spill] sm:$0xff] }
 0x5de   :  { %4491 = vmatpush.bf16.msrb.mxu3 %v12073_v46  ;;  %v3821_v46 = vpop.f32.mrf.mxu0  ;;  %vm12356_vm13 = vcmp.eq.s32.totalorder %v4529_v59, %v12297_v29  ;;  %vm12361_vm14 = vcmp.eq.s32.totalorder %v4529_v59, %v12300_v63  ;;  %v4524_v9 = vand.u32 15, %v15204_v36  ;;  %v15206_v59 = vld [vmem:[#allocation34_spill] sm:$0xff] }
 0x5df   :  { %4450 = vmatpush.bf16.msrb.mxu0 %v12077_v56  ;;  %v4438_v56 = vsel %vm14227_vm8, %v4436_v34, %v4437_v23  ;;  %v3836_v57 = vadd.f32 %v3835_v31, %v3821_v46  ;;  %vm12371_vm15 = vcmp.eq.s32.totalorder %v4528_v0, %v12297_v29  ;;  %vm12381_vm4 = vcmp.eq.s32.totalorder %v4528_v0, %v12300_v63 }
 0x5e0   :  { %4464 = vmatpush.bf16.msrb.mxu1 %v12079_v45  ;;  %v4441_v45 = vsel %vm14227_vm8, %v4439_v61, %v4440_v55  ;;  %v4523_v38 = vand.u32 15, %v15206_v59  ;;  %v15207_v0 = vmov 0  ;;  %v15243_v59 = vmov 0 }
 0x5e1   :  { %4478 = vmatpush.bf16.msrb.mxu2 %v12083_v40  ;;  %v3849_v40 = vpop.f32.mrf.mxu2 }
 0x5e2   :  { %4492 = vmatpush.bf16.msrb.mxu3 %v12085_v27  ;;  %v3863_v27 = vpop.f32.mrf.mxu3 }
 0x5e3   :  { %4451 = vmatpush.bf16.msrb.mxu0 %v12089_v35 }
 0x5e4   :  { %4465 = vmatpush.bf16.msrb.mxu1 %v12091_v24 }
 0x5e5   :  { %4479 = vmatpush.bf16.msrb.mxu2 %v12095_v22 }
 0x5e6   :  { %4493 = vmatpush.bf16.msrb.mxu3 %v12097_v2  ;;  %4452 = vmatmul.bf16.vlgmr.msrb.gmra.mxu0 %v4438_v56  ;;  %v4084_v58 = vpop.f32.mrf.mxu0  ;;  %v4098_v35 = vpop.f32.mrf.mxu1 }
 0x5e7   :  { %4466 = vmatmul.bf16.vlgmr.msrb.gmra.mxu1 %v4441_v45  ;;  %v4099_v44 = vadd.f32 %v4098_v35, %v4084_v58  ;;  %8015 = vmatpush.msk.msra.mxu0 %vm12307_vm9, %v15168_v3 }
 0x5e8   :  { %4480 = vmatmul.bf16.vlgmr.msrb.gmra.mxu2 %v4438_v56  ;;  %8031 = vmatpush.msk.msra.mxu1 %vm12376_vm1, %v15168_v3 }
 0x5e9   :  { %4494 = vmatmul.bf16.vlgmr.msrb.gmra.mxu3 %v4441_v45  ;;  %v12269_v24 = vadd.f32 %v4099_v44, %v3866_v17  ;;  %8047 = vmatpush.msk.msra.mxu2 %vm12312_vm0, %v15168_v3  ;;  %v15182_v45 = vld [vmem:[#allocation21_spill] sm:$0xff] }
 0x5ea   :  { %8016 = vmatpush.msk.msra.mxu0 %vm12335_vm2, %v15168_v3  ;;  %8063 = vmatpush.msk.msra.mxu3 %vm12392_vm7, %v15168_v3 }
 0x5eb   :  { %15160 = vst [vmem:[#allocation66_spill] sm:$0xff] %v12269_v24  ;;  %8048 = vmatpush.msk.msra.mxu2 %vm12340_vm5, %v15168_v3 }
 0x5ec   :  { %8017 = vmatpush.msk.msra.mxu0 %vm12356_vm13, %v15168_v3 }
 0x5ed   :  { %v4112_v47 = vpop.f32.mrf.mxu2  ;;  %8049 = vmatpush.msk.msra.mxu2 %vm12361_vm14, %v15168_v3 }
 0x5ee   :  { %v4126_v6 = vpop.f32.mrf.mxu3  ;;  %v4086_v2 = vpop.f32.mrf.mxu0  ;;  %8018 = vmatpush.msk.msra.mxu0 %vm12371_vm15, %v15168_v3 }
 0x5ef   :  { %v4127_v22 = vadd.f32 %v4126_v6, %v4112_v47  ;;  %v4100_v5 = vpop.f32.mrf.mxu1  ;;  %v15187_v6 = vmov 0  ;;  %8050 = vmatpush.msk.msra.mxu2 %vm12381_vm4, %v15168_v3 }
 0x5f0   :  { %v4101_v51 = vadd.f32 %v4100_v5, %v4086_v2  ;;  %v15188_v6 = vsel %vm12381_vm4, 4294967295, %v15187_v6  ;;  %v15189_v2 = vmov 0  ;;  %v15191_v5 = vmov 0 }
 0x5f1   :  { %v12271_v39 = vadd.f32 %v4127_v22, %v3867_v62  ;;  %v3613_v62 = vadd.f32 %v12235_v54, %v3411_v42  ;;  %v3864_v54 = vadd.f32 %v3863_v27, %v3849_v40  ;;  %v4546_v40 = vand.u32 15, %v15182_v45 }
 0x5f2   :  { %v3868_v27 = vadd.f32 %v3836_v57, %v3599_v21  ;;  %v15190_v2 = vsel %vm12392_vm7, 4294967295, %v15189_v2  ;;  %v4526_v42 = vand.u32 15, %v15200_v52  ;;  %v15203_v21 = vld [vmem:[#allocation25_spill] sm:$0xff]  ;;  %vm12513_vm7 = vcmp.eq.s32.totalorder %v4524_v9, %v12297_v29 }
 0x5f3   :  { %v3627_v16 = vadd.f32 %v12237_v60, %v3613_v62  ;;  %v15177_v60 = vld [vmem:[#allocation26_spill] sm:$0xff]  ;;  %vm12397_vm8 = vcmp.eq.s32.totalorder %v4546_v40, %v12297_v29  ;;  %vm12418_vm3 = vcmp.eq.s32.totalorder %v4546_v40, %v12300_v63  ;;  %v15220_v40 = vmov 0 }
 0x5f4   :  { %v4527_v23 = vand.u32 15, %v15177_v60  ;;  %v15192_v5 = vsel %vm12397_vm8, 4294967295, %v15191_v5  ;;  %v15198_v15 = vsel %vm12418_vm3, 4294967295, %v15197_v15  ;;  %v12422_v48 = vadd.f32 %v4101_v51, %v3868_v27  ;;  %8032 = vmatpush.msk.msra.mxu1 %vm12397_vm8, %v15168_v3  ;;  %8064 = vmatpush.msk.msra.mxu3 %vm12418_vm3, %v15168_v3 }
 0x5f5   :  { %v4114_v10 = vpop.f32.mrf.mxu2  ;;  %v3869_v22 = vadd.f32 %v3864_v54, %v3627_v16  ;;  %v4544_v16 = vand.u32 15, %v15203_v21  ;;  %v15205_v54 = vld [vmem:[#allocation27_spill] sm:$0xff]  ;;  %vm12455_vm10 = vcmp.eq.s32.totalorder %v4526_v42, %v12297_v29  ;;  %vm12465_vm3 = vcmp.eq.s32.totalorder %v4526_v42, %v12300_v63 }
 0x5f6   :  { %v4128_v13 = vpop.f32.mrf.mxu3  ;;  %vm12408_vm6 = vcmp.eq.s32.totalorder %v4527_v23, %v12297_v29  ;;  %vm12413_vm11 = vcmp.eq.s32.totalorder %v4527_v23, %v12300_v63  ;;  %15199 = vst [vmem:[#allocation68_spill] sm:$0xff] %v12422_v48  ;;  %v4543_v18 = vand.u32 15, %v15205_v54  ;;  %v15208_v0 = vsel %vm12455_vm10, 4294967295, %v15207_v0 }
 0x5f7   :  { %v4129_v61 = vadd.f32 %v4128_v13, %v4114_v10  ;;  %v15193_v10 = vmov 0  ;;  %v15195_v13 = vmov 0  ;;  %8019 = vmatpush.msk.msra.mxu0 %vm12408_vm6, %v15168_v3  ;;  %8051 = vmatpush.msk.msra.mxu2 %vm12413_vm11, %v15168_v3  ;;  %v15215_v23 = vmov 0 }
 0x5f8   :  { %v15194_v10 = vsel %vm12408_vm6, 4294967295, %v15193_v10  ;;  %v15196_v13 = vsel %vm12413_vm11, 4294967295, %v15195_v13  ;;  %vm12491_vm6 = vcmp.eq.s32.totalorder %v4544_v16, %v12297_v29  ;;  %v15222_v27 = vmov 0 }
 0x5f9   :  { %v12424_v26 = vadd.f32 %v4129_v61, %v3869_v22  ;;  %8020 = vmatpush.msk.msra.mxu0 %vm12455_vm10, %v15168_v3  ;;  %v15219_v61 = vld [vmem:[#allocation29_spill] sm:$0xff]  ;;  %8052 = vmatpush.msk.msra.mxu2 %vm12465_vm3, %v15168_v3  ;;  %vm12508_vm10 = vcmp.eq.s32.totalorder %v4544_v16, %v12300_v63  ;;  %v15224_v22 = vmov 0  ;;  %v15227_v42 = vmov 0 }
 0x5fa   :  { %v4542_v45 = vand.u32 15, %v15219_v61  ;;  %v15223_v27 = vsel %vm12508_vm10, 4294967295, %v15222_v27  ;;  %v15225_v22 = vsel %vm12513_vm7, 4294967295, %v15224_v22  ;;  %vm12535_vm4 = vcmp.eq.s32.totalorder %v4543_v18, %v12300_v63 }
 0x5fb   :  { %v15246_v61 = vmov 0  ;;  %v4751_v7 = vadd.f32 %v12424_v26, %v12271_v39 }
 0x603   :  { %v12273_v4 = vpop.f32.mrf.mxu0 }
 0x604   :  { %v4193_v25 = vpop.f32.mrf.mxu1 }
 0x605   :  { %v4194_v53 = vadd.f32 %v4193_v25, %v12273_v4  ;;  %v4545_v4 = vand.u32 15, %v15201_v49  ;;  %v15202_v25 = vld [vmem:[#allocation30_spill] sm:$0xff]  ;;  %v15229_v49 = vmov 0 }
 0x606   :  { %v4525_v62 = vand.u32 15, %v15202_v25  ;;  %v15235_v25 = vld [vmem:[#allocation31_spill] sm:$0xff] }
 0x607   :  { %vm12460_vm12 = vcmp.eq.s32.totalorder %v4545_v4, %v12297_v29  ;;  %vm12470_vm11 = vcmp.eq.s32.totalorder %v4545_v4, %v12300_v63  ;;  %v15232_v4 = vmov 0 }
 0x608   :  { %v15214_v1 = vsel %vm12470_vm11, 4294967295, %v15213_v1  ;;  %8033 = vmatpush.msk.msra.mxu1 %vm12460_vm12, %v15168_v3  ;;  %vm12486_vm8 = vcmp.eq.s32.totalorder %v4525_v62, %v12297_v29  ;;  %8065 = vmatpush.msk.msra.mxu3 %vm12470_vm11, %v15168_v3  ;;  %vm12525_vm11 = vcmp.eq.s32.totalorder %v4543_v18, %v12297_v29  ;;  %v15233_v4 = vsel %vm12535_vm4, 4294967295, %v15232_v4 }
 0x609   :  { %v15216_v23 = vsel %vm12486_vm8, 4294967295, %v15215_v23  ;;  %8021 = vmatpush.msk.msra.mxu0 %vm12486_vm8, %v15168_v3  ;;  %v15228_v42 = vsel %vm12525_vm11, 4294967295, %v15227_v42  ;;  %15234 = vst [vmem:[#allocation67_spill] sm:$0xff] %v15233_v4  ;;  %vm12558_vm8 = vcmp.eq.s32.totalorder %v4542_v45, %v12297_v29  ;;  %v15257_v4 = vmov 0 }
 0x60a   :  { %8034 = vmatpush.msk.msra.mxu1 %vm12491_vm6, %v15168_v3  ;;  %8066 = vmatpush.msk.msra.mxu3 %vm12508_vm10, %v15168_v3  ;;  %vm12574_vm10 = vcmp.eq.s32.totalorder %v4523_v38, %v12300_v63 }
 0x60b   :  { %v12275_v28 = vpop.f32.mrf.mxu2  ;;  %v12279_v33 = vpop.f32.mrf.mxu0  ;;  %8022 = vmatpush.msk.msra.mxu0 %vm12513_vm7, %v15168_v3  ;;  %v15244_v59 = vsel %vm12574_vm10, 4294967295, %v15243_v59 }
 0x60c   :  { %v12277_v8 = vpop.f32.mrf.mxu3  ;;  %v12281_v50 = vpop.f32.mrf.mxu1  ;;  %8035 = vmatpush.msk.msra.mxu1 %vm12525_vm11, %v15168_v3  ;;  %15245 = vst [vmem:[#allocation72_spill] sm:$0xff] %v15244_v59  ;;  %8067 = vmatpush.msk.msra.mxu3 %vm12535_vm4, %v15168_v3 }
 0x60d   :  { %v4222_v57 = vadd.f32 %v12277_v8, %v12275_v28  ;;  %v15209_v28 = vmov 0  ;;  %v15211_v8 = vmov 0  ;;  %v4196_v21 = vadd.f32 %v12281_v50, %v12279_v33  ;;  %v15242_v50 = vld [vmem:[#allocation38_spill] sm:$0xff] }
 0x60e   :  { %v15210_v28 = vsel %vm12460_vm12, 4294967295, %v15209_v28  ;;  %v15212_v8 = vsel %vm12465_vm3, 4294967295, %v15211_v8  ;;  %vm12503_vm12 = vcmp.eq.s32.totalorder %v4525_v62, %v12300_v63  ;;  %vm12530_vm3 = vcmp.eq.s32.totalorder %v4524_v9, %v12300_v63  ;;  %8036 = vmatpush.msk.msra.mxu1 %vm12558_vm8, %v15168_v3 }
 0x60f   :  { %v15221_v40 = vsel %vm12503_vm12, 4294967295, %v15220_v40  ;;  %v15230_v49 = vsel %vm12530_vm3, 4294967295, %v15229_v49  ;;  %v4541_v62 = vand.u32 15, %v15235_v25  ;;  %8053 = vmatpush.msk.msra.mxu2 %vm12503_vm12, %v15168_v3  ;;  %v15236_v9 = vmov 0 }
 0x610   :  { %15231 = vst [vmem:[#allocation70_spill] sm:$0xff] %v15230_v49  ;;  %v15239_v33 = vmov 0  ;;  %v4521_v54 = vand.u32 15, %v15242_v50  ;;  %vm12579_vm12 = vcmp.eq.s32.totalorder %v4542_v45, %v12300_v63  ;;  %v15253_v45 = vmov 0 }
 0x611   :  { %v15240_v33 = vsel %vm12558_vm8, 4294967295, %v15239_v33  ;;  %v15247_v61 = vsel %vm12579_vm12, 4294967295, %v15246_v61  ;;  %8054 = vmatpush.msk.msra.mxu2 %vm12530_vm3, %v15168_v3  ;;  %vm12596_vm7 = vcmp.eq.s32.totalorder %v4541_v62, %v12297_v29  ;;  %v12603_v50 = vadd.f32 %v12422_v48, %v12269_v24  ;;  %v15263_v48 = vld [vmem:[#allocation35_spill] sm:$0xff]  ;;  %8068 = vmatpush.msk.msra.mxu3 %vm12579_vm12, %v15168_v3  ;;  %v15271_v24 = vld [vmem:[#allocation37_spill] sm:$0xff] }
 0x612   :  { %15241 = vst [vmem:[#allocation71_spill] sm:$0xff] %v15240_v33  ;;  %v15254_v45 = vsel %vm12596_vm7, 4294967295, %v15253_v45  ;;  %vm12618_vm3 = vcmp.eq.s32.totalorder %v4541_v62, %v12300_v63  ;;  %vm12630_vm8 = vcmp.eq.s32.totalorder %v4521_v54, %v12297_v29  ;;  %v15270_v62 = vld [vmem:[#allocation42_spill] sm:$0xff]  ;;  %v4538_v33 = vand.u32 15, %v15271_v24  ;;  %8037 = vmatpush.msk.msra.mxu1 %vm12596_vm7, %v15168_v3 }
 0x613   :  { %v12283_v14 = vpop.f32.mrf.mxu2  ;;  %15248 = vst [vmem:[#allocation73_spill] sm:$0xff] %v15247_v61  ;;  %8055 = vmatpush.msk.msra.mxu2 %vm12574_vm10, %v15168_v3  ;;  %vm12651_vm12 = vcmp.eq.s32.totalorder %v4521_v54, %v12300_v63  ;;  %v15272_v61 = vmov 0  ;;  %8069 = vmatpush.msk.msra.mxu3 %vm12618_vm3, %v15168_v3  ;;  %v15278_v24 = vmov 0 }
 0x614   :  { %v12285_v12 = vpop.f32.mrf.mxu3  ;;  %15255 = vst [vmem:[#allocation75_spill] sm:$0xff] %v15254_v45  ;;  %v15273_v61 = vsel %vm12651_vm12, 4294967295, %v15272_v61 }
 0x615   :  { %v12565_v18 = vadd.f32 %v12285_v12, %v12283_v14  ;;  %v15249_v14 = vld [vmem:[#allocation33_spill] sm:$0xff]  ;;  %15274 = vst [vmem:[#allocation80_spill] sm:$0xff] %v15273_v61 }
 0x616   :  { %v4540_v12 = vand.u32 15, %v15249_v14 }
 0x618   :  { %vm12656_vm10 = vcmp.eq.s32.totalorder %v4540_v12, %v12300_v63 }
 0x619   :  { %8070 = vmatpush.msk.msra.mxu3 %vm12656_vm10, %v15168_v3 }
 0x623   :  { %v12287_v32 = vpop.f32.mrf.mxu0 }
 0x624   :  { %v12289_v19 = vpop.f32.mrf.mxu1  ;;  %v4272_v37 = vadd.f32 %v12287_v32, %v4194_v53  ;;  %v15217_v32 = vmov 0  ;;  %v15226_v53 = vld [vmem:[#allocation36_spill] sm:$0xff] }
 0x625   :  { %v15218_v32 = vsel %vm12491_vm6, 4294967295, %v15217_v32  ;;  %v4522_v52 = vand.u32 15, %v15226_v53  ;;  %vm12553_vm6 = vcmp.eq.s32.totalorder %v4523_v38, %v12297_v29  ;;  %v15250_v38 = vmov 0  ;;  %v15256_v53 = vld [vmem:[#allocation40_spill] sm:$0xff] }
 0x626   :  { %v15237_v9 = vsel %vm12553_vm6, 4294967295, %v15236_v9  ;;  %v4520_v25 = vand.u32 15, %v15256_v53  ;;  %v4286_v14 = vadd.f32 %v12289_v19, %v4272_v37  ;;  %8023 = vmatpush.msk.msra.mxu0 %vm12553_vm6, %v15168_v3  ;;  %v15260_v53 = vmov 0 }
 0x627   :  { %15238 = vst [vmem:[#allocation69_spill] sm:$0xff] %v15237_v9  ;;  %vm12591_vm11 = vcmp.eq.s32.totalorder %v4522_v52, %v12297_v29  ;;  %vm12613_vm4 = vcmp.eq.s32.totalorder %v4522_v52, %v12300_v63  ;;  %v15261_v53 = vsel %vm12618_vm3, 4294967295, %v15260_v53  ;;  %v4539_v19 = vand.u32 15, %v15263_v48  ;;  %v15297_v9 = vld [vmem:[#allocation41_spill] sm:$0xff] }
 0x628   :  { %v15251_v38 = vsel %vm12591_vm11, 4294967295, %v15250_v38  ;;  %v15258_v4 = vsel %vm12613_vm4, 4294967295, %v15257_v4  ;;  %15262 = vst [vmem:[#allocation77_spill] sm:$0xff] %v15261_v53  ;;  %v15264_v37 = vmov 0  ;;  %vm12635_vm6 = vcmp.eq.s32.totalorder %v4540_v12, %v12297_v29  ;;  %8024 = vmatpush.msk.msra.mxu0 %vm12591_vm11, %v15168_v3  ;;  %8056 = vmatpush.msk.msra.mxu2 %vm12613_vm4, %v15168_v3  ;;  %v15285_v12 = vld [vmem:[#allocation39_spill] sm:$0xff] }
 0x629   :  { %15252 = vst [vmem:[#allocation74_spill] sm:$0xff] %v15251_v38  ;;  %v15265_v37 = vsel %vm12630_vm8, 4294967295, %v15264_v37  ;;  %v15267_v52 = vmov 0  ;;  %v4519_v48 = vand.u32 15, %v15270_v62  ;;  %v15275_v62 = vmov 0  ;;  %8038 = vmatpush.msk.msra.mxu1 %vm12635_vm6, %v15168_v3 }
 0x62a   :  { %15259 = vst [vmem:[#allocation76_spill] sm:$0xff] %v15258_v4  ;;  %v15268_v52 = vsel %vm12635_vm6, 4294967295, %v15267_v52  ;;  %v15276_v62 = vsel %vm12656_vm10, 4294967295, %v15275_v62  ;;  %vm12667_vm7 = vcmp.eq.s32.totalorder %v4520_v25, %v12297_v29  ;;  %vm12672_vm11 = vcmp.eq.s32.totalorder %v4539_v19, %v12297_v29  ;;  %8025 = vmatpush.msk.msra.mxu0 %vm12630_vm8, %v15168_v3  ;;  %8057 = vmatpush.msk.msra.mxu2 %vm12651_vm12, %v15168_v3 }
 0x62b   :  { %v12291_v43 = vpop.f32.mrf.mxu2  ;;  %v12318_v11 = vpop.f32.mrf.mxu0  ;;  %15266 = vst [vmem:[#allocation78_spill] sm:$0xff] %v15265_v37  ;;  %v15279_v24 = vsel %vm12667_vm7, 4294967295, %v15278_v24  ;;  %v4537_v45 = vand.u32 15, %v15285_v12  ;;  %vm12691_vm3 = vcmp.eq.s32.totalorder %v4520_v25, %v12300_v63  ;;  %vm12696_vm4 = vcmp.eq.s32.totalorder %v4539_v19, %v12300_v63  ;;  %8039 = vmatpush.msk.msra.mxu1 %vm12672_vm11, %v15168_v3 }
 0x62c   :  { %v12293_v17 = vpop.f32.mrf.mxu3  ;;  %v12320_v41 = vpop.f32.mrf.mxu1  ;;  %15269 = vst [vmem:[#allocation79_spill] sm:$0xff] %v15268_v52  ;;  %v12642_v59 = vadd.f32 %v12291_v43, %v4222_v57  ;;  %v15281_v43 = vmov 0  ;;  %v15284_v57 = vld [vmem:[#allocation48_spill] sm:$0xff]  ;;  %vm12707_vm6 = vcmp.eq.s32.totalorder %v4519_v48, %v12297_v29  ;;  %v15292_v25 = vmov 0  ;;  %v15296_v52 = vld [vmem:[#allocation54_spill] sm:$0xff]  ;;  %8026 = vmatpush.msk.msra.mxu0 %vm12667_vm7, %v15168_v3  ;;  %8058 = vmatpush.msk.msra.mxu2 %vm12691_vm3, %v15168_v3 }
 0x62d   :  { %15277 = vst [vmem:[#allocation81_spill] sm:$0xff] %v15276_v62  ;;  %v15282_v43 = vsel %vm12672_vm11, 4294967295, %v15281_v43  ;;  %v4518_v54 = vand.u32 15, %v15284_v57  ;;  %v15286_v57 = vmov 0  ;;  %v15293_v25 = vsel %vm12707_vm6, 4294967295, %v15292_v25  ;;  %8071 = vmatpush.msk.msra.mxu3 %vm12696_vm4, %v15168_v3 }
 0x62e   :  { %15280 = vst [vmem:[#allocation83_spill] sm:$0xff] %v15279_v24  ;;  %v15287_v57 = vsel %vm12691_vm3, 4294967295, %v15286_v57  ;;  %vm12712_vm8 = vcmp.eq.s32.totalorder %v4538_v33, %v12297_v29  ;;  %v15294_v19 = vmov 0  ;;  %v4517_v37 = vand.u32 15, %v15296_v52  ;;  %8027 = vmatpush.msk.msra.mxu0 %vm12707_vm6, %v15168_v3 }
 0x62f   :  { %15283 = vst [vmem:[#allocation84_spill] sm:$0xff] %v15282_v43  ;;  %v15295_v19 = vsel %vm12712_vm8, 4294967295, %v15294_v19  ;;  %v4536_v49 = vand.u32 15, %v15297_v9  ;;  %v4274_v61 = vadd.f32 %v12318_v11, %v4196_v21  ;;  %vm12726_vm10 = vcmp.eq.s32.totalorder %v4519_v48, %v12300_v63  ;;  %v15307_v9 = vld [vmem:[#allocation15_spill] sm:$0xff]  ;;  %v15308_v48 = vld [vmem:[#allocation45_spill] sm:$0xff]  ;;  %8040 = vmatpush.msk.msra.mxu1 %vm12712_vm8, %v15168_v3 }
 0x630   :  { %15288 = vst [vmem:[#allocation85_spill] sm:$0xff] %v15287_v57  ;;  %v15298_v62 = vmov 0  ;;  %vm12731_vm12 = vcmp.eq.s32.totalorder %v4538_v33, %v12300_v63  ;;  %v15300_v52 = vmov 0  ;;  %vm12742_vm11 = vcmp.eq.s32.totalorder %v4518_v54, %v12297_v29  ;;  %8059 = vmatpush.msk.msra.mxu2 %vm12726_vm10, %v15168_v3 }
 0x631   :  { %v15299_v62 = vsel %vm12726_vm10, 4294967295, %v15298_v62  ;;  %v15301_v52 = vsel %vm12731_vm12, 4294967295, %v15300_v52  ;;  %v15302_v11 = vmov 0  ;;  %vm12747_vm7 = vcmp.eq.s32.totalorder %v4537_v45, %v12297_v29  ;;  %8072 = vmatpush.msk.msra.mxu3 %vm12731_vm12, %v15168_v3  ;;  %8028 = vmatpush.msk.msra.mxu0 %vm12742_vm11, %v15168_v3 }
 0x632   :  { %v15303_v11 = vsel %vm12742_vm11, 4294967295, %v15302_v11  ;;  %v15304_v21 = vmov 0  ;;  %v4516_v33 = vand.u32 15, %v15307_v9  ;;  %v4535_v43 = vand.u32 15, %v15308_v48  ;;  %8041 = vmatpush.msk.msra.mxu1 %vm12747_vm7, %v15168_v3 }
 0x633   :  { %v12345_v55 = vpop.f32.mrf.mxu2  ;;  %v15305_v21 = vsel %vm12747_vm7, 4294967295, %v15304_v21  ;;  %vm12765_vm3 = vcmp.eq.s32.totalorder %v4537_v45, %v12300_v63  ;;  %v15312_v24 = vmov 0  ;;  %vm12776_vm8 = vcmp.eq.s32.totalorder %v4517_v37, %v12297_v29 }
 0x634   :  { %v12347_v46 = vpop.f32.mrf.mxu3  ;;  %15306 = vst [vmem:[#allocation87_spill] sm:$0xff] %v15305_v21  ;;  %v15313_v24 = vsel %vm12765_vm3, 4294967295, %v15312_v24  ;;  %vm12781_vm6 = vcmp.eq.s32.totalorder %v4536_v49, %v12297_v29  ;;  %v15318_v45 = vmov 0  ;;  %vm12795_vm12 = vcmp.eq.s32.totalorder %v4517_v37, %v12300_v63  ;;  %8073 = vmatpush.msk.msra.mxu3 %vm12765_vm3, %v15168_v3  ;;  %v15331_v37 = vld [vmem:[#allocation56_spill] sm:$0xff]  ;;  %8029 = vmatpush.msk.msra.mxu0 %vm12776_vm8, %v15168_v3 }
 0x635   :  { %15314 = vst [vmem:[#allocation89_spill] sm:$0xff] %v15313_v24  ;;  %v15319_v45 = vsel %vm12781_vm6, 4294967295, %v15318_v45  ;;  %vm12800_vm10 = vcmp.eq.s32.totalorder %v4536_v49, %v12300_v63  ;;  %v15324_v48 = vmov 0  ;;  %vm12812_vm7 = vcmp.eq.s32.totalorder %v4516_v33, %v12297_v29  ;;  %8042 = vmatpush.msk.msra.mxu1 %vm12781_vm6, %v15168_v3 }
 0x636   :  { %15320 = vst [vmem:[#allocation91_spill] sm:$0xff] %v15319_v45  ;;  %v15325_v48 = vsel %vm12800_vm10, 4294967295, %v15324_v48  ;;  %vm12817_vm11 = vcmp.eq.s32.totalorder %v4535_v43, %v12297_v29  ;;  %vm12831_vm3 = vcmp.eq.s32.totalorder %v4516_v33, %v12300_v63  ;;  %v15332_v24 = vmov 0  ;;  %8074 = vmatpush.msk.msra.mxu3 %vm12800_vm10, %v15168_v3  ;;  %v15338_v33 = vld [vmem:[#allocation59_spill] sm:$0xff]  ;;  %8030 = vmatpush.msk.msra.mxu0 %vm12812_vm7, %v15168_v3 }
 0x637   :  { %15326 = vst [vmem:[#allocation92_spill] sm:$0xff] %v15325_v48  ;;  %v15333_v24 = vsel %vm12831_vm3, 4294967295, %v15332_v24  ;;  %8043 = vmatpush.msk.msra.mxu1 %vm12817_vm11, %v15168_v3 }
 0x638   :  { %8079 = vmatpush.msk.msrb.mxu0 %vm12307_vm9, %v15168_v3 }
 0x63a   :  { %8080 = vmatpush.msk.msrb.mxu0 %vm12335_vm2, %v15168_v3  ;;  %vm15350_vm2 = vnez %v15190_v2 }
 0x63c   :  { %8081 = vmatpush.msk.msrb.mxu0 %vm12356_vm13, %v15168_v3  ;;  %vm15352_vm13 = vnez %v15192_v5 }
 0x63e   :  { %8082 = vmatpush.msk.msrb.mxu0 %vm12371_vm15, %v15168_v3  ;;  %vm15354_vm15 = vnez %v15198_v15  ;;  %v15365_v15 = vld [vmem:[#allocation70_spill] sm:$0xff] }
 0x643   :  { %v12366_v58 = vpop.f32.mrf.mxu0 }
 0x644   :  { %v12368_v35 = vpop.f32.mrf.mxu1 }
 0x645   :  { %v4387_v4 = vadd.f32 %v12368_v35, %v12366_v58  ;;  %v15289_v58 = vmov 0 }
 0x646   :  { %v15290_v58 = vsel %vm12696_vm4, 4294967295, %v15289_v58  ;;  %vm12760_vm4 = vcmp.eq.s32.totalorder %v4518_v54, %v12300_v63  ;;  %v15315_v54 = vmov 0 }
 0x647   :  { %15291 = vst [vmem:[#allocation86_spill] sm:$0xff] %v15290_v58  ;;  %v15309_v58 = vmov 0  ;;  %v4419_v9 = vadd.f32 %v4387_v4, %v4286_v14  ;;  %v15316_v54 = vsel %vm12776_vm8, 4294967295, %v15315_v54  ;;  %8060 = vmatpush.msk.msra.mxu2 %vm12760_vm4, %v15168_v3 }
 0x648   :  { %v15310_v58 = vsel %vm12760_vm4, 4294967295, %v15309_v58  ;;  %15317 = vst [vmem:[#allocation90_spill] sm:$0xff] %v15316_v54  ;;  %vm12836_vm4 = vcmp.eq.s32.totalorder %v4535_v43, %v12300_v63 }
 0x649   :  { %15311 = vst [vmem:[#allocation88_spill] sm:$0xff] %v15310_v58  ;;  %8061 = vmatpush.msk.msra.mxu2 %vm12795_vm12, %v15168_v3  ;;  %8075 = vmatpush.msk.msra.mxu3 %vm12836_vm4, %v15168_v3 }
 0x64b   :  { %v12475_v51 = vpop.f32.mrf.mxu2  ;;  %v12542_v16 = vpop.f32.mrf.mxu0  ;;  %8062 = vmatpush.msk.msra.mxu2 %vm12831_vm3, %v15168_v3 }
 0x64c   :  { %v12477_v60 = vpop.f32.mrf.mxu3  ;;  %v12544_v36 = vpop.f32.mrf.mxu1 }
 0x64d   :  { %v4389_v14 = vadd.f32 %v12544_v36, %v12542_v16  ;;  %v4288_v16 = vadd.f32 %v12320_v41, %v4274_v61  ;;  %v15327_v36 = vmov 0  ;;  %v4533_v41 = vand.u32 15, %v15331_v37  ;;  %8111 = vmatpush.msk.msrb.mxu2 %vm12312_vm0, %v15168_v3 }
 0x64e   :  { %v15328_v36 = vsel %vm12812_vm7, 4294967295, %v15327_v36  ;;  %v15334_v37 = vmov 0  ;;  %vm15349_vm0 = vnez %v15188_v6 }
 0x64f   :  { %v15335_v37 = vsel %vm12836_vm4, 4294967295, %v15334_v37  ;;  %vm12876_vm7 = vcmp.eq.s32.totalorder %v4533_v41, %v12297_v29  ;;  %vm12888_vm3 = vcmp.eq.s32.totalorder %v4533_v41, %v12300_v63  ;;  %8112 = vmatpush.msk.msrb.mxu2 %vm12340_vm5, %v15168_v3  ;;  %vm15351_vm5 = vnez %v15194_v10 }
 0x650   :  { %8083 = vmatpush.msk.msrb.mxu0 %vm15351_vm5, %v15168_v3  ;;  %vm15358_vm5 = vnez %v15214_v1  ;;  %v15371_v1 = vld [vmem:[#allocation71_spill] sm:$0xff] }
 0x651   :  { %8113 = vmatpush.msk.msrb.mxu2 %vm12361_vm14, %v15168_v3  ;;  %vm15353_vm14 = vnez %v15196_v13 }
 0x653   :  { %v12680_v38 = vpop.f32.mrf.mxu2  ;;  %8114 = vmatpush.msk.msrb.mxu2 %vm15349_vm0, %v15168_v3  ;;  %vm15356_vm0 = vnez %v15210_v28 }
 0x654   :  { %v12682_v53 = vpop.f32.mrf.mxu3 }
 0x655   :  { %8115 = vmatpush.msk.msrb.mxu2 %vm15353_vm14, %v15168_v3  ;;  %vm15360_vm14 = vnez %v15218_v32  ;;  %v15375_v32 = vld [vmem:[#allocation73_spill] sm:$0xff] }
 0x663   :  { %v4453_v35 = vpop.f32.mrf.mxu0 }
 0x664   :  { %v4467_v12 = vpop.f32.mrf.mxu1 }
 0x665   :  { %v4468_v57 = vadd.f32 %v4467_v12, %v4453_v35  ;;  %v15321_v35 = vld [vmem:[#allocation49_spill] sm:$0xff]  ;;  %v15322_v12 = vmov 0 }
 0x666   :  { %v4534_v4 = vand.u32 15, %v15321_v35  ;;  %v15323_v12 = vsel %vm12795_vm12, 4294967295, %v15322_v12 }
 0x667   :  { %v12822_v61 = vadd.f32 %v4468_v57, %v4419_v9  ;;  %v4314_v57 = vadd.f32 %v12293_v17, %v12642_v59  ;;  %v4415_v9 = vadd.f32 %v12477_v60, %v12475_v51  ;;  %v4532_v17 = vand.u32 15, %v15338_v33  ;;  %v15391_v33 = vld [vmem:[#allocation81_spill] sm:$0xff]  ;;  %v15420_v51 = vld [vmem:[#allocation66_spill] sm:$0xff] }
 0x668   :  { %vm12851_vm6 = vcmp.eq.s32.totalorder %v4534_v4, %v12297_v29  ;;  %v4421_v59 = vadd.f32 %v4389_v14, %v4288_v16  ;;  %vm12863_vm12 = vcmp.eq.s32.totalorder %v4534_v4, %v12300_v63  ;;  %v4302_v60 = vadd.f32 %v12345_v55, %v12565_v18  ;;  %v15383_v16 = vld [vmem:[#allocation77_spill] sm:$0xff] }
 0x669   :  { %v4743_v4 = vadd.f32 %v12603_v50, %v12822_v61  ;;  %8044 = vmatpush.msk.msra.mxu1 %vm12851_vm6, %v15168_v3  ;;  %v4420_v18 = vadd.f32 %v4415_v9, %v4314_v57  ;;  %8076 = vmatpush.msk.msra.mxu3 %vm12863_vm12, %v15168_v3  ;;  %vm12901_vm4 = vcmp.eq.s32.totalorder %v4532_v17, %v12297_v29  ;;  %v15387_v57 = vld [vmem:[#allocation79_spill] sm:$0xff]  ;;  %v15389_v9 = vld [vmem:[#allocation80_spill] sm:$0xff] }
 0x66a   :  { %vm12913_vm9 = vcmp.eq.s32.totalorder %v4532_v17, %v12300_v63  ;;  %v4316_v29 = vadd.f32 %v12347_v46, %v4302_v60  ;;  %v15393_v17 = vld [vmem:[#allocation83_spill] sm:$0xff]  ;;  %v15397_v60 = vld [vmem:[#allocation85_spill] sm:$0xff] }
 0x66b   :  { %v4481_v35 = vpop.f32.mrf.mxu2  ;;  %v4455_v54 = vpop.f32.mrf.mxu0  ;;  %8045 = vmatpush.msk.msra.mxu1 %vm12876_vm7, %v15168_v3  ;;  %8077 = vmatpush.msk.msra.mxu3 %vm12888_vm3, %v15168_v3 }
 0x66c   :  { %v4495_v58 = vpop.f32.mrf.mxu3  ;;  %v4469_v21 = vpop.f32.mrf.mxu1 }
 0x66d   :  { %v4470_v45 = vadd.f32 %v4469_v21, %v4455_v54  ;;  %v4496_v48 = vadd.f32 %v4495_v58, %v4481_v35  ;;  %v4417_v58 = vadd.f32 %v12682_v53, %v12680_v38  ;;  %8046 = vmatpush.msk.msra.mxu1 %vm12901_vm4, %v15168_v3  ;;  %8078 = vmatpush.msk.msra.mxu3 %vm12913_vm9, %v15168_v3  ;;  %v15385_v35 = vld [vmem:[#allocation78_spill] sm:$0xff] }
 0x66f   :  { %v12880_v54 = vadd.f32 %v4470_v45, %v4421_v59  ;;  %v12921_v53 = vadd.f32 %v4496_v48, %v4420_v18  ;;  %v4422_v34 = vadd.f32 %v4417_v58, %v4316_v29  ;;  %8095 = vmatpush.msk.msrb.mxu1 %vm12376_vm1, %v15168_v3  ;;  %8127 = vmatpush.msk.msrb.mxu3 %vm15350_vm2, %v15168_v3  ;;  %v15395_v59 = vld [vmem:[#allocation84_spill] sm:$0xff]  ;;  %v15406_v18 = vld [vmem:[#allocation87_spill] sm:$0xff] }
 0x670   :  { %vm15355_vm1 = vnez %v15208_v0  ;;  %vm15357_vm2 = vnez %v15212_v8  ;;  %v15367_v0 = vld [vmem:[#allocation67_spill] sm:$0xff]  ;;  %v15369_v8 = vld [vmem:[#allocation69_spill] sm:$0xff]  ;;  %v15421_v58 = vld [vmem:[#allocation68_spill] sm:$0xff] }
 0x671   :  { %v4744_v30 = vadd.f32 %v4743_v4, %v12880_v54  ;;  %v4752_v48 = vadd.f32 %v4751_v7, %v12921_v53  ;;  %8096 = vmatpush.msk.msrb.mxu1 %vm15352_vm13, %v15168_v3  ;;  %8128 = vmatpush.msk.msrb.mxu3 %vm15354_vm15, %v15168_v3  ;;  %vm15359_vm13 = vnez %v15216_v23  ;;  %vm15361_vm15 = vnez %v15221_v40  ;;  %v15373_v23 = vld [vmem:[#allocation72_spill] sm:$0xff]  ;;  %v15399_v4 = vld [vmem:[#allocation86_spill] sm:$0xff] }
 0x672   :  { %8084 = vmatpush.msk.msrb.mxu0 %vm15355_vm1, %v15168_v3  ;;  %8116 = vmatpush.msk.msrb.mxu2 %vm15357_vm2, %v15168_v3  ;;  %vm15362_vm1 = vnez %v15223_v27  ;;  %vm15364_vm2 = vnez %v15228_v42  ;;  %v15377_v27 = vld [vmem:[#allocation74_spill] sm:$0xff]  ;;  %v15381_v42 = vld [vmem:[#allocation76_spill] sm:$0xff] }
 0x673   :  { %v4483_v63 = vpop.f32.mrf.mxu2  ;;  %v4745_v45 = vrot.slane %v4744_v30, 4  ;;  %8097 = vmatpush.msk.msrb.mxu1 %vm15356_vm0, %v15168_v3  ;;  %8129 = vmatpush.msk.msrb.mxu3 %vm15358_vm5, %v15168_v3  ;;  %vm15363_vm0 = vnez %v15225_v22  ;;  %vm15366_vm5 = vnez %v15365_v15  ;;  %v15379_v22 = vld [vmem:[#allocation75_spill] sm:$0xff] }
 0x674   :  { %v4497_v20 = vpop.f32.mrf.mxu3  ;;  %8085 = vmatpush.msk.msrb.mxu0 %vm15359_vm13, %v15168_v3  ;;  %8117 = vmatpush.msk.msrb.mxu2 %vm15361_vm15, %v15168_v3  ;;  %vm15368_vm13 = vnez %v15367_v0  ;;  %vm15372_vm15 = vnez %v15371_v1 }
 0x675   :  { %v4498_v46 = vadd.f32 %v4497_v20, %v4483_v63  ;;  %v4746_v14 = vadd.f32 %v4745_v45, %v4744_v30  ;;  %8098 = vmatpush.msk.msrb.mxu1 %vm15360_vm14, %v15168_v3  ;;  %8130 = vmatpush.msk.msrb.mxu3 %vm15362_vm1, %v15168_v3  ;;  %vm15370_vm14 = vnez %v15369_v8  ;;  %vm15374_vm1 = vnez %v15373_v23 }
 0x676   :  { %8086 = vmatpush.msk.msrb.mxu0 %vm15363_vm0, %v15168_v3  ;;  %8118 = vmatpush.msk.msrb.mxu2 %vm15366_vm5, %v15168_v3  ;;  %vm15376_vm0 = vnez %v15375_v32  ;;  %vm15380_vm5 = vnez %v15379_v22 }
 0x677   :  { %v12949_v31 = vadd.f32 %v4498_v46, %v4422_v34  ;;  %v4747_v56 = vrot.slane %v4746_v14, 2  ;;  %8099 = vmatpush.msk.msrb.mxu1 %vm15364_vm2, %v15168_v3  ;;  %8131 = vmatpush.msk.msrb.mxu3 %vm15368_vm13, %v15168_v3  ;;  %vm15378_vm2 = vnez %v15377_v27  ;;  %vm15382_vm13 = vnez %v15381_v42 }
 0x678   :  { %8087 = vmatpush.msk.msrb.mxu0 %vm15370_vm14, %v15168_v3  ;;  %8119 = vmatpush.msk.msrb.mxu2 %vm15374_vm1, %v15168_v3  ;;  %vm15384_vm14 = vnez %v15383_v16  ;;  %vm15388_vm1 = vnez %v15387_v57 }
 0x679   :  { %v4753_v44 = vadd.f32 %v4752_v48, %v12949_v31  ;;  %v4748_v47 = vadd.f32 %v4747_v56, %v4746_v14  ;;  %8100 = vmatpush.msk.msrb.mxu1 %vm15372_vm15, %v15168_v3  ;;  %8132 = vmatpush.msk.msrb.mxu3 %vm15376_vm0, %v15168_v3  ;;  %vm15386_vm15 = vnez %v15385_v35  ;;  %vm15390_vm0 = vnez %v15389_v9 }
 0x67a   :  { %8088 = vmatpush.msk.msrb.mxu0 %vm15378_vm2, %v15168_v3  ;;  %8120 = vmatpush.msk.msrb.mxu2 %vm15382_vm13, %v15168_v3  ;;  %vm15392_vm2 = vnez %v15391_v33  ;;  %vm15396_vm13 = vnez %v15395_v59 }
 0x67b   :  { %v4754_v6 = vrot.slane %v4753_v44, 4  ;;  %v4749_v2 = vrot.slane %v4748_v47, 1  ;;  %8101 = vmatpush.msk.msrb.mxu1 %vm15380_vm5, %v15168_v3  ;;  %8133 = vmatpush.msk.msrb.mxu3 %vm15384_vm14, %v15168_v3  ;;  %vm15394_vm5 = vnez %v15393_v17  ;;  %vm15398_vm14 = vnez %v15397_v60 }
 0x67c   :  { %8089 = vmatpush.msk.msrb.mxu0 %vm15386_vm15, %v15168_v3  ;;  %8121 = vmatpush.msk.msrb.mxu2 %vm15390_vm0, %v15168_v3  ;;  %vm15400_vm15 = vnez %v15399_v4  ;;  %vm15402_vm0 = vnez %v15295_v19  ;;  %v15410_v19 = vld [vmem:[#allocation89_spill] sm:$0xff] }
 0x67d   :  { %v4755_v5 = vadd.f32 %v4754_v6, %v4753_v44  ;;  %v4750_v10 = vadd.f32 %v4749_v2, %v4748_v47  ;;  %8102 = vmatpush.msk.msrb.mxu1 %vm15388_vm1, %v15168_v3  ;;  %8134 = vmatpush.msk.msrb.mxu3 %vm15392_vm2, %v15168_v3  ;;  %vm15401_vm1 = vnez %v15293_v25  ;;  %vm15403_vm2 = vnez %v15299_v62  ;;  %v15408_v25 = vld [vmem:[#allocation88_spill] sm:$0xff] }
 0x67e   :  { %8090 = vmatpush.msk.msrb.mxu0 %vm15394_vm5, %v15168_v3  ;;  %8122 = vmatpush.msk.msrb.mxu2 %vm15398_vm14, %v15168_v3  ;;  %vm15404_vm5 = vnez %v15301_v52  ;;  %vm15407_vm14 = vnez %v15406_v18  ;;  %v15413_v52 = vld [vmem:[#allocation91_spill] sm:$0xff]  ;;  %v13169_v62 = vld [vmem:[%s13848_s4 + $0x78] sm:$0xff] }
 0x67f   :  { %v4756_v13 = vrot.slane %v4755_v5, 2  ;;  %4776 = vmatmul.f32.vlgmr.msra.gmra.mxu0 %v4750_v10  ;;  %4816 = vmatmul.f32.vlgmr.msra.gmra.mxu2 %v4750_v10 }
 0x680   :  { %8103 = vmatpush.msk.msrb.mxu1 %vm15396_vm13, %v15168_v3  ;;  %8135 = vmatpush.msk.msrb.mxu3 %vm15400_vm15, %v15168_v3  ;;  %vm15405_vm13 = vnez %v15303_v11  ;;  %vm15409_vm15 = vnez %v15408_v25 }
 0x681   :  { %v4757_v28 = vadd.f32 %v4756_v13, %v4755_v5  ;;  %8091 = vmatpush.msk.msrb.mxu0 %vm15401_vm1, %v15168_v3  ;;  %8123 = vmatpush.msk.msrb.mxu2 %vm15403_vm2, %v15168_v3  ;;  %vm15411_vm1 = vnez %v15410_v19  ;;  %vm15415_vm2 = vnez %v15323_v12  ;;  %v13164_v19 = vld [vmem:[%s13848_s4 + $0x38] sm:$0xff] }
 0x682   :  { %8104 = vmatpush.msk.msrb.mxu1 %vm15402_vm0, %v15168_v3  ;;  %8136 = vmatpush.msk.msrb.mxu3 %vm15404_vm5, %v15168_v3  ;;  %vm15414_vm0 = vnez %v15413_v52  ;;  %vm15417_vm5 = vnez %v15328_v36 }
 0x683   :  { %v4758_v40 = vrot.slane %v4757_v28, 1  ;;  %8092 = vmatpush.msk.msrb.mxu0 %vm15405_vm13, %v15168_v3  ;;  %8124 = vmatpush.msk.msrb.mxu2 %vm15409_vm15, %v15168_v3  ;;  %vm15419_vm13 = vnez %v15335_v37 }
 0x684   :  { %8105 = vmatpush.msk.msrb.mxu1 %vm15407_vm14, %v15168_v3  ;;  %8137 = vmatpush.msk.msrb.mxu3 %vm15411_vm1, %v15168_v3  ;;  %vm15450_vm14 = vsmask.f32 7424 }
 0x685   :  { %v4759_v41 = vadd.f32 %v4758_v40, %v4757_v28  ;;  %8093 = vmatpush.msk.msrb.mxu0 %vm12776_vm8, %v15168_v3  ;;  %8125 = vmatpush.msk.msrb.mxu2 %vm15415_vm2, %v15168_v3  ;;  %vm15418_vm8 = vnez %v15333_v24  ;;  %vm15451_vm15 = vmmov %vm15450_vm14  ;;  %vm15460_vm2 = vsmask.f32 6400 }
 0x686   :  { %8106 = vmatpush.msk.msrb.mxu1 %vm15414_vm0, %v15168_v3  ;;  %8138 = vmatpush.msk.msrb.mxu3 %vm12800_vm10, %v15168_v3  ;;  %vm15458_vm1 = vmmov %vm15450_vm14 }
 0x687   :  { %4796 = vmatmul.f32.vlgmr.msra.gmra.mxu1 %v4759_v41  ;;  %4836 = vmatmul.f32.vlgmr.msra.gmra.mxu3 %v4759_v41  ;;  %vm15459_vm0 = vmmov %vm15458_vm1 }
 0x688   :  { %8094 = vmatpush.msk.msrb.mxu0 %vm15417_vm5, %v15168_v3  ;;  %8107 = vmatpush.msk.msrb.mxu1 %vm12817_vm11, %v15168_v3  ;;  %vm15461_vm5 = vmmov %vm15460_vm2 }
 0x689   :  { %8126 = vmatpush.msk.msrb.mxu2 %vm15418_vm8, %v15168_v3  ;;  %8139 = vmatpush.msk.msrb.mxu3 %vm15419_vm13, %v15168_v3  ;;  %vm15462_vm8 = vcmask 1046528  }
 0x68a   :  { %8108 = vmatpush.msk.msrb.mxu1 %vm12851_vm6, %v15168_v3  ;;  %vm15463_vm13 = vmmov %vm15462_vm8 }
 0x68b   :  { %8140 = vmatpush.msk.msrb.mxu3 %vm12863_vm12, %v15168_v3  ;;  %5616 = vmatpush.bf16.msra.mxu2 %v13164_v19 }
 0x68c   :  { %8109 = vmatpush.msk.msrb.mxu1 %vm12876_vm7, %v15168_v3 }
 0x68d   :  { %8141 = vmatpush.msk.msrb.mxu3 %vm12888_vm3, %v15168_v3 }
 0x68e   :  { %8110 = vmatpush.msk.msrb.mxu1 %vm12901_vm4, %v15168_v3  ;;  %vm15422_vm4 = vcmask 1040384  }
 0x68f   :  { %8142 = vmatpush.msk.msrb.mxu3 %vm12913_vm9, %v15168_v3 }
 0x691   :  { %5635 = vmatpush.bf16.msra.mxu3 %v13169_v62 }
 0x6fc   :  { %v4777_v24 = vpop.f32.mrf.mxu0 }
 0x702   :  { %v4817_v50 = vpop.f32.mrf.mxu2 }
 0x704   :  { %v4797_v12 = vpop.f32.mrf.mxu1 }
 0x705   :  { %v4798_v36 = vadd.f32 %v4797_v12, %v4777_v24  ;;  %v13174_v24 = vld [vmem:[%s13848_s4 + $0xb8] sm:$0xff] }
 0x706   :  { %v13179_v12 = vld [vmem:[%s13848_s4 + $0xf8] sm:$0xff]  ;;  %5482 = vmatpush.bf16.msra.mxu0 %v13174_v24 }
 0x707   :  { %v4840_v49 = vmul.f32 0.001953125, %v4798_v36  ;;  %v13186_v36 = vld [vmem:[%s13848_s4 + $0x30] sm:$0xff]  ;;  %5501 = vmatpush.bf16.msra.mxu1 %v13179_v12 }
 0x708   :  { %5617 = vmatpush.bf16.msra.mxu2 %v13186_v36 }
 0x709   :  { %v4842_v37 = vperm.slane %v4840_v49, 0  ;;  %v13191_v49 = vld [vmem:[%s13848_s4 + $0x70] sm:$0xff] }
 0x70a   :  { %v4837_v43 = vpop.f32.mrf.mxu3  ;;  %5636 = vmatpush.bf16.msra.mxu3 %v13191_v49 }
 0x70b   :  { %v13122_v21 = vsub.f32 %v15420_v51, %v4842_v37  ;;  %v13125_v55 = vsub.f32 %v15421_v58, %v4842_v37  ;;  %v13128_v30 = vsub.f32 %v12822_v61, %v4842_v37  ;;  %v4838_v29 = vadd.f32 %v4837_v43, %v4817_v50  ;;  %v13198_v43 = vld [vmem:[%s13848_s4 + $0xb0] sm:$0xff] }
 0x70c   :  { %v13131_v38 = vsub.f32 %v12880_v54, %v4842_v37  ;;  %v13203_v51 = vld [vmem:[%s13848_s4 + $0xf0] sm:$0xff]  ;;  %5483 = vmatpush.bf16.msra.mxu0 %v13198_v43 }
 0x70d   :  { %v4852_v3 = vmul.f32 %v13122_v21, %v13122_v21  ;;  %v4854_v63 = vmul.f32 %v13125_v55, %v13125_v55  ;;  %v4841_v20 = vmul.f32 0.001953125, %v4838_v29  ;;  %v4856_v45 = vmul.f32 %v13128_v30, %v13128_v30  ;;  %v13210_v29 = vld [vmem:[%s13848_s4 + $0x28] sm:$0xff]  ;;  %5502 = vmatpush.bf16.msra.mxu1 %v13203_v51 }
 0x70e   :  { %v4858_v61 = vmul.f32 %v13131_v38, %v13131_v38  ;;  %5618 = vmatpush.bf16.msra.mxu2 %v13210_v29 }
 0x70f   :  { %v4860_v34 = vadd.f32 %v4854_v63, %v4852_v3  ;;  %v4843_v46 = vperm.slane %v4841_v20, 0  ;;  %v13215_v3 = vld [vmem:[%s13848_s4 + $0x68] sm:$0xff] }
 0x710   :  { %v13222_v20 = vld [vmem:[%s13848_s4 + $0xa8] sm:$0xff]  ;;  %5637 = vmatpush.bf16.msra.mxu3 %v13215_v3 }
 0x711   :  { %v4861_v7 = vadd.f32 %v4860_v34, %v4856_v45  ;;  %v13142_v14 = vsub.f32 %v12271_v39, %v4843_v46  ;;  %v13145_v54 = vsub.f32 %v12424_v26, %v4843_v46  ;;  %v13148_v48 = vsub.f32 %v12921_v53, %v4843_v46  ;;  %v13227_v45 = vld [vmem:[%s13848_s4 + $0xe8] sm:$0xff]  ;;  %5484 = vmatpush.bf16.msra.mxu0 %v13222_v20 }
 0x712   :  { %v13151_v44 = vsub.f32 %v12949_v31, %v4843_v46  ;;  %5503 = vmatpush.bf16.msra.mxu1 %v13227_v45 }
 0x713   :  { %v4862_v56 = vadd.f32 %v4861_v7, %v4858_v61  ;;  %v4853_v47 = vmul.f32 %v13142_v14, %v13142_v14  ;;  %v4855_v6 = vmul.f32 %v13145_v54, %v13145_v54  ;;  %v4857_v39 = vmul.f32 %v13148_v48, %v13148_v48  ;;  %v13234_v61 = vld [vmem:[%s13848_s4 + $0x20] sm:$0xff] }
 0x714   :  { %v4859_v53 = vmul.f32 %v13151_v44, %v13151_v44  ;;  %v13239_v7 = vld [vmem:[%s13848_s4 + $0x60] sm:$0xff]  ;;  %5619 = vmatpush.bf16.msra.mxu2 %v13234_v61 }
 0x715   :  { %v4863_v2 = vrot.slane %v4862_v56, 4  ;;  %v4869_v5 = vadd.f32 %v4855_v6, %v4853_v47  ;;  %v13246_v47 = vld [vmem:[%s13848_s4 + $0xa0] sm:$0xff]  ;;  %5638 = vmatpush.bf16.msra.mxu3 %v13239_v7 }
 0x716   :  { %v13251_v6 = vld [vmem:[%s13848_s4 + $0xe0] sm:$0xff]  ;;  %5485 = vmatpush.bf16.msra.mxu0 %v13246_v47 }
 0x717   :  { %v4864_v26 = vadd.f32 %v4863_v2, %v4862_v56  ;;  %v4870_v10 = vadd.f32 %v4869_v5, %v4857_v39  ;;  %v4960_v2 = vld [vmem:[%s13853_s9] sm:$0x3]  ;;  %5504 = vmatpush.bf16.msra.mxu1 %v13251_v6 }
 0x719   :  { %v4865_v13 = vrot.slane %v4864_v26, 2  ;;  %v4871_v15 = vadd.f32 %v4870_v10, %v4859_v53  ;;  %v5002_v53 = vld [vmem:[%s13854_s10] sm:$0x3]  ;;  %v13265_v10 = vld [vmem:[%s13848_s4 + $0x18] sm:$0xff] }
 0x71a   :  { %5620 = vmatpush.bf16.msra.mxu2 %v13265_v10 }
 0x71b   :  { %v4866_v31 = vadd.f32 %v4865_v13, %v4864_v26  ;;  %v4872_v0 = vrot.slane %v4871_v15, 4  ;;  %v13270_v13 = vld [vmem:[%s13848_s4 + $0x58] sm:$0xff] }
 0x71c   :  { %5639 = vmatpush.bf16.msra.mxu3 %v13270_v13 }
 0x71d   :  { %v4867_v28 = vrot.slane %v4866_v31, 1  ;;  %v4873_v8 = vadd.f32 %v4872_v0, %v4871_v15  ;;  %v13282_v0 = vld [vmem:[%s13848_s4 + $0xd8] sm:$0xff] }
 0x71e   :  { %5505 = vmatpush.bf16.msra.mxu1 %v13282_v0 }
 0x71f   :  { %v4868_v1 = vadd.f32 %v4867_v28, %v4866_v31  ;;  %v4874_v23 = vrot.slane %v4873_v8, 2  ;;  %v13277_v31 = vld [vmem:[%s13848_s4 + $0x98] sm:$0xff] }
 0x720   :  { %5486 = vmatpush.bf16.msra.mxu0 %v13277_v31 }
 0x721   :  { %4894 = vmatmul.f32.vlgmr.msrb.gmra.mxu0 %v4868_v1  ;;  %4934 = vmatmul.f32.vlgmr.msrb.gmra.mxu2 %v4868_v1  ;;  %v4875_v32 = vadd.f32 %v4874_v23, %v4873_v8  ;;  %v5004_v1 = vperm.slane %v5002_v53, 0  ;;  %v5005_v23 = vperm.slane %v5002_v53, 1  ;;  %v13380_v53 = vld [vmem:[%s13848_s4 + $0x1b0] sm:$0xff] }
 0x722   :  { %15426 = vst [vmem:[#allocation96_spill] sm:$0xff] %v13380_v53 }
 0x723   :  { %v4876_v40 = vrot.slane %v4875_v32, 1 }
 0x725   :  { %v4877_v27 = vadd.f32 %v4876_v40, %v4875_v32  ;;  %v13289_v32 = vld [vmem:[%s13848_s4 + $0x10] sm:$0xff] }
 0x726   :  { %5621 = vmatpush.bf16.msra.mxu2 %v13289_v32 }
 0x727   :  { %4914 = vmatmul.f32.vlgmr.msrb.gmra.mxu1 %v4877_v27  ;;  %4954 = vmatmul.f32.vlgmr.msrb.gmra.mxu3 %v4877_v27 }
 0x79e   :  { %v4895_v22 = vpop.f32.mrf.mxu0 }
 0x7a4   :  { %v4915_v42 = vpop.f32.mrf.mxu1  ;;  %v4935_v57 = vpop.f32.mrf.mxu2 }
 0x7a5   :  { %v4916_v16 = vadd.f32 %v4915_v42, %v4895_v22 }
 0x7a7   :  { %v4958_v41 = vmul.f32 0.001953125, %v4916_v16  ;;  %v13298_v16 = vld [vmem:[%s13848_s4 + $0x50] sm:$0xff] }
 0x7a8   :  { %5640 = vmatpush.bf16.msra.mxu3 %v13298_v16 }
 0x7a9   :  { %v4961_v35 = vadd.f32 1e-05, %v4958_v41  ;;  %v13304_v41 = vld [vmem:[%s13848_s4 + $0x90] sm:$0xff] }
 0x7aa   :  { %v4955_v9 = vpop.f32.mrf.mxu3  ;;  %5487 = vmatpush.bf16.msra.mxu0 %v13304_v41 }
 0x7ab   :  { %8861 = vrsqrt.f32 %v4961_v35  ;;  %v4956_v33 = vadd.f32 %v4955_v9, %v4935_v57  ;;  %vm4969_vm6 = vweird.f32 %v4961_v35 }
 0x7ad   :  { %v4959_v17 = vmul.f32 0.001953125, %v4956_v33 }
 0x7af   :  { %v4962_v59 = vadd.f32 1e-05, %v4959_v17 }
 0x7b1   :  { %v8862_v60 = vpop.eup %8861  ;;  %8863 = vrsqrt.f32 %v4962_v59  ;;  %vm4979_vm11 = vweird.f32 %v4962_v59 }
 0x7b2   :  { %v4964_v4 = vmul.f32 %v8862_v60, %v4961_v35  ;;  %vm4970_vm10 = vweird.f32 %v8862_v60  ;;  %v13314_v35 = vld [vmem:[%s13848_s4 + $0xd0] sm:$0xff] }
 0x7b3   :  { %vm4971_vm7 = vmor %vm4969_vm6, %vm4970_vm10  ;;  %5506 = vmatpush.bf16.msra.mxu1 %v13314_v35 }
 0x7b4   :  { %v4965_v18 = vmul.f32 %v8862_v60, %v4964_v4  ;;  %vm15465_vm10 = vmmov %vm15460_vm2 }
 0x7b5   :  { %vm15479_vm6 = vmmov %vm15460_vm2 }
 0x7b6   :  { %v4966_v52 = vmul.f32 0.5, %v4965_v18  ;;  %v13326_v18 = vld [vmem:[%s13848_s4 + $0x48] sm:$0xff] }
 0x7b7   :  { %v8864_v25 = vpop.eup %8863  ;;  %5641 = vmatpush.bf16.msra.mxu3 %v13326_v18 }
 0x7b8   :  { %v4974_v11 = vmul.f32 %v8864_v25, %v4962_v59  ;;  %v4967_v58 = vsub.f32 1.5, %v4966_v52  ;;  %vm4980_vm12 = vweird.f32 %v8864_v25 }
 0x7b9   :  { %vm4981_vm3 = vmor %vm4979_vm11, %vm4980_vm12 }
 0x7ba   :  { %v4975_v37 = vmul.f32 %v8864_v25, %v4974_v11  ;;  %v4968_v34 = vmul.f32 %v8862_v60, %v4967_v58  ;;  %vm15464_vm12 = vmmov %vm15460_vm2 }
 0x7bb   :  { %vm15477_vm11 = vmmov %vm15462_vm8 }
 0x7bc   :  { %v4976_v50 = vmul.f32 0.5, %v4975_v37  ;;  %v4972_v5 = vsel %vm4971_vm7, %v8862_v60, %v4968_v34  ;;  %v13338_v37 = vld [vmem:[%s13848_s4 + $0xc8] sm:$0xff]  ;;  %vm15480_vm7 = vmmov %vm15460_vm2 }
 0x7bd   :  { %15423 = vst [vmem:[#allocation93_spill] sm:$0xff] %v13338_v37  ;;  %5507 = vmatpush.bf16.msra.mxu1 %v13338_v37 }
 0x7be   :  { %v4977_v63 = vsub.f32 1.5, %v4976_v50 }
 0x7c0   :  { %v4978_v46 = vmul.f32 %v8864_v25, %v4977_v63  ;;  %v13344_v63 = vld [vmem:[%s13848_s4] sm:$0xff] }
 0x7c2   :  { %v4982_v56 = vsel %vm4981_vm3, %v8864_v25, %v4978_v46  ;;  %v13332_v25 = vld [vmem:[%s13848_s4 + $0x88] sm:$0xff]  ;;  %v13350_v46 = vld [vmem:[%s13848_s4 + $0x40] sm:$0xff]  ;;  %vm15478_vm3 = vmmov %vm15462_vm8 }
 0x7c3   :  { %v4985_v39 = vrot.slane %v4982_v56, 7  ;;  %5488 = vmatpush.bf16.msra.mxu0 %v13332_v25  ;;  %v13356_v56 = vld [vmem:[%s13848_s4 + $0x1b8] sm:$0xff]  ;;  %5642 = vmatpush.bf16.msra.mxu3 %v13350_v46 }
 0x7c5   :  { %v4986_v26 = vsel %vm15422_vm4, %v4972_v5, %v4985_v39  ;;  %v13362_v39 = vld [vmem:[%s13848_s4 + $0x1f8] sm:$0xff]  ;;  %v13367_v5 = vld [vmem:[%s13848_s4 + $0x80] sm:$0xff]  ;;  %vm15495_vm4 = vcmask 1045504  }
 0x7c6   :  { %v4988_v15 = vmul.f32 %v4986_v26, %v4960_v2  ;;  %15424 = vst [vmem:[#allocation94_spill] sm:$0xff] %v13367_v5  ;;  %v13372_v26 = vld [vmem:[%s13848_s4 + $0xc0] sm:$0xff] }
 0x7c7   :  { %15425 = vst [vmem:[#allocation95_spill] sm:$0xff] %v13372_v26  ;;  %5989 = vmatpush.bf16.msrb.mxu3 %v13362_v39  ;;  %5489 = vmatpush.bf16.msra.mxu0 %v13367_v5 }
 0x7c8   :  { %v4990_v28 = vperm.slane %v4988_v15, 0  ;;  %v4991_v8 = vperm.slane %v4988_v15, 1  ;;  %v13387_v15 = vld [vmem:[%s13848_s4 + $0x1f0] sm:$0xff]  ;;  %5508 = vmatpush.bf16.msra.mxu1 %v13372_v26 }
 0x7c9   :  { %15427 = vst [vmem:[#allocation97_spill] sm:$0xff] %v13387_v15 }
 0x7ca   :  { %v4994_v40 = vmul.f32 %v4990_v28, %v13122_v21  ;;  %v4995_v27 = vmul.f32 %v4991_v8, %v13142_v14  ;;  %v4996_v22 = vmul.f32 %v4990_v28, %v13125_v55  ;;  %v4997_v42 = vmul.f32 %v4991_v8, %v13145_v54 }
 0x7cb   :  { %v4998_v21 = vmul.f32 %v4990_v28, %v13128_v30  ;;  %v4999_v14 = vmul.f32 %v4991_v8, %v13148_v48  ;;  %v5000_v55 = vmul.f32 %v4990_v28, %v13131_v38  ;;  %v5001_v54 = vmul.f32 %v4991_v8, %v13151_v44  ;;  %v13320_v30 = vld [vmem:[%s13848_s4 + $0x8] sm:$0xff]  ;;  %v13392_v28 = vld [vmem:[%s13848_s4 + $0x138] sm:$0xff]  ;;  %5990 = vmatpush.bf16.msrb.mxu3 %v13387_v15 }
 0x7cc   :  { %v5008_v57 = vadd.f32 %v5004_v1, %v4994_v40  ;;  %v5009_v9 = vadd.f32 %v5005_v23, %v4995_v27  ;;  %v5010_v33 = vadd.f32 %v5004_v1, %v4996_v22  ;;  %v5011_v17 = vadd.f32 %v5005_v23, %v4997_v42  ;;  %5622 = vmatpush.bf16.msra.mxu2 %v13320_v30  ;;  %v13397_v8 = vld [vmem:[%s13848_s4 + $0x178] sm:$0xff]  ;;  %v13403_v40 = vld [vmem:[%s13848_s4 + $0x1a8] sm:$0xff] }
 0x7cd   :  { %v5012_v59 = vadd.f32 %v5004_v1, %v4998_v21  ;;  %v5013_v60 = vadd.f32 %v5005_v23, %v4999_v14  ;;  %v5014_v38 = vadd.f32 %v5004_v1, %v5000_v55  ;;  %v5015_v52 = vadd.f32 %v5005_v23, %v5001_v54  ;;  %15428 = vst [vmem:[#allocation98_spill] sm:$0xff] %v13392_v28  ;;  %v15431_v27 = vld [vmem:[#allocation82_spill] sm:$0xff] }
 0x7ce   :  { %v5016_v48 = vmax.f32 %v5008_v57, 0.0  ;;  %v5017_v44 = vmax.f32 %v5009_v9, 0.0  ;;  %v5018_v4 = vmax.f32 %v5010_v33, 0.0  ;;  %v5019_v11 = vmax.f32 %v5011_v17, 0.0  ;;  %15429 = vst [vmem:[#allocation99_spill] sm:$0xff] %v13397_v8  ;;  %5778 = vmatpush.bf16.msrb.mxu0 %v13392_v28  ;;  %5797 = vmatpush.bf16.msrb.mxu1 %v13397_v8  ;;  %v13616_v28 = vld [vmem:[%s13848_s4 + $0x140] sm:$0xff] }
 0x7cf   :  { %v5020_v58 = vmax.f32 %v5012_v59, 0.0  ;;  %v5021_v50 = vmax.f32 %v5013_v60, 0.0  ;;  %v5022_v34 = vmax.f32 %v5014_v38, 0.0  ;;  %v5023_v2 = vmax.f32 %v5015_v52, 0.0  ;;  %15430 = vst [vmem:[#allocation100_spill] sm:$0xff] %v13403_v40  ;;  %v13433_v60 = vld [vmem:[%s13848_s4 + $0x1e8] sm:$0xff] }
 0x7d0   :  { %5024 = vst [vmem:[#allocation7] sm:$0xff] %v5016_v48  ;;  %5623 = vmatpush.bf16.msra.mxu2 %v13344_v63  ;;  %vm15432_vm9 = vnez %v15431_v27  ;;  %5991 = vmatpush.bf16.msrb.mxu3 %v13433_v60 }
 0x7d1   :  { %5025 = vst [vmem:[#allocation7 + $0x8] sm:$0xff] %v5017_v44 }
 0x7d2   :  { %5026 = vst [vmem:[#allocation7 + $0x10] sm:$0xff] %v5018_v4 }
 0x7d3   :  { %5027 = vst [vmem:[#allocation7 + $0x18] sm:$0xff] %v5019_v11  ;;  %v13451_v11 = vld [vmem:[%s13848_s4 + $0x130] sm:$0xff] }
 0x7d4   :  { %5028 = vst [vmem:[#allocation7 + $0x20] sm:$0xff] %v5020_v58  ;;  %5970 = vmatpush.bf16.msrb.mxu2 %v13356_v56  ;;  %5779 = vmatpush.bf16.msrb.mxu0 %v13451_v11 }
 0x7d5   :  { %5029 = vst [vmem:[#allocation7 + $0x28] sm:$0xff] %v5021_v50 }
 0x7d6   :  { %5030 = vst [vmem:[#allocation7 + $0x30] sm:$0xff] %v5022_v34 }
 0x7d7   :  { %5031 = vst [vmem:[#allocation7 + $0x38] sm:$0xff] %v5023_v2 }
 0x7d8   :  { %v5032_v1 = vld [vmem:[#allocation7] ss:$8 sm:$0x3]  ;;  %v5037_v23 = vld [vmem:[#allocation7 + $0x1] ss:$8 sm:$0x3]  ;;  %5971 = vmatpush.bf16.msrb.mxu2 %v13380_v53 }
 0x7d9   :  { %5034 = vst.msk [vmem:[#allocation8 + $0x2] ss:$8 sm:$0x3] %vm15432_vm9, %v5032_v1  ;;  %v5042_v22 = vld [vmem:[#allocation7 + $0x2] ss:$8 sm:$0x3] }
 0x7da   :  { %5039 = vst.msk [vmem:[#allocation8 + $0x4] ss:$8 sm:$0x3] %vm15432_vm9, %v5037_v23  ;;  %v5047_v42 = vld [vmem:[#allocation7 + $0x3] ss:$8 sm:$0x3] }
 0x7db   :  { %5044 = vst.msk [vmem:[#allocation8 + $0x6] ss:$8 sm:$0x3] %vm15432_vm9, %v5042_v22  ;;  %v5052_v21 = vld [vmem:[#allocation7 + $0x4] ss:$8 sm:$0x3] }
 0x7dc   :  { %5049 = vst.msk [vmem:[#allocation8 + $0x10] ss:$8 sm:$0x3] %vm15432_vm9, %v5047_v42  ;;  %v5057_v14 = vld [vmem:[#allocation7 + $0x5] ss:$8 sm:$0x3]  ;;  %5972 = vmatpush.bf16.msrb.mxu2 %v13403_v40 }
 0x7dd   :  { %5054 = vst.msk [vmem:[#allocation8 + $0x12] ss:$8 sm:$0x3] %vm15432_vm9, %v5052_v21  ;;  %v5062_v55 = vld [vmem:[#allocation7 + $0x6] ss:$8 sm:$0x3] }
 0x7de   :  { %5059 = vst.msk [vmem:[#allocation8 + $0x14] ss:$8 sm:$0x3] %vm15432_vm9, %v5057_v14  ;;  %v5067_v54 = vld [vmem:[#allocation7 + $0x7] ss:$8 sm:$0x3] }
 0x7df   :  { %5064 = vst.msk [vmem:[#allocation8 + $0x16] ss:$8 sm:$0x3] %vm15432_vm9, %v5062_v55  ;;  %v5072_v57 = vld [vmem:[#allocation7 + $0x10] ss:$8 sm:$0x3] }
 0x7e0   :  { %5069 = vst.msk [vmem:[#allocation8 + $0x20] ss:$8 sm:$0x3] %vm15432_vm9, %v5067_v54  ;;  %v5077_v9 = vld [vmem:[#allocation7 + $0x11] ss:$8 sm:$0x3] }
 0x7e1   :  { %5074 = vst.msk [vmem:[#allocation8 + $0x22] ss:$8 sm:$0x3] %vm15432_vm9, %v5072_v57  ;;  %v5082_v33 = vld [vmem:[#allocation7 + $0x12] ss:$8 sm:$0x3] }
 0x7e2   :  { %v5322_v17 = vld [vmem:[#allocation8] sm:$0xff]  ;;  %v5323_v59 = vld [vmem:[#allocation8 + $0x8] sm:$0xff]  ;;  %5079 = vst.msk [vmem:[#allocation8 + $0x24] ss:$8 sm:$0x3] %vm15432_vm9, %v5077_v9  ;;  %v13458_v1 = vld [vmem:[%s13848_s4 + $0x170] sm:$0xff] }
 0x7e3   :  { %15433 = vst [vmem:[#allocation101_spill] sm:$0xff] %v13433_v60  ;;  %v5087_v38 = vld [vmem:[#allocation7 + $0x13] ss:$8 sm:$0x3]  ;;  %v5334_v2 = vld [vmem:[#allocation8] sm:$0xfe]  ;;  %5798 = vmatpush.bf16.msrb.mxu1 %v13458_v1 }
 0x7e4   :  { %5084 = vst.msk [vmem:[#allocation8 + $0x26] ss:$8 sm:$0x3] %vm15432_vm9, %v5082_v33  ;;  %v5092_v48 = vld [vmem:[#allocation7 + $0x14] ss:$8 sm:$0x3] }
 0x7e5   :  { %5089 = vst.msk [vmem:[#allocation8 + $0x30] ss:$8 sm:$0x3] %vm15432_vm9, %v5087_v38  ;;  %v5097_v44 = vld [vmem:[#allocation7 + $0x15] ss:$8 sm:$0x3] }
 0x7e6   :  { %5094 = vst.msk [vmem:[#allocation8 + $0x32] ss:$8 sm:$0x3] %vm15432_vm9, %v5092_v48  ;;  %v13442_v4 = vld [vmem:[#allocation8 + $0x10] sm:$0xff]  ;;  %v13444_v52 = vld [vmem:[#allocation8 + $0x18] sm:$0xff]  ;;  %v13467_v42 = vld [vmem:[%s13848_s4 + $0x1a0] sm:$0xff] }
 0x7e7   :  { %5099 = vst.msk [vmem:[#allocation8 + $0x34] ss:$8 sm:$0x3] %vm15432_vm9, %v5097_v44  ;;  %v5330_v58 = vpack.c.bf16 %v13442_v4, %v5322_v17  ;;  %v5331_v50 = vpack.c.bf16 %v13444_v52, %v5323_v59  ;;  %v5102_v34 = vld [vmem:[#allocation7 + $0x16] ss:$8 sm:$0x3]  ;;  %v5338_v23 = vpack.c.bf16 %v13442_v4, %v5334_v2  ;;  %5973 = vmatpush.bf16.msrb.mxu2 %v13467_v42 }
 0x7e8   :  { %15434 = vst [vmem:[#allocation102_spill] sm:$0xff] %v13451_v11  ;;  %v5335_v22 = vld [vmem:[#allocation8 + $0x8] sm:$0xfe]  ;;  %v13473_v14 = vld [vmem:[%s13848_s4 + $0x1e0] sm:$0xff]  ;;  %v13490_v9 = vld [vmem:[%s13848_s4 + $0x198] sm:$0xff] }
 0x7e9   :  { %15435 = vst [vmem:[#allocation103_spill] sm:$0xff] %v13458_v1  ;;  %5624 = vmatmul.bf16.vlgmr.msra.gmra.mxu2 %v5330_v58  ;;  %5643 = vmatmul.bf16.vlgmr.msra.gmra.mxu3 %v5331_v50  ;;  %v5339_v21 = vpack.c.bf16 %v13444_v52, %v5335_v22  ;;  %v13478_v55 = vld [vmem:[%s13848_s4 + $0x128] sm:$0xff]  ;;  %v5345_v54 = vshll.u32 %v5338_v23, 16  ;;  %v13496_v17 = vld [vmem:[%s13848_s4 + $0x1d8] sm:$0xff]  ;;  %v13502_v59 = vld [vmem:[%s13848_s4 + $0x120] sm:$0xff] }
 0x7ea   :  { %5104 = vst.msk [vmem:[#allocation8 + $0x36] ss:$8 sm:$0x3] %vm15432_vm9, %v5102_v34  ;;  %v13485_v57 = vld [vmem:[%s13848_s4 + $0x168] sm:$0xff]  ;;  %5992 = vmatpush.bf16.msrb.mxu3 %v13473_v14  ;;  %5780 = vmatpush.bf16.msrb.mxu0 %v13478_v55  ;;  %v13511_v34 = vld [vmem:[%s13848_s4 + $0x160] sm:$0xff]  ;;  %v13516_v2 = vld [vmem:[%s13848_s4 + $0x190] sm:$0xff] }
 0x7eb   :  { %15436 = vst [vmem:[#allocation104_spill] sm:$0xff] %v13467_v42  ;;  %v5357_v33 = vshll.u32 %v5339_v21, 16  ;;  %v5107_v38 = vld [vmem:[#allocation7 + $0x17] ss:$8 sm:$0x3]  ;;  %v5326_v48 = vld [vmem:[#allocation8 + $0x20] sm:$0xff]  ;;  %5799 = vmatpush.bf16.msrb.mxu1 %v13485_v57  ;;  %5974 = vmatpush.bf16.msrb.mxu2 %v13490_v9 }
 0x7ec   :  { %15437 = vst [vmem:[#allocation105_spill] sm:$0xff] %v13473_v14  ;;  %v5327_v44 = vld [vmem:[#allocation8 + $0x28] sm:$0xff]  ;;  %v5347_v58 = vrot.slane %v5345_v54, 1  ;;  %v13522_v54 = vld [vmem:[%s13848_s4 + $0x1d0] sm:$0xff]  ;;  %v13532_v14 = vld [vmem:[%s13848_s4 + $0x118] sm:$0xff] }
 0x7ed   :  { %15438 = vst [vmem:[#allocation106_spill] sm:$0xff] %v13478_v55  ;;  %v5359_v50 = vrot.slane %v5357_v33, 1  ;;  %v13590_v60 = vld [vmem:[%s13848_s4 + $0x1c0] sm:$0xff] }
 0x7ee   :  { %15439 = vst [vmem:[#allocation107_spill] sm:$0xff] %v13485_v57  ;;  %5993 = vmatpush.bf16.msrb.mxu3 %v13496_v17  ;;  %v5355_v57 = vshrl.u32 %v5339_v21, 16  ;;  %5781 = vmatpush.bf16.msrb.mxu0 %v13502_v59  ;;  %v13547_v21 = vld [vmem:[%s13848_s4 + $0x188] sm:$0xff] }
 0x7ef   :  { %15440 = vst [vmem:[#allocation108_spill] sm:$0xff] %v13490_v9  ;;  %5800 = vmatpush.bf16.msrb.mxu1 %v13511_v34  ;;  %5975 = vmatpush.bf16.msrb.mxu2 %v13516_v2 }
 0x7f0   :  { %15441 = vst [vmem:[#allocation109_spill] sm:$0xff] %v13496_v17  ;;  %v5360_v1 = vor.u32 %v5359_v50, %v5355_v57  ;;  %v5820_v57 = vld [vmem:[#allocation8] sm:$0xf8]  ;;  %v5821_v50 = vld [vmem:[#allocation8 + $0x8] sm:$0xf8] }
 0x7f1   :  { %15442 = vst [vmem:[#allocation110_spill] sm:$0xff] %v13502_v59  ;;  %v5328_v22 = vld [vmem:[#allocation8 + $0x30] sm:$0xff]  ;;  %v5329_v55 = vld [vmem:[#allocation8 + $0x38] sm:$0xff] }
 0x7f2   :  { %5109 = vst.msk [vmem:[#allocation8 + $0x40] ss:$8 sm:$0x3] %vm15432_vm9, %v5107_v38  ;;  %v13524_v33 = vpack.c.bf16 %v5328_v22, %v5326_v48  ;;  %v5343_v38 = vshrl.u32 %v5338_v23, 16  ;;  %v13526_v9 = vpack.c.bf16 %v5329_v55, %v5327_v44  ;;  %v13541_v23 = vld [vmem:[%s13848_s4 + $0x158] sm:$0xff]  ;;  %5994 = vmatpush.bf16.msrb.mxu3 %v13522_v54  ;;  %v13552_v55 = vld [vmem:[%s13848_s4 + $0x1c8] sm:$0xff]  ;;  %5782 = vmatpush.bf16.msrb.mxu0 %v13532_v14 }
 0x7f3   :  { %15443 = vst [vmem:[#allocation111_spill] sm:$0xff] %v13511_v34  ;;  %5801 = vmatpush.bf16.msrb.mxu1 %v13541_v23  ;;  %v5824_v34 = vpack.c.bf16 %v13442_v4, %v5820_v57  ;;  %5976 = vmatpush.bf16.msrb.mxu2 %v13547_v21 }
 0x7f4   :  { %15444 = vst [vmem:[#allocation112_spill] sm:$0xff] %v13516_v2  ;;  %v5348_v42 = vor.u32 %v5347_v58, %v5343_v38  ;;  %v5350_v17 = vshll.u32 %v13524_v33, 16  ;;  %v14316_v11 = vshll.u32 %v13526_v9, 16  ;;  %v5366_v22 = vshrl.u32 %v13524_v33, 16 }
 0x7f5   :  { %15445 = vst [vmem:[#allocation113_spill] sm:$0xff] %v13522_v54  ;;  %v5374_v2 = vshrl.u32 %v13526_v9, 16  ;;  %v5832_v40 = vshll.u32 %v5824_v34, 16 }
 0x7f6   :  { %15446 = vst [vmem:[#allocation114_spill] sm:$0xff] %v13532_v14  ;;  %v13554_v48 = vrot.slane %v5350_v17, 1  ;;  %v13558_v44 = vrot.slane %v14316_v11, 1  ;;  %v13571_v11 = vld [vmem:[%s13848_s4 + $0x110] sm:$0xff]  ;;  %5995 = vmatpush.bf16.msrb.mxu3 %v13552_v55  ;;  %v5837_v5 = vrot.slane %v5350_v17, 2 }
 0x7f7   :  { %15447 = vst [vmem:[#allocation115_spill] sm:$0xff] %v13541_v23  ;;  %v13576_v14 = vld [vmem:[%s13848_s4 + $0x150] sm:$0xff]  ;;  %v13585_v23 = vld [vmem:[%s13848_s4 + $0x180] sm:$0xff]  ;;  %v5848_v57 = vrot.slane %v5374_v2, 1  ;;  %5783 = vmatpush.bf16.msrb.mxu0 %v13571_v11 }
 0x7f8   :  { %15448 = vst [vmem:[#allocation116_spill] sm:$0xff] %v13547_v21  ;;  %v5353_v38 = vsel %vm15450_vm14, %v5348_v42, %v13554_v48  ;;  %v5365_v54 = vsel %vm15451_vm15, %v5360_v1, %v13558_v44  ;;  %v5825_v1 = vpack.c.bf16 %v13444_v52, %v5821_v50  ;;  %5802 = vmatpush.bf16.msrb.mxu1 %v13576_v14  ;;  %v13604_v50 = vld [vmem:[%s13848_s4 + $0x148] sm:$0xff]  ;;  %vm15499_vm14 = vmmov %vm15460_vm2 }
 0x7f9   :  { %15449 = vst [vmem:[#allocation117_spill] sm:$0xff] %v13552_v55  ;;  %v5336_v58 = vld [vmem:[#allocation8 + $0x40] sm:$0x1]  ;;  %5490 = vmatmul.bf16.vlgmr.msra.gmra.mxu0 %v5353_v38  ;;  %5509 = vmatmul.bf16.vlgmr.msra.gmra.mxu1 %v5365_v54  ;;  %v5337_v59 = vld [vmem:[#allocation8 + $0x48] sm:$0x1]  ;;  %v5836_v54 = vrot.slane %v5366_v22, 1  ;;  %vm15500_vm15 = vmmov %vm15460_vm2 }
 0x7fa   :  { %15452 = vst [vmem:[#allocation118_spill] sm:$0xff] %v13571_v11  ;;  %v5340_v42 = vpack.c.bf16 %v5336_v58, %v5336_v58  ;;  %5629 = vmatmul.bf16.gmra.mxu2 %v13524_v33  ;;  %5648 = vmatmul.bf16.gmra.mxu3 %v13526_v9  ;;  %v13599_v58 = vld [vmem:[%s13848_s4 + $0x108] sm:$0xff]  ;;  %v5829_v38 = vshrl.u32 %v5824_v34, 16  ;;  %v5341_v21 = vpack.c.bf16 %v5337_v59, %v5337_v59  ;;  %v5841_v8 = vshrl.u32 %v5825_v1, 16  ;;  %v13611_v11 = vld [vmem:[%s13848_s4 + $0x100] sm:$0xff] }
 0x7fb   :  { %15453 = vst [vmem:[#allocation119_spill] sm:$0xff] %v13576_v14  ;;  %5977 = vmatpush.bf16.msrb.mxu2 %v13585_v23  ;;  %5996 = vmatpush.bf16.msrb.mxu3 %v13590_v60  ;;  %v5844_v14 = vshll.u32 %v5825_v1, 16  ;;  %v5822_v26 = vld [vmem:[#allocation8 + $0x40] sm:$0x7]  ;;  %v5823_v15 = vld [vmem:[#allocation8 + $0x48] sm:$0x7]  ;;  %v13638_v17 = vor.u32 %v5837_v5, %v5836_v54 }
 0x7fc   :  { %15454 = vst [vmem:[#allocation120_spill] sm:$0xff] %v13585_v23  ;;  %v5370_v55 = vshll.u32 %v5340_v42, 16  ;;  %v5112_v42 = vld [vmem:[#allocation7 + $0x20] ss:$8 sm:$0x3]  ;;  %5784 = vmatpush.bf16.msrb.mxu0 %v13599_v58  ;;  %5803 = vmatpush.bf16.msrb.mxu1 %v13604_v50  ;;  %v5378_v1 = vshll.u32 %v5341_v21, 16  ;;  %v5368_v21 = vor.u32 %v5366_v22, %v13554_v48 }
 0x7fd   :  { %15455 = vst [vmem:[#allocation121_spill] sm:$0xff] %v13590_v60  ;;  %v5117_v59 = vld [vmem:[#allocation7 + $0x21] ss:$8 sm:$0x3]  ;;  %v5831_v60 = vrot.slane %v5829_v38, 1  ;;  %v5834_v23 = vrot.slane %v5832_v40, 2  ;;  %v5376_v40 = vor.u32 %v5374_v2, %v13558_v44 }
 0x7fe   :  { %15456 = vst [vmem:[#allocation122_spill] sm:$0xff] %v13604_v50  ;;  %v5122_v34 = vld [vmem:[#allocation7 + $0x22] ss:$8 sm:$0x3]  ;;  %v5846_v53 = vrot.slane %v5844_v14, 2  ;;  %v5372_v50 = vrot.slane %v5370_v55, 1 }
 0x7ff   :  { %6159 = vmatpush.bf16.msra.mxu2 %v13164_v19  ;;  %6178 = vmatpush.bf16.msra.mxu3 %v13169_v62  ;;  %5114 = vst.msk [vmem:[#allocation8 + $0x45] ss:$8 sm:$0x3] %vm15432_vm9, %v5112_v42  ;;  %v5843_v19 = vrot.slane %v5841_v8, 1  ;;  %v15457_v62 = vshll.u32 %v13526_v9, 16  ;;  %v13628_v42 = vpack.c.bf16 %v5822_v26, %v5822_v26  ;;  %v5835_v26 = vor.u32 %v5834_v23, %v5831_v60 }
 0x800   :  { %5119 = vst.msk [vmem:[#allocation8 + $0x47] ss:$8 sm:$0x3] %vm15432_vm9, %v5117_v59  ;;  %5785 = vmatpush.bf16.msrb.mxu0 %v13611_v11  ;;  %5804 = vmatpush.bf16.msrb.mxu1 %v13616_v28  ;;  %v5127_v8 = vld [vmem:[#allocation7 + $0x23] ss:$8 sm:$0x3] }
 0x801   :  { %v5849_v37 = vrot.slane %v15457_v62, 2  ;;  %5124 = vst.msk [vmem:[#allocation8 + $0x51] ss:$8 sm:$0x3] %vm15432_vm9, %v5122_v34  ;;  %v5380_v55 = vrot.slane %v5378_v1, 1  ;;  %v5847_v2 = vor.u32 %v5846_v53, %v5843_v19  ;;  %v5853_v44 = vshrl.u32 %v13628_v42, 16 }
 0x802   :  { %v5132_v14 = vld [vmem:[#allocation7 + $0x24] ss:$8 sm:$0x3]  ;;  %5129 = vst.msk [vmem:[#allocation8 + $0x53] ss:$8 sm:$0x3] %vm15432_vm9, %v5127_v8 }
 0x803   :  { %6160 = vmatpush.bf16.msra.mxu2 %v13186_v36  ;;  %6179 = vmatpush.bf16.msra.mxu3 %v13191_v49  ;;  %v5827_v36 = vpack.c.bf16 %v5823_v15, %v5823_v15  ;;  %v5137_v49 = vld [vmem:[#allocation7 + $0x25] ss:$8 sm:$0x3]  ;;  %v13644_v48 = vor.u32 %v5849_v37, %v5848_v57  ;;  %5134 = vst.msk [vmem:[#allocation8 + $0x55] ss:$8 sm:$0x3] %vm15432_vm9, %v5132_v14 }
 0x804   :  { %6065 = vmatpush.bf16.msra.mxu0 %v13174_v24  ;;  %6084 = vmatpush.bf16.msra.mxu1 %v13179_v12  ;;  %5139 = vst.msk [vmem:[#allocation8 + $0x57] ss:$8 sm:$0x3] %vm15432_vm9, %v5137_v49  ;;  %v5142_v24 = vld [vmem:[#allocation7 + $0x26] ss:$8 sm:$0x3]  ;;  %v5373_v12 = vsel %vm15458_vm1, %v5368_v21, %v5372_v50  ;;  %v5381_v5 = vsel %vm15459_vm0, %v5376_v40, %v5380_v55  ;;  %vm15504_vm1 = vmmov %vm15495_vm4 }
 0x805   :  { %5144 = vst.msk [vmem:[#allocation8 + $0x61] ss:$8 sm:$0x3] %vm15432_vm9, %v5142_v24  ;;  %v5147_v37 = vld [vmem:[#allocation7 + $0x27] ss:$8 sm:$0x3]  ;;  %v5851_v60 = vsel %vm15461_vm5, %v5847_v2, %v13644_v48  ;;  %vm15505_vm0 = vmmov %vm15504_vm1 }
 0x806   :  { %v5856_v53 = vshll.u32 %v13628_v42, 16  ;;  %v5862_v15 = vshrl.u32 %v5827_v36, 16  ;;  %5149 = vst.msk [vmem:[#allocation8 + $0x63] ss:$8 sm:$0x3] %vm15432_vm9, %v5147_v37 }
 0x807   :  { %6161 = vmatpush.bf16.msra.mxu2 %v13210_v29  ;;  %6180 = vmatpush.bf16.msra.mxu3 %v13215_v3  ;;  %v5865_v29 = vshll.u32 %v5827_v36, 16  ;;  %v5839_v3 = vsel %vm15460_vm2, %v5835_v26, %v13638_v17  ;;  %v5152_v23 = vld [vmem:[#allocation7 + $0x30] ss:$8 sm:$0x3]  ;;  %v5654_v54 = vld [vmem:[#allocation8] sm:$0xfc] }
 0x808   :  { %6066 = vmatpush.bf16.msra.mxu0 %v13198_v43  ;;  %6085 = vmatpush.bf16.msra.mxu1 %v13203_v51  ;;  %v5157_v22 = vld [vmem:[#allocation7 + $0x31] ss:$8 sm:$0x3]  ;;  %v5655_v57 = vld [vmem:[#allocation8 + $0x8] sm:$0xfc]  ;;  %v5864_v34 = vrot.slane %v5862_v15, 1 }
 0x809   :  { %5495 = vmatmul.bf16.gmra.mxu0 %v5373_v12  ;;  %5514 = vmatmul.bf16.gmra.mxu1 %v5381_v5  ;;  %5154 = vst.msk [vmem:[#allocation8 + $0x65] ss:$8 sm:$0x3] %vm15432_vm9, %v5152_v23  ;;  %v5162_v50 = vld [vmem:[#allocation7 + $0x32] ss:$8 sm:$0x3] }
 0x80a   :  { %5978 = vmatmul.bf16.vlgmr.msrb.gmra.mxu2 %v5839_v3  ;;  %5997 = vmatmul.bf16.vlgmr.msrb.gmra.mxu3 %v5851_v60  ;;  %5159 = vst.msk [vmem:[#allocation8 + $0x67] ss:$8 sm:$0x3] %vm15432_vm9, %v5157_v22  ;;  %v5167_v43 = vld [vmem:[#allocation7 + $0x33] ss:$8 sm:$0x3] }
 0x80b   :  { %6162 = vmatpush.bf16.msra.mxu2 %v13234_v61  ;;  %6181 = vmatpush.bf16.msra.mxu3 %v13239_v7  ;;  %5164 = vst.msk [vmem:[#allocation8 + $0x71] ss:$8 sm:$0x3] %vm15432_vm9, %v5162_v50  ;;  %v5172_v51 = vld [vmem:[#allocation7 + $0x34] ss:$8 sm:$0x3]  ;;  %v5658_v61 = vpack.c.bf16 %v13442_v4, %v5654_v54  ;;  %v5659_v7 = vpack.c.bf16 %v13444_v52, %v5655_v57 }
 0x80c   :  { %6067 = vmatpush.bf16.msra.mxu0 %v13222_v20  ;;  %6086 = vmatpush.bf16.msra.mxu1 %v13227_v45  ;;  %5169 = vst.msk [vmem:[#allocation8 + $0x73] ss:$8 sm:$0x3] %vm15432_vm9, %v5167_v43  ;;  %v5177_v38 = vld [vmem:[#allocation7 + $0x35] ss:$8 sm:$0x3] }
 0x80d   :  { %5174 = vst.msk [vmem:[#allocation8 + $0x75] ss:$8 sm:$0x3] %vm15432_vm9, %v5172_v51  ;;  %v5855_v20 = vrot.slane %v5853_v44, 1  ;;  %v5858_v45 = vrot.slane %v5856_v53, 2  ;;  %v5867_v1 = vrot.slane %v5865_v29, 2 }
 0x80e   :  { %5179 = vst.msk [vmem:[#allocation8 + $0x77] ss:$8 sm:$0x3] %vm15432_vm9, %v5177_v38  ;;  %v5182_v59 = vld [vmem:[#allocation7 + $0x36] ss:$8 sm:$0x3] }
 0x80f   :  { %6163 = vmatpush.bf16.msra.mxu2 %v13265_v10  ;;  %6182 = vmatpush.bf16.msra.mxu3 %v13270_v13  ;;  %5184 = vst.msk [vmem:[#allocation8 + $0x81] ss:$8 sm:$0x3] %vm15432_vm9, %v5182_v59  ;;  %v5669_v4 = vrot.slane %v13524_v33, 1  ;;  %v5668_v10 = vrot.slane %v5658_v61, 1  ;;  %v5671_v52 = vrot.slane %v5659_v7, 1  ;;  %v5859_v62 = vor.u32 %v5858_v45, %v5855_v20 }
 0x810   :  { %6068 = vmatpush.bf16.msra.mxu0 %v13246_v47  ;;  %6087 = vmatpush.bf16.msra.mxu1 %v13251_v6  ;;  %v5672_v13 = vrot.slane %v13526_v9, 1  ;;  %v5187_v19 = vld [vmem:[#allocation7 + $0x37] ss:$8 sm:$0x3]  ;;  %v6021_v42 = vld [vmem:[#allocation8 + $0x40] sm:$0xf8]  ;;  %v5868_v47 = vor.u32 %v5867_v1, %v5864_v34 }
 0x811   :  { %v13694_v21 = vld [vmem:[#allocation8 + $0x50] sm:$0xff]  ;;  %5189 = vst.msk [vmem:[#allocation8 + $0x83] ss:$8 sm:$0x3] %vm15432_vm9, %v5187_v19  ;;  %v6025_v6 = vld [vmem:[#allocation8 + $0x60] sm:$0xff]  ;;  %v13700_v8 = vld [vmem:[#allocation8 + $0x58] sm:$0xff]  ;;  %v5670_v26 = vsel %vm15462_vm8, %v5668_v10, %v5669_v4 }
 0x812   :  { %v6022_v40 = vld [vmem:[#allocation8 + $0x48] sm:$0xf8]  ;;  %v5673_v27 = vsel %vm15463_vm13, %v5671_v52, %v5672_v13  ;;  %v5869_v49 = vsel %vm15465_vm10, %v13644_v48, %v5868_v47  ;;  %v15467_v3 = vld [vmem:[#allocation96_spill] sm:$0xff]  ;;  %v15470_v57 = vld [vmem:[#allocation95_spill] sm:$0xff]  ;;  %vm15506_vm2 = vcmask 1044480  }
 0x813   :  { %6164 = vmatpush.bf16.msra.mxu2 %v13289_v32  ;;  %6183 = vmatpush.bf16.msra.mxu3 %v13298_v16  ;;  %v6026_v14 = vld [vmem:[#allocation8 + $0x68] sm:$0xff]  ;;  %v6032_v36 = vpack.c.bf16 %v13700_v8, %v6022_v40  ;;  %v15472_v43 = vld [vmem:[#allocation99_spill] sm:$0xff]  ;;  %v15473_v61 = vld [vmem:[#allocation100_spill] sm:$0xff]  ;;  %vm15508_vm8 = vsmask.f32 5376 }
 0x814   :  { %6069 = vmatpush.bf16.msra.mxu0 %v13277_v31  ;;  %6088 = vmatpush.bf16.msra.mxu1 %v13282_v0  ;;  %v5860_v31 = vsel %vm15464_vm12, %v13638_v17, %v5859_v62  ;;  %v6031_v0 = vpack.c.bf16 %v13694_v21, %v6021_v42  ;;  %v5657_v17 = vld [vmem:[#allocation8 + $0x48] sm:$0x3]  ;;  %v15474_v7 = vld [vmem:[#allocation101_spill] sm:$0xff]  ;;  %v15476_v52 = vld [vmem:[#allocation103_spill] sm:$0xff] }
 0x815   :  { %v6027_v32 = vld [vmem:[#allocation8 + $0x70] sm:$0xff]  ;;  %v6028_v16 = vld [vmem:[#allocation8 + $0x78] sm:$0xff]  ;;  %v6121_v24 = vshrl.u32 %v6032_v36, 16  ;;  %v6124_v48 = vshll.u32 %v6032_v36, 16  ;;  %v5661_v37 = vpack.c.bf16 %v5657_v17, %v5657_v17  ;;  %v15469_v54 = vld [vmem:[#allocation94_spill] sm:$0xff] }
 0x816   :  { %v13718_v55 = vpack.c.bf16 %v6027_v32, %v6025_v6  ;;  %v6104_v2 = vshrl.u32 %v6031_v0, 16  ;;  %v6107_v44 = vshll.u32 %v6031_v0, 16  ;;  %v15471_v50 = vld [vmem:[#allocation98_spill] sm:$0xff]  ;;  %v6029_v1 = vld [vmem:[#allocation8 + $0x80] sm:$0x7]  ;;  %v15481_v32 = vld [vmem:[#allocation104_spill] sm:$0xff] }
 0x817   :  { %6165 = vmatpush.bf16.msra.mxu2 %v13320_v30  ;;  %6184 = vmatpush.bf16.msra.mxu3 %v13326_v18  ;;  %v13720_v30 = vpack.c.bf16 %v6028_v16, %v6026_v14  ;;  %v5656_v18 = vld [vmem:[#allocation8 + $0x40] sm:$0x3]  ;;  %v6123_v29 = vrot.slane %v6121_v24, 1  ;;  %v5676_v38 = vrot.slane %v5661_v37, 1  ;;  %v15475_v10 = vld [vmem:[#allocation102_spill] sm:$0xff]  ;;  %v6035_v47 = vpack.c.bf16 %v6029_v1, %v6029_v1  ;;  %v15485_v36 = vld [vmem:[#allocation108_spill] sm:$0xff] }
 0x818   :  { %6070 = vmatpush.bf16.msra.mxu0 %v13304_v41  ;;  %6089 = vmatpush.bf16.msra.mxu1 %v13314_v35  ;;  %v15466_v41 = vld [vmem:[#allocation93_spill] sm:$0xff]  ;;  %v6112_v35 = vshrl.u32 %v13718_v55, 16  ;;  %v6115_v12 = vshll.u32 %v13718_v55, 16  ;;  %v5660_v5 = vpack.c.bf16 %v5656_v18, %v5656_v18  ;;  %v6106_v53 = vrot.slane %v6104_v2, 1  ;;  %v6030_v19 = vld [vmem:[#allocation8 + $0x88] sm:$0x7]  ;;  %vm15496_vm9 = vmmov %vm15495_vm4 }
 0x819   :  { %5786 = vmatmul.bf16.vlgmr.msrb.gmra.mxu0 %v5670_v26  ;;  %5805 = vmatmul.bf16.vlgmr.msrb.gmra.mxu1 %v5673_v27  ;;  %v6109_v15 = vrot.slane %v6107_v44, 2  ;;  %v5677_v42 = vsel %vm15478_vm3, %v5672_v13, %v5676_v38  ;;  %v15482_v14 = vld [vmem:[#allocation105_spill] sm:$0xff]  ;;  %v6036_v16 = vpack.c.bf16 %v6030_v19, %v6030_v19  ;;  %v15483_v33 = vld [vmem:[#allocation106_spill] sm:$0xff]  ;;  %v6138_v26 = vshrl.u32 %v6035_v47, 16  ;;  %v15488_v44 = vld [vmem:[#allocation111_spill] sm:$0xff] }
 0x81a   :  { %5983 = vmatmul.bf16.gmra.mxu2 %v5860_v31  ;;  %6002 = vmatmul.bf16.gmra.mxu3 %v5869_v49  ;;  %v6117_v60 = vrot.slane %v6115_v12, 2  ;;  %v5674_v51 = vrot.slane %v5660_v5, 1  ;;  %v6037_v9 = vld [vmem:[#allocation8 + $0x40] sm:$0xf0]  ;;  %v6038_v13 = vld [vmem:[#allocation8 + $0x48] sm:$0xf0]  ;;  %vm15507_vm5 = vmmov %vm15506_vm2 }
 0x81b   :  { %6166 = vmatpush.bf16.msra.mxu2 %v13344_v63  ;;  %6185 = vmatpush.bf16.msra.mxu3 %v13350_v46  ;;  %v6129_v63 = vshrl.u32 %v13720_v30, 16  ;;  %v6132_v46 = vshll.u32 %v13720_v30, 16  ;;  %v6110_v20 = vor.u32 %v6109_v15, %v6106_v53  ;;  %v6141_v27 = vshll.u32 %v6035_v47, 16  ;;  %v15486_v49 = vld [vmem:[#allocation109_spill] sm:$0xff]  ;;  %v15487_v2 = vld [vmem:[#allocation110_spill] sm:$0xff]  ;;  %v15489_v37 = vld [vmem:[#allocation112_spill] sm:$0xff] }
 0x81c   :  { %6071 = vmatpush.bf16.msra.mxu0 %v13332_v25  ;;  %6090 = vmatpush.bf16.msra.mxu1 %v15466_v41  ;;  %v6114_v25 = vrot.slane %v6112_v35, 1  ;;  %v5675_v62 = vsel %vm15477_vm11, %v5669_v4, %v5674_v51  ;;  %v15484_v4 = vld [vmem:[#allocation107_spill] sm:$0xff]  ;;  %v6147_v31 = vshrl.u32 %v6036_v16, 16  ;;  %v6150_v0 = vshll.u32 %v6036_v16, 16  ;;  %v15490_v53 = vld [vmem:[#allocation113_spill] sm:$0xff]  ;;  %vm15509_vm13 = vmmov %vm15508_vm8 }
 0x81d   :  { %v6131_v23 = vrot.slane %v6129_v63, 1  ;;  %v6134_v22 = vrot.slane %v6132_v46, 2  ;;  %v6041_v18 = vpack.c.bf16 %v13694_v21, %v6037_v9  ;;  %v6042_v17 = vpack.c.bf16 %v13700_v8, %v6038_v13  ;;  %v15498_v51 = vld [vmem:[#allocation119_spill] sm:$0xff]  ;;  %v6039_v1 = vld [vmem:[#allocation8 + $0x80] sm:$0xf]  ;;  %vm15510_vm12 = vmmov %vm15506_vm2 }
 0x81e   :  { %v6118_v45 = vor.u32 %v6117_v60, %v6114_v25  ;;  %v6140_v24 = vrot.slane %v6138_v26, 1  ;;  %v6149_v41 = vrot.slane %v6147_v31, 1  ;;  %v6152_v5 = vrot.slane %v6150_v0, 2  ;;  %v15492_v25 = vld [vmem:[#allocation115_spill] sm:$0xff]  ;;  %v6294_v19 = vld [vmem:[#allocation8 + $0x48] sm:$0xc0]  ;;  %vm15511_vm10 = vmmov %vm15506_vm2 }
 0x81f   :  { %6319 = vmatpush.bf16.msrb.mxu2 %v13356_v56  ;;  %6338 = vmatpush.bf16.msrb.mxu3 %v13362_v39  ;;  %v6126_v56 = vrot.slane %v6124_v48, 2  ;;  %v15468_v39 = vld [vmem:[#allocation97_spill] sm:$0xff]  ;;  %v6135_v34 = vor.u32 %v6134_v22, %v6131_v23  ;;  %v6143_v48 = vrot.slane %v6141_v27, 2  ;;  %v6051_v15 = vrot.slane %v6041_v18, 2  ;;  %v15493_v22 = vld [vmem:[#allocation116_spill] sm:$0xff]  ;;  %vm15512_vm11 = vmmov %vm15508_vm8 }
 0x820   :  { %6072 = vmatpush.bf16.msra.mxu0 %v15469_v54  ;;  %6091 = vmatpush.bf16.msra.mxu1 %v15470_v57  ;;  %v6119_v6 = vsel %vm15479_vm6, %v6110_v20, %v6118_v45  ;;  %v6153_v23 = vor.u32 %v6152_v5, %v6149_v41  ;;  %v15494_v54 = vld [vmem:[#allocation117_spill] sm:$0xff]  ;;  %v6226_v41 = vrot.slane %v6132_v46, 3  ;;  %vm15513_vm3 = vmmov %vm15508_vm8  ;;  %vm6016_vm6 = vcmask 785408  }
 0x821   :  { %v6127_v59 = vor.u32 %v6126_v56, %v6123_v29  ;;  %v6052_v29 = vrot.slane %v13718_v55, 2  ;;  %v6054_v56 = vrot.slane %v6042_v17, 2  ;;  %v6144_v60 = vor.u32 %v6143_v48, %v6140_v24  ;;  %v15502_v20 = vld [vmem:[#allocation121_spill] sm:$0xff] }
 0x822   :  { %v6213_v17 = vrot.slane %v6112_v35, 2  ;;  %v6225_v48 = vrot.slane %v6129_v63, 2  ;;  %v6200_v35 = vld [vmem:[#allocation8 + $0x88] sm:$0x1f] }
 0x823   :  { %6320 = vmatpush.bf16.msrb.mxu2 %v15467_v3  ;;  %6339 = vmatpush.bf16.msrb.mxu3 %v15468_v39  ;;  %v6136_v40 = vsel %vm15480_vm7, %v6127_v59, %v6135_v34  ;;  %v6055_v3 = vrot.slane %v13720_v30, 2  ;;  %v15491_v39 = vld [vmem:[#allocation114_spill] sm:$0xff]  ;;  %v6053_v57 = vsel %vm15495_vm4, %v6051_v15, %v6052_v29  ;;  %v6145_v38 = vsel %vm15499_vm14, %v6118_v45, %v6144_v60 }
 0x824   :  { %6251 = vmatpush.bf16.msrb.mxu0 %v15471_v50  ;;  %6270 = vmatpush.bf16.msrb.mxu1 %v15472_v43  ;;  %v15497_v43 = vld [vmem:[#allocation118_spill] sm:$0xff] }
 0x825   :  { %v6056_v50 = vsel %vm15496_vm9, %v6054_v56, %v6055_v3  ;;  %v15503_v59 = vld [vmem:[#allocation122_spill] sm:$0xff]  ;;  %v6227_v56 = vor.u32 %v6226_v41, %v6225_v48 }
 0x827   :  { %6321 = vmatpush.bf16.msrb.mxu2 %v15473_v61  ;;  %6340 = vmatpush.bf16.msrb.mxu3 %v15474_v7  ;;  %v6154_v61 = vsel %vm15500_vm15, %v6135_v34, %v6153_v23  ;;  %v15501_v7 = vld [vmem:[#allocation120_spill] sm:$0xff]  ;;  %v6298_v34 = vpack.c.bf16 %v13700_v8, %v6294_v19  ;;  %v6204_v23 = vpack.c.bf16 %v6200_v35, %v6200_v35 }
 0x828   :  { %6252 = vmatpush.bf16.msrb.mxu0 %v15475_v10  ;;  %6271 = vmatpush.bf16.msrb.mxu1 %v15476_v52  ;;  %v6040_v10 = vld [vmem:[#allocation8 + $0x88] sm:$0xf]  ;;  %v6293_v52 = vld [vmem:[#allocation8 + $0x40] sm:$0xc0] }
 0x829   :  { %5791 = vmatmul.bf16.gmra.mxu0 %v5675_v62  ;;  %5810 = vmatmul.bf16.gmra.mxu1 %v5677_v42  ;;  %v6043_v62 = vpack.c.bf16 %v6039_v1, %v6039_v1  ;;  %v6044_v42 = vpack.c.bf16 %v6040_v10, %v6040_v10  ;;  %v6297_v45 = vpack.c.bf16 %v13694_v21, %v6293_v52  ;;  %v6308_v16 = vrot.slane %v6298_v34, 3 }
 0x82a   :  { %6167 = vmatmul.bf16.vlgmr.msra.gmra.mxu2 %v6119_v6  ;;  %6186 = vmatmul.bf16.vlgmr.msra.gmra.mxu3 %v6136_v40  ;;  %v6197_v40 = vld [vmem:[#allocation8 + $0x40] sm:$0xe0] }
 0x82b   :  { %6322 = vmatpush.bf16.msrb.mxu2 %v15481_v32  ;;  %6341 = vmatpush.bf16.msrb.mxu3 %v15482_v14  ;;  %v6057_v47 = vrot.slane %v6043_v62, 2  ;;  %v6059_v6 = vrot.slane %v6044_v42, 2  ;;  %v6305_v32 = vrot.slane %v6297_v45, 3  ;;  %v6306_v14 = vrot.slane %v13718_v55, 3 }
 0x82c   :  { %6253 = vmatpush.bf16.msrb.mxu0 %v15483_v33  ;;  %6272 = vmatpush.bf16.msrb.mxu1 %v15484_v4  ;;  %v6309_v33 = vrot.slane %v13720_v30, 3  ;;  %v6201_v4 = vpack.c.bf16 %v13694_v21, %v6197_v40 }
 0x82d   :  { %v6307_v13 = vsel %vm15506_vm2, %v6305_v32, %v6306_v14 }
 0x82e   :  { %v6310_v26 = vsel %vm15507_vm5, %v6308_v16, %v6309_v33  ;;  %v6206_v27 = vshrl.u32 %v6201_v4, 16  ;;  %v6209_v31 = vshll.u32 %v6201_v4, 16 }
 0x82f   :  { %6323 = vmatpush.bf16.msrb.mxu2 %v15485_v36  ;;  %6342 = vmatpush.bf16.msrb.mxu3 %v15486_v49  ;;  %v6295_v49 = vld [vmem:[#allocation8 + $0x80] sm:$0x3f] }
 0x830   :  { %6254 = vmatpush.bf16.msrb.mxu0 %v15487_v2  ;;  %6273 = vmatpush.bf16.msrb.mxu1 %v15488_v44  ;;  %v6208_v21 = vrot.slane %v6206_v27, 2  ;;  %v6211_v18 = vrot.slane %v6209_v31, 3  ;;  %v6296_v2 = vld [vmem:[#allocation8 + $0x88] sm:$0x3f]  ;;  %v6299_v5 = vpack.c.bf16 %v6295_v49, %v6295_v49 }
 0x833   :  { %6324 = vmatpush.bf16.msrb.mxu2 %v15489_v37  ;;  %6343 = vmatpush.bf16.msrb.mxu3 %v15490_v53  ;;  %v6300_v37 = vpack.c.bf16 %v6296_v2, %v6296_v2  ;;  %v6212_v53 = vor.u32 %v6211_v18, %v6208_v21 }
 0x834   :  { %6255 = vmatpush.bf16.msrb.mxu0 %v15491_v39  ;;  %6274 = vmatpush.bf16.msrb.mxu1 %v15492_v25  ;;  %v6311_v39 = vrot.slane %v6299_v5, 3 }
 0x835   :  { %v6313_v55 = vrot.slane %v6300_v37, 3 }
 0x836   :  { %v6312_v30 = vsel %vm15510_vm12, %v6306_v14, %v6311_v39 }
 0x837   :  { %6325 = vmatpush.bf16.msrb.mxu2 %v15493_v22  ;;  %6344 = vmatpush.bf16.msrb.mxu3 %v15494_v54  ;;  %v6314_v63 = vsel %vm15511_vm10, %v6309_v33, %v6313_v55  ;;  %v6239_v54 = vshrl.u32 %v6204_v23, 16 }
 0x838   :  { %6256 = vmatpush.bf16.msrb.mxu0 %v15497_v43  ;;  %6275 = vmatpush.bf16.msrb.mxu1 %v15498_v51 }
 0x839   :  { %6073 = vmatmul.bf16.vlgmr.msra.gmra.mxu0 %v6053_v57  ;;  %6092 = vmatmul.bf16.vlgmr.msra.gmra.mxu1 %v6056_v50  ;;  %v6242_v57 = vshll.u32 %v6204_v23, 16  ;;  %v6241_v51 = vrot.slane %v6239_v54, 2 }
 0x83a   :  { %6172 = vmatmul.bf16.gmra.mxu2 %v6145_v38  ;;  %6191 = vmatmul.bf16.gmra.mxu3 %v6154_v61 }
 0x83b   :  { %6326 = vmatpush.bf16.msrb.mxu2 %v15501_v7  ;;  %6345 = vmatpush.bf16.msrb.mxu3 %v15502_v20  ;;  %v6244_v38 = vrot.slane %v6242_v57, 3 }
 0x83c   :  { %6257 = vmatpush.bf16.msrb.mxu0 %v13599_v58  ;;  %6276 = vmatpush.bf16.msrb.mxu1 %v15503_v59  ;;  %v6198_v58 = vld [vmem:[#allocation8 + $0x48] sm:$0xe0] }
 0x83d   :  { %v6202_v9 = vpack.c.bf16 %v13700_v8, %v6198_v58  ;;  %v6214_v8 = vrot.slane %v6115_v12, 3  ;;  %v6245_v7 = vor.u32 %v6244_v38, %v6241_v51 }
 0x83f   :  { %v6218_v0 = vshrl.u32 %v6202_v9, 16  ;;  %v6221_v36 = vshll.u32 %v6202_v9, 16  ;;  %v6215_v15 = vor.u32 %v6214_v8, %v6213_v17  ;;  %v6246_v59 = vsel %vm15513_vm3, %v6227_v56, %v6245_v7 }
 0x840   :  { %6258 = vmatpush.bf16.msrb.mxu0 %v13611_v11  ;;  %6277 = vmatpush.bf16.msrb.mxu1 %v13616_v28  ;;  %v6058_v11 = vsel %vm15504_vm1, %v6052_v29, %v6057_v47  ;;  %v6060_v28 = vsel %vm15505_vm0, %v6055_v3, %v6059_v6  ;;  %v6199_v3 = vld [vmem:[#allocation8 + $0x80] sm:$0x1f] }
 0x841   :  { %v6220_v44 = vrot.slane %v6218_v0, 2  ;;  %v6223_v24 = vrot.slane %v6221_v36, 3  ;;  %v6216_v12 = vsel %vm15508_vm8, %v6212_v53, %v6215_v15  ;;  %v6203_v60 = vpack.c.bf16 %v6199_v3, %v6199_v3 }
 0x843   :  { %v6224_v29 = vor.u32 %v6223_v24, %v6220_v44  ;;  %v6230_v46 = vshrl.u32 %v6203_v60, 16  ;;  %v6233_v22 = vshll.u32 %v6203_v60, 16 }
 0x845   :  { %v6228_v25 = vsel %vm15509_vm13, %v6224_v29, %v6227_v56  ;;  %v6232_v50 = vrot.slane %v6230_v46, 2  ;;  %v6235_v43 = vrot.slane %v6233_v22, 3 }
 0x847   :  { %v6236_v61 = vor.u32 %v6235_v43, %v6232_v50 }
 0x849   :  { %6078 = vmatmul.bf16.gmra.mxu0 %v6058_v11  ;;  %6097 = vmatmul.bf16.gmra.mxu1 %v6060_v28  ;;  %v6237_v20 = vsel %vm15512_vm11, %v6215_v15, %v6236_v61 }
 0x84a   :  { %6327 = vmatmul.bf16.vlgmr.msrb.gmra.mxu2 %v6307_v13  ;;  %6346 = vmatmul.bf16.vlgmr.msrb.gmra.mxu3 %v6310_v26 }
 0x859   :  { %6259 = vmatmul.bf16.vlgmr.msrb.gmra.mxu0 %v6216_v12  ;;  %6278 = vmatmul.bf16.vlgmr.msrb.gmra.mxu1 %v6228_v25 }
 0x85a   :  { %6332 = vmatmul.bf16.gmra.mxu2 %v6312_v30  ;;  %6351 = vmatmul.bf16.gmra.mxu3 %v6314_v63 }
 0x869   :  { %6264 = vmatmul.bf16.gmra.mxu0 %v6237_v20  ;;  %6283 = vmatmul.bf16.gmra.mxu1 %v6246_v59 }
 0x86c   :  { %v5625_v1 = vpop.f32.mrf.mxu2  ;;  %v5644_v10 = vpop.f32.mrf.mxu3 }
 0x874   :  { %v5627_v62 = vpop.f32.mrf.mxu2  ;;  %v5646_v42 = vpop.f32.mrf.mxu3 }
 0x876   :  { %v5491_v52 = vpop.f32.mrf.mxu0  ;;  %v5510_v19 = vpop.f32.mrf.mxu1 }
 0x877   :  { %v5511_v4 = vadd.f32 %v5510_v19, %v5491_v52 }
 0x879   :  { %v5626_v9 = vadd.f32 %v5625_v1, %v5511_v4 }
 0x87b   :  { %v5645_v31 = vadd.f32 %v5644_v10, %v5626_v9 }
 0x87d   :  { %v5630_v47 = vpop.f32.mrf.mxu2  ;;  %v5649_v6 = vpop.f32.mrf.mxu3 }
 0x87e   :  { %v5493_v45 = vpop.f32.mrf.mxu0  ;;  %v5512_v34 = vpop.f32.mrf.mxu1 }
 0x87f   :  { %v5513_v27 = vadd.f32 %v5512_v34, %v5493_v45 }
 0x881   :  { %v5628_v17 = vadd.f32 %v5627_v62, %v5513_v27 }
 0x883   :  { %v5647_v48 = vadd.f32 %v5646_v42, %v5628_v17 }
 0x885   :  { %v5632_v32 = vpop.f32.mrf.mxu2  ;;  %v5651_v14 = vpop.f32.mrf.mxu3 }
 0x886   :  { %v5496_v40 = vpop.f32.mrf.mxu0  ;;  %v5515_v58 = vpop.f32.mrf.mxu1 }
 0x887   :  { %v5516_v24 = vadd.f32 %v5515_v58, %v5496_v40 }
 0x889   :  { %v5631_v56 = vadd.f32 %v5630_v47, %v5516_v24 }
 0x88b   :  { %v5650_v12 = vadd.f32 %v5649_v6, %v5631_v56 }
 0x88d   :  { %v5979_v11 = vpop.f32.mrf.mxu2  ;;  %v5998_v28 = vpop.f32.mrf.mxu3 }
 0x88e   :  { %v5498_v16 = vpop.f32.mrf.mxu0  ;;  %v5517_v33 = vpop.f32.mrf.mxu1  ;;  %v5999_v21 = vadd.f32 %v5998_v28, %v5979_v11 }
 0x88f   :  { %v5518_v55 = vadd.f32 %v5517_v33, %v5498_v16 }
 0x891   :  { %v5633_v22 = vadd.f32 %v5632_v32, %v5518_v55 }
 0x893   :  { %v5652_v43 = vadd.f32 %v5651_v14, %v5633_v22 }
 0x895   :  { %v5981_v36 = vpop.f32.mrf.mxu2  ;;  %v6000_v49 = vpop.f32.mrf.mxu3 }
 0x896   :  { %v5787_v13 = vpop.f32.mrf.mxu0  ;;  %v5806_v26 = vpop.f32.mrf.mxu1  ;;  %v6001_v53 = vadd.f32 %v6000_v49, %v5981_v36 }
 0x897   :  { %v5807_v0 = vadd.f32 %v5806_v26, %v5787_v13 }
 0x899   :  { %v5816_v18 = vadd.f32 %v5807_v0, %v5645_v31 }
 0x89b   :  { %v6008_v8 = vadd.f32 %v5999_v21, %v5816_v18 }
 0x89d   :  { %8865 = vtanh.f32 %v6008_v8  ;;  %v5984_v5 = vpop.f32.mrf.mxu2  ;;  %v6003_v37 = vpop.f32.mrf.mxu3 }
 0x89e   :  { %v5789_v2 = vpop.f32.mrf.mxu0  ;;  %v5808_v44 = vpop.f32.mrf.mxu1  ;;  %v6004_v30 = vadd.f32 %v6003_v37, %v5984_v5 }
 0x89f   :  { %v5809_v41 = vadd.f32 %v5808_v44, %v5789_v2 }
 0x8a1   :  { %v5817_v15 = vadd.f32 %v5809_v41, %v5647_v48 }
 0x8a3   :  { %v8866_v29 = vpop.eup %8865  ;;  %v6009_v3 = vadd.f32 %v6001_v53, %v5817_v15 }
 0x8a4   :  { %6017 = vst.msk [vmem:[%s13855_s11] sm:$0xff] %vm6016_vm6, %v8866_v29 }
 0x8a5   :  { %8867 = vtanh.f32 %v6009_v3  ;;  %v5986_v60 = vpop.f32.mrf.mxu2  ;;  %v6005_v23 = vpop.f32.mrf.mxu3 }
 0x8a6   :  { %v5792_v35 = vpop.f32.mrf.mxu0  ;;  %v5811_v39 = vpop.f32.mrf.mxu1  ;;  %v6006_v7 = vadd.f32 %v6005_v23, %v5986_v60 }
 0x8a7   :  { %v5812_v25 = vadd.f32 %v5811_v39, %v5792_v35 }
 0x8a9   :  { %v5818_v63 = vadd.f32 %v5812_v25, %v5650_v12 }
 0x8ab   :  { %v8868_v46 = vpop.eup %8867  ;;  %v6010_v54 = vadd.f32 %v6004_v30, %v5818_v63 }
 0x8ac   :  { %6018 = vst.msk [vmem:[%s13855_s11 + $0x8] sm:$0xff] %vm6016_vm6, %v8868_v46 }
 0x8ad   :  { %8869 = vtanh.f32 %v6010_v54  ;;  %v6168_v38 = vpop.f32.mrf.mxu2  ;;  %v6187_v61 = vpop.f32.mrf.mxu3 }
 0x8ae   :  { %v5794_v57 = vpop.f32.mrf.mxu0  ;;  %v5813_v50 = vpop.f32.mrf.mxu1 }
 0x8af   :  { %v5814_v51 = vadd.f32 %v5813_v50, %v5794_v57 }
 0x8b1   :  { %v5819_v20 = vadd.f32 %v5814_v51, %v5652_v43 }
 0x8b3   :  { %v8870_v59 = vpop.eup %8869  ;;  %v6011_v1 = vadd.f32 %v6006_v7, %v5819_v20 }
 0x8b4   :  { %6019 = vst.msk [vmem:[%s13855_s11 + $0x10] sm:$0xff] %vm6016_vm6, %v8870_v59 }
 0x8b5   :  { %8871 = vtanh.f32 %v6011_v1  ;;  %v6170_v19 = vpop.f32.mrf.mxu2  ;;  %v6189_v62 = vpop.f32.mrf.mxu3 }
 0x8b6   :  { %v6074_v10 = vpop.f32.mrf.mxu0  ;;  %v6093_v52 = vpop.f32.mrf.mxu1 }
 0x8b7   :  { %v6094_v4 = vadd.f32 %v6093_v52, %v6074_v10 }
 0x8b9   :  { %v6169_v9 = vadd.f32 %v6168_v38, %v6094_v4 }
 0x8bb   :  { %v8872_v42 = vpop.eup %8871  ;;  %v6188_v31 = vadd.f32 %v6187_v61, %v6169_v9 }
 0x8bc   :  { %6020 = vst.msk [vmem:[%s13855_s11 + $0x18] sm:$0xff] %vm6016_vm6, %v8872_v42 }
 0x8bd   :  { %v6173_v47 = vpop.f32.mrf.mxu2  ;;  %v6192_v6 = vpop.f32.mrf.mxu3 }
 0x8be   :  { %v6076_v45 = vpop.f32.mrf.mxu0  ;;  %v6095_v34 = vpop.f32.mrf.mxu1 }
 0x8bf   :  { %v6096_v27 = vadd.f32 %v6095_v34, %v6076_v45 }
 0x8c1   :  { %v6171_v17 = vadd.f32 %v6170_v19, %v6096_v27 }
 0x8c3   :  { %v6190_v48 = vadd.f32 %v6189_v62, %v6171_v17 }
 0x8c5   :  { %v6175_v32 = vpop.f32.mrf.mxu2  ;;  %v6194_v14 = vpop.f32.mrf.mxu3 }
 0x8c6   :  { %v6079_v40 = vpop.f32.mrf.mxu0  ;;  %v6098_v58 = vpop.f32.mrf.mxu1 }
 0x8c7   :  { %v6099_v24 = vadd.f32 %v6098_v58, %v6079_v40 }
 0x8c9   :  { %v6174_v15 = vadd.f32 %v6173_v47, %v6099_v24 }
 0x8cb   :  { %v6193_v12 = vadd.f32 %v6192_v6, %v6174_v15 }
 0x8cd   :  { %v6328_v11 = vpop.f32.mrf.mxu2  ;;  %v6347_v28 = vpop.f32.mrf.mxu3 }
 0x8ce   :  { %v6081_v16 = vpop.f32.mrf.mxu0  ;;  %v6100_v33 = vpop.f32.mrf.mxu1  ;;  %v6348_v36 = vadd.f32 %v6347_v28, %v6328_v11 }
 0x8cf   :  { %v6101_v55 = vadd.f32 %v6100_v33, %v6081_v16 }
 0x8d1   :  { %v6176_v63 = vadd.f32 %v6175_v32, %v6101_v55 }
 0x8d3   :  { %v6195_v43 = vadd.f32 %v6194_v14, %v6176_v63 }
 0x8d5   :  { %v6330_v21 = vpop.f32.mrf.mxu2  ;;  %v6349_v18 = vpop.f32.mrf.mxu3 }
 0x8d6   :  { %v6260_v13 = vpop.f32.mrf.mxu0  ;;  %v6279_v26 = vpop.f32.mrf.mxu1  ;;  %v6350_v5 = vadd.f32 %v6349_v18, %v6330_v21 }
 0x8d7   :  { %v6280_v0 = vadd.f32 %v6279_v26, %v6260_v13 }
 0x8d9   :  { %v6289_v49 = vadd.f32 %v6280_v0, %v6188_v31 }
 0x8db   :  { %v6357_v8 = vadd.f32 %v6348_v36, %v6289_v49 }
 0x8dd   :  { %8873 = vtanh.f32 %v6357_v8  ;;  %v6333_v56 = vpop.f32.mrf.mxu2  ;;  %v6352_v3 = vpop.f32.mrf.mxu3 }
 0x8de   :  { %v6262_v2 = vpop.f32.mrf.mxu0  ;;  %v6281_v44 = vpop.f32.mrf.mxu1  ;;  %v6353_v60 = vadd.f32 %v6352_v3, %v6333_v56 }
 0x8df   :  { %v6282_v41 = vadd.f32 %v6281_v44, %v6262_v2 }
 0x8e1   :  { %v6290_v37 = vadd.f32 %v6282_v41, %v6190_v48 }
 0x8e3   :  { %v8874_v53 = vpop.eup %8873  ;;  %v6358_v29 = vadd.f32 %v6350_v5, %v6290_v37 }
 0x8e4   :  { %6365 = vst.msk [vmem:[%s13855_s11 + $0x20] sm:$0xff] %vm6016_vm6, %v8874_v53 }
 0x8e5   :  { %8875 = vtanh.f32 %v6358_v29  ;;  %v6335_v22 = vpop.f32.mrf.mxu2  ;;  %v6354_v54 = vpop.f32.mrf.mxu3 }
 0x8e6   :  { %v6265_v35 = vpop.f32.mrf.mxu0  ;;  %v6284_v39 = vpop.f32.mrf.mxu1  ;;  %v6355_v38 = vadd.f32 %v6354_v54, %v6335_v22 }
 0x8e7   :  { %v6285_v25 = vadd.f32 %v6284_v39, %v6265_v35 }
 0x8e9   :  { %v6291_v23 = vadd.f32 %v6285_v25, %v6193_v12 }
 0x8eb   :  { %v8876_v30 = vpop.eup %8875  ;;  %v6359_v46 = vadd.f32 %v6353_v60, %v6291_v23 }
 0x8ec   :  { %6366 = vst.msk [vmem:[%s13855_s11 + $0x28] sm:$0xff] %vm6016_vm6, %v8876_v30 }
 0x8ed   :  { %8877 = vtanh.f32 %v6359_v46 }
 0x8ee   :  { %v6267_v57 = vpop.f32.mrf.mxu0  ;;  %v6286_v50 = vpop.f32.mrf.mxu1 }
 0x8ef   :  { %v6287_v51 = vadd.f32 %v6286_v50, %v6267_v57 }
 0x8f1   :  { %v6292_v61 = vadd.f32 %v6287_v51, %v6195_v43 }
 0x8f3   :  { %v8878_v7 = vpop.eup %8877  ;;  %v6360_v20 = vadd.f32 %v6355_v38, %v6292_v61 }
 0x8f4   :  { %6367 = vst.msk [vmem:[%s13855_s11 + $0x30] sm:$0xff] %vm6016_vm6, %v8878_v7 }
 0x8f5   :  { %8879 = vtanh.f32 %v6360_v20 }
 0x8fb   :  { %v8880_v59 = vpop.eup %8879 }
 0x8fc   :  { %6368 = vst.msk [vmem:[%s13855_s11 + $0x38] sm:$0xff] %vm6016_vm6, %v8880_v59 }
 0x8fd   :  { %6373 = vsyncpa [#allocation10], 1 }
 0x8fe   :  { %6374 = vsyncpa [#allocation12], 1 }

</bundles_post_ra>
